<compile_context>
chip_gen: v7x
topology: tpu7x:2x2x1
jax: 0.10.0
libtpu: 0.0.40
codegen_flags: <defaults>
</compile_context>

<pallas_src>
import functools

import jax
import jax.numpy as jnp
from jax.experimental import pallas as pl
from jax.experimental.pallas import tpu as pltpu

RRELU_SLOPE = (1.0 / 8.0 + 1.0 / 3.0) / 2.0   # F.rrelu eval-mode slope = 11/48
BN_EPS = 1e-5

_VMEM_LIMIT_CACHE = None


def _vmem_limit_bytes():
    """Generation-aware VMEM cap: ~3/4 of physical, never above 100 MiB
    (96 MiB on v5e/v6e's 128 MiB, 48 MiB on v7x's 64 MiB)."""
    global _VMEM_LIMIT_CACHE
    if _VMEM_LIMIT_CACHE is None:
        try:
            cap = int(pltpu.get_tpu_info().vmem_capacity_bytes)
        except Exception:
            cap = 64 * 1024 * 1024
        _VMEM_LIMIT_CACHE = int(min(cap * 3 // 4, 100 * 1024 * 1024))
    return _VMEM_LIMIT_CACHE


# --------------------------------------------------------------------------
# Kernel 1: 3x3 conv (stride 1, pad 1) as one folded-K MXU dot per row band,
# optionally with the nearest-2x upsample fused in, plus per-band BN partials.
# --------------------------------------------------------------------------
def _conv3x3_kernel(a_ref, b1_ref, b2_ref, w_ref, bias_ref,
                    out_ref, bsum_ref, bssq_ref, *, th, wcols, upsample):
    # Haloed input row band (th_in + 2, W_pad, Cin): one th_in-row block plus
    # two single-row halo blocks of the same spatially padded array.
    band = jnp.concatenate(
        [a_ref[0], b1_ref[0], b2_ref[0]], axis=0).astype(jnp.float32)

    if upsample:
        # Fused nearest-2x upsample: duplicate rows so the band covers the
        # th + 2 haloed rows of the zero-padded upsampled image.  Column
        # duplication is folded into the weight matrix (column-phase
        # decomposition), so no column data movement is needed.
        r_in, wpad, cin = band.shape
        dup = jnp.broadcast_to(band[:, None], (r_in, 2, wpad, cin))
        band = dup.reshape(2 * r_in, wpad, cin)[1:th + 3]

    # im2col in VMEM: fold all 9 taps into the contraction dimension so the
    # conv is a single MXU dot (K = 9*Cin) that accumulates on the MXU.
    taps = [band[di:di + th, dj:dj + wcols, :]
            for di in range(3) for dj in range(3)]
    lhs = jnp.concatenate(taps, axis=-1).reshape(th * wcols, -1)

    acc = jnp.dot(lhs.astype(jnp.bfloat16), w_ref[...],
                  preferred_element_type=jnp.float32)
    acc = acc + bias_ref[...]

    out_ref[...] = acc.reshape(out_ref.shape).astype(out_ref.dtype)
    # Per-band BatchNorm partial statistics from the f32 accumulator, emitted
    # as distinct blocks (both grid axes stay 'parallel').
    bsum_ref[...] = jnp.sum(acc, axis=0).reshape(bsum_ref.shape)
    bssq_ref[...] = jnp.sum(acc * acc, axis=0).reshape(bssq_ref.shape)


def _pick_row_tile(out_h, wcols, cin, ncol, upsample, budget=3 * 1024 * 1024):
    """Largest divisor of out_h whose per-band working set fits the budget."""
    def band_bytes(th):
        m = th * wcols
        lhs = m * 9 * cin * 4                       # f32 im2col tile
        acc = m * ncol * 4                          # f32 matmul result
        out = 2 * m * ncol * 2                      # double-buffered bf16 out
        inp = 2 * (th + 2) * (wcols + 2) * cin * 2  # double-buffered bf16 in
        return lhs + acc + out + inp
    best = None
    for th in range(1, out_h + 1):
        if out_h % th:
            continue
        if upsample and th % 2:
            continue
        if band_bytes(th) <= budget:
            best = th
    if best is None:
        best = 2 if upsample else 1
    # TODO(synk): also tile along W (masked last band) for very wide images.
    return best


def conv3x3(xp, w_pt, b_pt, *, upsample):
    """3x3 / stride-1 / pad-1 conv of the spatially pre-padded bf16 NHWC input
    `xp = pad(x, 1)`.  If `upsample`, computes conv(nearest_upsample_2x(x))
    without ever materializing the upsampled tensor.

    Returns:
      out  : (N, Hout, Wout, Cout) bf16
      csum : (Cout,) f32 per-channel sum of the f32 conv output
      cssq : (Cout,) f32 per-channel sum of squares
    """
    n, hp, wp, cin = xp.shape
    h_in, w_in = hp - 2, wp - 2
    cout = w_pt.shape[0]

    w_hw = jnp.transpose(w_pt, (2, 3, 1, 0)).astype(jnp.float32)  # (3,3,Ci,Co)
    if upsample:
        out_h, out_w, wcols, ncol = 2 * h_in, 2 * w_in, w_in, 2 * cout
        zero = jnp.zeros_like(w_hw[:, :1])
        # Column-phase decomposition of nearest-2x + 3-tap conv along W:
        #   even output columns read low-res column offsets {0, 1}
        #   odd  output columns read low-res column offsets {1, 2}
        wq0 = jnp.concatenate(
            [w_hw[:, 0:1], w_hw[:, 1:2] + w_hw[:, 2:3], zero], axis=1)
        wq1 = jnp.concatenate(
            [zero, w_hw[:, 0:1] + w_hw[:, 1:2], w_hw[:, 2:3]], axis=1)
        rhs = jnp.concatenate([wq0.reshape(9 * cin, cout),
                               wq1.reshape(9 * cin, cout)], axis=1)
        bias = jnp.tile(b_pt.astype(jnp.float32), 2)
    else:
        out_h, out_w, wcols, ncol = h_in, w_in, w_in, cout
        rhs = w_hw.reshape(9 * cin, cout)
        bias = b_pt.astype(jnp.float32)
    rhs = rhs.astype(jnp.bfloat16)
    bias = bias.reshape(1, ncol)

    th = _pick_row_tile(out_h, wcols, cin, ncol, upsample)
    n_bands = out_h // th
    th_in = th // 2 if upsample else th

    kern = functools.partial(_conv3x3_kernel, th=th, wcols=wcols,
                             upsample=upsample)
    out, bsum, bssq = pl.pallas_call(
        kern,
        out_shape=(
            jax.ShapeDtypeStruct((n, out_h, wcols, ncol), jnp.bfloat16),
            jax.ShapeDtypeStruct((n, n_bands, 1, ncol), jnp.float32),
            jax.ShapeDtypeStruct((n, n_bands, 1, ncol), jnp.float32),
        ),
        grid=(n, n_bands),
        in_specs=[
            # Haloed row band: th_in rows + two single-row halo blocks of the
            # SAME padded array (VMEM bounded by band size, not image size).
            pl.BlockSpec((1, th_in, wp, cin), lambda i, r: (i, r, 0, 0)),
            pl.BlockSpec((1, 1, wp, cin),
                         lambda i, r: (i, (r + 1) * th_in, 0, 0)),
            pl.BlockSpec((1, 1, wp, cin),
                         lambda i, r: (i, (r + 1) * th_in + 1, 0, 0)),
            pl.BlockSpec((9 * cin, ncol), lambda i, r: (0, 0)),
            pl.BlockSpec((1, ncol), lambda i, r: (0, 0)),
        ],
        out_specs=(
            pl.BlockSpec((1, th, wcols, ncol), lambda i, r: (i, r, 0, 0)),
            pl.BlockSpec((1, 1, 1, ncol), lambda i, r: (i, r, 0, 0)),
            pl.BlockSpec((1, 1, 1, ncol), lambda i, r: (i, r, 0, 0)),
        ),
        compiler_params=pltpu.CompilerParams(
            dimension_semantics=("parallel", "parallel"),
            vmem_limit_bytes=_vmem_limit_bytes()),
    )(xp, xp, xp, rhs, bias)

    csum = jnp.sum(bsum, axis=(0, 1, 2))
    cssq = jnp.sum(bssq, axis=(0, 1, 2))
    if upsample:
        # Undo the paired-column layout (free contiguous reshape) and fold the
        # column-parity dimension of the statistics.
        out = out.reshape(n, out_h, out_w, cout)
        csum = csum.reshape(2, cout).sum(axis=0)
        cssq = cssq.reshape(2, cout).sum(axis=0)
    return out, csum, cssq


# --------------------------------------------------------------------------
# Kernel 2/3: fused BatchNorm-apply (+ residual add) + rrelu, row-tiled.
# Channels are folded onto the 128-lane axis when possible (lane-dense stores
# with no dead data); scale/shift are lane-tiled accordingly.
# --------------------------------------------------------------------------
def _bn_rrelu_kernel(x_ref, sc_ref, sh_ref, o_ref):
    y = x_ref[...].astype(jnp.float32) * sc_ref[...] + sh_ref[...]
    o_ref[...] = jnp.where(y >= 0, y, y * RRELU_SLOPE).astype(o_ref.dtype)


def _bn_add_rrelu_kernel(x_ref, skip_ref, sc_ref, sh_ref, o_ref):
    y = (x_ref[...].astype(jnp.float32) * sc_ref[...] + sh_ref[...]
         + skip_ref[...].astype(jnp.float32))
    o_ref[...] = jnp.where(y >= 0, y, y * RRELU_SLOPE).astype(o_ref.dtype)


def _bn_elementwise(kernel, tensors, scale, shift, out_dtype):
    shape = tensors[0].shape
    c = shape[-1]
    m = tensors[0].size // c
    if 128 % c == 0 and (m * c) % 128 == 0:
        lanes = 128
        rows = (m * c) // lanes
        xs = [t.reshape(rows, lanes) for t in tensors]
        sc = jnp.tile(scale, lanes // c).reshape(1, lanes)
        sh = jnp.tile(shift, lanes // c).reshape(1, lanes)
    else:  # fallback: channels stay on the (partially masked) lane axis
        lanes, rows = c, m
        xs = [t.reshape(rows, lanes) for t in tensors]
        sc = scale.reshape(1, lanes)
        sh = shift.reshape(1, lanes)
    tm = rows if rows <= 2048 else 2048
    out = pl.pallas_call(
        kernel,
        out_shape=jax.ShapeDtypeStruct((rows, lanes), out_dtype),
        grid=(pl.cdiv(rows, tm),),
        in_specs=[pl.BlockSpec((tm, lanes), lambda i: (i, 0)) for _ in xs]
                 + [pl.BlockSpec((1, lanes), lambda i: (0, 0))] * 2,
        out_specs=pl.BlockSpec((tm, lanes), lambda i: (i, 0)),
        compiler_params=pltpu.CompilerParams(
            dimension_semantics=("parallel",),
            vmem_limit_bytes=_vmem_limit_bytes()),
    )(*xs, sc, sh)
    return out.reshape(shape)


def bn_rrelu(x, scale, shift):
    return _bn_elementwise(_bn_rrelu_kernel, [x], scale, shift, jnp.bfloat16)


def bn_add_rrelu(x, skip, scale, shift):
    return _bn_elementwise(_bn_add_rrelu_kernel, [x, skip], scale, shift,
                           jnp.float32)


# --------------------------------------------------------------------------
# Glue (XLA): finish BN stats, spatial pad, fallback upsample, init, forward.
# --------------------------------------------------------------------------
def bn_scale_shift(csum, cssq, count, gamma, beta):
    """Training-mode BatchNorm (biased variance) from per-channel f32 sums."""
    mean = csum / count
    var = jnp.maximum(cssq / count - mean * mean, 0.0)
    scale = gamma.astype(jnp.float32) * jax.lax.rsqrt(var + BN_EPS)
    shift = beta.astype(jnp.float32) - mean * scale
    return scale, shift


def _pad_hw(x):
    return jnp.pad(x, ((0, 0), (1, 1), (1, 1), (0, 0)))


def upsample_nearest(x, s):
    n, h, w, c = x.shape
    y = jnp.broadcast_to(x[:, :, None, :, None, :], (n, h, s, w, s, c))
    return y.reshape(n, h * s, w * s, c)


def res_up_forward(x_nchw, params, scale=2):
    """Forward pass of Res_up (training-mode BN, eval-mode rrelu)."""
    x = jnp.transpose(x_nchw, (0, 2, 3, 1)).astype(jnp.bfloat16)   # NCHW->NHWC
    n, h, w, _ = x.shape
    xp = _pad_hw(x)

    fused = (scale == 2)
    # TODO(synk): general `scale` falls back to an XLA nearest upsample plus a
    # non-fused conv; only scale=2 is fused into the conv kernels.

    # h1 = rrelu(BN1(conv1(x)))   (BN stats come out of the conv kernel)
    h1, s1, q1 = conv3x3(xp, params["w1"], params["b1"], upsample=False)
    sc1, sh1 = bn_scale_shift(s1, q1, n * h * w, params["g1"], params["be1"])
    h1a = bn_rrelu(h1, sc1, sh1)                                   # bf16

    if fused:
        skip, _, _ = conv3x3(xp, params["w3"], params["b3"], upsample=True)
        h2, s2, q2 = conv3x3(_pad_hw(h1a), params["w2"], params["b2"],
                             upsample=True)
    else:
        xu = upsample_nearest(x, scale)
        skip, _, _ = conv3x3(_pad_hw(xu), params["w3"], params["b3"],
                             upsample=False)
        h1u = upsample_nearest(h1a, scale)
        h2, s2, q2 = conv3x3(_pad_hw(h1u), params["w2"], params["b2"],
                             upsample=False)

    count2 = h2.shape[0] * h2.shape[1] * h2.shape[2]
    sc2, sh2 = bn_scale_shift(s2, q2, count2, params["g2"], params["be2"])

    # out = rrelu(BN2(conv2(up(h1))) + skip)  — one fused elementwise pass.
    out = bn_add_rrelu(h2, skip, sc2, sh2)
    return jnp.transpose(out, (0, 3, 1, 2))                        # NHWC->NCHW


def _init_conv(key, cout, cin, k=3):
    wk, bk = jax.random.split(key)
    bound = 1.0 / (cin * k * k) ** 0.5
    w = jax.random.uniform(wk, (cout, cin, k, k), jnp.float32, -bound, bound)
    b = jax.random.uniform(bk, (cout,), jnp.float32, -bound, bound)
    return w, b


def init_res_up(key, channel_in, channel_out):
    k1, k2, k3 = jax.random.split(key, 3)
    w1, b1 = _init_conv(k1, channel_out // 2, channel_in)
    w2, b2 = _init_conv(k2, channel_out, channel_out // 2)
    w3, b3 = _init_conv(k3, channel_out, channel_in)
    return dict(
        w1=w1, b1=b1, w2=w2, b2=b2, w3=w3, b3=b3,
        g1=jnp.ones((channel_out // 2,), jnp.float32),
        be1=jnp.zeros((channel_out // 2,), jnp.float32),
        g2=jnp.ones((channel_out,), jnp.float32),
        be2=jnp.zeros((channel_out,), jnp.float32),
    )


# Pure-XLA reference that mirrors the kernel's bf16 quantization points, so a
# tight tolerance is meaningful (catches structural bugs, not bf16 noise).
def _ref_forward(x_nchw, params, scale=2):
    f32 = jnp.float32
    q = lambda t: t.astype(jnp.bfloat16).astype(f32)

    def conv(xq, w, b):
        wq = q(jnp.transpose(w, (2, 3, 1, 0)))                     # HWIO
        y = jax.lax.conv_general_dilated(
            xq, wq, window_strides=(1, 1), padding="SAME",
            dimension_numbers=("NHWC", "HWIO", "NHWC"))
        return y + b.astype(f32)

    def up(t):
        n, h, w, c = t.shape
        y = jnp.broadcast_to(t[:, :, None, :, None, :],
                             (n, h, scale, w, scale, c))
        return y.reshape(n, h * scale, w * scale, c)

    def bn(yf, g, be):
        mean = jnp.mean(yf, axis=(0, 1, 2))
        var = jnp.maximum(jnp.mean(yf * yf, axis=(0, 1, 2)) - mean * mean, 0.0)
        sc = g * jax.lax.rsqrt(var + BN_EPS)
        return sc, be - mean * sc

    rrelu = lambda y: jnp.where(y >= 0, y, y * RRELU_SLOPE)

    x = q(jnp.transpose(x_nchw, (0, 2, 3, 1)).astype(f32))
    skip = q(conv(up(x), params["w3"], params["b3"]))
    h1f = conv(x, params["w1"], params["b1"])
    sc1, sh1 = bn(h1f, params["g1"], params["be1"])
    h1a = q(rrelu(q(h1f) * sc1 + sh1))
    h2f = conv(up(h1a), params["w2"], params["b2"])
    sc2, sh2 = bn(h2f, params["g2"], params["be2"])
    out = rrelu(q(h2f) * sc2 + sh2 + skip)
    return jnp.transpose(out, (0, 3, 1, 2))


if __name__ == "__main__":
    batch, channel_in, channel_out, spatial, scale = 2, 4, 16, 16, 2

    root = jax.random.PRNGKey(0)
    pkey, xkey = jax.random.split(root)
    params = init_res_up(pkey, channel_in, channel_out)
    x = jax.random.normal(xkey, (batch, channel_in, spatial, spatial),
                          jnp.float32)

    fwd = jax.jit(functools.partial(res_up_forward, scale=scale))
    y = fwd(x, params)
    jax.block_until_ready(y)

    assert y.shape == (batch, channel_out, scale * spatial, scale * spatial), y.shape
    assert bool(jnp.all(jnp.isfinite(y)))

    # Numerics check against the bf16-mirrored XLA reference.
    y_ref = jax.jit(functools.partial(_ref_forward, scale=scale))(x, params)
    err_max = float(jnp.max(jnp.abs(y - y_ref)))
    err_mean = float(jnp.mean(jnp.abs(y - y_ref)))
    assert err_max < 0.15 and err_mean < 0.02, (err_max, err_mean)

    print("KERNEL_OK")
</pallas_src>

<mosaic_0001>
module attributes {stable_mosaic.version = 11 : i64} {
  func.func @_conv3x3_kernel(%arg0: i32, %arg1: i32, %arg2: memref<1x16x18x4xbf16, #tpu.memory_space<vmem>>, %arg3: memref<1x1x18x4xbf16, #tpu.memory_space<vmem>>, %arg4: memref<1x1x18x4xbf16, #tpu.memory_space<vmem>>, %arg5: memref<36x8xbf16, #tpu.memory_space<vmem>>, %arg6: memref<1x8xf32, #tpu.memory_space<vmem>>, %arg7: memref<1x16x16x8xbf16, #tpu.memory_space<vmem>>, %arg8: memref<1x1x1x8xf32, #tpu.memory_space<vmem>>, %arg9: memref<1x1x1x8xf32, #tpu.memory_space<vmem>>) attributes {dimension_semantics = [#tpu.dimension_semantics<parallel>, #tpu.dimension_semantics<parallel>], iteration_bounds = array<i64: 2, 1>, scalar_prefetch = 0 : i64, scratch_operands = 0 : i64, tpu.core_type = #tpu.core_type<tc>, window_params = [{transform_indices = @transform_0, window_bounds = array<i64: 1, 16, 18, 4>}, {transform_indices = @transform_1, window_bounds = array<i64: 1, 1, 18, 4>}, {transform_indices = @transform_2, window_bounds = array<i64: 1, 1, 18, 4>}, {pipeline_mode = #tpu.pipeline_mode<synchronous>, transform_indices = @transform_3, window_bounds = array<i64: 36, 8>}, {pipeline_mode = #tpu.pipeline_mode<synchronous>, transform_indices = @transform_4, window_bounds = array<i64: 1, 8>}, {transform_indices = @transform_5, window_bounds = array<i64: 1, 16, 16, 8>}, {transform_indices = @transform_6, window_bounds = array<i64: 1, 1, 1, 8>}, {transform_indices = @transform_7, window_bounds = array<i64: 1, 1, 1, 8>}]} {
    %c0 = arith.constant 0 : index
    %c0_0 = arith.constant 0 : index
    %c0_1 = arith.constant 0 : index
    %c0_2 = arith.constant 0 : index
    %0 = vector.load %arg2[%c0, %c0_0, %c0_1, %c0_2] : memref<1x16x18x4xbf16, #tpu.memory_space<vmem>>, vector<1x16x18x4xbf16>
    %1 = vector.shape_cast %0 : vector<1x16x18x4xbf16> to vector<16x18x4xbf16>
    %c0_3 = arith.constant 0 : index
    %c0_4 = arith.constant 0 : index
    %c0_5 = arith.constant 0 : index
    %c0_6 = arith.constant 0 : index
    %2 = vector.load %arg3[%c0_3, %c0_4, %c0_5, %c0_6] : memref<1x1x18x4xbf16, #tpu.memory_space<vmem>>, vector<1x1x18x4xbf16>
    %3 = vector.shape_cast %2 : vector<1x1x18x4xbf16> to vector<1x18x4xbf16>
    %c0_7 = arith.constant 0 : index
    %c0_8 = arith.constant 0 : index
    %c0_9 = arith.constant 0 : index
    %c0_10 = arith.constant 0 : index
    %4 = vector.load %arg4[%c0_7, %c0_8, %c0_9, %c0_10] : memref<1x1x18x4xbf16, #tpu.memory_space<vmem>>, vector<1x1x18x4xbf16>
    %5 = vector.shape_cast %4 : vector<1x1x18x4xbf16> to vector<1x18x4xbf16>
    %6 = tpu.concatenate %1, %3, %5 in 0 : vector<16x18x4xbf16>, vector<1x18x4xbf16>, vector<1x18x4xbf16> -> vector<18x18x4xbf16>
    %7 = arith.extf %6 : vector<18x18x4xbf16> to vector<18x18x4xf32>
    %8 = vector.extract_strided_slice %7 {offsets = [0, 0, 0], sizes = [16, 16, 4], strides = [1, 1, 1]} : vector<18x18x4xf32> to vector<16x16x4xf32>
    %9 = vector.extract_strided_slice %7 {offsets = [0, 1, 0], sizes = [16, 16, 4], strides = [1, 1, 1]} : vector<18x18x4xf32> to vector<16x16x4xf32>
    %10 = vector.extract_strided_slice %7 {offsets = [0, 2, 0], sizes = [16, 16, 4], strides = [1, 1, 1]} : vector<18x18x4xf32> to vector<16x16x4xf32>
    %11 = vector.extract_strided_slice %7 {offsets = [1, 0, 0], sizes = [16, 16, 4], strides = [1, 1, 1]} : vector<18x18x4xf32> to vector<16x16x4xf32>
    %12 = vector.extract_strided_slice %7 {offsets = [1, 1, 0], sizes = [16, 16, 4], strides = [1, 1, 1]} : vector<18x18x4xf32> to vector<16x16x4xf32>
    %13 = vector.extract_strided_slice %7 {offsets = [1, 2, 0], sizes = [16, 16, 4], strides = [1, 1, 1]} : vector<18x18x4xf32> to vector<16x16x4xf32>
    %14 = vector.extract_strided_slice %7 {offsets = [2, 0, 0], sizes = [16, 16, 4], strides = [1, 1, 1]} : vector<18x18x4xf32> to vector<16x16x4xf32>
    %15 = vector.extract_strided_slice %7 {offsets = [2, 1, 0], sizes = [16, 16, 4], strides = [1, 1, 1]} : vector<18x18x4xf32> to vector<16x16x4xf32>
    %16 = vector.extract_strided_slice %7 {offsets = [2, 2, 0], sizes = [16, 16, 4], strides = [1, 1, 1]} : vector<18x18x4xf32> to vector<16x16x4xf32>
    %17 = tpu.concatenate %8, %9, %10, %11, %12, %13, %14, %15, %16 in 2 : vector<16x16x4xf32>, vector<16x16x4xf32>, vector<16x16x4xf32>, vector<16x16x4xf32>, vector<16x16x4xf32>, vector<16x16x4xf32>, vector<16x16x4xf32>, vector<16x16x4xf32>, vector<16x16x4xf32> -> vector<16x16x36xf32>
    %18 = vector.shape_cast %17 : vector<16x16x36xf32> to vector<256x36xf32>
    %19 = arith.truncf %18 : vector<256x36xf32> to vector<256x36xbf16>
    %c0_11 = arith.constant 0 : index
    %c0_12 = arith.constant 0 : index
    %20 = vector.load %arg5[%c0_11, %c0_12] : memref<36x8xbf16, #tpu.memory_space<vmem>>, vector<36x8xbf16>
    %cst = arith.constant dense<0.000000e+00> : vector<256x8xf32>
    %21 = tpu.matmul %19, %20, %cst {dimension_numbers = #tpu.dot_dimension_numbers<[1], [0], [0], [1], [0, 0, 1, 1], [], []>} : vector<256x36xbf16>, vector<36x8xbf16>, vector<256x8xf32> -> vector<256x8xf32>
    %c0_13 = arith.constant 0 : index
    %c0_14 = arith.constant 0 : index
    %22 = vector.load %arg6[%c0_13, %c0_14] : memref<1x8xf32, #tpu.memory_space<vmem>>, vector<1x8xf32>
    %23 = vector.broadcast %22 : vector<1x8xf32> to vector<256x8xf32>
    %24 = arith.addf %21, %23 : vector<256x8xf32>
    %25 = vector.shape_cast %24 : vector<256x8xf32> to vector<1x16x16x8xf32>
    %26 = arith.truncf %25 : vector<1x16x16x8xf32> to vector<1x16x16x8xbf16>
    %c0_15 = arith.constant 0 : index
    %c0_16 = arith.constant 0 : index
    %c0_17 = arith.constant 0 : index
    %c0_18 = arith.constant 0 : index
    %27 = vector.load %arg7[%c0_15, %c0_16, %c0_17, %c0_18] : memref<1x16x16x8xbf16, #tpu.memory_space<vmem>>, vector<1x16x16x8xbf16>
    tpu.vector_store %arg7[%c0_15, %c0_16, %c0_17, %c0_18], %26 {strides = array<i32>} : memref<1x16x16x8xbf16, #tpu.memory_space<vmem>>, vector<1x16x16x8xbf16>,
    %cst_19 = arith.constant dense<0.000000e+00> : vector<8xf32>
    %28 = vector.multi_reduction <add>, %24, %cst_19 [0] : vector<256x8xf32> to vector<8xf32>
    %29 = vector.shape_cast %28 : vector<8xf32> to vector<1x1x1x8xf32>
    %c0_20 = arith.constant 0 : index
    %c0_21 = arith.constant 0 : index
    %c0_22 = arith.constant 0 : index
    %c0_23 = arith.constant 0 : index
    %30 = vector.load %arg8[%c0_20, %c0_21, %c0_22, %c0_23] : memref<1x1x1x8xf32, #tpu.memory_space<vmem>>, vector<1x1x1x8xf32>
    tpu.vector_store %arg8[%c0_20, %c0_21, %c0_22, %c0_23], %29 {strides = array<i32>} : memref<1x1x1x8xf32, #tpu.memory_space<vmem>>, vector<1x1x1x8xf32>,
    %31 = arith.mulf %24, %24 : vector<256x8xf32>
    %cst_24 = arith.constant dense<0.000000e+00> : vector<8xf32>
    %32 = vector.multi_reduction <add>, %31, %cst_24 [0] : vector<256x8xf32> to vector<8xf32>
    %33 = vector.shape_cast %32 : vector<8xf32> to vector<1x1x1x8xf32>
    %c0_25 = arith.constant 0 : index
    %c0_26 = arith.constant 0 : index
    %c0_27 = arith.constant 0 : index
    %c0_28 = arith.constant 0 : index
    %34 = vector.load %arg9[%c0_25, %c0_26, %c0_27, %c0_28] : memref<1x1x1x8xf32, #tpu.memory_space<vmem>>, vector<1x1x1x8xf32>
    tpu.vector_store %arg9[%c0_25, %c0_26, %c0_27, %c0_28], %33 {strides = array<i32>} : memref<1x1x1x8xf32, #tpu.memory_space<vmem>>, vector<1x1x1x8xf32>,
    return
  }
  func.func @transform_0(%arg0: i32, %arg1: i32) -> (i32, i32, i32, i32) {
    %c0_i32 = arith.constant 0 : i32
    %c0_i32_0 = arith.constant 0 : i32
    %c0_i32_1 = arith.constant 0 : i32
    return %arg0, %arg1, %c0_i32, %c0_i32_0 : i32, i32, i32, i32
  }
  func.func @transform_1(%arg0: i32, %arg1: i32) -> (i32, i32, i32, i32) {
    %c1_i32 = arith.constant 1 : i32
    %0 = arith.addi %arg1, %c1_i32 : i32
    %c16_i32 = arith.constant 16 : i32
    %1 = arith.muli %0, %c16_i32 : i32
    %c0_i32 = arith.constant 0 : i32
    %c0_i32_0 = arith.constant 0 : i32
    %c0_i32_1 = arith.constant 0 : i32
    return %arg0, %1, %c0_i32, %c0_i32_0 : i32, i32, i32, i32
  }
  func.func @transform_2(%arg0: i32, %arg1: i32) -> (i32, i32, i32, i32) {
    %c1_i32 = arith.constant 1 : i32
    %0 = arith.addi %arg1, %c1_i32 : i32
    %c16_i32 = arith.constant 16 : i32
    %1 = arith.muli %0, %c16_i32 : i32
    %c1_i32_0 = arith.constant 1 : i32
    %2 = arith.addi %1, %c1_i32_0 : i32
    %c0_i32 = arith.constant 0 : i32
    %c0_i32_1 = arith.constant 0 : i32
    %c0_i32_2 = arith.constant 0 : i32
    return %arg0, %2, %c0_i32, %c0_i32_1 : i32, i32, i32, i32
  }
  func.func @transform_3(%arg0: i32, %arg1: i32) -> (i32, i32) {
    %c0_i32 = arith.constant 0 : i32
    %c0_i32_0 = arith.constant 0 : i32
    %c0_i32_1 = arith.constant 0 : i32
    return %c0_i32, %c0_i32_0 : i32, i32
  }
  func.func @transform_4(%arg0: i32, %arg1: i32) -> (i32, i32) {
    %c0_i32 = arith.constant 0 : i32
    %c0_i32_0 = arith.constant 0 : i32
    %c0_i32_1 = arith.constant 0 : i32
    return %c0_i32, %c0_i32_0 : i32, i32
  }
  func.func @transform_5(%arg0: i32, %arg1: i32) -> (i32, i32, i32, i32) {
    %c0_i32 = arith.constant 0 : i32
    %c0_i32_0 = arith.constant 0 : i32
    %c0_i32_1 = arith.constant 0 : i32
    return %arg0, %arg1, %c0_i32, %c0_i32_0 : i32, i32, i32, i32
  }
  func.func @transform_6(%arg0: i32, %arg1: i32) -> (i32, i32, i32, i32) {
    %c0_i32 = arith.constant 0 : i32
    %c0_i32_0 = arith.constant 0 : i32
    %c0_i32_1 = arith.constant 0 : i32
    return %arg0, %arg1, %c0_i32, %c0_i32_0 : i32, i32, i32, i32
  }
  func.func @transform_7(%arg0: i32, %arg1: i32) -> (i32, i32, i32, i32) {
    %c0_i32 = arith.constant 0 : i32
    %c0_i32_0 = arith.constant 0 : i32
    %c0_i32_1 = arith.constant 0 : i32
    return %arg0, %arg1, %c0_i32, %c0_i32_0 : i32, i32, i32, i32
  }
}

module attributes {stable_mosaic.version = 11 : i64} {
  func.func @_bn_rrelu_kernel(%arg0: i32, %arg1: memref<32x128xbf16, #tpu.memory_space<vmem>>, %arg2: memref<1x128xf32, #tpu.memory_space<vmem>>, %arg3: memref<1x128xf32, #tpu.memory_space<vmem>>, %arg4: memref<32x128xbf16, #tpu.memory_space<vmem>>) attributes {dimension_semantics = [#tpu.dimension_semantics<parallel>], iteration_bounds = array<i64: 1>, scalar_prefetch = 0 : i64, scratch_operands = 0 : i64, tpu.core_type = #tpu.core_type<tc>, window_params = [{transform_indices = @transform_0, window_bounds = array<i64: 32, 128>}, {pipeline_mode = #tpu.pipeline_mode<synchronous>, transform_indices = @transform_1, window_bounds = array<i64: 1, 128>}, {pipeline_mode = #tpu.pipeline_mode<synchronous>, transform_indices = @transform_2, window_bounds = array<i64: 1, 128>}, {transform_indices = @transform_3, window_bounds = array<i64: 32, 128>}]} {
    %c0 = arith.constant 0 : index
    %c0_0 = arith.constant 0 : index
    %0 = vector.load %arg1[%c0, %c0_0] : memref<32x128xbf16, #tpu.memory_space<vmem>>, vector<32x128xbf16>
    %1 = arith.extf %0 : vector<32x128xbf16> to vector<32x128xf32>
    %c0_1 = arith.constant 0 : index
    %c0_2 = arith.constant 0 : index
    %2 = vector.load %arg2[%c0_1, %c0_2] : memref<1x128xf32, #tpu.memory_space<vmem>>, vector<1x128xf32>
    %3 = vector.broadcast %2 : vector<1x128xf32> to vector<32x128xf32>
    %4 = arith.mulf %1, %3 : vector<32x128xf32>
    %c0_3 = arith.constant 0 : index
    %c0_4 = arith.constant 0 : index
    %5 = vector.load %arg3[%c0_3, %c0_4] : memref<1x128xf32, #tpu.memory_space<vmem>>, vector<1x128xf32>
    %6 = vector.broadcast %5 : vector<1x128xf32> to vector<32x128xf32>
    %7 = arith.addf %4, %6 : vector<32x128xf32>
    %cst = arith.constant 0.000000e+00 : f32
    %8 = vector.broadcast %cst : f32 to vector<32x128xf32>
    %9 = arith.cmpf oge, %7, %8 : vector<32x128xf32>
    %cst_5 = arith.constant 0.229166672 : f32
    %10 = vector.broadcast %cst_5 : f32 to vector<32x128xf32>
    %11 = arith.mulf %7, %10 : vector<32x128xf32>
    %12 = arith.select %9, %7, %11 : vector<32x128xi1>, vector<32x128xf32>
    %13 = arith.truncf %12 : vector<32x128xf32> to vector<32x128xbf16>
    %c0_6 = arith.constant 0 : index
    %c0_7 = arith.constant 0 : index
    %14 = vector.load %arg4[%c0_6, %c0_7] : memref<32x128xbf16, #tpu.memory_space<vmem>>, vector<32x128xbf16>
    tpu.vector_store %arg4[%c0_6, %c0_7], %13 {strides = array<i32>} : memref<32x128xbf16, #tpu.memory_space<vmem>>, vector<32x128xbf16>,
    return
  }
  func.func @transform_0(%arg0: i32) -> (i32, i32) {
    %c0_i32 = arith.constant 0 : i32
    %c0_i32_0 = arith.constant 0 : i32
    return %arg0, %c0_i32 : i32, i32
  }
  func.func @transform_1(%arg0: i32) -> (i32, i32) {
    %c0_i32 = arith.constant 0 : i32
    %c0_i32_0 = arith.constant 0 : i32
    %c0_i32_1 = arith.constant 0 : i32
    return %c0_i32, %c0_i32_0 : i32, i32
  }
  func.func @transform_2(%arg0: i32) -> (i32, i32) {
    %c0_i32 = arith.constant 0 : i32
    %c0_i32_0 = arith.constant 0 : i32
    %c0_i32_1 = arith.constant 0 : i32
    return %c0_i32, %c0_i32_0 : i32, i32
  }
  func.func @transform_3(%arg0: i32) -> (i32, i32) {
    %c0_i32 = arith.constant 0 : i32
    %c0_i32_0 = arith.constant 0 : i32
    return %arg0, %c0_i32 : i32, i32
  }
}

module attributes {stable_mosaic.version = 11 : i64} {
  func.func @_conv3x3_kernel(%arg0: i32, %arg1: i32, %arg2: memref<1x16x18x4xbf16, #tpu.memory_space<vmem>>, %arg3: memref<1x1x18x4xbf16, #tpu.memory_space<vmem>>, %arg4: memref<1x1x18x4xbf16, #tpu.memory_space<vmem>>, %arg5: memref<36x32xbf16, #tpu.memory_space<vmem>>, %arg6: memref<1x32xf32, #tpu.memory_space<vmem>>, %arg7: memref<1x32x16x32xbf16, #tpu.memory_space<vmem>>, %arg8: memref<1x1x1x32xf32, #tpu.memory_space<vmem>>, %arg9: memref<1x1x1x32xf32, #tpu.memory_space<vmem>>) attributes {dimension_semantics = [#tpu.dimension_semantics<parallel>, #tpu.dimension_semantics<parallel>], iteration_bounds = array<i64: 2, 1>, scalar_prefetch = 0 : i64, scratch_operands = 0 : i64, tpu.core_type = #tpu.core_type<tc>, window_params = [{transform_indices = @transform_0, window_bounds = array<i64: 1, 16, 18, 4>}, {transform_indices = @transform_1, window_bounds = array<i64: 1, 1, 18, 4>}, {transform_indices = @transform_2, window_bounds = array<i64: 1, 1, 18, 4>}, {pipeline_mode = #tpu.pipeline_mode<synchronous>, transform_indices = @transform_3, window_bounds = array<i64: 36, 32>}, {pipeline_mode = #tpu.pipeline_mode<synchronous>, transform_indices = @transform_4, window_bounds = array<i64: 1, 32>}, {transform_indices = @transform_5, window_bounds = array<i64: 1, 32, 16, 32>}, {transform_indices = @transform_6, window_bounds = array<i64: 1, 1, 1, 32>}, {transform_indices = @transform_7, window_bounds = array<i64: 1, 1, 1, 32>}]} {
    %c0 = arith.constant 0 : index
    %c0_0 = arith.constant 0 : index
    %c0_1 = arith.constant 0 : index
    %c0_2 = arith.constant 0 : index
    %0 = vector.load %arg2[%c0, %c0_0, %c0_1, %c0_2] : memref<1x16x18x4xbf16, #tpu.memory_space<vmem>>, vector<1x16x18x4xbf16>
    %1 = vector.shape_cast %0 : vector<1x16x18x4xbf16> to vector<16x18x4xbf16>
    %c0_3 = arith.constant 0 : index
    %c0_4 = arith.constant 0 : index
    %c0_5 = arith.constant 0 : index
    %c0_6 = arith.constant 0 : index
    %2 = vector.load %arg3[%c0_3, %c0_4, %c0_5, %c0_6] : memref<1x1x18x4xbf16, #tpu.memory_space<vmem>>, vector<1x1x18x4xbf16>
    %3 = vector.shape_cast %2 : vector<1x1x18x4xbf16> to vector<1x18x4xbf16>
    %c0_7 = arith.constant 0 : index
    %c0_8 = arith.constant 0 : index
    %c0_9 = arith.constant 0 : index
    %c0_10 = arith.constant 0 : index
    %4 = vector.load %arg4[%c0_7, %c0_8, %c0_9, %c0_10] : memref<1x1x18x4xbf16, #tpu.memory_space<vmem>>, vector<1x1x18x4xbf16>
    %5 = vector.shape_cast %4 : vector<1x1x18x4xbf16> to vector<1x18x4xbf16>
    %6 = tpu.concatenate %1, %3, %5 in 0 : vector<16x18x4xbf16>, vector<1x18x4xbf16>, vector<1x18x4xbf16> -> vector<18x18x4xbf16>
    %7 = arith.extf %6 : vector<18x18x4xbf16> to vector<18x18x4xf32>
    %8 = vector.shape_cast %7 : vector<18x18x4xf32> to vector<18x1x18x4xf32>
    %9 = vector.shape_cast %8 : vector<18x1x18x4xf32> to vector<18x1x18x4xf32>
    %10 = vector.broadcast %9 : vector<18x1x18x4xf32> to vector<18x2x18x4xf32>
    %11 = vector.shape_cast %10 : vector<18x2x18x4xf32> to vector<36x18x4xf32>
    %12 = vector.extract_strided_slice %11 {offsets = [1, 0, 0], sizes = [34, 18, 4], strides = [1, 1, 1]} : vector<36x18x4xf32> to vector<34x18x4xf32>
    %13 = vector.extract_strided_slice %12 {offsets = [0, 0, 0], sizes = [32, 16, 4], strides = [1, 1, 1]} : vector<34x18x4xf32> to vector<32x16x4xf32>
    %14 = vector.extract_strided_slice %12 {offsets = [0, 1, 0], sizes = [32, 16, 4], strides = [1, 1, 1]} : vector<34x18x4xf32> to vector<32x16x4xf32>
    %15 = vector.extract_strided_slice %12 {offsets = [0, 2, 0], sizes = [32, 16, 4], strides = [1, 1, 1]} : vector<34x18x4xf32> to vector<32x16x4xf32>
    %16 = vector.extract_strided_slice %12 {offsets = [1, 0, 0], sizes = [32, 16, 4], strides = [1, 1, 1]} : vector<34x18x4xf32> to vector<32x16x4xf32>
    %17 = vector.extract_strided_slice %12 {offsets = [1, 1, 0], sizes = [32, 16, 4], strides = [1, 1, 1]} : vector<34x18x4xf32> to vector<32x16x4xf32>
    %18 = vector.extract_strided_slice %12 {offsets = [1, 2, 0], sizes = [32, 16, 4], strides = [1, 1, 1]} : vector<34x18x4xf32> to vector<32x16x4xf32>
    %19 = vector.extract_strided_slice %12 {offsets = [2, 0, 0], sizes = [32, 16, 4], strides = [1, 1, 1]} : vector<34x18x4xf32> to vector<32x16x4xf32>
    %20 = vector.extract_strided_slice %12 {offsets = [2, 1, 0], sizes = [32, 16, 4], strides = [1, 1, 1]} : vector<34x18x4xf32> to vector<32x16x4xf32>
    %21 = vector.extract_strided_slice %12 {offsets = [2, 2, 0], sizes = [32, 16, 4], strides = [1, 1, 1]} : vector<34x18x4xf32> to vector<32x16x4xf32>
    %22 = tpu.concatenate %13, %14, %15, %16, %17, %18, %19, %20, %21 in 2 : vector<32x16x4xf32>, vector<32x16x4xf32>, vector<32x16x4xf32>, vector<32x16x4xf32>, vector<32x16x4xf32>, vector<32x16x4xf32>, vector<32x16x4xf32>, vector<32x16x4xf32>, vector<32x16x4xf32> -> vector<32x16x36xf32>
    %23 = vector.shape_cast %22 : vector<32x16x36xf32> to vector<512x36xf32>
    %24 = arith.truncf %23 : vector<512x36xf32> to vector<512x36xbf16>
    %c0_11 = arith.constant 0 : index
    %c0_12 = arith.constant 0 : index
    %25 = vector.load %arg5[%c0_11, %c0_12] : memref<36x32xbf16, #tpu.memory_space<vmem>>, vector<36x32xbf16>
    %cst = arith.constant dense<0.000000e+00> : vector<512x32xf32>
    %26 = tpu.matmul %24, %25, %cst {dimension_numbers = #tpu.dot_dimension_numbers<[1], [0], [0], [1], [0, 0, 1, 1], [], []>} : vector<512x36xbf16>, vector<36x32xbf16>, vector<512x32xf32> -> vector<512x32xf32>
    %c0_13 = arith.constant 0 : index
    %c0_14 = arith.constant 0 : index
    %27 = vector.load %arg6[%c0_13, %c0_14] : memref<1x32xf32, #tpu.memory_space<vmem>>, vector<1x32xf32>
    %28 = vector.broadcast %27 : vector<1x32xf32> to vector<512x32xf32>
    %29 = arith.addf %26, %28 : vector<512x32xf32>
    %30 = vector.shape_cast %29 : vector<512x32xf32> to vector<1x32x16x32xf32>
    %31 = arith.truncf %30 : vector<1x32x16x32xf32> to vector<1x32x16x32xbf16>
    %c0_15 = arith.constant 0 : index
    %c0_16 = arith.constant 0 : index
    %c0_17 = arith.constant 0 : index
    %c0_18 = arith.constant 0 : index
    %32 = vector.load %arg7[%c0_15, %c0_16, %c0_17, %c0_18] : memref<1x32x16x32xbf16, #tpu.memory_space<vmem>>, vector<1x32x16x32xbf16>
    tpu.vector_store %arg7[%c0_15, %c0_16, %c0_17, %c0_18], %31 {strides = array<i32>} : memref<1x32x16x32xbf16, #tpu.memory_space<vmem>>, vector<1x32x16x32xbf16>,
    %cst_19 = arith.constant dense<0.000000e+00> : vector<32xf32>
    %33 = vector.multi_reduction <add>, %29, %cst_19 [0] : vector<512x32xf32> to vector<32xf32>
    %34 = vector.shape_cast %33 : vector<32xf32> to vector<1x1x1x32xf32>
    %c0_20 = arith.constant 0 : index
    %c0_21 = arith.constant 0 : index
    %c0_22 = arith.constant 0 : index
    %c0_23 = arith.constant 0 : index
    %35 = vector.load %arg8[%c0_20, %c0_21, %c0_22, %c0_23] : memref<1x1x1x32xf32, #tpu.memory_space<vmem>>, vector<1x1x1x32xf32>
    tpu.vector_store %arg8[%c0_20, %c0_21, %c0_22, %c0_23], %34 {strides = array<i32>} : memref<1x1x1x32xf32, #tpu.memory_space<vmem>>, vector<1x1x1x32xf32>,
    %36 = arith.mulf %29, %29 : vector<512x32xf32>
    %cst_24 = arith.constant dense<0.000000e+00> : vector<32xf32>
    %37 = vector.multi_reduction <add>, %36, %cst_24 [0] : vector<512x32xf32> to vector<32xf32>
    %38 = vector.shape_cast %37 : vector<32xf32> to vector<1x1x1x32xf32>
    %c0_25 = arith.constant 0 : index
    %c0_26 = arith.constant 0 : index
    %c0_27 = arith.constant 0 : index
    %c0_28 = arith.constant 0 : index
    %39 = vector.load %arg9[%c0_25, %c0_26, %c0_27, %c0_28] : memref<1x1x1x32xf32, #tpu.memory_space<vmem>>, vector<1x1x1x32xf32>
    tpu.vector_store %arg9[%c0_25, %c0_26, %c0_27, %c0_28], %38 {strides = array<i32>} : memref<1x1x1x32xf32, #tpu.memory_space<vmem>>, vector<1x1x1x32xf32>,
    return
  }
  func.func @transform_0(%arg0: i32, %arg1: i32) -> (i32, i32, i32, i32) {
    %c0_i32 = arith.constant 0 : i32
    %c0_i32_0 = arith.constant 0 : i32
    %c0_i32_1 = arith.constant 0 : i32
    return %arg0, %arg1, %c0_i32, %c0_i32_0 : i32, i32, i32, i32
  }
  func.func @transform_1(%arg0: i32, %arg1: i32) -> (i32, i32, i32, i32) {
    %c1_i32 = arith.constant 1 : i32
    %0 = arith.addi %arg1, %c1_i32 : i32
    %c16_i32 = arith.constant 16 : i32
    %1 = arith.muli %0, %c16_i32 : i32
    %c0_i32 = arith.constant 0 : i32
    %c0_i32_0 = arith.constant 0 : i32
    %c0_i32_1 = arith.constant 0 : i32
    return %arg0, %1, %c0_i32, %c0_i32_0 : i32, i32, i32, i32
  }
  func.func @transform_2(%arg0: i32, %arg1: i32) -> (i32, i32, i32, i32) {
    %c1_i32 = arith.constant 1 : i32
    %0 = arith.addi %arg1, %c1_i32 : i32
    %c16_i32 = arith.constant 16 : i32
    %1 = arith.muli %0, %c16_i32 : i32
    %c1_i32_0 = arith.constant 1 : i32
    %2 = arith.addi %1, %c1_i32_0 : i32
    %c0_i32 = arith.constant 0 : i32
    %c0_i32_1 = arith.constant 0 : i32
    %c0_i32_2 = arith.constant 0 : i32
    return %arg0, %2, %c0_i32, %c0_i32_1 : i32, i32, i32, i32
  }
  func.func @transform_3(%arg0: i32, %arg1: i32) -> (i32, i32) {
    %c0_i32 = arith.constant 0 : i32
    %c0_i32_0 = arith.constant 0 : i32
    %c0_i32_1 = arith.constant 0 : i32
    return %c0_i32, %c0_i32_0 : i32, i32
  }
  func.func @transform_4(%arg0: i32, %arg1: i32) -> (i32, i32) {
    %c0_i32 = arith.constant 0 : i32
    %c0_i32_0 = arith.constant 0 : i32
    %c0_i32_1 = arith.constant 0 : i32
    return %c0_i32, %c0_i32_0 : i32, i32
  }
  func.func @transform_5(%arg0: i32, %arg1: i32) -> (i32, i32, i32, i32) {
    %c0_i32 = arith.constant 0 : i32
    %c0_i32_0 = arith.constant 0 : i32
    %c0_i32_1 = arith.constant 0 : i32
    return %arg0, %arg1, %c0_i32, %c0_i32_0 : i32, i32, i32, i32
  }
  func.func @transform_6(%arg0: i32, %arg1: i32) -> (i32, i32, i32, i32) {
    %c0_i32 = arith.constant 0 : i32
    %c0_i32_0 = arith.constant 0 : i32
    %c0_i32_1 = arith.constant 0 : i32
    return %arg0, %arg1, %c0_i32, %c0_i32_0 : i32, i32, i32, i32
  }
  func.func @transform_7(%arg0: i32, %arg1: i32) -> (i32, i32, i32, i32) {
    %c0_i32 = arith.constant 0 : i32
    %c0_i32_0 = arith.constant 0 : i32
    %c0_i32_1 = arith.constant 0 : i32
    return %arg0, %arg1, %c0_i32, %c0_i32_0 : i32, i32, i32, i32
  }
}

module attributes {stable_mosaic.version = 11 : i64} {
  func.func @_conv3x3_kernel(%arg0: i32, %arg1: i32, %arg2: memref<1x16x18x8xbf16, #tpu.memory_space<vmem>>, %arg3: memref<1x1x18x8xbf16, #tpu.memory_space<vmem>>, %arg4: memref<1x1x18x8xbf16, #tpu.memory_space<vmem>>, %arg5: memref<72x32xbf16, #tpu.memory_space<vmem>>, %arg6: memref<1x32xf32, #tpu.memory_space<vmem>>, %arg7: memref<1x32x16x32xbf16, #tpu.memory_space<vmem>>, %arg8: memref<1x1x1x32xf32, #tpu.memory_space<vmem>>, %arg9: memref<1x1x1x32xf32, #tpu.memory_space<vmem>>) attributes {dimension_semantics = [#tpu.dimension_semantics<parallel>, #tpu.dimension_semantics<parallel>], iteration_bounds = array<i64: 2, 1>, scalar_prefetch = 0 : i64, scratch_operands = 0 : i64, tpu.core_type = #tpu.core_type<tc>, window_params = [{transform_indices = @transform_0, window_bounds = array<i64: 1, 16, 18, 8>}, {transform_indices = @transform_1, window_bounds = array<i64: 1, 1, 18, 8>}, {transform_indices = @transform_2, window_bounds = array<i64: 1, 1, 18, 8>}, {pipeline_mode = #tpu.pipeline_mode<synchronous>, transform_indices = @transform_3, window_bounds = array<i64: 72, 32>}, {pipeline_mode = #tpu.pipeline_mode<synchronous>, transform_indices = @transform_4, window_bounds = array<i64: 1, 32>}, {transform_indices = @transform_5, window_bounds = array<i64: 1, 32, 16, 32>}, {transform_indices = @transform_6, window_bounds = array<i64: 1, 1, 1, 32>}, {transform_indices = @transform_7, window_bounds = array<i64: 1, 1, 1, 32>}]} {
    %c0 = arith.constant 0 : index
    %c0_0 = arith.constant 0 : index
    %c0_1 = arith.constant 0 : index
    %c0_2 = arith.constant 0 : index
    %0 = vector.load %arg2[%c0, %c0_0, %c0_1, %c0_2] : memref<1x16x18x8xbf16, #tpu.memory_space<vmem>>, vector<1x16x18x8xbf16>
    %1 = vector.shape_cast %0 : vector<1x16x18x8xbf16> to vector<16x18x8xbf16>
    %c0_3 = arith.constant 0 : index
    %c0_4 = arith.constant 0 : index
    %c0_5 = arith.constant 0 : index
    %c0_6 = arith.constant 0 : index
    %2 = vector.load %arg3[%c0_3, %c0_4, %c0_5, %c0_6] : memref<1x1x18x8xbf16, #tpu.memory_space<vmem>>, vector<1x1x18x8xbf16>
    %3 = vector.shape_cast %2 : vector<1x1x18x8xbf16> to vector<1x18x8xbf16>
    %c0_7 = arith.constant 0 : index
    %c0_8 = arith.constant 0 : index
    %c0_9 = arith.constant 0 : index
    %c0_10 = arith.constant 0 : index
    %4 = vector.load %arg4[%c0_7, %c0_8, %c0_9, %c0_10] : memref<1x1x18x8xbf16, #tpu.memory_space<vmem>>, vector<1x1x18x8xbf16>
    %5 = vector.shape_cast %4 : vector<1x1x18x8xbf16> to vector<1x18x8xbf16>
    %6 = tpu.concatenate %1, %3, %5 in 0 : vector<16x18x8xbf16>, vector<1x18x8xbf16>, vector<1x18x8xbf16> -> vector<18x18x8xbf16>
    %7 = arith.extf %6 : vector<18x18x8xbf16> to vector<18x18x8xf32>
    %8 = vector.shape_cast %7 : vector<18x18x8xf32> to vector<18x1x18x8xf32>
    %9 = vector.shape_cast %8 : vector<18x1x18x8xf32> to vector<18x1x18x8xf32>
    %10 = vector.broadcast %9 : vector<18x1x18x8xf32> to vector<18x2x18x8xf32>
    %11 = vector.shape_cast %10 : vector<18x2x18x8xf32> to vector<36x18x8xf32>
    %12 = vector.extract_strided_slice %11 {offsets = [1, 0, 0], sizes = [34, 18, 8], strides = [1, 1, 1]} : vector<36x18x8xf32> to vector<34x18x8xf32>
    %13 = vector.extract_strided_slice %12 {offsets = [0, 0, 0], sizes = [32, 16, 8], strides = [1, 1, 1]} : vector<34x18x8xf32> to vector<32x16x8xf32>
    %14 = vector.extract_strided_slice %12 {offsets = [0, 1, 0], sizes = [32, 16, 8], strides = [1, 1, 1]} : vector<34x18x8xf32> to vector<32x16x8xf32>
    %15 = vector.extract_strided_slice %12 {offsets = [0, 2, 0], sizes = [32, 16, 8], strides = [1, 1, 1]} : vector<34x18x8xf32> to vector<32x16x8xf32>
    %16 = vector.extract_strided_slice %12 {offsets = [1, 0, 0], sizes = [32, 16, 8], strides = [1, 1, 1]} : vector<34x18x8xf32> to vector<32x16x8xf32>
    %17 = vector.extract_strided_slice %12 {offsets = [1, 1, 0], sizes = [32, 16, 8], strides = [1, 1, 1]} : vector<34x18x8xf32> to vector<32x16x8xf32>
    %18 = vector.extract_strided_slice %12 {offsets = [1, 2, 0], sizes = [32, 16, 8], strides = [1, 1, 1]} : vector<34x18x8xf32> to vector<32x16x8xf32>
    %19 = vector.extract_strided_slice %12 {offsets = [2, 0, 0], sizes = [32, 16, 8], strides = [1, 1, 1]} : vector<34x18x8xf32> to vector<32x16x8xf32>
    %20 = vector.extract_strided_slice %12 {offsets = [2, 1, 0], sizes = [32, 16, 8], strides = [1, 1, 1]} : vector<34x18x8xf32> to vector<32x16x8xf32>
    %21 = vector.extract_strided_slice %12 {offsets = [2, 2, 0], sizes = [32, 16, 8], strides = [1, 1, 1]} : vector<34x18x8xf32> to vector<32x16x8xf32>
    %22 = tpu.concatenate %13, %14, %15, %16, %17, %18, %19, %20, %21 in 2 : vector<32x16x8xf32>, vector<32x16x8xf32>, vector<32x16x8xf32>, vector<32x16x8xf32>, vector<32x16x8xf32>, vector<32x16x8xf32>, vector<32x16x8xf32>, vector<32x16x8xf32>, vector<32x16x8xf32> -> vector<32x16x72xf32>
    %23 = vector.shape_cast %22 : vector<32x16x72xf32> to vector<512x72xf32>
    %24 = arith.truncf %23 : vector<512x72xf32> to vector<512x72xbf16>
    %c0_11 = arith.constant 0 : index
    %c0_12 = arith.constant 0 : index
    %25 = vector.load %arg5[%c0_11, %c0_12] : memref<72x32xbf16, #tpu.memory_space<vmem>>, vector<72x32xbf16>
    %cst = arith.constant dense<0.000000e+00> : vector<512x32xf32>
    %26 = tpu.matmul %24, %25, %cst {dimension_numbers = #tpu.dot_dimension_numbers<[1], [0], [0], [1], [0, 0, 1, 1], [], []>} : vector<512x72xbf16>, vector<72x32xbf16>, vector<512x32xf32> -> vector<512x32xf32>
    %c0_13 = arith.constant 0 : index
    %c0_14 = arith.constant 0 : index
    %27 = vector.load %arg6[%c0_13, %c0_14] : memref<1x32xf32, #tpu.memory_space<vmem>>, vector<1x32xf32>
    %28 = vector.broadcast %27 : vector<1x32xf32> to vector<512x32xf32>
    %29 = arith.addf %26, %28 : vector<512x32xf32>
    %30 = vector.shape_cast %29 : vector<512x32xf32> to vector<1x32x16x32xf32>
    %31 = arith.truncf %30 : vector<1x32x16x32xf32> to vector<1x32x16x32xbf16>
    %c0_15 = arith.constant 0 : index
    %c0_16 = arith.constant 0 : index
    %c0_17 = arith.constant 0 : index
    %c0_18 = arith.constant 0 : index
    %32 = vector.load %arg7[%c0_15, %c0_16, %c0_17, %c0_18] : memref<1x32x16x32xbf16, #tpu.memory_space<vmem>>, vector<1x32x16x32xbf16>
    tpu.vector_store %arg7[%c0_15, %c0_16, %c0_17, %c0_18], %31 {strides = array<i32>} : memref<1x32x16x32xbf16, #tpu.memory_space<vmem>>, vector<1x32x16x32xbf16>,
    %cst_19 = arith.constant dense<0.000000e+00> : vector<32xf32>
    %33 = vector.multi_reduction <add>, %29, %cst_19 [0] : vector<512x32xf32> to vector<32xf32>
    %34 = vector.shape_cast %33 : vector<32xf32> to vector<1x1x1x32xf32>
    %c0_20 = arith.constant 0 : index
    %c0_21 = arith.constant 0 : index
    %c0_22 = arith.constant 0 : index
    %c0_23 = arith.constant 0 : index
    %35 = vector.load %arg8[%c0_20, %c0_21, %c0_22, %c0_23] : memref<1x1x1x32xf32, #tpu.memory_space<vmem>>, vector<1x1x1x32xf32>
    tpu.vector_store %arg8[%c0_20, %c0_21, %c0_22, %c0_23], %34 {strides = array<i32>} : memref<1x1x1x32xf32, #tpu.memory_space<vmem>>, vector<1x1x1x32xf32>,
    %36 = arith.mulf %29, %29 : vector<512x32xf32>
    %cst_24 = arith.constant dense<0.000000e+00> : vector<32xf32>
    %37 = vector.multi_reduction <add>, %36, %cst_24 [0] : vector<512x32xf32> to vector<32xf32>
    %38 = vector.shape_cast %37 : vector<32xf32> to vector<1x1x1x32xf32>
    %c0_25 = arith.constant 0 : index
    %c0_26 = arith.constant 0 : index
    %c0_27 = arith.constant 0 : index
    %c0_28 = arith.constant 0 : index
    %39 = vector.load %arg9[%c0_25, %c0_26, %c0_27, %c0_28] : memref<1x1x1x32xf32, #tpu.memory_space<vmem>>, vector<1x1x1x32xf32>
    tpu.vector_store %arg9[%c0_25, %c0_26, %c0_27, %c0_28], %38 {strides = array<i32>} : memref<1x1x1x32xf32, #tpu.memory_space<vmem>>, vector<1x1x1x32xf32>,
    return
  }
  func.func @transform_0(%arg0: i32, %arg1: i32) -> (i32, i32, i32, i32) {
    %c0_i32 = arith.constant 0 : i32
    %c0_i32_0 = arith.constant 0 : i32
    %c0_i32_1 = arith.constant 0 : i32
    return %arg0, %arg1, %c0_i32, %c0_i32_0 : i32, i32, i32, i32
  }
  func.func @transform_1(%arg0: i32, %arg1: i32) -> (i32, i32, i32, i32) {
    %c1_i32 = arith.constant 1 : i32
    %0 = arith.addi %arg1, %c1_i32 : i32
    %c16_i32 = arith.constant 16 : i32
    %1 = arith.muli %0, %c16_i32 : i32
    %c0_i32 = arith.constant 0 : i32
    %c0_i32_0 = arith.constant 0 : i32
    %c0_i32_1 = arith.constant 0 : i32
    return %arg0, %1, %c0_i32, %c0_i32_0 : i32, i32, i32, i32
  }
  func.func @transform_2(%arg0: i32, %arg1: i32) -> (i32, i32, i32, i32) {
    %c1_i32 = arith.constant 1 : i32
    %0 = arith.addi %arg1, %c1_i32 : i32
    %c16_i32 = arith.constant 16 : i32
    %1 = arith.muli %0, %c16_i32 : i32
    %c1_i32_0 = arith.constant 1 : i32
    %2 = arith.addi %1, %c1_i32_0 : i32
    %c0_i32 = arith.constant 0 : i32
    %c0_i32_1 = arith.constant 0 : i32
    %c0_i32_2 = arith.constant 0 : i32
    return %arg0, %2, %c0_i32, %c0_i32_1 : i32, i32, i32, i32
  }
  func.func @transform_3(%arg0: i32, %arg1: i32) -> (i32, i32) {
    %c0_i32 = arith.constant 0 : i32
    %c0_i32_0 = arith.constant 0 : i32
    %c0_i32_1 = arith.constant 0 : i32
    return %c0_i32, %c0_i32_0 : i32, i32
  }
  func.func @transform_4(%arg0: i32, %arg1: i32) -> (i32, i32) {
    %c0_i32 = arith.constant 0 : i32
    %c0_i32_0 = arith.constant 0 : i32
    %c0_i32_1 = arith.constant 0 : i32
    return %c0_i32, %c0_i32_0 : i32, i32
  }
  func.func @transform_5(%arg0: i32, %arg1: i32) -> (i32, i32, i32, i32) {
    %c0_i32 = arith.constant 0 : i32
    %c0_i32_0 = arith.constant 0 : i32
    %c0_i32_1 = arith.constant 0 : i32
    return %arg0, %arg1, %c0_i32, %c0_i32_0 : i32, i32, i32, i32
  }
  func.func @transform_6(%arg0: i32, %arg1: i32) -> (i32, i32, i32, i32) {
    %c0_i32 = arith.constant 0 : i32
    %c0_i32_0 = arith.constant 0 : i32
    %c0_i32_1 = arith.constant 0 : i32
    return %arg0, %arg1, %c0_i32, %c0_i32_0 : i32, i32, i32, i32
  }
  func.func @transform_7(%arg0: i32, %arg1: i32) -> (i32, i32, i32, i32) {
    %c0_i32 = arith.constant 0 : i32
    %c0_i32_0 = arith.constant 0 : i32
    %c0_i32_1 = arith.constant 0 : i32
    return %arg0, %arg1, %c0_i32, %c0_i32_0 : i32, i32, i32, i32
  }
}

module attributes {stable_mosaic.version = 11 : i64} {
  func.func @_bn_add_rrelu_kernel(%arg0: i32, %arg1: memref<256x128xbf16, #tpu.memory_space<vmem>>, %arg2: memref<256x128xbf16, #tpu.memory_space<vmem>>, %arg3: memref<1x128xf32, #tpu.memory_space<vmem>>, %arg4: memref<1x128xf32, #tpu.memory_space<vmem>>, %arg5: memref<256x128xf32, #tpu.memory_space<vmem>>) attributes {dimension_semantics = [#tpu.dimension_semantics<parallel>], iteration_bounds = array<i64: 1>, scalar_prefetch = 0 : i64, scratch_operands = 0 : i64, tpu.core_type = #tpu.core_type<tc>, window_params = [{transform_indices = @transform_0, window_bounds = array<i64: 256, 128>}, {transform_indices = @transform_1, window_bounds = array<i64: 256, 128>}, {pipeline_mode = #tpu.pipeline_mode<synchronous>, transform_indices = @transform_2, window_bounds = array<i64: 1, 128>}, {pipeline_mode = #tpu.pipeline_mode<synchronous>, transform_indices = @transform_3, window_bounds = array<i64: 1, 128>}, {transform_indices = @transform_4, window_bounds = array<i64: 256, 128>}]} {
    %c0 = arith.constant 0 : index
    %c0_0 = arith.constant 0 : index
    %0 = vector.load %arg1[%c0, %c0_0] : memref<256x128xbf16, #tpu.memory_space<vmem>>, vector<256x128xbf16>
    %1 = arith.extf %0 : vector<256x128xbf16> to vector<256x128xf32>
    %c0_1 = arith.constant 0 : index
    %c0_2 = arith.constant 0 : index
    %2 = vector.load %arg3[%c0_1, %c0_2] : memref<1x128xf32, #tpu.memory_space<vmem>>, vector<1x128xf32>
    %3 = vector.broadcast %2 : vector<1x128xf32> to vector<256x128xf32>
    %4 = arith.mulf %1, %3 : vector<256x128xf32>
    %c0_3 = arith.constant 0 : index
    %c0_4 = arith.constant 0 : index
    %5 = vector.load %arg4[%c0_3, %c0_4] : memref<1x128xf32, #tpu.memory_space<vmem>>, vector<1x128xf32>
    %6 = vector.broadcast %5 : vector<1x128xf32> to vector<256x128xf32>
    %7 = arith.addf %4, %6 : vector<256x128xf32>
    %c0_5 = arith.constant 0 : index
    %c0_6 = arith.constant 0 : index
    %8 = vector.load %arg2[%c0_5, %c0_6] : memref<256x128xbf16, #tpu.memory_space<vmem>>, vector<256x128xbf16>
    %9 = arith.extf %8 : vector<256x128xbf16> to vector<256x128xf32>
    %10 = arith.addf %7, %9 : vector<256x128xf32>
    %cst = arith.constant 0.000000e+00 : f32
    %11 = vector.broadcast %cst : f32 to vector<256x128xf32>
    %12 = arith.cmpf oge, %10, %11 : vector<256x128xf32>
    %cst_7 = arith.constant 0.229166672 : f32
    %13 = vector.broadcast %cst_7 : f32 to vector<256x128xf32>
    %14 = arith.mulf %10, %13 : vector<256x128xf32>
    %15 = arith.select %12, %10, %14 : vector<256x128xi1>, vector<256x128xf32>
    %c0_8 = arith.constant 0 : index
    %c0_9 = arith.constant 0 : index
    %16 = vector.load %arg5[%c0_8, %c0_9] : memref<256x128xf32, #tpu.memory_space<vmem>>, vector<256x128xf32>
    tpu.vector_store %arg5[%c0_8, %c0_9], %15 {strides = array<i32>} : memref<256x128xf32, #tpu.memory_space<vmem>>, vector<256x128xf32>,
    return
  }
  func.func @transform_0(%arg0: i32) -> (i32, i32) {
    %c0_i32 = arith.constant 0 : i32
    %c0_i32_0 = arith.constant 0 : i32
    return %arg0, %c0_i32 : i32, i32
  }
  func.func @transform_1(%arg0: i32) -> (i32, i32) {
    %c0_i32 = arith.constant 0 : i32
    %c0_i32_0 = arith.constant 0 : i32
    return %arg0, %c0_i32 : i32, i32
  }
  func.func @transform_2(%arg0: i32) -> (i32, i32) {
    %c0_i32 = arith.constant 0 : i32
    %c0_i32_0 = arith.constant 0 : i32
    %c0_i32_1 = arith.constant 0 : i32
    return %c0_i32, %c0_i32_0 : i32, i32
  }
  func.func @transform_3(%arg0: i32) -> (i32, i32) {
    %c0_i32 = arith.constant 0 : i32
    %c0_i32_0 = arith.constant 0 : i32
    %c0_i32_1 = arith.constant 0 : i32
    return %c0_i32, %c0_i32_0 : i32, i32
  }
  func.func @transform_4(%arg0: i32) -> (i32, i32) {
    %c0_i32 = arith.constant 0 : i32
    %c0_i32_0 = arith.constant 0 : i32
    return %arg0, %c0_i32 : i32, i32
  }
}

</mosaic_0001>

<bundles_post_ra>
// kernel: tile.48
= control target key start
LH: loop header
LB: loop body
LE: loop exit
PB: predicated region body
PF: predicated region fallthrough
CT: control target
= control target key end

     0   :  { %s22_s0 = inlined_call_operand.vmem [shape: f32[16], index: 0, kind: input, shape index: {}]   ;;  %s23_s1 = inlined_call_operand.vmem [shape: f32[2,16], index: 1, kind: output, shape index: {}]  }
   0x1   :  { %v4_v0 = vld [vmem:[%s22_s0] ss:$0 sm:$0xff] }
   0x2   :  { %5 = vst [vmem:[%s23_s1] sm:$0x3] %v4_v0 }

// kernel: tile.49
= control target key start
LH: loop header
LB: loop body
LE: loop exit
PB: predicated region body
PF: predicated region fallthrough
CT: control target
= control target key end

     0   :  { %vm7_vm0 = vcmask 130048   ;;  %vm13_vm1 = vcmask 261248   ;;  %s39_s0 = inlined_call_operand.vmem [shape: f32[2,16], index: 0, kind: input, shape index: {}]   ;;  %s40_s1 = inlined_call_operand.vmem [shape: f32[1,32], index: 1, kind: output, shape index: {}]  }
   0x1   :  { %v4_v0 = vld [vmem:[%s39_s0] sm:$0x3]  ;;  %s22_s0 = smov 16  }
   0x2   :  { %5 = vst [vmem:[#allocation1] sm:$0x3] %v4_v0 }
   0x9   :  { %v10_v1 = vld [vmem:[#allocation1 + $0x1] sm:$0x1]   ;;  %v6_v2 = vld [vmem:[#allocation1] sm:$0x1]  }
   0xa   :  { %11 = vrot.lane.b32.xlu0 %v10_v1, %s22_s0  ;;  %8 = vst.msk [vmem:[#allocation0] sm:$0x1] %vm7_vm0, %v6_v2  }
  0x7c   :  { %v12_v3 = vpop.permute.xlu0 %11  }
  0x7d   :  { %14 = vst.msk [vmem:[#allocation0] sm:$0x1] %vm13_vm1, %v12_v3  }
  0x84   :  { %v18_v4 = vld [vmem:[#allocation0] sm:$0x1] }
  0x85   :  { %20 = vst [vmem:[%s40_s1] sm:$0x1] %v18_v4 }

// kernel: tile.38
= control target key start
LH: loop header
LB: loop body
LE: loop exit
PB: predicated region body
PF: predicated region fallthrough
CT: control target
= control target key end

     0   :  { %s28_s0 = inlined_call_operand.vmem [shape: f32[8], index: 0, kind: input, shape index: {}]   ;;  %s29_s1 = inlined_call_operand.vmem [shape: f32[16,8], index: 1, kind: output, shape index: {}]  }
   0x1   :  { %v4_v0 = vld [vmem:[%s28_s0] ss:$0 sm:$0xff] }
   0x2   :  { %5 = vst [vmem:[%s29_s1] sm:$0xff] %v4_v0  ;;  %8 = vst [vmem:[%s29_s1 + $0x8] sm:$0xff] %v4_v0 }

// kernel: tile.39
= control target key start
LH: loop header
LB: loop body
LE: loop exit
PB: predicated region body
PF: predicated region fallthrough
CT: control target
= control target key end

     0   :  { %s131_s10 = smov 120   ;;  %s132_s11 = smov 104   ;;  %vm3_vm0 = vcmask 64512   ;;  %vm9_vm1 = vcmask 1048512   ;;  %vm15_vm2 = vcmask 982912   ;;  %vm21_vm3 = vcmask 917312   ;;  %s207_s0 = inlined_call_operand.vmem [shape: f32[16,8], index: 0, kind: input, shape index: {}]   ;;  %s208_s1 = inlined_call_operand.vmem [shape: f32[1,128], index: 1, kind: output, shape index: {}]  }
   0x1   :  { %v101_v0 = vld [vmem:[%s207_s0 + $0xf] sm:$0x1]   ;;  %v103_v1 = vld [vmem:[%s207_s0 + $0xd] sm:$0x1]   ;;  %v102_v2 = vld [vmem:[%s207_s0 + $0xe] sm:$0x1]  }
   0x2   :  { %7 = vrot.lane.b32.xlu0 %v101_v0, %s131_s10  ;;  %19 = vrot.lane.b32.xlu1 %v103_v1, %s132_s11  ;;  %v104_v3 = vld [vmem:[%s207_s0 + $0xc] sm:$0x1]   ;;  %s133_s16 = smov 112   ;;  %s134_s17 = smov 96   ;;  %v105_v4 = vld [vmem:[%s207_s0 + $0xb] sm:$0x1]  }
   0x3   :  { %v106_v5 = vld [vmem:[%s207_s0 + $0xa] sm:$0x1]   ;;  %v2_v6 = vld [vmem:[%s207_s0] sm:$0x1]   ;;  %s135_s24 = smov 88   ;;  %s136_s25 = smov 80  }
   0x4   :  { %4 = vst.msk [vmem:[#allocation0] sm:$0x1] %vm3_vm0, %v2_v6   ;;  %v107_v7 = vld [vmem:[%s207_s0 + $0x9] sm:$0x1]   ;;  %v108_v8 = vld [vmem:[%s207_s0 + $0x8] sm:$0x1]  }
   0x5   :  { %s137_s30 = smov 72   ;;  %s138_s2 = smov 64   ;;  %v109_v9 = vld [vmem:[%s207_s0 + $0x7] sm:$0x1]   ;;  %v110_v10 = vld [vmem:[%s207_s0 + $0x6] sm:$0x1]  }
   0x6   :  { %13 = vrot.lane.b32.xlu0 %v102_v2, %s133_s16  ;;  %25 = vrot.lane.b32.xlu1 %v104_v3, %s134_s17  ;;  %s139_s7 = smov 56   ;;  %s140_s8 = smov 48   ;;  %v111_v11 = vld [vmem:[%s207_s0 + $0x5] sm:$0x1]   ;;  %v112_v12 = vld [vmem:[%s207_s0 + $0x4] sm:$0x1]  }
   0x7   :  { %s141_s13 = smov 40   ;;  %s142_s14 = smov 32   ;;  %v113_v13 = vld [vmem:[%s207_s0 + $0x3] sm:$0x1]   ;;  %v114_v14 = vld [vmem:[%s207_s0 + $0x2] sm:$0x1]  }
   0x8   :  { %s143_s19 = smov 24   ;;  %s144_s20 = smov 16   ;;  %v115_v15 = vld [vmem:[%s207_s0 + $0x1] sm:$0x1]   ;;  %vm27_vm4 = vcmask 851712   ;;  %vm33_vm5 = vcmask 786112  }
   0x9   :  { %s145_s0 = smov 8   ;;  %vm39_vm6 = vcmask 720512   ;;  %vm45_vm7 = vcmask 654912   ;;  %vm51_vm8 = vcmask 589312   ;;  %vm57_vm9 = vcmask 523712  }
   0xa   :  { %31 = vrot.lane.b32.xlu0 %v105_v4, %s135_s24  ;;  %37 = vrot.lane.b32.xlu1 %v106_v5, %s136_s25  ;;  %vm63_vm10 = vcmask 458112   ;;  %vm69_vm11 = vcmask 392512   ;;  %vm75_vm12 = vcmask 326912   ;;  %vm81_vm13 = vcmask 261312  }
   0xb   :  { %vm87_vm14 = vcmask 195712   ;;  %vm93_vm15 = vcmask 130112  }
   0xe   :  { %43 = vrot.lane.b32.xlu0 %v107_v7, %s137_s30  ;;  %49 = vrot.lane.b32.xlu1 %v108_v8, %s138_s2 }
  0x12   :  { %55 = vrot.lane.b32.xlu0 %v109_v9, %s139_s7  ;;  %61 = vrot.lane.b32.xlu1 %v110_v10, %s140_s8 }
  0x16   :  { %67 = vrot.lane.b32.xlu0 %v111_v11, %s141_s13  ;;  %73 = vrot.lane.b32.xlu1 %v112_v12, %s142_s14 }
  0x1a   :  { %79 = vrot.lane.b32.xlu0 %v113_v13, %s143_s19  ;;  %85 = vrot.lane.b32.xlu1 %v114_v14, %s144_s20 }
  0x1e   :  { %91 = vrot.lane.b32.xlu0 %v115_v15, %s145_s0 }
  0x74   :  { %v8_v16 = vpop.permute.xlu0 %7   ;;  %v20_v17 = vpop.permute.xlu1 %19  }
  0x75   :  { %10 = vst.msk [vmem:[#allocation0] sm:$0x1] %vm9_vm1, %v8_v16  }
  0x78   :  { %v14_v18 = vpop.permute.xlu0 %13   ;;  %v26_v19 = vpop.permute.xlu1 %25  }
  0x79   :  { %16 = vst.msk [vmem:[#allocation0] sm:$0x1] %vm15_vm2, %v14_v18  }
  0x7a   :  { %22 = vst.msk [vmem:[#allocation0] sm:$0x1] %vm21_vm3, %v20_v17  }
  0x7b   :  { %28 = vst.msk [vmem:[#allocation0] sm:$0x1] %vm27_vm4, %v26_v19  }
  0x7c   :  { %v32_v20 = vpop.permute.xlu0 %31   ;;  %v38_v21 = vpop.permute.xlu1 %37  }
  0x7d   :  { %34 = vst.msk [vmem:[#allocation0] sm:$0x1] %vm33_vm5, %v32_v20  }
  0x7e   :  { %40 = vst.msk [vmem:[#allocation0] sm:$0x1] %vm39_vm6, %v38_v21  }
  0x80   :  { %v44_v22 = vpop.permute.xlu0 %43   ;;  %v50_v23 = vpop.permute.xlu1 %49  }
  0x81   :  { %46 = vst.msk [vmem:[#allocation0] sm:$0x1] %vm45_vm7, %v44_v22  }
  0x82   :  { %52 = vst.msk [vmem:[#allocation0] sm:$0x1] %vm51_vm8, %v50_v23  }
  0x84   :  { %v56_v24 = vpop.permute.xlu0 %55   ;;  %v62_v25 = vpop.permute.xlu1 %61  }
  0x85   :  { %58 = vst.msk [vmem:[#allocation0] sm:$0x1] %vm57_vm9, %v56_v24  }
  0x86   :  { %64 = vst.msk [vmem:[#allocation0] sm:$0x1] %vm63_vm10, %v62_v25  }
  0x88   :  { %v68_v26 = vpop.permute.xlu0 %67   ;;  %v74_v27 = vpop.permute.xlu1 %73  }
  0x89   :  { %70 = vst.msk [vmem:[#allocation0] sm:$0x1] %vm69_vm11, %v68_v26  }
  0x8a   :  { %76 = vst.msk [vmem:[#allocation0] sm:$0x1] %vm75_vm12, %v74_v27  }
  0x8c   :  { %v80_v28 = vpop.permute.xlu0 %79   ;;  %v86_v29 = vpop.permute.xlu1 %85  }
  0x8d   :  { %82 = vst.msk [vmem:[#allocation0] sm:$0x1] %vm81_vm13, %v80_v28  }
  0x8e   :  { %88 = vst.msk [vmem:[#allocation0] sm:$0x1] %vm87_vm14, %v86_v29  }
  0x90   :  { %v92_v30 = vpop.permute.xlu0 %91  }
  0x91   :  { %94 = vst.msk [vmem:[#allocation0] sm:$0x1] %vm93_vm15, %v92_v30  }
  0x98   :  { %v98_v31 = vld [vmem:[#allocation0] sm:$0x1] }
  0x99   :  { %100 = vst [vmem:[%s208_s1] sm:$0x1] %v98_v31 }

// kernel: res_up_forward.6
= control target key start
LH: loop header
LB: loop body
LE: loop exit
PB: predicated region body
PF: predicated region fallthrough
CT: control target
= control target key end

     0   :  { %s148_s0 = inlined_call_operand.vmem [shape: bf16[32,128], index: 0, kind: input, shape index: {}]   ;;  %s149_s1 = inlined_call_operand.vmem [shape: f32[1,128], index: 1, kind: input, shape index: {}]   ;;  %s150_s2 = inlined_call_operand.vmem [shape: f32[1,128], index: 2, kind: input, shape index: {}]   ;;  %s151_s3 = inlined_call_operand.vmem [shape: bf16[32,128], index: 3, kind: output, shape index: {}]  }
   0x1   :  { %v91_v0 = vld [vmem:[%s148_s0] sm:$0xff]   ;;  %v108_v4 = vld [vmem:[%s148_s0 + $0x8] sm:$0xff]  }
   0x2   :  { %v80_v1 = vld [vmem:[%s149_s1] ss:$0 sm:$0xff]  ;;  %v92_v2 = vunpack.c.l.bf16 %v91_v0  ;;  %v93_v3 = vunpack.c.h.bf16 %v91_v0  ;;  %v96_v6 = vunpack.c.l.bf16 %v108_v4  ;;  %v97_v7 = vunpack.c.h.bf16 %v108_v4 }
   0x3   :  { %v81_v5 = vld [vmem:[%s150_s2] ss:$0 sm:$0xff] }
   0x4   :  { %v29_v8 = vmul.f32 %v92_v2, %v80_v1  ;;  %v30_v9 = vmul.f32 %v93_v3, %v80_v1  ;;  %v31_v10 = vmul.f32 %v96_v6, %v80_v1  ;;  %v32_v11 = vmul.f32 %v97_v7, %v80_v1 }
   0x6   :  { %v40_v12 = vadd.f32 %v81_v5, %v29_v8  ;;  %v41_v13 = vadd.f32 %v81_v5, %v30_v9  ;;  %v42_v14 = vadd.f32 %v81_v5, %v31_v10  ;;  %v43_v15 = vadd.f32 %v81_v5, %v32_v11 }
   0x8   :  { %vm44_vm0 = vcmp.ge.f32.partialorder %v40_v12, 0.0  ;;  %vm45_vm1 = vcmp.ge.f32.partialorder %v41_v13, 0.0  ;;  %v48_v16 = vmul.f32 0.22916667, %v40_v12  ;;  %v49_v17 = vmul.f32 0.22916667, %v41_v13 }
   0x9   :  { %vm46_vm2 = vcmp.ge.f32.partialorder %v42_v14, 0.0  ;;  %vm47_vm3 = vcmp.ge.f32.partialorder %v43_v15, 0.0  ;;  %v50_v18 = vmul.f32 0.22916667, %v42_v14  ;;  %v51_v19 = vmul.f32 0.22916667, %v43_v15 }
   0xa   :  { %v52_v20 = vsel %vm44_vm0, %v40_v12, %v48_v16  ;;  %v53_v21 = vsel %vm45_vm1, %v41_v13, %v49_v17 }
   0xb   :  { %v101_v22 = vpack.c.bf16 %v53_v21, %v52_v20  ;;  %v54_v23 = vsel %vm46_vm2, %v42_v14, %v50_v18  ;;  %v55_v24 = vsel %vm47_vm3, %v43_v15, %v51_v19 }
   0xc   :  { %v106_v25 = vpack.c.bf16 %v55_v24, %v54_v23 }
   0xd   :  { %102 = vst [vmem:[%s151_s3] sm:$0xff] %v101_v22  }
   0xe   :  { %109 = vst [vmem:[%s151_s3 + $0x8] sm:$0xff] %v106_v25  }

// kernel: res_up_forward.5
= control target key start
LH: loop header
LB: loop body
LE: loop exit
PB: predicated region body
PF: predicated region fallthrough
CT: control target
= control target key end

     0   :  { %s3623_s24 = smov 0   ;;  %s3625_s25 = smov 0   ;;  %s5098_s0 = inlined_call_operand.vmem [shape: bf16[2,18,18,4], index: 0, kind: input, shape index: {}, may-alias: {0,1,2}]   ;;  %s5099_s1 = inlined_call_operand.vmem [shape: bf16[2,18,18,4], index: 1, kind: input, shape index: {}, may-alias: {0,1,2}]   ;;  %s5100_s2 = inlined_call_operand.vmem [shape: bf16[2,18,18,4], index: 2, kind: input, shape index: {}, may-alias: {0,1,2}]   ;;  %s5101_s3 = inlined_call_operand.vmem [shape: bf16[36,8], index: 3, kind: input, shape index: {}]   ;;  %s5102_s4 = inlined_call_operand.vmem [shape: f32[1,8], index: 4, kind: input, shape index: {}]   ;;  %s5103_s5 = inlined_call_operand.vmem [shape: bf16[2,16,16,8], index: 5, kind: output, shape index: {0}]   ;;  %s5104_s6 = inlined_call_operand.vmem [shape: f32[2,1,1,8], index: 6, kind: output, shape index: {1}]   ;;  %s5105_s7 = inlined_call_operand.vmem [shape: f32[2,1,1,8], index: 7, kind: output, shape index: {2}]  }
   0x1   :  { %s3627_s26 = smov 0  }
   0x2 LB: > { %s30_s27 = sadd.s32 1, %s3569_s25  ;;  %p2664_p0 = scmp.ge.s32.totalorder %s3573_s26, 1  ;;  %s3573_s26 = sphi %s3627_s26, %s18_s26   ;;  %s3569_s25 = sphi %s3625_s25, %s5313_s25   ;;  %s3565_s24 = sphi %s3623_s24, %s5312_s24  }
   0x3   : > { %p32_p1 = scmp.ge.s32.totalorder %s30_s27, 2  ;;  %p330_p2 = scmp.lt.s32.totalorder %s3573_s26, 3 }
   0x5   : > { %s5315_s27 = smov (%p32_p1, %s30_s27), 0  ;;  %p331_p3 = pnand %p2664_p0, %p330_p2 }
   0x7   : > { %334 = sbr.rel (%p331_p3) target bundleno = 645 (0x285), region = 40 }
   0xe   : > { %p418_p4 = scmp.lt.s32.totalorder %s3565_s24, 1  ;;  %vm641_vm0 = vcmask 1046528   ;;  %s3575_s9 = smov 4   ;;  %vm818_vm1 = vcmask 1045504   ;;  %vm1953_vm2 = vcmask 1041408   ;;  %vm1597_vm3 = vcmask 31744  }
   0xf   : > { %s3576_s10 = smov 8   ;;  %s3577_s11 = smov 12   ;;  %vm1630_vm4 = vcmask 64512   ;;  %vm1663_vm5 = vcmask 97280   ;;  %vm1696_vm6 = vcmask 130048   ;;  %vm1729_vm7 = vcmask 162816  }
  0x10   : > { %s5317_s24 = smov (!%p418_p4, %s3565_s24), 1  ;;  %s3578_s14 = smov 16   ;;  %vm1762_vm8 = vcmask 195584   ;;  %vm1795_vm9 = vcmask 228352   ;;  %vm1828_vm10 = vcmask 261120   ;;  %vm1904_vm11 = vcmask 293888  }
  0x11   : > { %s3644_s28 = smul.u32 216, %s5317_s24  ;;  %s3579_s17 = smov 20   ;;  %vm2246_vm12 = vcmask 60416   ;;  %vm2348_vm13 = vcmask 57344  }
  0x12   : > { %s3580_s20 = smov 24   ;;  %s3581_s21 = smov 28  }
  0x13   : > { %s3650_s8 = scalar_lea.vmem %s5098_s0, %s3644_s28  ;;  %s3582_s22 = smov 32  }
  0x14   : > { %v2801_v0 = vld [vmem:[%s3650_s8 + $0x18] sm:$0xff]   ;;  %v3654_v1 = vld [vmem:[%s3650_s8 + $0x20] sm:$0x1]  ;;  %v3665_v7 = vld [vmem:[%s3650_s8 + $0x8] sm:$0x1]  ;;  %s2725_s23 = sadd.s32 192, %s3644_s28 }
  0x15   : > { %v2762_v2 = vld [vmem:[%s3650_s8] sm:$0xff]   ;;  %v3657_v3 = vunpack.c.l.bf16 %v2801_v0  ;;  %v3659_v4 = vunpack.c.h.bf16 %v2801_v0  ;;  %v5112_v5 = vunpack.c.l.bf16 %v3654_v1  ;;  %v3669_v9 = vld [vmem:[%s3650_s8 + $0x2c] sm:$0x1]  ;;  %v5115_v11 = vunpack.c.l.bf16 %v3665_v7  ;;  %v3690_v23 = vld [vmem:[%s3650_s8 + $0x14] sm:$0x1] }
  0x16   : > { %v3662_v6 = vunpack.c.l.bf16 %v2762_v2  ;;  %v494_v8 = vld [vmem:[%s3650_s8 + $0x24] sm:$0xff]   ;;  %v3671_v10 = vunpack.c.h.bf16 %v2762_v2  ;;  %v488_v14 = vld [vmem:[%s3650_s8 + $0xc] sm:$0xff]   ;;  %v5114_v21 = vunpack.c.l.bf16 %v3669_v9  ;;  %v500_v28 = vld [vmem:[%s3650_s8 + $0x3c] sm:$0xff]   ;;  %v5116_v37 = vunpack.c.l.bf16 %v3690_v23 }
  0x17   : > { %v3674_v12 = vunpack.c.l.bf16 %v494_v8  ;;  %v3676_v13 = vunpack.c.h.bf16 %v494_v8  ;;  %v652_v15 = vrot.slane %v3657_v3, 1  ;;  %v653_v16 = vrot.slane %v3659_v4, 1  ;;  %v3705_v33 = vld [vmem:[%s3650_s8 + $0x44] sm:$0x1]  ;;  %v2802_v38 = vld [vmem:[%s3650_s8 + $0x30] sm:$0xff]   ;;  %v2803_v58 = vld [vmem:[%s3650_s8 + $0x48] sm:$0xff]  }
  0x18   : > { %v655_v17 = vrot.slane %v5112_v5, 1  ;;  %v642_v18 = vrot.slane %v3662_v6, 1  ;;  %v643_v19 = vrot.slane %v3671_v10, 1  ;;  %v645_v20 = vrot.slane %v5115_v11, 1  ;;  %v3721_v43 = vld [vmem:[%s3650_s8 + $0x38] sm:$0x1] }
  0x19   : > { %v657_v22 = vrot.slane %v3674_v12, 1  ;;  %v654_v24 = vsel %vm641_vm0, %v652_v15, %v653_v16  ;;  %v658_v26 = vrot.slane %v3676_v13, 1  ;;  %v3695_v27 = vunpack.c.l.bf16 %v488_v14  ;;  %v506_v52 = vld [vmem:[%s3650_s8 + $0x54] sm:$0xff]   ;;  %v3743_v57 = vld [vmem:[%s3650_s8 + $0x5c] sm:$0x1] }
  0x1a   : > { %v656_v25 = vsel %vm641_vm0, %v653_v16, %v655_v17  ;;  %v644_v30 = vsel %vm641_vm0, %v642_v18, %v643_v19  ;;  %v646_v31 = vsel %vm641_vm0, %v643_v19, %v645_v20  ;;  %v660_v32 = vrot.slane %v5114_v21, 1  ;;  %v512_v19 = vld [vmem:[%s3650_s8 + $0x6c] sm:$0xff]   ;;  %v3872_v5 = vld [vmem:[%s3650_s8 + $0x98] sm:$0x1] }
  0x1b   : > { %5184 = vst [vmem:[#allocation2_spill] sm:$0xff] %v3695_v27  ;;  %v3698_v29 = vpack.i.bf16 %v656_v25, %v654_v24  ;;  %v2908_v34 = vpack.i.bf16 %v646_v31, %v644_v30  ;;  %v659_v35 = vsel %vm641_vm0, %v657_v22, %v658_v26  ;;  %v3708_v36 = vunpack.c.h.bf16 %v488_v14  ;;  %v3761_v14 = vld [vmem:[%s3650_s8 + $0x50] sm:$0x1]  ;;  %v530_v21 = vld [vmem:[%s3650_s8 + $0xb4] sm:$0xff]  }
  0x1c   : > { %v661_v39 = vsel %vm641_vm0, %v658_v26, %v660_v32  ;;  %v647_v40 = vrot.slane %v3695_v27, 1  ;;  %v3716_v41 = vunpack.c.l.bf16 %v500_v28  ;;  %v3718_v42 = vunpack.c.h.bf16 %v500_v28  ;;  %v3778_v26 = vld [vmem:[%s3650_s8 + $0x74] sm:$0x1]  ;;  %v2804_v28 = vld [vmem:[%s3650_s8 + $0x60] sm:$0xff]  }
  0x1d   : > { %5185 = vst [vmem:[#allocation3_spill] sm:$0xff] %v3698_v29  ;;  %5186 = vst [vmem:[#allocation4_spill] sm:$0xff] %v3708_v36  ;;  %2919 = vrot.lane.b32.xlu1 %v3698_v29, %s3575_s9  ;;  %2909 = vrot.lane.b32.xlu0 %v2908_v34, %s3575_s9  ;;  %v3724_v44 = vpack.i.bf16 %v661_v39, %v659_v35  ;;  %v648_v45 = vrot.slane %v3708_v36, 1  ;;  %v650_v46 = vrot.slane %v5116_v37, 1  ;;  %v5111_v47 = vunpack.c.l.bf16 %v3705_v33 }
  0x1e   : > { %v667_v48 = vrot.slane %v3716_v41, 1  ;;  %v668_v49 = vrot.slane %v3718_v42, 1  ;;  %v3732_v50 = vunpack.c.l.bf16 %v2802_v38  ;;  %v3734_v51 = vunpack.c.h.bf16 %v2802_v38 }
  0x1f   : > { %5187 = vst [vmem:[#allocation5_spill] sm:$0xff] %v3724_v44  ;;  %v649_v53 = vsel %vm641_vm0, %v647_v40, %v648_v45  ;;  %v651_v54 = vsel %vm641_vm0, %v648_v45, %v650_v46  ;;  %v670_v55 = vrot.slane %v5111_v47, 1  ;;  %v5110_v56 = vunpack.c.l.bf16 %v3721_v43  ;;  %v3796_v45 = vld [vmem:[%s3650_s8 + $0x68] sm:$0x1] }
  0x20   : > { %v3748_v59 = vpack.i.bf16 %v651_v54, %v649_v53  ;;  %v669_v60 = vsel %vm641_vm0, %v667_v48, %v668_v49  ;;  %v662_v61 = vrot.slane %v3732_v50, 1  ;;  %v663_v62 = vrot.slane %v3734_v51, 1  ;;  %v518_v53 = vld [vmem:[%s3650_s8 + $0x84] sm:$0xff]  }
  0x21   : > { %2924 = vrot.lane.b32.xlu1 %v3724_v44, %s3575_s9  ;;  %v671_v63 = vsel %vm641_vm0, %v668_v49, %v670_v55  ;;  %v665_v0 = vrot.slane %v5110_v56, 1  ;;  %v3756_v2 = vunpack.c.l.bf16 %v506_v52  ;;  %v3758_v8 = vunpack.c.h.bf16 %v506_v52 }
  0x22   : > { %5188 = vst [vmem:[#allocation6_spill] sm:$0xff] %v3748_v59  ;;  %2914 = vrot.lane.b32.xlu0 %v3748_v59, %s3575_s9  ;;  %v3765_v15 = vpack.i.bf16 %v671_v63, %v669_v60  ;;  %v664_v16 = vsel %vm641_vm0, %v662_v61, %v663_v62  ;;  %v5109_v17 = vunpack.c.l.bf16 %v3743_v57  ;;  %v3769_v18 = vunpack.c.l.bf16 %v2803_v58 }
  0x23   : > { %5189 = vst [vmem:[#allocation7_spill] sm:$0xff] %v3756_v2  ;;  %5190 = vst [vmem:[#allocation8_spill] sm:$0xff] %v3758_v8  ;;  %v666_v20 = vsel %vm641_vm0, %v663_v62, %v665_v0  ;;  %v677_v22 = vrot.slane %v3756_v2, 1  ;;  %v678_v24 = vrot.slane %v3758_v8, 1  ;;  %v3775_v25 = vunpack.c.h.bf16 %v2803_v58 }
  0x24   : > { %5191 = vst [vmem:[#allocation9_spill] sm:$0xff] %v3765_v15  ;;  %5192 = vst [vmem:[#allocation10_spill] sm:$0xff] %v3769_v18  ;;  %v3783_v30 = vpack.i.bf16 %v666_v20, %v664_v16  ;;  %v680_v31 = vrot.slane %v5109_v17, 1  ;;  %v5108_v32 = vunpack.c.l.bf16 %v3761_v14  ;;  %v672_v34 = vrot.slane %v3769_v18, 1  ;;  %v3819_v16 = vld [vmem:[%s3650_s8 + $0x8c] sm:$0x1] }
  0x25   : > { %5193 = vst [vmem:[#allocation11_spill] sm:$0xff] %v3775_v25  ;;  %2934 = vrot.lane.b32.xlu1 %v3765_v15, %s3575_s9  ;;  %v679_v35 = vsel %vm641_vm0, %v677_v22, %v678_v24  ;;  %v673_v38 = vrot.slane %v3775_v25, 1  ;;  %v3791_v39 = vunpack.c.l.bf16 %v512_v19  ;;  %v3793_v40 = vunpack.c.h.bf16 %v512_v19  ;;  %v2805_v19 = vld [vmem:[%s3650_s8 + $0x78] sm:$0xff]  }
  0x26   : > { %5194 = vst [vmem:[#allocation12_spill] sm:$0xff] %v3783_v30  ;;  %2929 = vrot.lane.b32.xlu0 %v3783_v30, %s3575_s9  ;;  %v681_v46 = vsel %vm641_vm0, %v678_v24, %v680_v31  ;;  %v675_v48 = vrot.slane %v5108_v32, 1  ;;  %v5107_v49 = vunpack.c.l.bf16 %v3778_v26  ;;  %v3804_v52 = vunpack.c.l.bf16 %v2804_v28  ;;  %v3854_v32 = vld [vmem:[%s3650_s8 + $0xa4] sm:$0x1]  ;;  %v3913_v30 = vld [vmem:[%s3650_s8 + $0xb0] sm:$0x1] }
  0x27   : > { %5195 = vst [vmem:[#allocation13_spill] sm:$0xff] %v3791_v39  ;;  %5196 = vst [vmem:[#allocation14_spill] sm:$0xff] %v3793_v40  ;;  %v3807_v54 = vpack.i.bf16 %v681_v46, %v679_v35  ;;  %v674_v55 = vsel %vm641_vm0, %v672_v34, %v673_v38  ;;  %v687_v58 = vrot.slane %v3791_v39, 1  ;;  %v688_v60 = vrot.slane %v3793_v40, 1  ;;  %v3837_v46 = vld [vmem:[%s3650_s8 + $0x80] sm:$0x1] }
  0x28   : > { %5197 = vst [vmem:[#allocation15_spill] sm:$0xff] %v3804_v52  ;;  %v676_v61 = vsel %vm641_vm0, %v673_v38, %v675_v48  ;;  %v690_v62 = vrot.slane %v5107_v49, 1  ;;  %v3815_v63 = vunpack.c.h.bf16 %v2804_v28  ;;  %v5106_v0 = vunpack.c.l.bf16 %v3796_v45 }
  0x29   : > { %5198 = vst [vmem:[#allocation16_spill] sm:$0xff] %v3807_v54  ;;  %2944 = vrot.lane.b32.xlu1 %v3807_v54, %s3575_s9  ;;  %v3824_v20 = vpack.i.bf16 %v676_v61, %v674_v55  ;;  %v689_v22 = vsel %vm641_vm0, %v687_v58, %v688_v60  ;;  %v682_v24 = vrot.slane %v3804_v52, 1  ;;  %v3828_v31 = vunpack.c.l.bf16 %v518_v53  ;;  %v524_v61 = vld [vmem:[%s3650_s8 + $0x9c] sm:$0xff]  }
  0x2a   : > { %5199 = vst [vmem:[#allocation17_spill] sm:$0xff] %v3815_v63  ;;  %v691_v28 = vsel %vm641_vm0, %v688_v60, %v690_v62  ;;  %v683_v34 = vrot.slane %v3815_v63, 1  ;;  %v685_v35 = vrot.slane %v5106_v0, 1  ;;  %v3834_v38 = vunpack.c.h.bf16 %v518_v53  ;;  %v3895_v54 = vld [vmem:[%s3650_s8 + $0xbc] sm:$0x1] }
  0x2b   : > { %5200 = vst [vmem:[#allocation18_spill] sm:$0xff] %v3824_v20  ;;  %5201 = vst [vmem:[#allocation19_spill] sm:$0xff] %v3828_v31  ;;  %2939 = vrot.lane.b32.xlu0 %v3824_v20, %s3575_s9  ;;  %v3841_v48 = vpack.i.bf16 %v691_v28, %v689_v22  ;;  %v5113_v55 = vunpack.c.l.bf16 %v3819_v16  ;;  %v697_v58 = vrot.slane %v3828_v31, 1  ;;  %v3845_v60 = vunpack.c.l.bf16 %v2805_v19  ;;  %v2806_v22 = vld [vmem:[%s3650_s8 + $0x90] sm:$0xff]  }
  0x2c   : > { %5202 = vst [vmem:[#allocation20_spill] sm:$0xff] %v3834_v38  ;;  %v684_v62 = vsel %vm641_vm0, %v682_v24, %v683_v34  ;;  %v686_v53 = vsel %vm641_vm0, %v683_v34, %v685_v35  ;;  %v698_v0 = vrot.slane %v3834_v38, 1  ;;  %v3851_v49 = vunpack.c.h.bf16 %v2805_v19 }
  0x2d   : > { %5203 = vst [vmem:[#allocation21_spill] sm:$0xff] %v3841_v48  ;;  %5204 = vst [vmem:[#allocation22_spill] sm:$0xff] %v3845_v60  ;;  %2954 = vrot.lane.b32.xlu1 %v3841_v48, %s3575_s9  ;;  %v3859_v28 = vpack.i.bf16 %v686_v53, %v684_v62  ;;  %v700_v17 = vrot.slane %v5113_v55, 1  ;;  %v5121_v24 = vunpack.c.l.bf16 %v3837_v46  ;;  %v692_v34 = vrot.slane %v3845_v60, 1 }
  0x2e   : > { %5205 = vst [vmem:[#allocation23_spill] sm:$0xff] %v3851_v49  ;;  %v699_v35 = vsel %vm641_vm0, %v697_v58, %v698_v0  ;;  %v693_v19 = vrot.slane %v3851_v49, 1  ;;  %v3867_v56 = vunpack.c.l.bf16 %v524_v61  ;;  %v3869_v47 = vunpack.c.h.bf16 %v524_v61 }
  0x2f   : > { %5206 = vst [vmem:[#allocation24_spill] sm:$0xff] %v3859_v28  ;;  %2949 = vrot.lane.b32.xlu0 %v3859_v28, %s3575_s9  ;;  %v701_v62 = vsel %vm641_vm0, %v698_v0, %v700_v17  ;;  %v695_v53 = vrot.slane %v5121_v24, 1  ;;  %v5126_v58 = vunpack.c.l.bf16 %v3854_v32  ;;  %v3880_v55 = vunpack.c.l.bf16 %v2806_v22 }
  0x30   : > { %5207 = vst [vmem:[#allocation25_spill] sm:$0xff] %v3867_v56  ;;  %5208 = vst [vmem:[#allocation26_spill] sm:$0xff] %v3869_v47  ;;  %v3883_v61 = vpack.i.bf16 %v701_v62, %v699_v35  ;;  %v694_v11 = vsel %vm641_vm0, %v692_v34, %v693_v19  ;;  %v707_v37 = vrot.slane %v3867_v56, 1  ;;  %v708_v48 = vrot.slane %v3869_v47, 1  ;;  %v2807_v35 = vld [vmem:[%s3650_s8 + $0xa8] sm:$0xff]   ;;  %s443_s8 = scalar_lea.vmem %s5099_s1, %s2725_s23  ;;  %s483_s23 = scalar_lea.vmem %s5105_s7, %s5317_s24 }
  0x31   : > { %5209 = vst [vmem:[#allocation27_spill] sm:$0xff] %v3880_v55  ;;  %v696_v28 = vsel %vm641_vm0, %v693_v19, %v695_v53  ;;  %v710_v17 = vrot.slane %v5126_v58, 1  ;;  %v3891_v0 = vunpack.c.h.bf16 %v2806_v22  ;;  %v5133_v24 = vunpack.c.l.bf16 %v3872_v5 }
  0x32   : > { %5210 = vst [vmem:[#allocation28_spill] sm:$0xff] %v3883_v61  ;;  %2964 = vrot.lane.b32.xlu1 %v3883_v61, %s3575_s9  ;;  %v3900_v34 = vpack.i.bf16 %v696_v28, %v694_v11  ;;  %v709_v62 = vsel %vm641_vm0, %v707_v37, %v708_v48  ;;  %v702_v20 = vrot.slane %v3880_v55, 1  ;;  %v3904_v19 = vunpack.c.l.bf16 %v530_v21 }
  0x33   : > { %5211 = vst [vmem:[#allocation29_spill] sm:$0xff] %v3891_v0  ;;  %v711_v53 = vsel %vm641_vm0, %v708_v48, %v710_v17  ;;  %v703_v22 = vrot.slane %v3891_v0, 1  ;;  %v705_v58 = vrot.slane %v5133_v24, 1  ;;  %v3910_v15 = vunpack.c.h.bf16 %v530_v21 }
  0x34   : > { %5212 = vst [vmem:[#allocation30_spill] sm:$0xff] %v3900_v34  ;;  %2959 = vrot.lane.b32.xlu0 %v3900_v34, %s3575_s9  ;;  %v3917_v11 = vpack.i.bf16 %v711_v53, %v709_v62  ;;  %v5138_v37 = vunpack.c.l.bf16 %v3895_v54  ;;  %v717_v28 = vrot.slane %v3904_v19, 1  ;;  %v3921_v61 = vunpack.c.l.bf16 %v2807_v35 }
  0x35   : > { %v704_v48 = vsel %vm641_vm0, %v702_v20, %v703_v22  ;;  %v706_v17 = vsel %vm641_vm0, %v703_v22, %v705_v58  ;;  %v718_v21 = vrot.slane %v3910_v15, 1  ;;  %v3926_v24 = vunpack.c.h.bf16 %v2807_v35 }
  0x36   : > { %5213 = vst [vmem:[#allocation31_spill] sm:$0xff] %v3917_v11  ;;  %2974 = vrot.lane.b32.xlu1 %v3917_v11, %s3575_s9  ;;  %v3930_v34 = vpack.i.bf16 %v706_v17, %v704_v48  ;;  %v720_v62 = vrot.slane %v5138_v37, 1  ;;  %v5150_v53 = vunpack.c.l.bf16 %v3913_v30  ;;  %v712_v44 = vrot.slane %v3921_v61, 1 }
  0x37   : > { %v719_v20 = vsel %vm641_vm0, %v717_v28, %v718_v21  ;;  %v713_v58 = vrot.slane %v3926_v24, 1  ;;  %v824_v22 = vrot.slane %v3695_v27, 2  ;;  %v825_v35 = vrot.slane %v3708_v36, 2 }
  0x38   : > { %5214 = vst [vmem:[#allocation32_spill] sm:$0xff] %v3930_v34  ;;  %2969 = vrot.lane.b32.xlu0 %v3930_v34, %s3575_s9  ;;  %v721_v48 = vsel %vm641_vm0, %v718_v21, %v720_v62  ;;  %v715_v17 = vrot.slane %v5150_v53, 1  ;;  %v5215_v37 = vunpack.c.l.bf16 %v3690_v23  ;;  %v819_v59 = vrot.slane %v3662_v6, 2 }
  0x39   : > { %v3948_v28 = vpack.i.bf16 %v721_v48, %v719_v20  ;;  %v714_v29 = vsel %vm641_vm0, %v712_v44, %v713_v58  ;;  %v826_v27 = vsel %vm818_vm1, %v824_v22, %v825_v35  ;;  %v820_v36 = vrot.slane %v3671_v10, 2 }
  0x3a   : > { %v827_v11 = vrot.slane %v5215_v37, 2  ;;  %v716_v34 = vsel %vm641_vm0, %v713_v58, %v715_v17  ;;  %v5216_v62 = vunpack.c.l.bf16 %v3665_v7  ;;  %v834_v23 = vrot.slane %v3674_v12, 2 }
  0x3b   : > { %2984 = vrot.lane.b32.xlu1 %v3948_v28, %s3575_s9  ;;  %v3960_v37 = vpack.i.bf16 %v716_v34, %v714_v29  ;;  %v821_v44 = vsel %vm818_vm1, %v819_v59, %v820_v36  ;;  %v835_v22 = vrot.slane %v3676_v13, 2  ;;  %v829_v7 = vrot.slane %v3657_v3, 2 }
  0x3c   : > { %v828_v21 = vsel %vm818_vm1, %v825_v35, %v827_v11  ;;  %v822_v53 = vrot.slane %v5216_v62, 2  ;;  %v5217_v11 = vunpack.c.l.bf16 %v3669_v9  ;;  %v830_v48 = vrot.slane %v3659_v4, 2 }
  0x3d   : > { %v3962_v20 = vpack.i.bf16 %v828_v21, %v826_v27  ;;  %2979 = vrot.lane.b32.xlu0 %v3960_v37, %s3575_s9  ;;  %v836_v27 = vsel %vm818_vm1, %v834_v23, %v835_v22  ;;  %v5218_v34 = vunpack.c.l.bf16 %v3654_v1  ;;  %v844_v17 = vrot.slane %v3716_v41, 2  ;;  %s2727_s9 = sadd.s32 204, %s3644_s28 }
  0x3e   : > { %v823_v58 = vsel %vm818_vm1, %v820_v36, %v822_v53  ;;  %v837_v35 = vrot.slane %v5217_v11, 2  ;;  %v831_v9 = vsel %vm818_vm1, %v829_v7, %v830_v48  ;;  %v845_v53 = vrot.slane %v3718_v42, 2  ;;  %s4362_s12 = scalar_lea.vmem %s5100_s2, %s2727_s9 }
  0x3f   : > { %v2988_v29 = vpack.i.bf16 %v823_v58, %v821_v44  ;;  %v832_v59 = vrot.slane %v5218_v34, 2  ;;  %v5219_v21 = vunpack.c.l.bf16 %v3705_v33  ;;  %2994 = vrot.lane.b32.xlu1 %v3962_v20, %s3576_s10  ;;  %v839_v23 = vrot.slane %v3732_v50, 2 }
  0x40   : > { %v838_v36 = vsel %vm818_vm1, %v835_v22, %v837_v35  ;;  %v840_v58 = vrot.slane %v3734_v51, 2  ;;  %v846_v22 = vsel %vm818_vm1, %v844_v17, %v845_v53  ;;  %v5220_v35 = vunpack.c.l.bf16 %v3721_v43 }
  0x41   : > { %v847_v62 = vrot.slane %v5219_v21, 2  ;;  %v3984_v44 = vpack.i.bf16 %v838_v36, %v836_v27  ;;  %v833_v1 = vsel %vm818_vm1, %v830_v48, %v832_v59  ;;  %2989 = vrot.lane.b32.xlu0 %v2988_v29, %s3576_s10  ;;  %v854_v34 = vrot.slane %v3756_v2, 2 }
  0x42   : > { %v842_v33 = vrot.slane %v5220_v35, 2  ;;  %v3994_v7 = vpack.i.bf16 %v833_v1, %v831_v9  ;;  %v841_v27 = vsel %vm818_vm1, %v839_v23, %v840_v58  ;;  %v855_v48 = vrot.slane %v3758_v8, 2 }
  0x43   : > { %v848_v11 = vsel %vm818_vm1, %v845_v53, %v847_v62  ;;  %v5221_v36 = vunpack.c.l.bf16 %v3743_v57  ;;  %v849_v53 = vrot.slane %v3769_v18, 2  ;;  %v850_v43 = vrot.slane %v3775_v25, 2  ;;  %3004 = vrot.lane.b32.xlu1 %v3984_v44, %s3576_s10 }
  0x44   : > { %v843_v59 = vsel %vm818_vm1, %v840_v58, %v842_v33  ;;  %v4006_v29 = vpack.i.bf16 %v848_v11, %v846_v22  ;;  %v856_v9 = vsel %vm818_vm1, %v854_v34, %v855_v48  ;;  %v5222_v21 = vunpack.c.l.bf16 %v3761_v14 }
  0x45   : > { %v857_v17 = vrot.slane %v5221_v36, 2  ;;  %v864_v23 = vrot.slane %v3791_v39, 2  ;;  %v865_v57 = vrot.slane %v3793_v40, 2  ;;  %v5223_v58 = vunpack.c.l.bf16 %v3778_v26  ;;  %2999 = vrot.lane.b32.xlu0 %v3994_v7, %s3576_s10 }
  0x46   : > { %v852_v62 = vrot.slane %v5222_v21, 2  ;;  %v4018_v33 = vpack.i.bf16 %v843_v59, %v841_v27  ;;  %v859_v22 = vrot.slane %v3804_v52, 2  ;;  %v860_v11 = vrot.slane %v3815_v63, 2 }
  0x47   : > { %v858_v1 = vsel %vm818_vm1, %v855_v48, %v857_v17  ;;  %v867_v35 = vrot.slane %v5223_v58, 2  ;;  %v851_v14 = vsel %vm818_vm1, %v849_v53, %v850_v43  ;;  %v5224_v48 = vunpack.c.l.bf16 %v3796_v45  ;;  %3014 = vrot.lane.b32.xlu1 %v4006_v29, %s3576_s10 }
  0x48   : > { %v853_v34 = vsel %vm818_vm1, %v850_v43, %v852_v62  ;;  %v4028_v26 = vpack.i.bf16 %v858_v1, %v856_v9  ;;  %v874_v17 = vrot.slane %v3828_v31, 2  ;;  %v875_v27 = vrot.slane %v3834_v38, 2 }
  0x49   : > { %v862_v36 = vrot.slane %v5224_v48, 2  ;;  %v866_v59 = vsel %vm818_vm1, %v864_v23, %v865_v57  ;;  %v868_v21 = vsel %vm818_vm1, %v865_v57, %v867_v35  ;;  %v5225_v53 = vunpack.c.l.bf16 %v3819_v16  ;;  %3009 = vrot.lane.b32.xlu0 %v4018_v33, %s3576_s10 }
  0x4a   : > { %v4038_v45 = vpack.i.bf16 %v853_v34, %v851_v14  ;;  %v861_v43 = vsel %vm818_vm1, %v859_v22, %v860_v11  ;;  %v869_v62 = vrot.slane %v3845_v60, 2  ;;  %v870_v1 = vrot.slane %v3851_v49, 2 }
  0x4b   : > { %v877_v58 = vrot.slane %v5225_v53, 2  ;;  %v863_v9 = vsel %vm818_vm1, %v860_v11, %v862_v36  ;;  %v5226_v23 = vunpack.c.l.bf16 %v3837_v46  ;;  %3024 = vrot.lane.b32.xlu1 %v4028_v26, %s3576_s10  ;;  %v4048_v16 = vpack.i.bf16 %v868_v21, %v866_v59 }
  0x4c   : > { %v876_v57 = vsel %vm818_vm1, %v874_v17, %v875_v27  ;;  %v884_v22 = vrot.slane %v3867_v56, 2  ;;  %v885_v11 = vrot.slane %v3869_v47, 2  ;;  %v5227_v14 = vunpack.c.l.bf16 %v3854_v32 }
  0x4d   : > { %v872_v48 = vrot.slane %v5226_v23, 2  ;;  %v878_v35 = vsel %vm818_vm1, %v875_v27, %v877_v58  ;;  %3019 = vrot.lane.b32.xlu0 %v4038_v45, %s3576_s10  ;;  %v4058_v46 = vpack.i.bf16 %v863_v9, %v861_v43  ;;  %v879_v36 = vrot.slane %v3880_v55, 2 }
  0x4e   : > { %v887_v34 = vrot.slane %v5227_v14, 2  ;;  %v880_v59 = vrot.slane %v3891_v0, 2  ;;  %v5228_v17 = vunpack.c.l.bf16 %v3872_v5  ;;  %v871_v27 = vsel %vm818_vm1, %v869_v62, %v870_v1 }
  0x4f   : > { %v873_v53 = vsel %vm818_vm1, %v870_v1, %v872_v48  ;;  %3034 = vrot.lane.b32.xlu1 %v4048_v16, %s3576_s10  ;;  %v4068_v32 = vpack.i.bf16 %v878_v35, %v876_v57  ;;  %v894_v58 = vrot.slane %v3904_v19, 2  ;;  %v895_v43 = vrot.slane %v3910_v15, 2 }
  0x50   : > { %v882_v21 = vrot.slane %v5228_v17, 2  ;;  %v5229_v9 = vunpack.c.l.bf16 %v3895_v54  ;;  %v886_v14 = vsel %vm818_vm1, %v884_v22, %v885_v11  ;;  %v888_v5 = vsel %vm818_vm1, %v885_v11, %v887_v34 }
  0x51   : > { %v889_v62 = vrot.slane %v3921_v61, 2  ;;  %v890_v1 = vrot.slane %v3926_v24, 2  ;;  %3029 = vrot.lane.b32.xlu0 %v4058_v46, %s3576_s10  ;;  %v4080_v48 = vpack.i.bf16 %v873_v53, %v871_v27  ;;  %v881_v57 = vsel %vm818_vm1, %v879_v36, %v880_v59  ;;  %v5231_v53 = vld [vmem:[#allocation2_spill] sm:$0xff] }
  0x52   : > { %v897_v23 = vrot.slane %v5229_v9, 2  ;;  %v883_v35 = vsel %vm818_vm1, %v880_v59, %v882_v21  ;;  %v5230_v54 = vunpack.c.l.bf16 %v3913_v30  ;;  %v4088_v22 = vpack.i.bf16 %v888_v5, %v886_v14 }
  0x53   : > { %3044 = vrot.lane.b32.xlu1 %v4068_v32, %s3576_s10  ;;  %v896_v11 = vsel %vm818_vm1, %v894_v58, %v895_v43  ;;  %v4092_v9 = vpack.i.bf16 %v883_v35, %v881_v57  ;;  %v891_v27 = vsel %vm818_vm1, %v889_v62, %v890_v1  ;;  %v3073_v21 = vpack.i.bf16 %v3659_v4, %v3657_v3  ;;  %v5232_v58 = vld [vmem:[#allocation4_spill] sm:$0xff]  ;;  %v5233_v57 = vld [vmem:[#allocation3_spill] sm:$0xff] }
  0x54   : > { %v892_v17 = vrot.slane %v5230_v54, 2  ;;  %v898_v34 = vsel %vm818_vm1, %v895_v43, %v897_v23  ;;  %v3068_v43 = vpack.i.bf16 %v5232_v58, %v5231_v53  ;;  %v3083_v23 = vpack.i.bf16 %v3734_v51, %v3732_v50  ;;  %v3549_v35 = vld [vmem:[%s5101_s3 + $0x8] sm:$0xff]   ;;  %v5234_v54 = vld [vmem:[#allocation6_spill] sm:$0xff] }
  0x55   : > { %3039 = vrot.lane.b32.xlu0 %v4080_v48, %s3576_s10  ;;  %v4098_v30 = vpack.i.bf16 %v898_v34, %v896_v11  ;;  %v3078_v14 = vpack.i.bf16 %v3676_v13, %v3674_v12  ;;  %v3093_v5 = vpack.i.bf16 %v3775_v25, %v3769_v18  ;;  %v3088_v62 = vpack.i.bf16 %v3718_v42, %v3716_v41  ;;  %v5235_v34 = vld [vmem:[#allocation5_spill] sm:$0xff] }
  0x56   : > { %v893_v36 = vsel %vm818_vm1, %v890_v1, %v892_v17  ;;  %v3548_v1 = vld [vmem:[%s5101_s3] sm:$0xff]   ;;  %v3550_v17 = vld [vmem:[%s5101_s3 + $0x10] ss:$0 sps:$4 sm:$0x33]  }
  0x57   : > { %3054 = vrot.lane.b32.xlu1 %v4088_v22, %s3576_s10  ;;  %v4102_v59 = vpack.i.bf16 %v893_v36, %v891_v27  ;;  %2827 = vmatprep.subr.bf16.mxu0 %v3548_v1  ;;  %v1955_v11 = vsel %vm1953_vm2, %v3550_v17, 0  ;;  %v5237_v27 = vld [vmem:[#allocation9_spill] sm:$0xff] }
  0x58   : > { %2865 = vmatprep.subr.bf16.mxu1 %v3548_v1  ;;  %2828 = vmatpush3.bf16.msra.mxu0 %v3548_v1 }
  0x59   : > { %3049 = vrot.lane.b32.xlu0 %v4092_v9, %s3576_s10  ;;  %2868 = vmatpush3.bf16.msra.mxu1 %v3548_v1 }
  0x5a   : > { %2829 = vmatprep.subr.bf16.mxu0 %v3549_v35  ;;  %2866 = vmatprep.subr.bf16.mxu1 %v3549_v35 }
  0x5b   : > { %3064 = vrot.lane.b32.xlu1 %v4098_v30, %s3576_s10 }
  0x5c   : > { %2830 = vmatpush3.bf16.msra.mxu0 %v3549_v35 }
  0x5d   : > { %3059 = vrot.lane.b32.xlu0 %v4102_v59, %s3576_s10  ;;  %2869 = vmatpush3.bf16.msra.mxu1 %v3549_v35 }
  0x5e   : > { %2871 = vmatprep.subr.msk.bf16.mxu0 %vm1953_vm2, %v3550_v17  ;;  %2872 = vmatprep.subr.msk.bf16.mxu1 %vm1953_vm2, %v3550_v17 }
  0x5f   : > { %3074 = vrot.lane.b32.xlu1 %v3073_v21, %s3577_s11 }
  0x60   : > { %2832 = vmatpush3.bf16.msra.mxu0 %v1955_v11 }
  0x61   : > { %3069 = vrot.lane.b32.xlu0 %v3068_v43, %s3577_s11  ;;  %2870 = vmatpush3.bf16.msra.mxu1 %v1955_v11 }
  0x63   : > { %3084 = vrot.lane.b32.xlu1 %v3083_v23, %s3577_s11 }
  0x65   : > { %3079 = vrot.lane.b32.xlu0 %v3078_v14, %s3577_s11 }
  0x67   : > { %3094 = vrot.lane.b32.xlu1 %v3093_v5, %s3577_s11 }
  0x69   : > { %3089 = vrot.lane.b32.xlu0 %v3088_v62, %s3577_s11 }
  0x6b   : > { %3104 = vrot.lane.b32.xlu1 %v5233_v57, %s3578_s14 }
  0x6d   : > { %3099 = vrot.lane.b32.xlu0 %v5234_v54, %s3578_s14 }
  0x6f   : > { %3114 = vrot.lane.b32.xlu1 %v3994_v7, %s3579_s17 }
  0x71   : > { %3109 = vrot.lane.b32.xlu0 %v3962_v20, %s3579_s17  ;;  %v5236_v20 = vld [vmem:[#allocation12_spill] sm:$0xff] }
  0x73   : > { %3124 = vrot.lane.b32.xlu1 %v3078_v14, %s3580_s20  ;;  %v3223_v14 = vpack.i.bf16 %v3758_v8, %v3756_v2 }
  0x75   : > { %3119 = vrot.lane.b32.xlu0 %v3073_v21, %s3580_s20  ;;  %v5238_v21 = vld [vmem:[#allocation18_spill] sm:$0xff] }
  0x77   : > { %3134 = vrot.lane.b32.xlu1 %v5235_v34, %s3581_s21 }
  0x79   : > { %3129 = vrot.lane.b32.xlu0 %v5233_v57, %s3581_s21  ;;  %v5241_v57 = vld [vmem:[#allocation16_spill] sm:$0xff] }
  0x7b   : > { %3144 = vrot.lane.b32.xlu1 %v3984_v44, %s3582_s22 }
  0x7d   : > { %3139 = vrot.lane.b32.xlu0 %v3994_v7, %s3582_s22 }
  0x7f   : > { %3154 = vrot.lane.b32.xlu1 %v5236_v20, %s3578_s14 }
  0x81   : > { %3149 = vrot.lane.b32.xlu0 %v5235_v34, %s3578_s14 }
  0x83   : > { %3164 = vrot.lane.b32.xlu1 %v4018_v33, %s3579_s17 }
  0x85   : > { %3159 = vrot.lane.b32.xlu0 %v3984_v44, %s3579_s17 }
  0x87   : > { %3174 = vrot.lane.b32.xlu1 %v3088_v62, %s3580_s20 }
  0x89   : > { %3169 = vrot.lane.b32.xlu0 %v3083_v23, %s3580_s20 }
  0x8b   : > { %3184 = vrot.lane.b32.xlu1 %v5237_v27, %s3581_s21 }
  0x8d   : > { %3179 = vrot.lane.b32.xlu0 %v5236_v20, %s3581_s21  ;;  %v5248_v20 = vld [vmem:[#allocation24_spill] sm:$0xff] }
  0x8f   : > { %v4169_v7 = vpop.permute.xlu1 %2919  ;;  %3194 = vrot.lane.b32.xlu1 %v4006_v29, %s3582_s22  ;;  %v4173_v36 = vpop.permute.xlu0 %2909 }
  0x91   : > { %3189 = vrot.lane.b32.xlu0 %v4018_v33, %s3582_s22 }
  0x93   : > { %v4177_v44 = vpop.permute.xlu1 %2924  ;;  %3204 = vrot.lane.b32.xlu1 %v5238_v21, %s3578_s14 }
  0x94   : > { %v4181_v43 = vpop.permute.xlu0 %2914 }
  0x95   : > { %3199 = vrot.lane.b32.xlu0 %v5237_v27, %s3578_s14 }
  0x97   : > { %v4185_v23 = vpop.permute.xlu1 %2934  ;;  %3214 = vrot.lane.b32.xlu1 %v4038_v45, %s3579_s17 }
  0x98   : > { %v4191_v62 = vpop.permute.xlu0 %2929 }
  0x99   : > { %3209 = vrot.lane.b32.xlu0 %v4006_v29, %s3579_s17  ;;  %v3253_v29 = vpack.i.bf16 %v3815_v63, %v3804_v52 }
  0x9b   : > { %3224 = vrot.lane.b32.xlu1 %v3223_v14, %s3580_s20  ;;  %v4196_v33 = vpop.permute.xlu1 %2944 }
  0x9c   : > { %5239 = vst [vmem:[#allocation2_spill] sm:$0xff] %v4196_v33 }
  0x9d   : > { %3219 = vrot.lane.b32.xlu0 %v3093_v5, %s3580_s20  ;;  %v4199_v1 = vpop.permute.xlu0 %2939 }
  0x9e   : > { %5240 = vst [vmem:[#allocation4_spill] sm:$0xff] %v4199_v1 }
  0x9f   : > { %3234 = vrot.lane.b32.xlu1 %v5241_v57, %s3581_s21  ;;  %v4203_v35 = vpop.permute.xlu1 %2954 }
  0xa0   : > { %5242 = vst [vmem:[#allocation3_spill] sm:$0xff] %v4203_v35 }
  0xa1   : > { %3229 = vrot.lane.b32.xlu0 %v5238_v21, %s3581_s21  ;;  %v4207_v54 = vpop.permute.xlu0 %2949 }
  0xa2   : > { %5243 = vst [vmem:[#allocation6_spill] sm:$0xff] %v4207_v54 }
  0xa3   : > { %3244 = vrot.lane.b32.xlu1 %v4028_v26, %s3582_s22 }
  0xa4   : > { %v4213_v17 = vpop.permute.xlu1 %2964 }
  0xa5   : > { %5244 = vst [vmem:[#allocation5_spill] sm:$0xff] %v4213_v17  ;;  %3239 = vrot.lane.b32.xlu0 %v4038_v45, %s3582_s22  ;;  %v3283_v45 = vpack.i.bf16 %v3793_v40, %v3791_v39  ;;  %v5254_v40 = vld [vmem:[#allocation30_spill] sm:$0xff] }
  0xa6   : > { %v4217_v5 = vpop.permute.xlu0 %2959 }
  0xa7   : > { %5245 = vst [vmem:[#allocation12_spill] sm:$0xff] %v4217_v5  ;;  %3254 = vrot.lane.b32.xlu1 %v3253_v29, %s3577_s11  ;;  %v5249_v5 = vld [vmem:[#allocation21_spill] sm:$0xff] }
  0xa8   : > { %v4220_v11 = vpop.permute.xlu1 %2974 }
  0xa9   : > { %5246 = vst [vmem:[#allocation9_spill] sm:$0xff] %v4220_v11  ;;  %3249 = vrot.lane.b32.xlu0 %v3223_v14, %s3577_s11 }
  0xaa   : > { %v4223_v34 = vpop.permute.xlu0 %2969 }
  0xab   : > { %5247 = vst [vmem:[#allocation18_spill] sm:$0xff] %v4223_v34  ;;  %3264 = vrot.lane.b32.xlu1 %v5248_v20, %s3578_s14 }
  0xad   : > { %3259 = vrot.lane.b32.xlu0 %v5241_v57, %s3578_s14  ;;  %v2985_v27 = vpop.permute.xlu1 %2984 }
  0xaf   : > { %v2980_v21 = vpop.permute.xlu0 %2979  ;;  %3274 = vrot.lane.b32.xlu1 %v4058_v46, %s3579_s17 }
  0xb1   : > { %3269 = vrot.lane.b32.xlu0 %v4028_v26, %s3579_s17  ;;  %v4235_v14 = vpop.permute.xlu1 %2994 }
  0xb3   : > { %v4237_v34 = vpop.permute.xlu0 %2989  ;;  %3284 = vrot.lane.b32.xlu1 %v3283_v45, %s3580_s20 }
  0xb4   : > { %v2991_v2 = vunpack.i.l.bf16 %v4237_v34 }
  0xb5   : > { %3279 = vrot.lane.b32.xlu0 %v3253_v29, %s3580_s20  ;;  %v4241_v57 = vpop.permute.xlu1 %3004  ;;  %v3313_v29 = vpack.i.bf16 %v3851_v49, %v3845_v60 }
  0xb7   : > { %v4243_v11 = vpop.permute.xlu0 %2999  ;;  %3294 = vrot.lane.b32.xlu1 %v5249_v5, %s3581_s21 }
  0xb9   : > { %3289 = vrot.lane.b32.xlu0 %v5248_v20, %s3581_s21  ;;  %v4249_v17 = vpop.permute.xlu1 %3014 }
  0xbb   : > { %v4251_v26 = vpop.permute.xlu0 %3009  ;;  %3304 = vrot.lane.b32.xlu1 %v4048_v16, %s3582_s22 }
  0xbd   : > { %3299 = vrot.lane.b32.xlu0 %v4058_v46, %s3582_s22  ;;  %v4259_v52 = vpop.permute.xlu1 %3024 }
  0xbe   : > { %5250 = vst [vmem:[#allocation16_spill] sm:$0xff] %v4259_v52 }
  0xbf   : > { %v4261_v63 = vpop.permute.xlu0 %3019  ;;  %3314 = vrot.lane.b32.xlu1 %v3313_v29, %s3577_s11 }
  0xc0   : > { %5251 = vst [vmem:[#allocation24_spill] sm:$0xff] %v4261_v63 }
  0xc1   : > { %3309 = vrot.lane.b32.xlu0 %v3283_v45, %s3577_s11  ;;  %v4265_v20 = vpop.permute.xlu1 %3034  ;;  %v3343_v45 = vpack.i.bf16 %v3834_v38, %v3828_v31 }
  0xc2   : > { %5252 = vst [vmem:[#allocation21_spill] sm:$0xff] %v4265_v20  ;;  %v2986_v20 = vunpack.i.l.bf16 %v2985_v27 }
  0xc3   : > { %v4267_v39 = vpop.permute.xlu0 %3029  ;;  %3324 = vrot.lane.b32.xlu1 %v5254_v40, %s3578_s14 }
  0xc4   : > { %5253 = vst [vmem:[#allocation33_spill] sm:$0xff] %v4267_v39  ;;  %v2987_v39 = vunpack.i.h.bf16 %v2985_v27 }
  0xc5   : > { %3319 = vrot.lane.b32.xlu0 %v5249_v5, %s3578_s14  ;;  %v4273_v60 = vpop.permute.xlu1 %3044  ;;  %v2982_v5 = vunpack.i.h.bf16 %v2980_v21 }
  0xc6   : > { %5255 = vst [vmem:[#allocation30_spill] sm:$0xff] %v4273_v60  ;;  %v2981_v60 = vunpack.i.l.bf16 %v2980_v21  ;;  %v1629_v31 = vsel %vm1597_vm3, %v3910_v15, %v2987_v39 }
  0xc7   : > { %v4275_v46 = vpop.permute.xlu0 %3039  ;;  %3334 = vrot.lane.b32.xlu1 %v4080_v48, %s3579_s17  ;;  %v1627_v39 = vsel %vm1597_vm3, %v3926_v24, %v2982_v5  ;;  %v2794_v5 = vld [vmem:[%s443_s8] sm:$0xff]  }
  0xc8   : > { %5256 = vst [vmem:[#allocation34_spill] sm:$0xff] %v4275_v46 }
  0xc9   : > { %3329 = vrot.lane.b32.xlu0 %v4048_v16, %s3579_s17  ;;  %v4283_v49 = vpop.permute.xlu1 %3054  ;;  %v1628_v16 = vsel %vm1597_vm3, %v3904_v19, %v2986_v20  ;;  %v1626_v20 = vsel %vm1597_vm3, %v3921_v61, %v2981_v60  ;;  %v3373_v60 = vpack.i.bf16 %v3891_v0, %v3880_v55 }
  0xca   : > { %5257 = vst [vmem:[#allocation35_spill] sm:$0xff] %v4283_v49 }
  0xcb   : > { %v4285_v54 = vpop.permute.xlu0 %3049  ;;  %3344 = vrot.lane.b32.xlu1 %v3343_v45, %s3580_s20 }
  0xcc   : > { %5258 = vst [vmem:[#allocation36_spill] sm:$0xff] %v4285_v54  ;;  %v5259_v54 = vld [vmem:[#allocation28_spill] sm:$0xff] }
  0xcd   : > { %3339 = vrot.lane.b32.xlu0 %v3313_v29, %s3580_s20  ;;  %v3065_v46 = vpop.permute.xlu1 %3064 }
  0xce   : > { %v3067_v35 = vunpack.i.h.bf16 %v3065_v46  ;;  %v3066_v18 = vunpack.i.l.bf16 %v3065_v46 }
  0xcf   : > { %v3060_v27 = vpop.permute.xlu0 %3059  ;;  %3354 = vrot.lane.b32.xlu1 %v5259_v54, %s3581_s21 }
  0xd0   : > { %v4296_v21 = vsel %vm1630_vm4, %v1629_v31, %v3067_v35  ;;  %v4299_v29 = vsel %vm1630_vm4, %v1628_v16, %v3066_v18  ;;  %v3062_v49 = vunpack.i.h.bf16 %v3060_v27  ;;  %v3061_v46 = vunpack.i.l.bf16 %v3060_v27  ;;  %v5265_v27 = vld [vmem:[#allocation32_spill] sm:$0xff] }
  0xd1   : > { %5260 = vst [vmem:[#allocation28_spill] sm:$0xff] %v4296_v21  ;;  %5261 = vst [vmem:[#allocation37_spill] sm:$0xff] %v4299_v29  ;;  %3349 = vrot.lane.b32.xlu0 %v5254_v40, %s3581_s21  ;;  %v4307_v38 = vpop.permute.xlu1 %3074  ;;  %v2916_v21 = vunpack.i.l.bf16 %v4181_v43 }
  0xd2   : > { %v4310_v25 = vsel %vm1630_vm4, %v1626_v20, %v3061_v46  ;;  %v4313_v31 = vsel %vm1630_vm4, %v1627_v39, %v3062_v49  ;;  %v4346_v39 = vunpack.c.l.bf16 %v2794_v5  ;;  %v4352_v20 = vpack.i.bf16 %v3869_v47, %v3867_v56 }
  0xd3   : > { %5262 = vst [vmem:[#allocation38_spill] sm:$0xff] %v4310_v25  ;;  %5263 = vst [vmem:[#allocation39_spill] sm:$0xff] %v4313_v31  ;;  %v4315_v18 = vpop.permute.xlu0 %3069  ;;  %3364 = vrot.lane.b32.xlu1 %v4068_v32, %s3582_s22  ;;  %v4356_v31 = vpack.i.bf16 %v3926_v24, %v3921_v61  ;;  %v2912_v24 = vunpack.i.h.bf16 %v4173_v36  ;;  %v2911_v61 = vunpack.i.l.bf16 %v4173_v36  ;;  %v2917_v25 = vunpack.i.h.bf16 %v4181_v43 }
  0xd4   : > { %v2996_v36 = vunpack.i.l.bf16 %v4235_v14  ;;  %v3077_v55 = vunpack.i.h.bf16 %v4307_v38  ;;  %v3076_v0 = vunpack.i.l.bf16 %v4307_v38  ;;  %v1600_v63 = vsel %vm1597_vm3, %v5231_v53, %v2916_v21 }
  0xd5   : > { %3359 = vrot.lane.b32.xlu0 %v4080_v48, %s3582_s22  ;;  %v4324_v40 = vpop.permute.xlu1 %3084  ;;  %v4339_v48 = vld [vmem:[%s443_s8 + $0x8] sm:$0x1]  ;;  %v1601_v38 = vsel %vm1597_vm3, %v5232_v58, %v2917_v25  ;;  %v3072_v52 = vunpack.i.h.bf16 %v4315_v18  ;;  %v3071_v1 = vunpack.i.l.bf16 %v4315_v18 }
  0xd6   : > { %v5266_v56 = vunpack.c.l.bf16 %v4339_v48 }
  0xd7   : > { %v4326_v35 = vpop.permute.xlu0 %3079  ;;  %3374 = vrot.lane.b32.xlu1 %v3373_v60, %s3577_s11 }
  0xd8   : > { %v4389_v47 = vrot.slane %v5266_v56, 1  ;;  %v1598_v56 = vsel %vm1597_vm3, %v3662_v6, %v2911_v61  ;;  %v1633_v6 = vsel %vm1630_vm4, %v1600_v63, %v2996_v36 }
  0xd9   : > { %3369 = vrot.lane.b32.xlu0 %v3343_v45, %s3577_s11  ;;  %v4333_v49 = vpop.permute.xlu1 %3094  ;;  %v4348_v45 = vunpack.c.h.bf16 %v2794_v5  ;;  %v4370_v5 = vpack.i.bf16 %v3910_v15, %v3904_v19  ;;  %v4383_v15 = vld [vmem:[%s4362_s12] sm:$0xff]   ;;  %v2997_v19 = vunpack.i.h.bf16 %v4235_v14  ;;  %v1599_v14 = vsel %vm1597_vm3, %v3671_v10, %v2912_v24 }
  0xda   : > { %v1631_v25 = vsel %vm1630_vm4, %v1598_v56, %v2991_v2  ;;  %v1666_v58 = vsel %vm1663_vm5, %v1633_v6, %v3076_v0 }
  0xdb   : > { %v4335_v16 = vpop.permute.xlu0 %3089  ;;  %3384 = vrot.lane.b32.xlu1 %v5265_v27, %s3578_s14  ;;  %v1634_v24 = vsel %vm1630_vm4, %v1601_v38, %v2997_v19  ;;  %v1664_v2 = vsel %vm1663_vm5, %v1631_v25, %v3071_v1 }
  0xdc   : > { %5264 = vst [vmem:[#allocation40_spill] sm:$0xff] %v4335_v16  ;;  %v1667_v21 = vsel %vm1663_vm5, %v1634_v24, %v3077_v55 }
  0xdd   : > { %3379 = vrot.lane.b32.xlu0 %v5259_v54, %s3578_s14  ;;  %v4344_v46 = vpop.permute.xlu1 %3104 }
  0xde   : > { %v3107_v61 = vunpack.i.h.bf16 %v4344_v46  ;;  %v3106_v43 = vunpack.i.l.bf16 %v4344_v46 }
  0xdf   : > { %v4364_v54 = vpop.permute.xlu0 %3099  ;;  %3394 = vrot.lane.b32.xlu1 %v4092_v9, %s3579_s17 }
  0xe0   : > { %v3102_v63 = vunpack.i.h.bf16 %v4364_v54  ;;  %v3101_v19 = vunpack.i.l.bf16 %v4364_v54  ;;  %v1699_v56 = vsel %vm1696_vm6, %v1666_v58, %v3106_v43  ;;  %v1700_v38 = vsel %vm1696_vm6, %v1667_v21, %v3107_v61 }
  0xe1   : > { %3389 = vrot.lane.b32.xlu0 %v4068_v32, %s3579_s17  ;;  %v4378_v29 = vpop.permute.xlu1 %3114  ;;  %v2992_v32 = vunpack.i.h.bf16 %v4237_v34  ;;  %v4404_v34 = vunpack.c.l.bf16 %v4383_v15 }
  0xe2   : > { %v3117_v36 = vunpack.i.h.bf16 %v4378_v29  ;;  %v3116_v46 = vunpack.i.l.bf16 %v4378_v29 }
  0xe3   : > { %v3110_v8 = vpop.permute.xlu0 %3109  ;;  %3404 = vrot.lane.b32.xlu1 %v4352_v20, %s3580_s20  ;;  %v1632_v53 = vsel %vm1630_vm4, %v1599_v14, %v2992_v32 }
  0xe4   : > { %v1665_v32 = vsel %vm1663_vm5, %v1632_v53, %v3072_v52  ;;  %v3112_v14 = vunpack.i.h.bf16 %v3110_v8  ;;  %v3111_v0 = vunpack.i.l.bf16 %v3110_v8  ;;  %v1697_v8 = vsel %vm1696_vm6, %v1664_v2, %v3101_v19  ;;  %v4446_v2 = vld [vmem:[%s4362_s12 + $0x8] sm:$0x1] }
  0xe5   : > { %3399 = vrot.lane.b32.xlu0 %v3373_v60, %s3580_s20  ;;  %v3125_v10 = vpop.permute.xlu1 %3124  ;;  %v5267_v60 = vld [vmem:[#allocation31_spill] sm:$0xff]  ;;  %v1698_v52 = vsel %vm1696_vm6, %v1665_v32, %v3102_v63  ;;  %v1733_v43 = vsel %vm1729_vm7, %v1700_v38, %v3117_v36 }
  0xe6   : > { %v3127_v6 = vunpack.i.h.bf16 %v3125_v10  ;;  %v3126_v54 = vunpack.i.l.bf16 %v3125_v10  ;;  %v1730_v10 = vsel %vm1729_vm7, %v1697_v8, %v3111_v0  ;;  %v1731_v61 = vsel %vm1729_vm7, %v1698_v52, %v3112_v14 }
  0xe7   : > { %v3120_v18 = vpop.permute.xlu0 %3119  ;;  %3414 = vrot.lane.b32.xlu1 %v5267_v60, %s3581_s21  ;;  %v5268_v52 = vunpack.c.l.bf16 %v4339_v48  ;;  %v2922_v48 = vunpack.i.h.bf16 %v4169_v7 }
  0xe8   : > { %v3122_v24 = vunpack.i.h.bf16 %v3120_v18  ;;  %v3121_v33 = vunpack.i.l.bf16 %v3120_v18  ;;  %v1766_v18 = vsel %vm1762_vm8, %v1733_v43, %v3127_v6 }
  0xe9   : > { %3409 = vrot.lane.b32.xlu0 %v5265_v27, %s3581_s21  ;;  %v3135_v55 = vpop.permute.xlu1 %3134  ;;  %v1732_v27 = vsel %vm1729_vm7, %v1699_v56, %v3116_v46 }
  0xea   : > { %v3137_v29 = vunpack.i.h.bf16 %v3135_v55  ;;  %v3136_v16 = vunpack.i.l.bf16 %v3135_v55  ;;  %v1765_v21 = vsel %vm1762_vm8, %v1732_v27, %v3126_v54  ;;  %v1763_v36 = vsel %vm1762_vm8, %v1730_v10, %v3121_v33 }
  0xeb   : > { %v3130_v1 = vpop.permute.xlu0 %3129  ;;  %3424 = vrot.lane.b32.xlu1 %v4088_v22, %s3582_s22  ;;  %v1764_v46 = vsel %vm1762_vm8, %v1731_v61, %v3122_v24  ;;  %v4463_v54 = vunpack.c.h.bf16 %v4383_v15  ;;  %v592_v24 = vunpack.c.l.bf16 %v4446_v2  ;;  %v1198_v27 = vrot.slane %v5268_v52, 2 }
  0xec   : > { %v3132_v25 = vunpack.i.h.bf16 %v3130_v1  ;;  %v3131_v53 = vunpack.i.l.bf16 %v3130_v1  ;;  %v1798_v32 = vsel %vm1795_vm9, %v1765_v21, %v3136_v16  ;;  %v1799_v14 = vsel %vm1795_vm9, %v1766_v18, %v3137_v29 }
  0xed   : > { %3419 = vrot.lane.b32.xlu0 %v4092_v9, %s3582_s22  ;;  %v3145_v58 = vpop.permute.xlu1 %3144  ;;  %v4476_v15 = vpack.i.bf16 %v4348_v45, %v4346_v39  ;;  %v5269_v10 = vrot.slane %v4348_v45, 1  ;;  %v5270_v61 = vrot.slane %v4346_v39, 1  ;;  %v2926_v21 = vunpack.i.l.bf16 %v4177_v44 }
  0xee   : > { %v3147_v19 = vunpack.i.h.bf16 %v3145_v58  ;;  %v3146_v63 = vunpack.i.l.bf16 %v3145_v58  ;;  %v1796_v6 = vsel %vm1795_vm9, %v1763_v36, %v3131_v53  ;;  %v1797_v16 = vsel %vm1795_vm9, %v1764_v46, %v3132_v25 }
  0xef   : > { %v3140_v0 = vpop.permute.xlu0 %3139  ;;  %3434 = vrot.lane.b32.xlu1 %v4356_v31, %s3577_s11  ;;  %v4483_v25 = vsel %vm641_vm0, %v5270_v61, %v5269_v10  ;;  %v2921_v53 = vunpack.i.l.bf16 %v4169_v7  ;;  %v2927_v58 = vunpack.i.h.bf16 %v4177_v44  ;;  %v1395_v36 = vrot.slane %v4404_v34, 1 }
  0xf0   : > { %v1831_v9 = vsel %vm1828_vm10, %v1798_v32, %v3146_v63  ;;  %v1832_v55 = vsel %vm1828_vm10, %v1799_v14, %v3147_v19  ;;  %v3142_v56 = vunpack.i.h.bf16 %v3140_v0  ;;  %v3141_v38 = vunpack.i.l.bf16 %v3140_v0 }
  0xf1   : > { %3429 = vrot.lane.b32.xlu0 %v4352_v20, %s3577_s11  ;;  %v4458_v33 = vpop.permute.xlu1 %3154  ;;  %v1862_v29 = vpack.c.bf16 %v1832_v55, %v1831_v9  ;;  %v5271_v19 = vmov %v5269_v10  ;;  %v1396_v7 = vrot.slane %v4463_v54, 1  ;;  %v1398_v46 = vrot.slane %v592_v24, 1 }
  0xf2   : > { %v1829_v1 = vsel %vm1828_vm10, %v1796_v6, %v3141_v38  ;;  %v1830_v8 = vsel %vm1828_vm10, %v1797_v16, %v3142_v56  ;;  %v4496_v63 = vsel %vm641_vm0, %v5271_v19, %v4389_v47  ;;  %v3007_v44 = vunpack.i.h.bf16 %v4241_v57 }
  0xf3   : > { %v4470_v20 = vpop.permute.xlu0 %3149  ;;  %3444 = vrot.lane.b32.xlu1 %v3960_v37, %s3578_s14  ;;  %v1861_v43 = vpack.c.bf16 %v1830_v8, %v1829_v1  ;;  %v5272_v32 = vrot.slane %v4348_v45, 2  ;;  %v5273_v14 = vrot.slane %v4346_v39, 2  ;;  %v3002_v55 = vunpack.i.h.bf16 %v4243_v11 }
  0xf4   : > { %v3001_v56 = vunpack.i.l.bf16 %v4243_v11  ;;  %v3086_v38 = vunpack.i.l.bf16 %v4324_v40  ;;  %v1603_v39 = vsel %vm1597_vm3, %v3659_v4, %v2922_v48  ;;  %v1602_v45 = vsel %vm1597_vm3, %v3657_v3, %v2921_v53 }
  0xf5   : > { %3439 = vrot.lane.b32.xlu0 %v5267_v60, %s3578_s14  ;;  %2833 = vmatprep.mubr.msk.bf16.mxu0 %vm1904_vm11, %v1861_v43  ;;  %v3165_v18 = vpop.permute.xlu1 %3164  ;;  %v3006_v60 = vunpack.i.l.bf16 %v4241_v57  ;;  %v4510_v47 = vsel %vm818_vm1, %v5273_v14, %v5272_v32  ;;  %v5274_v0 = vmov %v5272_v32  ;;  %v3087_v57 = vunpack.i.h.bf16 %v4324_v40 }
  0xf6   : > { %2834 = vmatmul.mubr.msk.bf16.vlgmr.msra.gmra.mrb[0].mxu0 %vm1904_vm11, %v1862_v29  ;;  %v4515_v9 = vsel %vm818_vm1, %v5274_v0, %v1198_v27  ;;  %v1605_v16 = vsel %vm1597_vm3, %v3676_v13, %v2927_v58  ;;  %v1604_v11 = vsel %vm1597_vm3, %v3674_v12, %v2926_v21  ;;  %v3082_v29 = vunpack.i.h.bf16 %v4326_v35 }
  0xf7   : > { %v3160_v6 = vpop.permute.xlu0 %3159  ;;  %3454 = vrot.lane.b32.xlu1 %v4102_v59, %s3579_s17  ;;  %v3081_v40 = vunpack.i.l.bf16 %v4326_v35  ;;  %v4536_v8 = vsel %vm641_vm0, %v1395_v36, %v1396_v7  ;;  %v4539_v4 = vsel %vm641_vm0, %v1396_v7, %v1398_v46  ;;  %v1638_v3 = vsel %vm1630_vm4, %v1605_v16, %v3007_v44 }
  0xf8   : > { %v1637_v13 = vsel %vm1630_vm4, %v1604_v11, %v3006_v60  ;;  %v3157_v12 = vunpack.i.h.bf16 %v4458_v33  ;;  %v3156_v52 = vunpack.i.l.bf16 %v4458_v33  ;;  %v1636_v35 = vsel %vm1630_vm4, %v1603_v39, %v3002_v55 }
  0xf9   : > { %3449 = vrot.lane.b32.xlu0 %v4088_v22, %s3579_s17  ;;  %v3175_v1 = vpop.permute.xlu1 %3174  ;;  %v1635_v27 = vsel %vm1630_vm4, %v1602_v45, %v3001_v56  ;;  %v1670_v22 = vsel %vm1663_vm5, %v1637_v13, %v3086_v38  ;;  %v1671_v43 = vsel %vm1663_vm5, %v1638_v3, %v3087_v57  ;;  %v3152_v61 = vunpack.i.h.bf16 %v4470_v20 }
  0xfa   : > { %v3151_v48 = vunpack.i.l.bf16 %v4470_v20  ;;  %v3167_v53 = vunpack.i.h.bf16 %v3165_v18  ;;  %v3166_v58 = vunpack.i.l.bf16 %v3165_v18  ;;  %v1668_v33 = vsel %vm1663_vm5, %v1635_v27, %v3081_v40 }
  0xfb   : > { %v3170_v10 = vpop.permute.xlu0 %3169  ;;  %3464 = vrot.lane.b32.xlu1 %v4370_v5, %s3580_s20  ;;  %v1669_v21 = vsel %vm1663_vm5, %v1636_v35, %v3082_v29  ;;  %v3162_v19 = vunpack.i.h.bf16 %v3160_v6  ;;  %v3161_v36 = vunpack.i.l.bf16 %v3160_v6  ;;  %v1703_v46 = vsel %vm1696_vm6, %v1670_v22, %v3156_v52 }
  0xfc   : > { %v1704_v44 = vsel %vm1696_vm6, %v1671_v43, %v3157_v12  ;;  %v3177_v60 = vunpack.i.h.bf16 %v3175_v1  ;;  %v3176_v32 = vunpack.i.l.bf16 %v3175_v1  ;;  %v3172_v14 = vunpack.i.h.bf16 %v3170_v10 }
  0xfd   : > { %3459 = vrot.lane.b32.xlu0 %v4356_v31, %s3580_s20  ;;  %v3185_v7 = vpop.permute.xlu1 %3184  ;;  %v3171_v20 = vunpack.i.l.bf16 %v3170_v10  ;;  %v1701_v56 = vsel %vm1696_vm6, %v1668_v33, %v3151_v48  ;;  %v1702_v57 = vsel %vm1696_vm6, %v1669_v21, %v3152_v61  ;;  %v1736_v31 = vsel %vm1729_vm7, %v1703_v46, %v3166_v58 }
  0xfe   : > { %v3187_v0 = vunpack.i.h.bf16 %v3185_v7  ;;  %v3186_v18 = vunpack.i.l.bf16 %v3185_v7  ;;  %v1737_v38 = vsel %vm1729_vm7, %v1704_v44, %v3167_v53  ;;  %v1734_v6 = vsel %vm1729_vm7, %v1701_v56, %v3161_v36 }
  0xff   : > { %v3180_v55 = vpop.permute.xlu0 %3179  ;;  %3474 = vrot.lane.b32.xlu1 %v3948_v28, %s3581_s21  ;;  %v1735_v39 = vsel %vm1729_vm7, %v1702_v57, %v3162_v19  ;;  %v1769_v29 = vsel %vm1762_vm8, %v1736_v31, %v3176_v32  ;;  %v1770_v40 = vsel %vm1762_vm8, %v1737_v38, %v3177_v60  ;;  %v1767_v13 = vsel %vm1762_vm8, %v1734_v6, %v3171_v20  ;;  %v5275_v57 = vld [vmem:[#allocation40_spill] sm:$0xff] }
 0x100   : > { %v3182_v45 = vunpack.i.h.bf16 %v3180_v55  ;;  %v3181_v16 = vunpack.i.l.bf16 %v3180_v55  ;;  %v1768_v12 = vsel %vm1762_vm8, %v1735_v39, %v3172_v14  ;;  %v1802_v52 = vsel %vm1795_vm9, %v1769_v29, %v3186_v18 }
 0x101   : > { %3469 = vrot.lane.b32.xlu0 %v3960_v37, %s3581_s21  ;;  %v3195_v11 = vpop.permute.xlu1 %3194  ;;  %v1803_v35 = vsel %vm1795_vm9, %v1770_v40, %v3187_v0  ;;  %v1496_v58 = vrot.slane %v4404_v34, 2  ;;  %v1497_v33 = vrot.slane %v4463_v54, 2  ;;  %v1499_v7 = vrot.slane %v592_v24, 2 }
 0x102   : > { %v3197_v1 = vunpack.i.h.bf16 %v3195_v11  ;;  %v3196_v3 = vunpack.i.l.bf16 %v3195_v11  ;;  %v1800_v61 = vsel %vm1795_vm9, %v1767_v13, %v3181_v16  ;;  %v1801_v48 = vsel %vm1795_vm9, %v1768_v12, %v3182_v45 }
 0x103   : > { %v3190_v27 = vpop.permute.xlu0 %3189  ;;  %3484 = vrot.lane.b32.xlu1 %v4098_v30, %s3582_s22  ;;  %v2937_v60 = vunpack.i.h.bf16 %v4185_v23  ;;  %v2936_v32 = vunpack.i.l.bf16 %v4185_v23  ;;  %v2932_v14 = vunpack.i.h.bf16 %v4191_v62  ;;  %v4604_v2 = vpack.i.bf16 %v4515_v9, %v4510_v47 }
 0x104   : > { %v1835_v37 = vsel %vm1828_vm10, %v1802_v52, %v3196_v3  ;;  %v1836_v22 = vsel %vm1828_vm10, %v1803_v35, %v3197_v1  ;;  %v3192_v43 = vunpack.i.h.bf16 %v3190_v27  ;;  %v3191_v10 = vunpack.i.l.bf16 %v3190_v27 }
 0x105   : > { %3479 = vrot.lane.b32.xlu0 %v4102_v59, %s3582_s22  ;;  %v4583_v53 = vpop.permute.xlu1 %3204  ;;  %v1864_v21 = vpack.c.bf16 %v1836_v22, %v1835_v37  ;;  %v4597_v59 = vpack.i.bf16 %v4496_v63, %v4483_v25  ;;  %v2931_v24 = vunpack.i.l.bf16 %v4191_v62  ;;  %v3523_v25 = vpack.i.bf16 %v4463_v54, %v4404_v34 }
 0x106   : > { %v1833_v19 = vsel %vm1828_vm10, %v1800_v61, %v3191_v10  ;;  %v1834_v36 = vsel %vm1828_vm10, %v1801_v48, %v3192_v43  ;;  %v3533_v23 = vpack.i.bf16 %v4539_v4, %v4536_v8  ;;  %v3017_v63 = vunpack.i.h.bf16 %v4249_v17 }
 0x107   : > { %v1863_v46 = vpack.c.bf16 %v1834_v36, %v1833_v19  ;;  %v4591_v44 = vpop.permute.xlu0 %3199  ;;  %3494 = vrot.lane.b32.xlu1 %v4476_v15, %s3577_s11  ;;  %v3016_v0 = vunpack.i.l.bf16 %v4249_v17  ;;  %v4618_v62 = vsel %vm818_vm1, %v1496_v58, %v1497_v33  ;;  %v3012_v47 = vunpack.i.h.bf16 %v4251_v26 }
 0x108   : > { %v3011_v9 = vunpack.i.l.bf16 %v4251_v26  ;;  %v3097_v34 = vunpack.i.h.bf16 %v4333_v49  ;;  %v3096_v54 = vunpack.i.l.bf16 %v4333_v49  ;;  %v1609_v17 = vsel %vm1597_vm3, %v3718_v42, %v2937_v60 }
 0x109   : > { %3489 = vrot.lane.b32.xlu0 %v4370_v5, %s3577_s11  ;;  %2837 = vmatprep.mubr.msk.bf16.mxu0 %vm1904_vm11, %v1863_v46  ;;  %v3215_v20 = vpop.permute.xlu1 %3214  ;;  %v4621_v5 = vsel %vm818_vm1, %v1497_v33, %v1499_v7  ;;  %v1608_v55 = vsel %vm1597_vm3, %v3716_v41, %v2936_v32  ;;  %v1607_v56 = vsel %vm1597_vm3, %v3734_v51, %v2932_v14  ;;  %v3092_v31 = vunpack.i.h.bf16 %v5275_v57 }
 0x10a   : > { %2838 = vmatmul.mubr.msk.bf16.gmra.mrb[4].mxu0 %vm1904_vm11, %v1864_v21  ;;  %v1606_v26 = vsel %vm1597_vm3, %v3732_v50, %v2931_v24  ;;  %v3091_v49 = vunpack.i.l.bf16 %v5275_v57  ;;  %v3543_v42 = vpack.i.bf16 %v4621_v5, %v4618_v62  ;;  %v1642_v6 = vsel %vm1630_vm4, %v1609_v17, %v3017_v63  ;;  %v5278_v62 = vld [vmem:[#allocation16_spill] sm:$0xff] }
 0x10b   : > { %v3210_v18 = vpop.permute.xlu0 %3209  ;;  %3504 = vrot.lane.b32.xlu1 %v4597_v59, %s3578_s14  ;;  %v1641_v41 = vsel %vm1630_vm4, %v1608_v55, %v3016_v0  ;;  %v3207_v51 = vunpack.i.h.bf16 %v4583_v53  ;;  %v3206_v39 = vunpack.i.l.bf16 %v4583_v53  ;;  %v1639_v50 = vsel %vm1630_vm4, %v1606_v26, %v3011_v9 }
 0x10c   : > { %v1640_v45 = vsel %vm1630_vm4, %v1607_v56, %v3012_v47  ;;  %v1674_v16 = vsel %vm1663_vm5, %v1641_v41, %v3096_v54  ;;  %v3202_v29 = vunpack.i.h.bf16 %v4591_v44  ;;  %v3201_v40 = vunpack.i.l.bf16 %v4591_v44 }
 0x10d   : > { %3499 = vrot.lane.b32.xlu0 %v3948_v28, %s3578_s14  ;;  %v3225_v38 = vpop.permute.xlu1 %3224  ;;  %v1675_v28 = vsel %vm1663_vm5, %v1642_v6, %v3097_v34  ;;  %v3217_v1 = vunpack.i.h.bf16 %v3215_v20  ;;  %v3216_v3 = vunpack.i.l.bf16 %v3215_v20  ;;  %v1672_v13 = vsel %vm1663_vm5, %v1639_v50, %v3091_v49  ;;  %s2728_s14 = sshll.u32 %s5317_s24, 7 }
 0x10e   : > { %v1673_v12 = vsel %vm1663_vm5, %v1640_v45, %v3092_v31  ;;  %v3212_v52 = vunpack.i.h.bf16 %v3210_v18  ;;  %v3211_v35 = vunpack.i.l.bf16 %v3210_v18  ;;  %v1707_v37 = vsel %vm1696_vm6, %v1674_v16, %v3206_v39 }
 0x10f   : > { %v3220_v11 = vpop.permute.xlu0 %3219  ;;  %3514 = vrot.lane.b32.xlu1 %v4604_v2, %s3579_s17  ;;  %v1708_v22 = vsel %vm1696_vm6, %v1675_v28, %v3207_v51  ;;  %v3227_v43 = vunpack.i.h.bf16 %v3225_v38  ;;  %v3226_v10 = vunpack.i.l.bf16 %v3225_v38  ;;  %v1705_v21 = vsel %vm1696_vm6, %v1672_v13, %v3201_v40  ;;  %v5276_v38 = vld [vmem:[#allocation2_spill] sm:$0xff]  ;;  %v5277_v51 = vld [vmem:[#allocation4_spill] sm:$0xff]  ;;  %v5281_v13 = vld [vmem:[#allocation7_spill] sm:$0xff] }
 0x110   : > { %v3222_v61 = vunpack.i.h.bf16 %v3220_v11  ;;  %v3221_v48 = vunpack.i.l.bf16 %v3220_v11  ;;  %v1706_v19 = vsel %vm1696_vm6, %v1673_v12, %v3202_v29  ;;  %v1741_v36 = vsel %vm1729_vm7, %v1708_v22, %v3217_v1  ;;  %v5280_v1 = vld [vmem:[#allocation8_spill] sm:$0xff] }
 0x111   : > { %3509 = vrot.lane.b32.xlu0 %v4098_v30, %s3579_s17  ;;  %v3235_v27 = vpop.permute.xlu1 %3234  ;;  %v1740_v30 = vsel %vm1729_vm7, %v1707_v37, %v3216_v3  ;;  %v1738_v7 = vsel %vm1729_vm7, %v1705_v21, %v3211_v35  ;;  %v1739_v46 = vsel %vm1729_vm7, %v1706_v19, %v3212_v52  ;;  %v1774_v24 = vsel %vm1762_vm8, %v1741_v36, %v3227_v43  ;;  %v5282_v52 = vld [vmem:[#allocation11_spill] sm:$0xff]  ;;  %s4920_s17 = scalar_lea.vmem %s5103_s5, %s2728_s14 }
 0x112   : > { %v3237_v53 = vunpack.i.h.bf16 %v3235_v27  ;;  %v3236_v58 = vunpack.i.l.bf16 %v3235_v27  ;;  %v1773_v14 = vsel %vm1762_vm8, %v1740_v30, %v3226_v10  ;;  %v1771_v63 = vsel %vm1762_vm8, %v1738_v7, %v3221_v48  ;;  %v5283_v27 = vld [vmem:[#allocation10_spill] sm:$0xff] }
 0x113   : > { %v3230_v33 = vpop.permute.xlu0 %3229  ;;  %3524 = vrot.lane.b32.xlu1 %v3523_v25, %s3580_s20  ;;  %v1772_v0 = vsel %vm1762_vm8, %v1739_v46, %v3222_v61  ;;  %v2947_v6 = vunpack.i.h.bf16 %v5276_v38  ;;  %v2946_v41 = vunpack.i.l.bf16 %v5276_v38  ;;  %v2942_v39 = vunpack.i.h.bf16 %v5277_v51 }
 0x114   : > { %v3232_v44 = vunpack.i.h.bf16 %v3230_v33  ;;  %v3231_v60 = vunpack.i.l.bf16 %v3230_v33  ;;  %v1806_v47 = vsel %vm1795_vm9, %v1773_v14, %v3236_v58  ;;  %v1807_v9 = vsel %vm1795_vm9, %v1774_v24, %v3237_v53 }
 0x115   : > { %3519 = vrot.lane.b32.xlu0 %v4476_v15, %s3580_s20  ;;  %v3245_v32 = vpop.permute.xlu1 %3244  ;;  %v2941_v50 = vunpack.i.l.bf16 %v5277_v51  ;;  %v3027_v5 = vunpack.i.h.bf16 %v5278_v62  ;;  %v1613_v3 = vsel %vm1597_vm3, %v5280_v1, %v2947_v6  ;;  %v1612_v12 = vsel %vm1597_vm3, %v5281_v13, %v2946_v41  ;;  %s477_s20 = scalar_lea.vmem %s5104_s6, %s5317_s24 }
 0x116   : > { %v3247_v20 = vunpack.i.h.bf16 %v3245_v32  ;;  %v3246_v25 = vunpack.i.l.bf16 %v3245_v32  ;;  %v1804_v55 = vsel %vm1795_vm9, %v1771_v63, %v3231_v60  ;;  %v1805_v56 = vsel %vm1795_vm9, %v1772_v0, %v3232_v44 }
 0x117   : > { %v3240_v34 = vpop.permute.xlu0 %3239  ;;  %3534 = vrot.lane.b32.xlu1 %v3533_v23, %s3581_s21  ;;  %v1611_v35 = vsel %vm1597_vm3, %v5282_v52, %v2942_v39  ;;  %v1610_v37 = vsel %vm1597_vm3, %v5283_v27, %v2941_v50  ;;  %v1646_v61 = vsel %vm1630_vm4, %v1613_v3, %v3027_v5  ;;  %v5284_v27 = vld [vmem:[#allocation3_spill] sm:$0xff] }
 0x118   : > { %v1839_v15 = vsel %vm1828_vm10, %v1806_v47, %v3246_v25  ;;  %v1840_v54 = vsel %vm1828_vm10, %v1807_v9, %v3247_v20  ;;  %v3242_v18 = vunpack.i.h.bf16 %v3240_v34  ;;  %v3241_v17 = vunpack.i.l.bf16 %v3240_v34 }
 0x119   : > { %3529 = vrot.lane.b32.xlu0 %v4597_v59, %s3581_s21  ;;  %v3255_v26 = vpop.permute.xlu1 %3254  ;;  %v1866_v57 = vpack.c.bf16 %v1840_v54, %v1839_v15 }
 0x11a   : > { %v1837_v31 = vsel %vm1828_vm10, %v1804_v55, %v3241_v17  ;;  %v1838_v8 = vsel %vm1828_vm10, %v1805_v56, %v3242_v18  ;;  %v3257_v11 = vunpack.i.h.bf16 %v3255_v26  ;;  %v3256_v29 = vunpack.i.l.bf16 %v3255_v26 }
 0x11b   : > { %v1865_v4 = vpack.c.bf16 %v1838_v8, %v1837_v31  ;;  %v3250_v23 = vpop.permute.xlu0 %3249  ;;  %3544 = vrot.lane.b32.xlu1 %v3543_v42, %s3582_s22  ;;  %v3026_v42 = vunpack.i.l.bf16 %v5278_v62 }
 0x11c   : > { %v3252_v22 = vunpack.i.h.bf16 %v3250_v23  ;;  %v3251_v43 = vunpack.i.l.bf16 %v3250_v23  ;;  %v1679_v30 = vsel %vm1663_vm5, %v1646_v61, %v3257_v11 }
 0x11d   : > { %3539 = vrot.lane.b32.xlu0 %v4604_v2, %s3582_s22  ;;  %2841 = vmatprep.mubr.msk.bf16.mxu0 %vm1904_vm11, %v1865_v4  ;;  %v3265_v49 = vpop.permute.xlu1 %3264  ;;  %v5279_v2 = vld [vmem:[#allocation24_spill] sm:$0xff]  ;;  %v1645_v48 = vsel %vm1630_vm4, %v1612_v12, %v3026_v42 }
 0x11e   : > { %2842 = vmatmul.mubr.msk.bf16.gmra.mrb[8].mxu0 %vm1904_vm11, %v1866_v57  ;;  %v3022_v16 = vunpack.i.h.bf16 %v5279_v2  ;;  %v3021_v28 = vunpack.i.l.bf16 %v5279_v2  ;;  %v3267_v53 = vunpack.i.h.bf16 %v3265_v49  ;;  %v3266_v58 = vunpack.i.l.bf16 %v3265_v49 }
 0x11f   : > { %v3260_v59 = vpop.permute.xlu0 %3259  ;;  %v1678_v19 = vsel %vm1663_vm5, %v1645_v48, %v3256_v29 }
 0x120   : > { %v1643_v33 = vsel %vm1630_vm4, %v1610_v37, %v3021_v28  ;;  %v1644_v21 = vsel %vm1630_vm4, %v1611_v35, %v3022_v16  ;;  %v3262_v7 = vunpack.i.h.bf16 %v3260_v59  ;;  %v3261_v46 = vunpack.i.l.bf16 %v3260_v59 }
 0x121   : > { %v3275_v45 = vpop.permute.xlu1 %3274  ;;  %v1676_v32 = vsel %vm1663_vm5, %v1643_v33, %v3251_v43  ;;  %v1677_v14 = vsel %vm1663_vm5, %v1644_v21, %v3252_v22  ;;  %v1711_v63 = vsel %vm1696_vm6, %v1678_v19, %v3266_v58  ;;  %v1712_v0 = vsel %vm1696_vm6, %v1679_v30, %v3267_v53  ;;  %v5285_v43 = vld [vmem:[#allocation6_spill] sm:$0xff]  ;;  %v5286_v53 = vld [vmem:[#allocation21_spill] sm:$0xff] }
 0x122   : > { %v3277_v44 = vunpack.i.h.bf16 %v3275_v45  ;;  %v3276_v60 = vunpack.i.l.bf16 %v3275_v45  ;;  %v1709_v55 = vsel %vm1696_vm6, %v1676_v32, %v3261_v46  ;;  %v1710_v56 = vsel %vm1696_vm6, %v1677_v14, %v3262_v7  ;;  %v5287_v21 = vld [vmem:[#allocation33_spill] sm:$0xff] }
 0x123   : > { %v3270_v40 = vpop.permute.xlu0 %3269  ;;  %v2957_v37 = vunpack.i.h.bf16 %v5284_v27  ;;  %v2956_v22 = vunpack.i.l.bf16 %v5284_v27  ;;  %v2951_v61 = vunpack.i.l.bf16 %v5285_v43  ;;  %v3037_v58 = vunpack.i.h.bf16 %v5286_v53  ;;  %v5289_v32 = vld [vmem:[#allocation13_spill] sm:$0xff] }
 0x124   : > { %v3272_v24 = vunpack.i.h.bf16 %v3270_v40  ;;  %v3271_v20 = vunpack.i.l.bf16 %v3270_v40  ;;  %v1744_v26 = vsel %vm1729_vm7, %v1711_v63, %v3276_v60  ;;  %v1745_v57 = vsel %vm1729_vm7, %v1712_v0, %v3277_v44  ;;  %v5288_v44 = vld [vmem:[#allocation14_spill] sm:$0xff] }
 0x125   : > { %v3285_v10 = vpop.permute.xlu1 %3284  ;;  %v3036_v33 = vunpack.i.l.bf16 %v5286_v53  ;;  %v3032_v19 = vunpack.i.h.bf16 %v5287_v21  ;;  %v3031_v30 = vunpack.i.l.bf16 %v5287_v21  ;;  %v1617_v60 = vsel %vm1597_vm3, %v5288_v44, %v2957_v37 }
 0x126   : > { %v3287_v47 = vunpack.i.h.bf16 %v3285_v10  ;;  %v3286_v9 = vunpack.i.l.bf16 %v3285_v10  ;;  %v1742_v31 = vsel %vm1729_vm7, %v1709_v55, %v3271_v20  ;;  %v1743_v8 = vsel %vm1729_vm7, %v1710_v56, %v3272_v24  ;;  %v5290_v24 = vld [vmem:[#allocation17_spill] sm:$0xff] }
 0x127   : > { %v3280_v36 = vpop.permute.xlu0 %3279  ;;  %v2952_v10 = vunpack.i.h.bf16 %v5285_v43  ;;  %v1616_v14 = vsel %vm1597_vm3, %v5289_v32, %v2956_v22 }
 0x128   : > { %v3282_v34 = vunpack.i.h.bf16 %v3280_v36  ;;  %v3281_v15 = vunpack.i.l.bf16 %v3280_v36  ;;  %v1777_v59 = vsel %vm1762_vm8, %v1744_v26, %v3286_v9  ;;  %v1778_v38 = vsel %vm1762_vm8, %v1745_v57, %v3287_v47 }
 0x129   : > { %v3295_v25 = vpop.permute.xlu1 %3294  ;;  %v1615_v20 = vsel %vm1597_vm3, %v5290_v24, %v2952_v10 }
 0x12a   : > { %v3297_v54 = vunpack.i.h.bf16 %v3295_v25  ;;  %v3296_v18 = vunpack.i.l.bf16 %v3295_v25  ;;  %v1775_v51 = vsel %vm1762_vm8, %v1742_v31, %v3281_v15  ;;  %v1776_v39 = vsel %vm1762_vm8, %v1743_v8, %v3282_v34  ;;  %v5291_v25 = vld [vmem:[#allocation15_spill] sm:$0xff] }
 0x12b   : > { %v3290_v17 = vpop.permute.xlu0 %3289  ;;  %v1614_v63 = vsel %vm1597_vm3, %v5291_v25, %v2951_v61  ;;  %v1650_v34 = vsel %vm1630_vm4, %v1617_v60, %v3037_v58  ;;  %v1649_v15 = vsel %vm1630_vm4, %v1616_v14, %v3036_v33  ;;  %v1648_v55 = vsel %vm1630_vm4, %v1615_v20, %v3032_v19  ;;  %v5292_v25 = vld [vmem:[#allocation5_spill] sm:$0xff] }
 0x12c   : > { %v3292_v4 = vunpack.i.h.bf16 %v3290_v17  ;;  %v3291_v23 = vunpack.i.l.bf16 %v3290_v17  ;;  %v1810_v50 = vsel %vm1795_vm9, %v1777_v59, %v3296_v18  ;;  %v1811_v45 = vsel %vm1795_vm9, %v1778_v38, %v3297_v54 }
 0x12d   : > { %v3305_v49 = vpop.permute.xlu1 %3304  ;;  %v1647_v17 = vsel %vm1630_vm4, %v1614_v63, %v3031_v30  ;;  %v2967_v63 = vunpack.i.h.bf16 %v5292_v25 }
 0x12e   : > { %v3307_v6 = vunpack.i.h.bf16 %v3305_v49  ;;  %v3306_v41 = vunpack.i.l.bf16 %v3305_v49  ;;  %v1808_v28 = vsel %vm1795_vm9, %v1775_v51, %v3291_v23  ;;  %v1809_v11 = vsel %vm1795_vm9, %v1776_v39, %v3292_v4 }
 0x12f   : > { %v3300_v62 = vpop.permute.xlu0 %3299 }
 0x130   : > { %v1843_v5 = vsel %vm1828_vm10, %v1810_v50, %v3306_v41  ;;  %v1844_v42 = vsel %vm1828_vm10, %v1811_v45, %v3307_v6  ;;  %v3302_v2 = vunpack.i.h.bf16 %v3300_v62  ;;  %v3301_v16 = vunpack.i.l.bf16 %v3300_v62 }
 0x131   : > { %v3315_v29 = vpop.permute.xlu1 %3314  ;;  %v1868_v40 = vpack.c.bf16 %v1844_v42, %v1843_v5 }
 0x132   : > { %v1841_v1 = vsel %vm1828_vm10, %v1808_v28, %v3301_v16  ;;  %v1842_v3 = vsel %vm1828_vm10, %v1809_v11, %v3302_v2  ;;  %v3317_v36 = vunpack.i.h.bf16 %v3315_v29  ;;  %v3316_v7 = vunpack.i.l.bf16 %v3315_v29 }
 0x133   : > { %v1867_v13 = vpack.c.bf16 %v1842_v3, %v1841_v1  ;;  %v3310_v12 = vpop.permute.xlu0 %3309 }
 0x134   : > { %v3312_v0 = vunpack.i.h.bf16 %v3310_v12  ;;  %v3311_v47 = vunpack.i.l.bf16 %v3310_v12  ;;  %v1682_v56 = vsel %vm1663_vm5, %v1649_v15, %v3316_v7  ;;  %v1683_v26 = vsel %vm1663_vm5, %v1650_v34, %v3317_v36 }
 0x135   : > { %2845 = vmatprep.mubr.msk.bf16.mxu0 %vm1904_vm11, %v1867_v13  ;;  %v3325_v52 = vpop.permute.xlu1 %3324 }
 0x136   : > { %2846 = vmatmul.mubr.msk.bf16.gmra.mrb[12].mxu0 %vm1904_vm11, %v1868_v40  ;;  %v3327_v54 = vunpack.i.h.bf16 %v3325_v52  ;;  %v3326_v18 = vunpack.i.l.bf16 %v3325_v52  ;;  %v1680_v49 = vsel %vm1663_vm5, %v1647_v17, %v3311_v47  ;;  %v1681_v59 = vsel %vm1663_vm5, %v1648_v55, %v3312_v0  ;;  %v5293_v47 = vld [vmem:[#allocation12_spill] sm:$0xff]  ;;  %v5295_v55 = vld [vmem:[#allocation34_spill] sm:$0xff] }
 0x137   : > { %v3320_v35 = vpop.permute.xlu0 %3319  ;;  %v2966_v0 = vunpack.i.l.bf16 %v5292_v25  ;;  %v2961_v34 = vunpack.i.l.bf16 %v5293_v47 }
 0x138   : > { %v3322_v31 = vunpack.i.h.bf16 %v3320_v35  ;;  %v3321_v8 = vunpack.i.l.bf16 %v3320_v35  ;;  %v1715_v51 = vsel %vm1696_vm6, %v1682_v56, %v3326_v18  ;;  %v1716_v39 = vsel %vm1696_vm6, %v1683_v26, %v3327_v54  ;;  %v5294_v54 = vld [vmem:[#allocation30_spill] sm:$0xff] }
 0x139   : > { %v3335_v48 = vpop.permute.xlu1 %3334  ;;  %v3047_v18 = vunpack.i.h.bf16 %v5294_v54  ;;  %v3046_v17 = vunpack.i.l.bf16 %v5294_v54  ;;  %v3042_v56 = vunpack.i.h.bf16 %v5295_v55  ;;  %v3041_v26 = vunpack.i.l.bf16 %v5295_v55 }
 0x13a   : > { %v3337_v4 = vunpack.i.h.bf16 %v3335_v48  ;;  %v3336_v23 = vunpack.i.l.bf16 %v3335_v48  ;;  %v1713_v28 = vsel %vm1696_vm6, %v1680_v49, %v3321_v8  ;;  %v1714_v11 = vsel %vm1696_vm6, %v1681_v59, %v3322_v31  ;;  %v5297_v49 = vld [vmem:[#allocation19_spill] sm:$0xff] }
 0x13b   : > { %v3330_v46 = vpop.permute.xlu0 %3329  ;;  %v1620_v59 = vsel %vm1597_vm3, %v5297_v49, %v2966_v0 }
 0x13c   : > { %v3332_v38 = vunpack.i.h.bf16 %v3330_v46  ;;  %v3331_v6 = vunpack.i.l.bf16 %v3330_v46  ;;  %v1748_v29 = vsel %vm1729_vm7, %v1715_v51, %v3336_v23  ;;  %v1749_v40 = vsel %vm1729_vm7, %v1716_v39, %v3337_v4  ;;  %v5296_v4 = vld [vmem:[#allocation20_spill] sm:$0xff] }
 0x13d   : > { %v3345_v9 = vpop.permute.xlu1 %3344  ;;  %v1621_v23 = vsel %vm1597_vm3, %v5296_v4, %v2967_v63 }
 0x13e   : > { %v3347_v50 = vunpack.i.h.bf16 %v3345_v9  ;;  %v3346_v45 = vunpack.i.l.bf16 %v3345_v9  ;;  %v1746_v1 = vsel %vm1729_vm7, %v1713_v28, %v3331_v6  ;;  %v1747_v3 = vsel %vm1729_vm7, %v1714_v11, %v3332_v38  ;;  %v5298_v38 = vld [vmem:[#allocation23_spill] sm:$0xff] }
 0x13f   : > { %v3340_v57 = vpop.permute.xlu0 %3339  ;;  %v2962_v9 = vunpack.i.h.bf16 %v5293_v47 }
 0x140   : > { %v3342_v62 = vunpack.i.h.bf16 %v3340_v57  ;;  %v3341_v5 = vunpack.i.l.bf16 %v3340_v57  ;;  %v1781_v35 = vsel %vm1762_vm8, %v1748_v29, %v3346_v45  ;;  %v1782_v27 = vsel %vm1762_vm8, %v1749_v40, %v3347_v50 }
 0x141   : > { %v3355_v41 = vpop.permute.xlu1 %3354  ;;  %v1619_v6 = vsel %vm1597_vm3, %v5298_v38, %v2962_v9 }
 0x142   : > { %v3357_v42 = vunpack.i.h.bf16 %v3355_v41  ;;  %v3356_v2 = vunpack.i.l.bf16 %v3355_v41  ;;  %v1779_v43 = vsel %vm1762_vm8, %v1746_v1, %v3341_v5  ;;  %v1780_v10 = vsel %vm1762_vm8, %v1747_v3, %v3342_v62  ;;  %v5299_v41 = vld [vmem:[#allocation22_spill] sm:$0xff] }
 0x143   : > { %v3350_v16 = vpop.permute.xlu0 %3349  ;;  %v1618_v51 = vsel %vm1597_vm3, %v5299_v41, %v2961_v34  ;;  %v1654_v62 = vsel %vm1630_vm4, %v1621_v23, %v3047_v18  ;;  %v1653_v5 = vsel %vm1630_vm4, %v1620_v59, %v3046_v17  ;;  %v1652_v28 = vsel %vm1630_vm4, %v1619_v6, %v3042_v56  ;;  %v5300_v41 = vld [vmem:[#allocation9_spill] sm:$0xff] }
 0x144   : > { %v3352_v13 = vunpack.i.h.bf16 %v3350_v16  ;;  %v3351_v12 = vunpack.i.l.bf16 %v3350_v16  ;;  %v1814_v61 = vsel %vm1795_vm9, %v1781_v35, %v3356_v2  ;;  %v1815_v48 = vsel %vm1795_vm9, %v1782_v27, %v3357_v42 }
 0x145   : > { %v3365_v52 = vpop.permute.xlu1 %3364  ;;  %v1651_v16 = vsel %vm1630_vm4, %v1618_v51, %v3041_v26  ;;  %v2977_v51 = vunpack.i.h.bf16 %v5300_v41 }
 0x146   : > { %v3367_v37 = vunpack.i.h.bf16 %v3365_v52  ;;  %v3366_v22 = vunpack.i.l.bf16 %v3365_v52  ;;  %v1812_v36 = vsel %vm1795_vm9, %v1779_v43, %v3351_v12  ;;  %v1813_v7 = vsel %vm1795_vm9, %v1780_v10, %v3352_v13 }
 0x147   : > { %v3360_v53 = vpop.permute.xlu0 %3359 }
 0x148   : > { %v1847_v58 = vsel %vm1828_vm10, %v1814_v61, %v3366_v22  ;;  %v1848_v33 = vsel %vm1828_vm10, %v1815_v48, %v3367_v37  ;;  %v3362_v21 = vunpack.i.h.bf16 %v3360_v53  ;;  %v3361_v19 = vunpack.i.l.bf16 %v3360_v53 }
 0x149   : > { %v3375_v30 = vpop.permute.xlu1 %3374  ;;  %v1870_v46 = vpack.c.bf16 %v1848_v33, %v1847_v58 }
 0x14a   : > { %v1845_v44 = vsel %vm1828_vm10, %v1812_v36, %v3361_v19  ;;  %v1846_v60 = vsel %vm1828_vm10, %v1813_v7, %v3362_v21  ;;  %v3377_v57 = vunpack.i.h.bf16 %v3375_v30  ;;  %v3376_v31 = vunpack.i.l.bf16 %v3375_v30 }
 0x14b   : > { %v3370_v32 = vpop.permute.xlu0 %3369  ;;  %v1869_v14 = vpack.c.bf16 %v1846_v60, %v1845_v44 }
 0x14c   : > { %v3372_v39 = vunpack.i.h.bf16 %v3370_v32  ;;  %v3371_v50 = vunpack.i.l.bf16 %v3370_v32  ;;  %v1686_v11 = vsel %vm1663_vm5, %v1653_v5, %v3376_v31  ;;  %v1687_v29 = vsel %vm1663_vm5, %v1654_v62, %v3377_v57 }
 0x14d   : > { %2849 = vmatprep.mubr.msk.bf16.mxu1 %vm1904_vm11, %v1869_v14  ;;  %v3385_v24 = vpop.permute.xlu1 %3384 }
 0x14e   : > { %2850 = vmatmul.mubr.msk.bf16.vlgmr.msra.gmra.mrb[0].mxu1 %vm1904_vm11, %v1870_v46  ;;  %v3387_v42 = vunpack.i.h.bf16 %v3385_v24  ;;  %v3386_v2 = vunpack.i.l.bf16 %v3385_v24  ;;  %v1684_v52 = vsel %vm1663_vm5, %v1651_v16, %v3371_v50  ;;  %v1685_v35 = vsel %vm1663_vm5, %v1652_v28, %v3372_v39  ;;  %v5301_v50 = vld [vmem:[#allocation18_spill] sm:$0xff]  ;;  %v5303_v28 = vld [vmem:[#allocation36_spill] sm:$0xff] }
 0x14f   : > { %v3380_v20 = vpop.permute.xlu0 %3379  ;;  %v2976_v39 = vunpack.i.l.bf16 %v5300_v41  ;;  %v2971_v62 = vunpack.i.l.bf16 %v5301_v50 }
 0x150   : > { %v3382_v1 = vunpack.i.h.bf16 %v3380_v20  ;;  %v3381_v3 = vunpack.i.l.bf16 %v3380_v20  ;;  %v1719_v43 = vsel %vm1696_vm6, %v1686_v11, %v3386_v2  ;;  %v1720_v10 = vsel %vm1696_vm6, %v1687_v29, %v3387_v42  ;;  %v5302_v42 = vld [vmem:[#allocation35_spill] sm:$0xff] }
 0x151   : > { %v3395_v15 = vpop.permute.xlu1 %3394  ;;  %v3057_v2 = vunpack.i.h.bf16 %v5302_v42  ;;  %v3056_v16 = vunpack.i.l.bf16 %v5302_v42  ;;  %v3052_v11 = vunpack.i.h.bf16 %v5303_v28  ;;  %v3051_v29 = vunpack.i.l.bf16 %v5303_v28 }
 0x152   : > { %v3397_v13 = vunpack.i.h.bf16 %v3395_v15  ;;  %v3396_v12 = vunpack.i.l.bf16 %v3395_v15  ;;  %v1717_v30 = vsel %vm1696_vm6, %v1684_v52, %v3381_v3  ;;  %v1718_v36 = vsel %vm1696_vm6, %v1685_v35, %v3382_v1  ;;  %v5305_v52 = vld [vmem:[#allocation25_spill] sm:$0xff] }
 0x153   : > { %v3390_v8 = vpop.permute.xlu0 %3389  ;;  %v1624_v35 = vsel %vm1597_vm3, %v5305_v52, %v2976_v39 }
 0x154   : > { %v3392_v27 = vunpack.i.h.bf16 %v3390_v8  ;;  %v3391_v37 = vunpack.i.l.bf16 %v3390_v8  ;;  %v1752_v7 = vsel %vm1729_vm7, %v1719_v43, %v3396_v12  ;;  %v1753_v46 = vsel %vm1729_vm7, %v1720_v10, %v3397_v13  ;;  %v5304_v13 = vld [vmem:[#allocation26_spill] sm:$0xff] }
 0x155   : > { %v3405_v45 = vpop.permute.xlu1 %3404  ;;  %v1625_v12 = vsel %vm1597_vm3, %v5304_v13, %v2977_v51 }
 0x156   : > { %v3407_v61 = vunpack.i.h.bf16 %v3405_v45  ;;  %v3406_v48 = vunpack.i.l.bf16 %v3405_v45  ;;  %v1750_v44 = vsel %vm1729_vm7, %v1717_v30, %v3391_v37  ;;  %v1751_v60 = vsel %vm1729_vm7, %v1718_v36, %v3392_v27  ;;  %v5306_v27 = vld [vmem:[#allocation29_spill] sm:$0xff] }
 0x157   : > { %v3400_v40 = vpop.permute.xlu0 %3399  ;;  %v2972_v45 = vunpack.i.h.bf16 %v5301_v50 }
 0x158   : > { %v3402_v53 = vunpack.i.h.bf16 %v3400_v40  ;;  %v3401_v58 = vunpack.i.l.bf16 %v3400_v40  ;;  %v1785_v20 = vsel %vm1762_vm8, %v1752_v7, %v3406_v48  ;;  %v1786_v25 = vsel %vm1762_vm8, %v1753_v46, %v3407_v61 }
 0x159   : > { %v3415_v22 = vpop.permute.xlu1 %3414  ;;  %v1623_v37 = vsel %vm1597_vm3, %v5306_v27, %v2972_v45 }
 0x15a   : > { %v3417_v33 = vunpack.i.h.bf16 %v3415_v22  ;;  %v3416_v21 = vunpack.i.l.bf16 %v3415_v22  ;;  %v1783_v47 = vsel %vm1762_vm8, %v1750_v44, %v3401_v58  ;;  %v1784_v9 = vsel %vm1762_vm8, %v1751_v60, %v3402_v53  ;;  %v5307_v22 = vld [vmem:[#allocation27_spill] sm:$0xff] }
 0x15b   : > { %v3410_v19 = vpop.permute.xlu0 %3409  ;;  %v1622_v43 = vsel %vm1597_vm3, %v5307_v22, %v2971_v62  ;;  %v1658_v53 = vsel %vm1630_vm4, %v1625_v12, %v3057_v2  ;;  %v1657_v58 = vsel %vm1630_vm4, %v1624_v35, %v3056_v16  ;;  %v1656_v30 = vsel %vm1630_vm4, %v1623_v37, %v3052_v11 }
 0x15c   : > { %v3412_v32 = vunpack.i.h.bf16 %v3410_v19  ;;  %v3411_v14 = vunpack.i.l.bf16 %v3410_v19  ;;  %v1818_v34 = vsel %vm1795_vm9, %v1785_v20, %v3416_v21  ;;  %v1819_v15 = vsel %vm1795_vm9, %v1786_v25, %v3417_v33 }
 0x15d   : > { %v3425_v24 = vpop.permute.xlu1 %3424  ;;  %v1655_v19 = vsel %vm1630_vm4, %v1622_v43, %v3051_v29 }
 0x15e   : > { %v3427_v63 = vunpack.i.h.bf16 %v3425_v24  ;;  %v3426_v0 = vunpack.i.l.bf16 %v3425_v24  ;;  %v1816_v26 = vsel %vm1795_vm9, %v1783_v47, %v3411_v14  ;;  %v1817_v57 = vsel %vm1795_vm9, %v1784_v9, %v3412_v32 }
 0x15f   : > { %v3420_v54 = vpop.permute.xlu0 %3419 }
 0x160   : > { %v1851_v18 = vsel %vm1828_vm10, %v1818_v34, %v3426_v0  ;;  %v1852_v17 = vsel %vm1828_vm10, %v1819_v15, %v3427_v63  ;;  %v3422_v55 = vunpack.i.h.bf16 %v3420_v54  ;;  %v3421_v56 = vunpack.i.l.bf16 %v3420_v54 }
 0x161   : > { %v3435_v31 = vpop.permute.xlu1 %3434  ;;  %v1872_v8 = vpack.c.bf16 %v1852_v17, %v1851_v18 }
 0x162   : > { %v1849_v4 = vsel %vm1828_vm10, %v1816_v26, %v3421_v56  ;;  %v1850_v23 = vsel %vm1828_vm10, %v1817_v57, %v3422_v55  ;;  %v3437_v40 = vunpack.i.h.bf16 %v3435_v31  ;;  %v3436_v1 = vunpack.i.l.bf16 %v3435_v31 }
 0x163   : > { %v1871_v49 = vpack.c.bf16 %v1850_v23, %v1849_v4  ;;  %v3430_v59 = vpop.permute.xlu0 %3429 }
 0x164   : > { %v3432_v10 = vunpack.i.h.bf16 %v3430_v59  ;;  %v3431_v61 = vunpack.i.l.bf16 %v3430_v59  ;;  %v1690_v36 = vsel %vm1663_vm5, %v1657_v58, %v3436_v1  ;;  %v1691_v7 = vsel %vm1663_vm5, %v1658_v53, %v3437_v40 }
 0x165   : > { %2853 = vmatprep.mubr.msk.bf16.mxu1 %vm1904_vm11, %v1871_v49  ;;  %v3445_v38 = vpop.permute.xlu1 %3444 }
 0x166   : > { %2854 = vmatmul.mubr.msk.bf16.gmra.mrb[4].mxu1 %vm1904_vm11, %v1872_v8  ;;  %v3447_v33 = vunpack.i.h.bf16 %v3445_v38  ;;  %v3446_v21 = vunpack.i.l.bf16 %v3445_v38  ;;  %v1688_v24 = vsel %vm1663_vm5, %v1655_v19, %v3431_v61  ;;  %v1689_v20 = vsel %vm1663_vm5, %v1656_v30, %v3432_v10  ;;  %v5308_v19 = vld [vmem:[#allocation37_spill] sm:$0xff] }
 0x167   : > { %v3440_v6 = vpop.permute.xlu0 %3439 }
 0x168   : > { %v3442_v44 = vunpack.i.h.bf16 %v3440_v6  ;;  %v3441_v60 = vunpack.i.l.bf16 %v3440_v6  ;;  %v1723_v47 = vsel %vm1696_vm6, %v1690_v36, %v3446_v21  ;;  %v1724_v9 = vsel %vm1696_vm6, %v1691_v7, %v3447_v33  ;;  %v5309_v36 = vld [vmem:[#allocation28_spill] sm:$0xff] }
 0x169   : > { %v3455_v5 = vpop.permute.xlu1 %3454 }
 0x16a   : > { %v3457_v32 = vunpack.i.h.bf16 %v3455_v5  ;;  %v3456_v14 = vunpack.i.l.bf16 %v3455_v5  ;;  %v1721_v26 = vsel %vm1696_vm6, %v1688_v24, %v3441_v60  ;;  %v1722_v57 = vsel %vm1696_vm6, %v1689_v20, %v3442_v44  ;;  %v5310_v24 = vld [vmem:[#allocation38_spill] sm:$0xff] }
 0x16b   : > { %v3450_v3 = vpop.permute.xlu0 %3449 }
 0x16c   : > { %v3452_v25 = vunpack.i.h.bf16 %v3450_v3  ;;  %v3451_v63 = vunpack.i.l.bf16 %v3450_v3  ;;  %v1756_v31 = vsel %vm1729_vm7, %v1723_v47, %v3456_v14  ;;  %v1757_v8 = vsel %vm1729_vm7, %v1724_v9, %v3457_v32 }
 0x16d   : > { %v3465_v48 = vpop.permute.xlu1 %3464 }
 0x16e   : > { %v3467_v34 = vunpack.i.h.bf16 %v3465_v48  ;;  %v3466_v15 = vunpack.i.l.bf16 %v3465_v48  ;;  %v1754_v4 = vsel %vm1729_vm7, %v1721_v26, %v3451_v63  ;;  %v1755_v23 = vsel %vm1729_vm7, %v1722_v57, %v3452_v25  ;;  %v5311_v25 = vld [vmem:[#allocation39_spill] sm:$0xff] }
 0x16f   : > { %v3460_v46 = vpop.permute.xlu0 %3459 }
 0x170   : > { %v3462_v54 = vunpack.i.h.bf16 %v3460_v46  ;;  %v3461_v18 = vunpack.i.l.bf16 %v3460_v46  ;;  %v1789_v6 = vsel %vm1762_vm8, %v1756_v31, %v3466_v15  ;;  %v1790_v41 = vsel %vm1762_vm8, %v1757_v8, %v3467_v34 }
 0x171   : > { %v3475_v0 = vpop.permute.xlu1 %3474 }
 0x172   : > { %v3477_v17 = vunpack.i.h.bf16 %v3475_v0  ;;  %v3476_v55 = vunpack.i.l.bf16 %v3475_v0  ;;  %v1787_v50 = vsel %vm1762_vm8, %v1754_v4, %v3461_v18  ;;  %v1788_v45 = vsel %vm1762_vm8, %v1755_v23, %v3462_v54 }
 0x173   : > { %v3470_v56 = vpop.permute.xlu0 %3469 }
 0x174   : > { %v3472_v49 = vunpack.i.h.bf16 %v3470_v56  ;;  %v3471_v59 = vunpack.i.l.bf16 %v3470_v56  ;;  %v1822_v62 = vsel %vm1795_vm9, %v1789_v6, %v3476_v55  ;;  %v1823_v5 = vsel %vm1795_vm9, %v1790_v41, %v3477_v17 }
 0x175   : > { %v3485_v38 = vpop.permute.xlu1 %3484 }
 0x176   : > { %v3487_v51 = vunpack.i.h.bf16 %v3485_v38  ;;  %v3486_v39 = vunpack.i.l.bf16 %v3485_v38  ;;  %v1820_v29 = vsel %vm1795_vm9, %v1787_v50, %v3471_v59  ;;  %v1821_v40 = vsel %vm1795_vm9, %v1788_v45, %v3472_v49 }
 0x177   : > { %v3480_v42 = vpop.permute.xlu0 %3479 }
 0x178   : > { %v1855_v2 = vsel %vm1828_vm10, %v1822_v62, %v3486_v39  ;;  %v1856_v16 = vsel %vm1828_vm10, %v1823_v5, %v3487_v51  ;;  %v3482_v28 = vunpack.i.h.bf16 %v3480_v42  ;;  %v3481_v11 = vunpack.i.l.bf16 %v3480_v42 }
 0x179   : > { %v3495_v1 = vpop.permute.xlu1 %3494  ;;  %v1874_v3 = vpack.c.bf16 %v1856_v16, %v1855_v2 }
 0x17a   : > { %v1853_v13 = vsel %vm1828_vm10, %v1820_v29, %v3481_v11  ;;  %v1854_v12 = vsel %vm1828_vm10, %v1821_v40, %v3482_v28  ;;  %v3497_v43 = vunpack.i.h.bf16 %v3495_v1  ;;  %v3496_v10 = vunpack.i.l.bf16 %v3495_v1 }
 0x17b   : > { %v1873_v52 = vpack.c.bf16 %v1854_v12, %v1853_v13  ;;  %v3490_v35 = vpop.permute.xlu0 %3489 }
 0x17c   : > { %v3492_v48 = vunpack.i.h.bf16 %v3490_v35  ;;  %v3491_v53 = vunpack.i.l.bf16 %v3490_v35  ;;  %v1694_v30 = vsel %vm1663_vm5, %v5308_v19, %v3496_v10  ;;  %v1695_v7 = vsel %vm1663_vm5, %v5309_v36, %v3497_v43 }
 0x17d   : > { %2857 = vmatprep.mubr.msk.bf16.mxu1 %vm1904_vm11, %v1873_v52  ;;  %v3505_v27 = vpop.permute.xlu1 %3504 }
 0x17e   : > { %2858 = vmatmul.mubr.msk.bf16.gmra.mrb[8].mxu1 %vm1904_vm11, %v1874_v3  ;;  %v3507_v33 = vunpack.i.h.bf16 %v3505_v27  ;;  %v3506_v21 = vunpack.i.l.bf16 %v3505_v27  ;;  %v1692_v20 = vsel %vm1663_vm5, %v5310_v24, %v3491_v53  ;;  %v1693_v63 = vsel %vm1663_vm5, %v5311_v25, %v3492_v48  ;;  %v4913_v27 = vld [vmem:[%s5102_s4] ss:$0 sm:$0xff] }
 0x17f   : > { %v3500_v37 = vpop.permute.xlu0 %3499 }
 0x180   : > { %v3502_v44 = vunpack.i.h.bf16 %v3500_v37  ;;  %v3501_v60 = vunpack.i.l.bf16 %v3500_v37  ;;  %v1727_v34 = vsel %vm1696_vm6, %v1694_v30, %v3506_v21  ;;  %v1728_v15 = vsel %vm1696_vm6, %v1695_v7, %v3507_v33 }
 0x181   : > { %v3515_v22 = vpop.permute.xlu1 %3514 }
 0x182   : > { %v3517_v32 = vunpack.i.h.bf16 %v3515_v22  ;;  %v3516_v14 = vunpack.i.l.bf16 %v3515_v22  ;;  %v1725_v31 = vsel %vm1696_vm6, %v1692_v20, %v3501_v60  ;;  %v1726_v8 = vsel %vm1696_vm6, %v1693_v63, %v3502_v44 }
 0x183   : > { %v3510_v61 = vpop.permute.xlu0 %3509 }
 0x184   : > { %v3512_v0 = vunpack.i.h.bf16 %v3510_v61  ;;  %v3511_v47 = vunpack.i.l.bf16 %v3510_v61  ;;  %v1760_v4 = vsel %vm1729_vm7, %v1727_v34, %v3516_v14  ;;  %v1761_v23 = vsel %vm1729_vm7, %v1728_v15, %v3517_v32 }
 0x185   : > { %v3525_v58 = vpop.permute.xlu1 %3524 }
 0x186   : > { %v3527_v54 = vunpack.i.h.bf16 %v3525_v58  ;;  %v3526_v18 = vunpack.i.l.bf16 %v3525_v58  ;;  %v1758_v49 = vsel %vm1729_vm7, %v1725_v31, %v3511_v47  ;;  %v1759_v59 = vsel %vm1729_vm7, %v1726_v8, %v3512_v0 }
 0x187   : > { %v3520_v46 = vpop.permute.xlu0 %3519 }
 0x188   : > { %v3522_v17 = vunpack.i.h.bf16 %v3520_v46  ;;  %v3521_v55 = vunpack.i.l.bf16 %v3520_v46  ;;  %v1793_v51 = vsel %vm1762_vm8, %v1760_v4, %v3526_v18  ;;  %v1794_v39 = vsel %vm1762_vm8, %v1761_v23, %v3527_v54 }
 0x189   : > { %v3535_v9 = vpop.permute.xlu1 %3534 }
 0x18a   : > { %v3537_v56 = vunpack.i.h.bf16 %v3535_v9  ;;  %v3536_v26 = vunpack.i.l.bf16 %v3535_v9  ;;  %v1791_v62 = vsel %vm1762_vm8, %v1758_v49, %v3521_v55  ;;  %v1792_v5 = vsel %vm1762_vm8, %v1759_v59, %v3522_v17 }
 0x18b   : > { %v3530_v57 = vpop.permute.xlu0 %3529 }
 0x18c   : > { %v3532_v38 = vunpack.i.h.bf16 %v3530_v57  ;;  %v3531_v6 = vunpack.i.l.bf16 %v3530_v57  ;;  %v1826_v42 = vsel %vm1795_vm9, %v1793_v51, %v3536_v26  ;;  %v1827_v2 = vsel %vm1795_vm9, %v1794_v39, %v3537_v56 }
 0x18d   : > { %v3545_v41 = vpop.permute.xlu1 %3544 }
 0x18e   : > { %v3547_v50 = vunpack.i.h.bf16 %v3545_v41  ;;  %v3546_v45 = vunpack.i.l.bf16 %v3545_v41  ;;  %v1824_v1 = vsel %vm1795_vm9, %v1791_v62, %v3531_v6  ;;  %v1825_v3 = vsel %vm1795_vm9, %v1792_v5, %v3532_v38 }
 0x18f   : > { %v3540_v16 = vpop.permute.xlu0 %3539 }
 0x190   : > { %v1859_v28 = vsel %vm1828_vm10, %v1826_v42, %v3546_v45  ;;  %v1860_v11 = vsel %vm1828_vm10, %v1827_v2, %v3547_v50  ;;  %v3542_v29 = vunpack.i.h.bf16 %v3540_v16  ;;  %v3541_v40 = vunpack.i.l.bf16 %v3540_v16 }
 0x191   : > { %v1876_v13 = vpack.c.bf16 %v1860_v11, %v1859_v28 }
 0x192   : > { %v1857_v12 = vsel %vm1828_vm10, %v1824_v1, %v3541_v40  ;;  %v1858_v52 = vsel %vm1828_vm10, %v1825_v3, %v3542_v29 }
 0x193   : > { %v1875_v35 = vpack.c.bf16 %v1858_v52, %v1857_v12 }
 0x195   : > { %2861 = vmatprep.mubr.msk.bf16.mxu1 %vm1904_vm11, %v1875_v35 }
 0x196   : > { %2862 = vmatmul.mubr.msk.bf16.gmra.mrb[12].mxu1 %vm1904_vm11, %v1876_v13 }
 0x1c9   : > { %v2835_v37 = vpop.f32.mrb[0].mxu0 }
 0x1ca   : > { %v2000_v22 = vadd.f32 %v2835_v37, %v4913_v27  ;;  %v1991_v43 = vpop.f32.mrb[1].mxu0 }
 0x1cb   : > { %v1992_v10 = vadd.f32 %v4913_v27, %v1991_v43  ;;  %v2836_v61 = vpop.f32.mrb[2].mxu0 }
 0x1cc   : > { %v2731_v48 = vpack.c.bf16 %v2000_v22, %v2000_v22  ;;  %v2003_v53 = vadd.f32 %v2836_v61, %v4913_v27  ;;  %v1994_v58 = vpop.f32.mrb[3].mxu0  ;;  %v2352_v30 = vmul.f32 %v2000_v22, %v2000_v22  ;;  %v2282_v14 = vsel %vm1630_vm4, %v2000_v22, 0.0 }
 0x1cd   : > { %v2729_v33 = vpack.c.bf16 %v1992_v10, %v1992_v10  ;;  %v2350_v21 = vmul.f32 %v1992_v10, %v1992_v10  ;;  %v1995_v19 = vadd.f32 %v4913_v27, %v1994_v58  ;;  %v2279_v7 = vsel %vm1630_vm4, %v1992_v10, 0.0 }
 0x1ce   : > { %2249 = vst.msk [vmem:[%s4920_s17 + $0x8] sm:$0xf] %vm2246_vm12, %v2731_v48  ;;  %v2732_v36 = vpack.c.bf16 %v2003_v53, %v2003_v53  ;;  %v2353_v20 = vmul.f32 %v2003_v53, %v2003_v53  ;;  %v2385_v47 = vsel %vm1630_vm4, %v2352_v30, 0.0  ;;  %v2284_v9 = vsel %vm1630_vm4, %v2003_v53, 0.0 }
 0x1cf   : > { %2247 = vst.msk [vmem:[%s4920_s17] sm:$0xf] %vm2246_vm12, %v2729_v33  ;;  %v2730_v46 = vpack.c.bf16 %v1995_v19, %v1995_v19  ;;  %v2280_v44 = vsel %vm1630_vm4, %v1995_v19, 0.0  ;;  %v2351_v60 = vmul.f32 %v1995_v19, %v1995_v19  ;;  %v2382_v24 = vsel %vm1630_vm4, %v2350_v21, 0.0 }
 0x1d0   : > { %2250 = vst.msk [vmem:[%s4920_s17 + $0xc] sm:$0xf] %vm2246_vm12, %v2732_v36  ;;  %v2281_v32 = vadd.f32 %v2280_v44, %v2279_v7  ;;  %v2387_v54 = vsel %vm1630_vm4, %v2353_v20, 0.0 }
 0x1d1   : > { %2248 = vst.msk [vmem:[%s4920_s17 + $0x4] sm:$0xf] %vm2246_vm12, %v2730_v46  ;;  %v2383_v25 = vsel %vm1630_vm4, %v2351_v60, 0.0 }
 0x1d2   : > { %v2283_v63 = vadd.f32 %v2282_v14, %v2281_v32  ;;  %v2384_v0 = vadd.f32 %v2383_v25, %v2382_v24 }
 0x1d4   : > { %v2386_v34 = vadd.f32 %v2385_v47, %v2384_v0  ;;  %v2285_v15 = vadd.f32 %v2284_v9, %v2283_v63 }
 0x1d6   : > { %v2388_v18 = vadd.f32 %v2387_v54, %v2386_v34 }
 0x1dd   : > { %v2839_v17 = vpop.f32.mrb[4].mxu0 }
 0x1de   : > { %v2016_v55 = vadd.f32 %v2839_v17, %v4913_v27  ;;  %v2007_v56 = vpop.f32.mrb[5].mxu0 }
 0x1df   : > { %v2008_v26 = vadd.f32 %v4913_v27, %v2007_v56  ;;  %v2840_v57 = vpop.f32.mrb[6].mxu0 }
 0x1e0   : > { %v2735_v31 = vpack.c.bf16 %v2016_v55, %v2016_v55  ;;  %v2019_v8 = vadd.f32 %v2840_v57, %v4913_v27  ;;  %v2010_v4 = vpop.f32.mrb[7].mxu0  ;;  %v2356_v45 = vmul.f32 %v2016_v55, %v2016_v55  ;;  %v2290_v2 = vsel %vm1630_vm4, %v2016_v55, 0.0 }
 0x1e1   : > { %v2733_v23 = vpack.c.bf16 %v2008_v26, %v2008_v26  ;;  %v2286_v49 = vsel %vm1630_vm4, %v2008_v26, 0.0  ;;  %v2354_v59 = vmul.f32 %v2008_v26, %v2008_v26  ;;  %v2011_v38 = vadd.f32 %v4913_v27, %v2010_v4 }
 0x1e2   : > { %2253 = vst.msk [vmem:[%s4920_s17 + $0x18] sm:$0xf] %vm2246_vm12, %v2735_v31  ;;  %v2287_v6 = vadd.f32 %v2286_v49, %v2285_v15  ;;  %v2736_v41 = vpack.c.bf16 %v2019_v8, %v2019_v8  ;;  %v2357_v16 = vmul.f32 %v2019_v8, %v2019_v8  ;;  %v2292_v29 = vsel %vm1630_vm4, %v2019_v8, 0.0 }
 0x1e3   : > { %2251 = vst.msk [vmem:[%s4920_s17 + $0x10] sm:$0xf] %vm2246_vm12, %v2733_v23  ;;  %v2389_v51 = vsel %vm1630_vm4, %v2354_v59, 0.0  ;;  %v2734_v39 = vpack.c.bf16 %v2011_v38, %v2011_v38  ;;  %v2288_v50 = vsel %vm1630_vm4, %v2011_v38, 0.0  ;;  %v2355_v42 = vmul.f32 %v2011_v38, %v2011_v38 }
 0x1e4   : > { %v2390_v62 = vadd.f32 %v2389_v51, %v2388_v18  ;;  %2254 = vst.msk [vmem:[%s4920_s17 + $0x1c] sm:$0xf] %vm2246_vm12, %v2736_v41  ;;  %v2289_v5 = vadd.f32 %v2288_v50, %v2287_v6  ;;  %v2393_v1 = vsel %vm1630_vm4, %v2356_v45, 0.0  ;;  %v2395_v12 = vsel %vm1630_vm4, %v2357_v16, 0.0 }
 0x1e5   : > { %2252 = vst.msk [vmem:[%s4920_s17 + $0x14] sm:$0xf] %vm2246_vm12, %v2734_v39  ;;  %v2391_v11 = vsel %vm1630_vm4, %v2355_v42, 0.0 }
 0x1e6   : > { %v2291_v28 = vadd.f32 %v2290_v2, %v2289_v5  ;;  %v2392_v40 = vadd.f32 %v2391_v11, %v2390_v62 }
 0x1e8   : > { %v2293_v3 = vadd.f32 %v2292_v29, %v2291_v28  ;;  %v2394_v13 = vadd.f32 %v2393_v1, %v2392_v40 }
 0x1ea   : > { %v2396_v52 = vadd.f32 %v2395_v12, %v2394_v13 }
 0x1f1   : > { %v2843_v35 = vpop.f32.mrb[8].mxu0 }
 0x1f2   : > { %v2032_v37 = vadd.f32 %v2843_v35, %v4913_v27  ;;  %v2023_v22 = vpop.f32.mrb[9].mxu0 }
 0x1f3   : > { %v2024_v43 = vadd.f32 %v4913_v27, %v2023_v22  ;;  %v2844_v10 = vpop.f32.mrb[10].mxu0 }
 0x1f4   : > { %v2739_v61 = vpack.c.bf16 %v2032_v37, %v2032_v37  ;;  %v2035_v48 = vadd.f32 %v2844_v10, %v4913_v27  ;;  %v2026_v53 = vpop.f32.mrb[11].mxu0  ;;  %v2360_v60 = vmul.f32 %v2032_v37, %v2032_v37  ;;  %v2298_v20 = vsel %vm1630_vm4, %v2032_v37, 0.0 }
 0x1f5   : > { %v2737_v58 = vpack.c.bf16 %v2024_v43, %v2024_v43  ;;  %v2294_v33 = vsel %vm1630_vm4, %v2024_v43, 0.0  ;;  %v2358_v21 = vmul.f32 %v2024_v43, %v2024_v43  ;;  %v2027_v19 = vadd.f32 %v4913_v27, %v2026_v53 }
 0x1f6   : > { %2257 = vst.msk [vmem:[%s4920_s17 + $0x28] sm:$0xf] %vm2246_vm12, %v2739_v61  ;;  %v2295_v30 = vadd.f32 %v2294_v33, %v2293_v3  ;;  %v2740_v36 = vpack.c.bf16 %v2035_v48, %v2035_v48  ;;  %v2361_v25 = vmul.f32 %v2035_v48, %v2035_v48  ;;  %v2300_v47 = vsel %vm1630_vm4, %v2035_v48, 0.0 }
 0x1f7   : > { %2255 = vst.msk [vmem:[%s4920_s17 + $0x20] sm:$0xf] %vm2246_vm12, %v2737_v58  ;;  %v2397_v7 = vsel %vm1630_vm4, %v2358_v21, 0.0  ;;  %v2738_v46 = vpack.c.bf16 %v2027_v19, %v2027_v19  ;;  %v2296_v44 = vsel %vm1630_vm4, %v2027_v19, 0.0  ;;  %v2359_v24 = vmul.f32 %v2027_v19, %v2027_v19 }
 0x1f8   : > { %v2398_v32 = vadd.f32 %v2397_v7, %v2396_v52  ;;  %2258 = vst.msk [vmem:[%s4920_s17 + $0x2c] sm:$0xf] %vm2246_vm12, %v2740_v36  ;;  %v2297_v14 = vadd.f32 %v2296_v44, %v2295_v30  ;;  %v2401_v34 = vsel %vm1630_vm4, %v2360_v60, 0.0  ;;  %v2403_v18 = vsel %vm1630_vm4, %v2361_v25, 0.0 }
 0x1f9   : > { %2256 = vst.msk [vmem:[%s4920_s17 + $0x24] sm:$0xf] %vm2246_vm12, %v2738_v46  ;;  %v2399_v0 = vsel %vm1630_vm4, %v2359_v24, 0.0 }
 0x1fa   : > { %v2299_v63 = vadd.f32 %v2298_v20, %v2297_v14  ;;  %v2400_v9 = vadd.f32 %v2399_v0, %v2398_v32 }
 0x1fc   : > { %v2301_v15 = vadd.f32 %v2300_v47, %v2299_v63  ;;  %v2402_v54 = vadd.f32 %v2401_v34, %v2400_v9 }
 0x1fe   : > { %v2404_v17 = vadd.f32 %v2403_v18, %v2402_v54 }
 0x209   : > { %v2847_v55 = vpop.f32.mrb[12].mxu0 }
 0x20a   : > { %v2048_v56 = vadd.f32 %v2847_v55, %v4913_v27  ;;  %v2039_v26 = vpop.f32.mrb[13].mxu0 }
 0x20b   : > { %v2040_v57 = vadd.f32 %v4913_v27, %v2039_v26  ;;  %v2848_v31 = vpop.f32.mrb[14].mxu0 }
 0x20c   : > { %v2743_v8 = vpack.c.bf16 %v2048_v56, %v2048_v56  ;;  %v2051_v4 = vadd.f32 %v2848_v31, %v4913_v27  ;;  %v2042_v23 = vpop.f32.mrb[15].mxu0  ;;  %v2364_v62 = vmul.f32 %v2048_v56, %v2048_v56  ;;  %v2306_v16 = vsel %vm1630_vm4, %v2048_v56, 0.0 }
 0x20d   : > { %v2741_v49 = vpack.c.bf16 %v2040_v57, %v2040_v57  ;;  %v2302_v59 = vsel %vm1630_vm4, %v2040_v57, 0.0  ;;  %v2362_v38 = vmul.f32 %v2040_v57, %v2040_v57  ;;  %v2043_v6 = vadd.f32 %v4913_v27, %v2042_v23 }
 0x20e   : > { %2261 = vst.msk [vmem:[%s4920_s17 + $0x38] sm:$0xf] %vm2246_vm12, %v2743_v8  ;;  %v2303_v41 = vadd.f32 %v2302_v59, %v2301_v15  ;;  %v2744_v51 = vpack.c.bf16 %v2051_v4, %v2051_v4  ;;  %v2365_v28 = vmul.f32 %v2051_v4, %v2051_v4  ;;  %v2308_v40 = vsel %vm1630_vm4, %v2051_v4, 0.0 }
 0x20f   : > { %2259 = vst.msk [vmem:[%s4920_s17 + $0x30] sm:$0xf] %vm2246_vm12, %v2741_v49  ;;  %v2405_v39 = vsel %vm1630_vm4, %v2362_v38, 0.0  ;;  %v2742_v50 = vpack.c.bf16 %v2043_v6, %v2043_v6  ;;  %v2304_v45 = vsel %vm1630_vm4, %v2043_v6, 0.0  ;;  %v2363_v2 = vmul.f32 %v2043_v6, %v2043_v6 }
 0x210   : > { %v2406_v5 = vadd.f32 %v2405_v39, %v2404_v17  ;;  %2262 = vst.msk [vmem:[%s4920_s17 + $0x3c] sm:$0xf] %vm2246_vm12, %v2744_v51  ;;  %v2305_v42 = vadd.f32 %v2304_v45, %v2303_v41  ;;  %v2409_v3 = vsel %vm1630_vm4, %v2364_v62, 0.0  ;;  %v2411_v52 = vsel %vm1630_vm4, %v2365_v28, 0.0 }
 0x211   : > { %2260 = vst.msk [vmem:[%s4920_s17 + $0x34] sm:$0xf] %vm2246_vm12, %v2742_v50  ;;  %v2407_v29 = vsel %vm1630_vm4, %v2363_v2, 0.0 }
 0x212   : > { %v2307_v11 = vadd.f32 %v2306_v16, %v2305_v42  ;;  %v2408_v1 = vadd.f32 %v2407_v29, %v2406_v5 }
 0x214   : > { %v2309_v13 = vadd.f32 %v2308_v40, %v2307_v11  ;;  %v2410_v12 = vadd.f32 %v2409_v3, %v2408_v1 }
 0x216   : > { %v2412_v35 = vadd.f32 %v2411_v52, %v2410_v12 }
 0x221   : > { %v2851_v37 = vpop.f32.mrb[0].mxu1 }
 0x222   : > { %v2064_v22 = vadd.f32 %v2851_v37, %v4913_v27  ;;  %v2055_v43 = vpop.f32.mrb[1].mxu1 }
 0x223   : > { %v2056_v10 = vadd.f32 %v4913_v27, %v2055_v43  ;;  %v2852_v61 = vpop.f32.mrb[2].mxu1 }
 0x224   : > { %v2747_v48 = vpack.c.bf16 %v2064_v22, %v2064_v22  ;;  %v2067_v53 = vadd.f32 %v2852_v61, %v4913_v27  ;;  %v2058_v58 = vpop.f32.mrb[3].mxu1  ;;  %v2368_v32 = vmul.f32 %v2064_v22, %v2064_v22  ;;  %v2314_v25 = vsel %vm1630_vm4, %v2064_v22, 0.0 }
 0x225   : > { %v2745_v33 = vpack.c.bf16 %v2056_v10, %v2056_v10  ;;  %v2310_v21 = vsel %vm1630_vm4, %v2056_v10, 0.0  ;;  %v2366_v19 = vmul.f32 %v2056_v10, %v2056_v10  ;;  %v2059_v30 = vadd.f32 %v4913_v27, %v2058_v58 }
 0x226   : > { %2265 = vst.msk [vmem:[%s4920_s17 + $0x48] sm:$0xf] %vm2246_vm12, %v2747_v48  ;;  %v2311_v36 = vadd.f32 %v2310_v21, %v2309_v13  ;;  %v2748_v7 = vpack.c.bf16 %v2067_v53, %v2067_v53  ;;  %v2369_v63 = vmul.f32 %v2067_v53, %v2067_v53  ;;  %v2316_v9 = vsel %vm1630_vm4, %v2067_v53, 0.0 }
 0x227   : > { %2263 = vst.msk [vmem:[%s4920_s17 + $0x40] sm:$0xf] %vm2246_vm12, %v2745_v33  ;;  %v2413_v46 = vsel %vm1630_vm4, %v2366_v19, 0.0  ;;  %v2746_v44 = vpack.c.bf16 %v2059_v30, %v2059_v30  ;;  %v2312_v60 = vsel %vm1630_vm4, %v2059_v30, 0.0  ;;  %v2367_v20 = vmul.f32 %v2059_v30, %v2059_v30 }
 0x228   : > { %v2414_v14 = vadd.f32 %v2413_v46, %v2412_v35  ;;  %2266 = vst.msk [vmem:[%s4920_s17 + $0x4c] sm:$0xf] %vm2246_vm12, %v2748_v7  ;;  %v2313_v24 = vadd.f32 %v2312_v60, %v2311_v36  ;;  %v2417_v15 = vsel %vm1630_vm4, %v2368_v32, 0.0  ;;  %v2419_v17 = vsel %vm1630_vm4, %v2369_v63, 0.0 }
 0x229   : > { %2264 = vst.msk [vmem:[%s4920_s17 + $0x44] sm:$0xf] %vm2246_vm12, %v2746_v44  ;;  %v2415_v47 = vsel %vm1630_vm4, %v2367_v20, 0.0 }
 0x22a   : > { %v2315_v0 = vadd.f32 %v2314_v25, %v2313_v24  ;;  %v2416_v34 = vadd.f32 %v2415_v47, %v2414_v14 }
 0x22c   : > { %v2317_v54 = vadd.f32 %v2316_v9, %v2315_v0  ;;  %v2418_v18 = vadd.f32 %v2417_v15, %v2416_v34 }
 0x22e   : > { %v2420_v55 = vadd.f32 %v2419_v17, %v2418_v18 }
 0x239   : > { %v2855_v56 = vpop.f32.mrb[4].mxu1 }
 0x23a   : > { %v2080_v26 = vadd.f32 %v2855_v56, %v4913_v27  ;;  %v2071_v57 = vpop.f32.mrb[5].mxu1 }
 0x23b   : > { %v2072_v31 = vadd.f32 %v4913_v27, %v2071_v57  ;;  %v2856_v8 = vpop.f32.mrb[6].mxu1 }
 0x23c   : > { %v2751_v4 = vpack.c.bf16 %v2080_v26, %v2080_v26  ;;  %v2083_v23 = vadd.f32 %v2856_v8, %v4913_v27  ;;  %v2074_v49 = vpop.f32.mrb[7].mxu1  ;;  %v2372_v5 = vmul.f32 %v2080_v26, %v2080_v26  ;;  %v2322_v28 = vsel %vm1630_vm4, %v2080_v26, 0.0 }
 0x23d   : > { %v2749_v59 = vpack.c.bf16 %v2072_v31, %v2072_v31  ;;  %v2318_v38 = vsel %vm1630_vm4, %v2072_v31, 0.0  ;;  %v2370_v6 = vmul.f32 %v2072_v31, %v2072_v31  ;;  %v2075_v41 = vadd.f32 %v4913_v27, %v2074_v49 }
 0x23e   : > { %2269 = vst.msk [vmem:[%s4920_s17 + $0x58] sm:$0xf] %vm2246_vm12, %v2751_v4  ;;  %v2319_v51 = vadd.f32 %v2318_v38, %v2317_v54  ;;  %v2752_v39 = vpack.c.bf16 %v2083_v23, %v2083_v23  ;;  %v2373_v11 = vmul.f32 %v2083_v23, %v2083_v23  ;;  %v2324_v1 = vsel %vm1630_vm4, %v2083_v23, 0.0 }
 0x23f   : > { %2267 = vst.msk [vmem:[%s4920_s17 + $0x50] sm:$0xf] %vm2246_vm12, %v2749_v59  ;;  %v2421_v50 = vsel %vm1630_vm4, %v2370_v6, 0.0  ;;  %v2750_v45 = vpack.c.bf16 %v2075_v41, %v2075_v41  ;;  %v2320_v62 = vsel %vm1630_vm4, %v2075_v41, 0.0  ;;  %v2371_v16 = vmul.f32 %v2075_v41, %v2075_v41 }
 0x240   : > { %v2422_v42 = vadd.f32 %v2421_v50, %v2420_v55  ;;  %2270 = vst.msk [vmem:[%s4920_s17 + $0x5c] sm:$0xf] %vm2246_vm12, %v2752_v39  ;;  %v2321_v2 = vadd.f32 %v2320_v62, %v2319_v51  ;;  %v2425_v13 = vsel %vm1630_vm4, %v2372_v5, 0.0  ;;  %v2427_v35 = vsel %vm1630_vm4, %v2373_v11, 0.0 }
 0x241   : > { %2268 = vst.msk [vmem:[%s4920_s17 + $0x54] sm:$0xf] %vm2246_vm12, %v2750_v45  ;;  %v2423_v40 = vsel %vm1630_vm4, %v2371_v16, 0.0 }
 0x242   : > { %v2323_v29 = vadd.f32 %v2322_v28, %v2321_v2  ;;  %v2424_v3 = vadd.f32 %v2423_v40, %v2422_v42 }
 0x244   : > { %v2325_v12 = vadd.f32 %v2324_v1, %v2323_v29  ;;  %v2426_v52 = vadd.f32 %v2425_v13, %v2424_v3 }
 0x246   : > { %v2428_v37 = vadd.f32 %v2427_v35, %v2426_v52 }
 0x251   : > { %v2859_v22 = vpop.f32.mrb[8].mxu1 }
 0x252   : > { %v2096_v43 = vadd.f32 %v2859_v22, %v4913_v27  ;;  %v2087_v10 = vpop.f32.mrb[9].mxu1 }
 0x253   : > { %v2088_v61 = vadd.f32 %v4913_v27, %v2087_v10  ;;  %v2860_v48 = vpop.f32.mrb[10].mxu1 }
 0x254   : > { %v2755_v53 = vpack.c.bf16 %v2096_v43, %v2096_v43  ;;  %v2099_v58 = vadd.f32 %v2860_v48, %v4913_v27  ;;  %v2090_v33 = vpop.f32.mrb[11].mxu1  ;;  %v2376_v14 = vmul.f32 %v2096_v43, %v2096_v43  ;;  %v2330_v63 = vsel %vm1630_vm4, %v2096_v43, 0.0 }
 0x255   : > { %v2753_v21 = vpack.c.bf16 %v2088_v61, %v2088_v61  ;;  %v2326_v19 = vsel %vm1630_vm4, %v2088_v61, 0.0  ;;  %v2374_v30 = vmul.f32 %v2088_v61, %v2088_v61  ;;  %v2091_v36 = vadd.f32 %v4913_v27, %v2090_v33 }
 0x256   : > { %2273 = vst.msk [vmem:[%s4920_s17 + $0x68] sm:$0xf] %vm2246_vm12, %v2755_v53  ;;  %v2327_v7 = vadd.f32 %v2326_v19, %v2325_v12  ;;  %v2756_v46 = vpack.c.bf16 %v2099_v58, %v2099_v58  ;;  %v2377_v0 = vmul.f32 %v2099_v58, %v2099_v58  ;;  %v2332_v34 = vsel %vm1630_vm4, %v2099_v58, 0.0 }
 0x257   : > { %2271 = vst.msk [vmem:[%s4920_s17 + $0x60] sm:$0xf] %vm2246_vm12, %v2753_v21  ;;  %v2429_v44 = vsel %vm1630_vm4, %v2374_v30, 0.0  ;;  %v2754_v60 = vpack.c.bf16 %v2091_v36, %v2091_v36  ;;  %v2328_v32 = vsel %vm1630_vm4, %v2091_v36, 0.0  ;;  %v2375_v25 = vmul.f32 %v2091_v36, %v2091_v36 }
 0x258   : > { %v2430_v24 = vadd.f32 %v2429_v44, %v2428_v37  ;;  %2274 = vst.msk [vmem:[%s4920_s17 + $0x6c] sm:$0xf] %vm2246_vm12, %v2756_v46  ;;  %v2329_v20 = vadd.f32 %v2328_v32, %v2327_v7  ;;  %v2433_v54 = vsel %vm1630_vm4, %v2376_v14, 0.0  ;;  %v2435_v55 = vsel %vm1630_vm4, %v2377_v0, 0.0 }
 0x259   : > { %2272 = vst.msk [vmem:[%s4920_s17 + $0x64] sm:$0xf] %vm2246_vm12, %v2754_v60  ;;  %v2431_v9 = vsel %vm1630_vm4, %v2375_v25, 0.0 }
 0x25a   : > { %v2331_v47 = vadd.f32 %v2330_v63, %v2329_v20  ;;  %v2432_v15 = vadd.f32 %v2431_v9, %v2430_v24 }
 0x25c   : > { %v2333_v18 = vadd.f32 %v2332_v34, %v2331_v47  ;;  %v2434_v17 = vadd.f32 %v2433_v54, %v2432_v15 }
 0x25e   : > { %v2436_v56 = vadd.f32 %v2435_v55, %v2434_v17 }
 0x269   : > { %v2863_v26 = vpop.f32.mrb[12].mxu1 }
 0x26a   : > { %v2112_v57 = vadd.f32 %v2863_v26, %v4913_v27  ;;  %v2103_v31 = vpop.f32.mrb[13].mxu1 }
 0x26b   : > { %v2104_v8 = vadd.f32 %v4913_v27, %v2103_v31  ;;  %v2864_v4 = vpop.f32.mrb[14].mxu1 }
 0x26c   : > { %v2759_v23 = vpack.c.bf16 %v2112_v57, %v2112_v57  ;;  %v2115_v49 = vadd.f32 %v2864_v4, %v4913_v27  ;;  %v2106_v59 = vpop.f32.mrb[15].mxu1  ;;  %v2380_v42 = vmul.f32 %v2112_v57, %v2112_v57  ;;  %v2338_v11 = vsel %vm1630_vm4, %v2112_v57, 0.0 }
 0x26d   : > { %v2757_v38 = vpack.c.bf16 %v2104_v8, %v2104_v8  ;;  %v2334_v6 = vsel %vm1630_vm4, %v2104_v8, 0.0  ;;  %v2378_v41 = vmul.f32 %v2104_v8, %v2104_v8  ;;  %v2107_v51 = vadd.f32 %v4913_v27, %v2106_v59 }
 0x26e   : > { %2277 = vst.msk [vmem:[%s4920_s17 + $0x78] sm:$0xf] %vm2246_vm12, %v2759_v23  ;;  %v2335_v39 = vadd.f32 %v2334_v6, %v2333_v18  ;;  %v2760_v50 = vpack.c.bf16 %v2115_v49, %v2115_v49  ;;  %v2381_v27 = vmul.f32 %v2115_v49, %v2115_v49  ;;  %v2340_v1 = vsel %vm1630_vm4, %v2115_v49, 0.0 }
 0x26f   : > { %2275 = vst.msk [vmem:[%s4920_s17 + $0x70] sm:$0xf] %vm2246_vm12, %v2757_v38  ;;  %v2437_v45 = vsel %vm1630_vm4, %v2378_v41, 0.0  ;;  %v2758_v62 = vpack.c.bf16 %v2107_v51, %v2107_v51  ;;  %v2336_v5 = vsel %vm1630_vm4, %v2107_v51, 0.0  ;;  %v2379_v28 = vmul.f32 %v2107_v51, %v2107_v51 }
 0x270   : > { %v2438_v2 = vadd.f32 %v2437_v45, %v2436_v56  ;;  %2278 = vst.msk [vmem:[%s4920_s17 + $0x7c] sm:$0xf] %vm2246_vm12, %v2760_v50  ;;  %v2337_v16 = vadd.f32 %v2336_v5, %v2335_v39  ;;  %v2441_v13 = vsel %vm1630_vm4, %v2380_v42, 0.0  ;;  %v2443_v35 = vsel %vm1630_vm4, %v2381_v27, 0.0 }
 0x271   : > { %2276 = vst.msk [vmem:[%s4920_s17 + $0x74] sm:$0xf] %vm2246_vm12, %v2758_v62  ;;  %v2439_v40 = vsel %vm1630_vm4, %v2379_v28, 0.0 }
 0x272   : > { %v2339_v29 = vadd.f32 %v2338_v11, %v2337_v16  ;;  %v2440_v3 = vadd.f32 %v2439_v40, %v2438_v2 }
 0x274   : > { %v2341_v12 = vadd.f32 %v2340_v1, %v2339_v29  ;;  %v2442_v52 = vadd.f32 %v2441_v13, %v2440_v3 }
 0x276   : > { %v2342_v37 = vrot.slane %v2341_v12, 4  ;;  %v2444_v22 = vadd.f32 %v2443_v35, %v2442_v52 }
 0x278   : > { %v2343_v43 = vadd.f32 %v2342_v37, %v2341_v12  ;;  %v2445_v10 = vrot.slane %v2444_v22, 4 }
 0x27a   : > { %v2344_v61 = vrot.slane %v2343_v43, 2  ;;  %v2446_v48 = vadd.f32 %v2445_v10, %v2444_v22 }
 0x27c   : > { %v2345_v53 = vadd.f32 %v2344_v61, %v2343_v43  ;;  %v2447_v58 = vrot.slane %v2446_v48, 2 }
 0x27e   : > { %v2346_v33 = vrot.slane %v2345_v53, 1  ;;  %v2448_v21 = vadd.f32 %v2447_v58, %v2446_v48 }
 0x280   : > { %v2347_v19 = vadd.f32 %v2346_v33, %v2345_v53  ;;  %v2449_v30 = vrot.slane %v2448_v21, 1 }
 0x282   : > { %2349 = vst.msk [vmem:[%s477_s20] sm:$0x1] %vm2348_vm13, %v2347_v19  ;;  %v2450_v36 = vadd.f32 %v2449_v30, %v2448_v21 }
 0x284   : > { %2451 = vst.msk [vmem:[%s483_s23] sm:$0x1] %vm2348_vm13, %v2450_v36 }
 0x285 PF: > { %s18_s26 = sadd.s32 1, %s3573_s26   ;;  %s5312_s24 = smov %s3569_s25 }
 0x286   : > { %p15_p5 = scmp.ge.s32.totalorder %s18_s26, 4   ;;  %s5313_s25 = smov %s5315_s27 }
 0x288   :  { %17 = sbr.rel (!%p15_p5) target bundleno = 2 (0x2), region = 100 }

// kernel: tile.58
= control target key start
LH: loop header
LB: loop body
LE: loop exit
PB: predicated region body
PF: predicated region fallthrough
CT: control target
= control target key end

     0   :  { %s22_s0 = inlined_call_operand.vmem [shape: f32[16], index: 0, kind: input, shape index: {}]   ;;  %s23_s1 = inlined_call_operand.vmem [shape: f32[8,16], index: 1, kind: output, shape index: {}]  }
   0x1   :  { %v4_v0 = vld [vmem:[%s22_s0] ss:$0 sm:$0xff] }
   0x2   :  { %5 = vst [vmem:[%s23_s1] sm:$0xff] %v4_v0 }

// kernel: tile.59
= control target key start
LH: loop header
LB: loop body
LE: loop exit
PB: predicated region body
PF: predicated region fallthrough
CT: control target
= control target key end

     0   :  { %s67_s10 = smov 112   ;;  %s68_s11 = smov 80   ;;  %vm3_vm0 = vcmask 130048   ;;  %vm9_vm1 = vcmask 1048448   ;;  %vm15_vm2 = vcmask 917248   ;;  %vm21_vm3 = vcmask 786048   ;;  %s111_s0 = inlined_call_operand.vmem [shape: f32[8,16], index: 0, kind: input, shape index: {}]   ;;  %s112_s1 = inlined_call_operand.vmem [shape: f32[1,128], index: 1, kind: output, shape index: {}]  }
   0x1   :  { %v53_v0 = vld [vmem:[%s111_s0 + $0x7] sm:$0x1]   ;;  %v55_v1 = vld [vmem:[%s111_s0 + $0x5] sm:$0x1]   ;;  %v54_v2 = vld [vmem:[%s111_s0 + $0x6] sm:$0x1]  }
   0x2   :  { %7 = vrot.lane.b32.xlu0 %v53_v0, %s67_s10  ;;  %19 = vrot.lane.b32.xlu1 %v55_v1, %s68_s11  ;;  %v56_v3 = vld [vmem:[%s111_s0 + $0x4] sm:$0x1]   ;;  %v2_v4 = vld [vmem:[%s111_s0] sm:$0x1]   ;;  %s69_s18 = smov 96   ;;  %s70_s19 = smov 64  }
   0x3   :  { %4 = vst.msk [vmem:[#allocation0] sm:$0x1] %vm3_vm0, %v2_v4   ;;  %v57_v5 = vld [vmem:[%s111_s0 + $0x3] sm:$0x1]   ;;  %v58_v6 = vld [vmem:[%s111_s0 + $0x2] sm:$0x1]  }
   0x4   :  { %s71_s24 = smov 48   ;;  %s72_s25 = smov 32   ;;  %v59_v7 = vld [vmem:[%s111_s0 + $0x1] sm:$0x1]   ;;  %vm27_vm4 = vcmask 654848   ;;  %vm33_vm5 = vcmask 523648  }
   0x5   :  { %s73_s0 = smov 16   ;;  %vm39_vm6 = vcmask 392448   ;;  %vm45_vm7 = vcmask 261248  }
   0x6   :  { %13 = vrot.lane.b32.xlu0 %v54_v2, %s69_s18  ;;  %25 = vrot.lane.b32.xlu1 %v56_v3, %s70_s19 }
   0xa   :  { %31 = vrot.lane.b32.xlu0 %v57_v5, %s71_s24  ;;  %37 = vrot.lane.b32.xlu1 %v58_v6, %s72_s25 }
   0xe   :  { %43 = vrot.lane.b32.xlu0 %v59_v7, %s73_s0 }
  0x74   :  { %v8_v8 = vpop.permute.xlu0 %7   ;;  %v20_v9 = vpop.permute.xlu1 %19  }
  0x75   :  { %10 = vst.msk [vmem:[#allocation0] sm:$0x1] %vm9_vm1, %v8_v8  }
  0x78   :  { %v14_v10 = vpop.permute.xlu0 %13   ;;  %v26_v11 = vpop.permute.xlu1 %25  }
  0x79   :  { %16 = vst.msk [vmem:[#allocation0] sm:$0x1] %vm15_vm2, %v14_v10  }
  0x7a   :  { %22 = vst.msk [vmem:[#allocation0] sm:$0x1] %vm21_vm3, %v20_v9  }
  0x7b   :  { %28 = vst.msk [vmem:[#allocation0] sm:$0x1] %vm27_vm4, %v26_v11  }
  0x7c   :  { %v32_v12 = vpop.permute.xlu0 %31   ;;  %v38_v13 = vpop.permute.xlu1 %37  }
  0x7d   :  { %34 = vst.msk [vmem:[#allocation0] sm:$0x1] %vm33_vm5, %v32_v12  }
  0x7e   :  { %40 = vst.msk [vmem:[#allocation0] sm:$0x1] %vm39_vm6, %v38_v13  }
  0x80   :  { %v44_v14 = vpop.permute.xlu0 %43  }
  0x81   :  { %46 = vst.msk [vmem:[#allocation0] sm:$0x1] %vm45_vm7, %v44_v14  }
  0x88   :  { %v50_v15 = vld [vmem:[#allocation0] sm:$0x1] }
  0x89   :  { %52 = vst [vmem:[%s112_s1] sm:$0x1] %v50_v15 }

// kernel: res_up_forward.7
= control target key start
LH: loop header
LB: loop body
LE: loop exit
PB: predicated region body
PF: predicated region fallthrough
CT: control target
= control target key end

     0   :  { %13 = vsyncpa [#allocation3], 0  ;;  %s7113_s0 = inlined_call_operand.vmem [shape: bf16[2,18,18,4], index: 0, kind: input, shape index: {}, may-alias: {0,1,2}]   ;;  %s7114_s1 = inlined_call_operand.vmem [shape: bf16[2,18,18,4], index: 1, kind: input, shape index: {}, may-alias: {0,1,2}]   ;;  %s7115_s2 = inlined_call_operand.vmem [shape: bf16[2,18,18,4], index: 2, kind: input, shape index: {}, may-alias: {0,1,2}]   ;;  %s7116_s3 = inlined_call_operand.vmem [shape: bf16[36,32], index: 3, kind: input, shape index: {}]   ;;  %s7117_s4 = inlined_call_operand.vmem [shape: f32[1,32], index: 4, kind: input, shape index: {}]   ;;  %s7118_s5 = inlined_call_operand.vmem [shape: bf16[2,32,16,32], index: 5, kind: output, shape index: {0}]   ;;  %s7119_s6 = inlined_call_operand.hbm [shape: f32[2,1,1,32], index: 6, kind: output, shape index: {1}]   ;;  %s7120_s7 = inlined_call_operand.hbm [shape: f32[2,1,1,32], index: 7, kind: output, shape index: {2}]  }
   0x1   :  { %15 = vsyncpa [#allocation3 + $0x1], 0 }
   0x2   :  { %16 = vsyncpa [#allocation5], 0 }
   0x3   :  { %18 = vsyncpa [#allocation5 + $0x1], 0  ;;  %s4657_s24 = smov 0   ;;  %s4659_s25 = smov 0  }
   0x4   :  { %s4661_s26 = smov 0   ;;  %s4663_s27 = smov 0  }
   0x5   :  { %s4665_s28 = smov 0   ;;  %s4667_s29 = smov 0  }
   0x6 LB: > { %s3412_s30 = sadd.s32 4294967295, %s4605_s29   ;;  %s3413_s8 = sadd.s32 4294967294, %s4605_s29   ;;  %s4605_s29 = sphi %s4667_s29, %s24_s29   ;;  %s4601_s28 = sphi %s4665_s28, %s7323_s28   ;;  %s4597_s27 = sphi %s4663_s27, %s7322_s27   ;;  %s4593_s26 = sphi %s4661_s26, %s7321_s26   ;;  %s4589_s25 = sphi %s4659_s25, %s7320_s25   ;;  %s4585_s24 = sphi %s4657_s24, %s7319_s24  }
   0x7   : > { %s36_s9 = sadd.s32 1, %s4601_s28  ;;  %s209_s10 = sadd.s32 1, %s4593_s26 }
   0x8   : > { %p38_p0 = scmp.ge.s32.totalorder %s36_s9, 2  ;;  %p219_p1 = scmp.ne.s32.totalorder %s4593_s26, %s4589_s25 }
   0x9   : > { %p220_p2 = scmp.eq.s32.totalorder %s3412_s30, 1  ;;  %p225_p3 = scmp.ne.s32.totalorder %s4589_s25, %s4585_s24 }
   0xa   : > { %s7325_s9 = smov (%p38_p0, %s36_s9), 0  ;;  %p226_p5 = scmp.eq.s32.totalorder %s3413_s8, 1 }
   0xb   : > { %p4697_p4 = por %p220_p2, %p219_p1  ;;  %s204_s12 = ssub.s32 %s4601_s28, %s7325_s9 }
   0xc   : > { %p3416_p6 = scmp.ge.s32.totalorder %s4605_s29, 1  ;;  %p207_p7 = scmp.eq.s32.totalorder %s204_s12, 0 }
   0xd   : > { %p4704_p8 = por %p226_p5, %p225_p3  ;;  %p336_p9 = scmp.lt.s32.totalorder %s4605_s29, 3 }
   0xe   : > { %s4710_s14 = scalar_select %p207_p7, %s4593_s26, %s209_s10  }
   0xf   : > { %p337_p10 = pnand %p3416_p6, %p336_p9 }
  0x11   : > { %340 = sbr.rel (%p337_p10) target bundleno = 701 (0x2bd), region = 40 }
  0x18   : > { %p420_p11 = scmp.lt.s32.totalorder %s4597_s27, 1  ;;  %vm634_vm0 = vcmask 1046528   ;;  %s4607_s20 = smov 4   ;;  %vm822_vm1 = vcmask 1045504   ;;  %vm2233_vm2 = vcmask 1041408   ;;  %vm1617_vm3 = vcmask 31744  }
  0x19   : > { %s4608_s8 = smov 8   ;;  %s4609_s17 = smov 12   ;;  %vm1652_vm4 = vcmask 64512   ;;  %vm1687_vm5 = vcmask 97280   ;;  %vm1752_vm6 = vcmask 130048   ;;  %vm1817_vm7 = vcmask 162816  }
  0x1a   : > { %s4714_s15 = scalar_select %p420_p11, %s4597_s27, 1  ;;  %vm1882_vm8 = vcmask 195584   ;;  %vm1947_vm9 = vcmask 228352   ;;  %vm2012_vm10 = vcmask 261120   ;;  %vm2136_vm11 = vcmask 293888  }
  0x1b   : > { %s4612_s22 = smov 24   ;;  %s4613_s10 = smov 28   ;;  %vm2782_vm12 = vcmask 257024   ;;  %vm2980_vm13 = vcmask 253952  }
  0x1c   : > { %s4717_s16 = smul.u32 216, %s4714_s15  ;;  %s4614_s12 = smov 32  }
  0x1e   : > { %s4723_s19 = scalar_lea.vmem %s7113_s0, %s4717_s16  ;;  %s3527_s21 = sadd.s32 192, %s4717_s16 }
  0x1f   : > { %v3635_v0 = vld [vmem:[%s4723_s19 + $0x18] sm:$0xff]   ;;  %v4727_v1 = vld [vmem:[%s4723_s19 + $0x20] sm:$0x1]  ;;  %v4738_v7 = vld [vmem:[%s4723_s19 + $0x8] sm:$0x1]  ;;  %s445_s30 = scalar_lea.vmem %s7114_s1, %s3527_s21  ;;  %s4611_s21 = smov 16  }
  0x20   : > { %v3596_v2 = vld [vmem:[%s4723_s19] sm:$0xff]   ;;  %v4730_v3 = vunpack.c.l.bf16 %v3635_v0  ;;  %v4732_v4 = vunpack.c.h.bf16 %v3635_v0  ;;  %v7130_v5 = vunpack.c.l.bf16 %v4727_v1  ;;  %v4742_v9 = vld [vmem:[%s4723_s19 + $0x2c] sm:$0x1]  ;;  %v7131_v11 = vunpack.c.l.bf16 %v4738_v7  ;;  %v4763_v23 = vld [vmem:[%s4723_s19 + $0x14] sm:$0x1]  ;;  %s3529_s18 = sadd.s32 204, %s4717_s16 }
  0x21   : > { %v4735_v6 = vunpack.c.l.bf16 %v3596_v2  ;;  %v484_v8 = vld [vmem:[%s4723_s19 + $0x24] sm:$0xff]   ;;  %v4744_v10 = vunpack.c.h.bf16 %v3596_v2  ;;  %v478_v14 = vld [vmem:[%s4723_s19 + $0xc] sm:$0xff]   ;;  %v7126_v21 = vunpack.c.l.bf16 %v4742_v9  ;;  %v490_v28 = vld [vmem:[%s4723_s19 + $0x3c] sm:$0xff]   ;;  %v7129_v37 = vunpack.c.l.bf16 %v4763_v23  ;;  %s5719_s23 = scalar_lea.vmem %s7115_s2, %s3529_s18  ;;  %s3522_s18 = sshll.u32 %s4597_s27, 4 }
  0x22   : > { %v4747_v12 = vunpack.c.l.bf16 %v484_v8  ;;  %v4749_v13 = vunpack.c.h.bf16 %v484_v8  ;;  %v645_v15 = vrot.slane %v4730_v3, 1  ;;  %v646_v16 = vrot.slane %v4732_v4, 1  ;;  %v4778_v33 = vld [vmem:[%s4723_s19 + $0x44] sm:$0x1]  ;;  %v3636_v38 = vld [vmem:[%s4723_s19 + $0x30] sm:$0xff]   ;;  %v3637_v58 = vld [vmem:[%s4723_s19 + $0x48] sm:$0xff]  }
  0x23   : > { %7202 = vst [vmem:[#allocation8_spill] sm:$0xff] %v4735_v6  ;;  %7203 = vst [vmem:[#allocation9_spill] sm:$0xff] %v4744_v10  ;;  %v648_v17 = vrot.slane %v7130_v5, 1  ;;  %v635_v18 = vrot.slane %v4735_v6, 1  ;;  %v636_v19 = vrot.slane %v4744_v10, 1  ;;  %v638_v20 = vrot.slane %v7131_v11, 1 }
  0x24   : > { %v650_v22 = vrot.slane %v4747_v12, 1  ;;  %v647_v24 = vsel %vm634_vm0, %v645_v15, %v646_v16  ;;  %v651_v26 = vrot.slane %v4749_v13, 1  ;;  %v4768_v27 = vunpack.c.l.bf16 %v478_v14  ;;  %v4794_v43 = vld [vmem:[%s4723_s19 + $0x38] sm:$0x1]  ;;  %v4816_v57 = vld [vmem:[%s4723_s19 + $0x5c] sm:$0x1] }
  0x25   : > { %v649_v25 = vsel %vm634_vm0, %v646_v16, %v648_v17  ;;  %v637_v30 = vsel %vm634_vm0, %v635_v18, %v636_v19  ;;  %v639_v31 = vsel %vm634_vm0, %v636_v19, %v638_v20  ;;  %v653_v32 = vrot.slane %v7126_v21, 1  ;;  %v496_v52 = vld [vmem:[%s4723_s19 + $0x54] sm:$0xff]   ;;  %v502_v19 = vld [vmem:[%s4723_s19 + $0x6c] sm:$0xff]  }
  0x26   : > { %v4771_v29 = vpack.i.bf16 %v649_v25, %v647_v24  ;;  %v3826_v34 = vpack.i.bf16 %v639_v31, %v637_v30  ;;  %v652_v35 = vsel %vm634_vm0, %v650_v22, %v651_v26  ;;  %v4781_v36 = vunpack.c.h.bf16 %v478_v14  ;;  %v4834_v14 = vld [vmem:[%s4723_s19 + $0x50] sm:$0x1] }
  0x27   : > { %v654_v39 = vsel %vm634_vm0, %v651_v26, %v653_v32  ;;  %v640_v40 = vrot.slane %v4768_v27, 1  ;;  %v4789_v41 = vunpack.c.l.bf16 %v490_v28  ;;  %v4791_v42 = vunpack.c.h.bf16 %v490_v28  ;;  %v4851_v26 = vld [vmem:[%s4723_s19 + $0x74] sm:$0x1]  ;;  %v3638_v28 = vld [vmem:[%s4723_s19 + $0x60] sm:$0xff]  }
  0x28   : > { %3837 = vrot.lane.b32.xlu1 %v4771_v29, %s4607_s20  ;;  %3827 = vrot.lane.b32.xlu0 %v3826_v34, %s4607_s20  ;;  %v4797_v44 = vpack.i.bf16 %v654_v39, %v652_v35  ;;  %v641_v45 = vrot.slane %v4781_v36, 1  ;;  %v643_v46 = vrot.slane %v7129_v37, 1  ;;  %v7124_v47 = vunpack.c.l.bf16 %v4778_v33  ;;  %v520_v37 = vld [vmem:[%s4723_s19 + $0xb4] sm:$0xff]  }
  0x29   : > { %v660_v48 = vrot.slane %v4789_v41, 1  ;;  %v661_v49 = vrot.slane %v4791_v42, 1  ;;  %v4805_v50 = vunpack.c.l.bf16 %v3636_v38  ;;  %v4807_v51 = vunpack.c.h.bf16 %v3636_v38 }
  0x2a   : > { %v642_v53 = vsel %vm634_vm0, %v640_v40, %v641_v45  ;;  %v644_v54 = vsel %vm634_vm0, %v641_v45, %v643_v46  ;;  %v663_v55 = vrot.slane %v7124_v47, 1  ;;  %v7127_v56 = vunpack.c.l.bf16 %v4794_v43  ;;  %v4869_v45 = vld [vmem:[%s4723_s19 + $0x68] sm:$0x1] }
  0x2b   : > { %v4821_v59 = vpack.i.bf16 %v644_v54, %v642_v53  ;;  %v662_v60 = vsel %vm634_vm0, %v660_v48, %v661_v49  ;;  %v655_v61 = vrot.slane %v4805_v50, 1  ;;  %v656_v62 = vrot.slane %v4807_v51, 1  ;;  %v508_v53 = vld [vmem:[%s4723_s19 + $0x84] sm:$0xff]  }
  0x2c   : > { %3842 = vrot.lane.b32.xlu1 %v4797_v44, %s4607_s20  ;;  %v664_v63 = vsel %vm634_vm0, %v661_v49, %v663_v55  ;;  %v658_v0 = vrot.slane %v7127_v56, 1  ;;  %v4829_v2 = vunpack.c.l.bf16 %v496_v52  ;;  %v4831_v8 = vunpack.c.h.bf16 %v496_v52  ;;  %v4945_v56 = vld [vmem:[%s4723_s19 + $0x98] sm:$0x1] }
  0x2d   : > { %3832 = vrot.lane.b32.xlu0 %v4821_v59, %s4607_s20  ;;  %v4838_v15 = vpack.i.bf16 %v664_v63, %v662_v60  ;;  %v657_v16 = vsel %vm634_vm0, %v655_v61, %v656_v62  ;;  %v7122_v17 = vunpack.c.l.bf16 %v4816_v57  ;;  %v4842_v18 = vunpack.c.l.bf16 %v3637_v58  ;;  %7216 = vst [vmem:[#allocation22_spill] sm:$0xff] %v4945_v56 }
  0x2e   : > { %v659_v20 = vsel %vm634_vm0, %v656_v62, %v658_v0  ;;  %v670_v22 = vrot.slane %v4829_v2, 1  ;;  %v671_v24 = vrot.slane %v4831_v8, 1  ;;  %v4848_v25 = vunpack.c.h.bf16 %v3637_v58 }
  0x2f   : > { %v4856_v30 = vpack.i.bf16 %v659_v20, %v657_v16  ;;  %v673_v31 = vrot.slane %v7122_v17, 1  ;;  %v7125_v32 = vunpack.c.l.bf16 %v4834_v14  ;;  %v665_v34 = vrot.slane %v4842_v18, 1  ;;  %v4892_v16 = vld [vmem:[%s4723_s19 + $0x8c] sm:$0x1] }
  0x30   : > { %3852 = vrot.lane.b32.xlu1 %v4838_v15, %s4607_s20  ;;  %v672_v35 = vsel %vm634_vm0, %v670_v22, %v671_v24  ;;  %v666_v38 = vrot.slane %v4848_v25, 1  ;;  %v4864_v39 = vunpack.c.l.bf16 %v502_v19  ;;  %v4866_v40 = vunpack.c.h.bf16 %v502_v19  ;;  %7207 = vst [vmem:[#allocation13_spill] sm:$0xff] %v4892_v16  ;;  %v3639_v19 = vld [vmem:[%s4723_s19 + $0x78] sm:$0xff]  }
  0x31   : > { %3847 = vrot.lane.b32.xlu0 %v4856_v30, %s4607_s20  ;;  %v674_v46 = vsel %vm634_vm0, %v671_v24, %v673_v31  ;;  %v668_v48 = vrot.slane %v7125_v32, 1  ;;  %v7121_v49 = vunpack.c.l.bf16 %v4851_v26  ;;  %v4877_v52 = vunpack.c.l.bf16 %v3638_v28 }
  0x32   : > { %7204 = vst [vmem:[#allocation10_spill] sm:$0xff] %v4864_v39  ;;  %7205 = vst [vmem:[#allocation11_spill] sm:$0xff] %v4866_v40  ;;  %v4880_v54 = vpack.i.bf16 %v674_v46, %v672_v35  ;;  %v667_v55 = vsel %vm634_vm0, %v665_v34, %v666_v38  ;;  %v680_v58 = vrot.slane %v4864_v39, 1  ;;  %v681_v60 = vrot.slane %v4866_v40, 1  ;;  %v4910_v46 = vld [vmem:[%s4723_s19 + $0x80] sm:$0x1] }
  0x33   : > { %7206 = vst [vmem:[#allocation12_spill] sm:$0xff] %v4877_v52  ;;  %v669_v61 = vsel %vm634_vm0, %v666_v38, %v668_v48  ;;  %v683_v62 = vrot.slane %v7121_v49, 1  ;;  %v4888_v63 = vunpack.c.h.bf16 %v3638_v28  ;;  %v7123_v0 = vunpack.c.l.bf16 %v4869_v45 }
  0x34   : > { %3862 = vrot.lane.b32.xlu1 %v4880_v54, %s4607_s20  ;;  %v4897_v20 = vpack.i.bf16 %v669_v61, %v667_v55  ;;  %v682_v22 = vsel %vm634_vm0, %v680_v58, %v681_v60  ;;  %v675_v24 = vrot.slane %v4877_v52, 1  ;;  %v4901_v31 = vunpack.c.l.bf16 %v508_v53  ;;  %v514_v61 = vld [vmem:[%s4723_s19 + $0x9c] sm:$0xff]  }
  0x35   : > { %v684_v28 = vsel %vm634_vm0, %v681_v60, %v683_v62  ;;  %v676_v34 = vrot.slane %v4888_v63, 1  ;;  %v678_v35 = vrot.slane %v7123_v0, 1  ;;  %v4907_v38 = vunpack.c.h.bf16 %v508_v53  ;;  %v4927_v0 = vld [vmem:[%s4723_s19 + $0xa4] sm:$0x1] }
  0x36   : > { %7208 = vst [vmem:[#allocation14_spill] sm:$0xff] %v4901_v31  ;;  %3857 = vrot.lane.b32.xlu0 %v4897_v20, %s4607_s20  ;;  %v4914_v48 = vpack.i.bf16 %v684_v28, %v682_v22  ;;  %v7128_v55 = vunpack.c.l.bf16 %v4892_v16  ;;  %v690_v58 = vrot.slane %v4901_v31, 1  ;;  %v4918_v60 = vunpack.c.l.bf16 %v3639_v19  ;;  %7213 = vst [vmem:[#allocation19_spill] sm:$0xff] %v4927_v0  ;;  %v3640_v22 = vld [vmem:[%s4723_s19 + $0x90] sm:$0xff]  }
  0x37   : > { %7209 = vst [vmem:[#allocation15_spill] sm:$0xff] %v4907_v38  ;;  %v677_v62 = vsel %vm634_vm0, %v675_v24, %v676_v34  ;;  %v679_v53 = vsel %vm634_vm0, %v676_v34, %v678_v35  ;;  %v691_v49 = vrot.slane %v4907_v38, 1  ;;  %v4924_v17 = vunpack.c.h.bf16 %v3639_v19  ;;  %v4969_v38 = vld [vmem:[%s4723_s19 + $0xbc] sm:$0x1] }
  0x38   : > { %7210 = vst [vmem:[#allocation16_spill] sm:$0xff] %v4914_v48  ;;  %7211 = vst [vmem:[#allocation17_spill] sm:$0xff] %v4918_v60  ;;  %3872 = vrot.lane.b32.xlu1 %v4914_v48, %s4607_s20  ;;  %v4932_v28 = vpack.i.bf16 %v679_v53, %v677_v62  ;;  %v693_v47 = vrot.slane %v7128_v55, 1  ;;  %v7135_v24 = vunpack.c.l.bf16 %v4910_v46  ;;  %v685_v34 = vrot.slane %v4918_v60, 1 }
  0x39   : > { %7212 = vst [vmem:[#allocation18_spill] sm:$0xff] %v4924_v17  ;;  %v692_v19 = vsel %vm634_vm0, %v690_v58, %v691_v49  ;;  %v686_v35 = vrot.slane %v4924_v17, 1  ;;  %v4940_v32 = vunpack.c.l.bf16 %v514_v61  ;;  %v4942_v21 = vunpack.c.h.bf16 %v514_v61  ;;  %7220 = vst [vmem:[#allocation26_spill] sm:$0xff] %v4969_v38 }
  0x3a   : > { %3867 = vrot.lane.b32.xlu0 %v4932_v28, %s4607_s20  ;;  %v694_v62 = vsel %vm634_vm0, %v691_v49, %v693_v47  ;;  %v688_v53 = vrot.slane %v7135_v24, 1  ;;  %v7138_v58 = vunpack.c.l.bf16 %v4927_v0  ;;  %v4953_v55 = vunpack.c.l.bf16 %v3640_v22 }
  0x3b   : > { %7214 = vst [vmem:[#allocation20_spill] sm:$0xff] %v4940_v32  ;;  %7215 = vst [vmem:[#allocation21_spill] sm:$0xff] %v4942_v21  ;;  %v4957_v61 = vpack.i.bf16 %v694_v62, %v692_v19  ;;  %v687_v5 = vsel %vm634_vm0, %v685_v34, %v686_v35  ;;  %v700_v11 = vrot.slane %v4940_v32, 1  ;;  %v701_v48 = vrot.slane %v4942_v21, 1  ;;  %v3641_v19 = vld [vmem:[%s4723_s19 + $0xa8] sm:$0xff]  }
  0x3c   : > { %7217 = vst [vmem:[#allocation23_spill] sm:$0xff] %v4953_v55  ;;  %v689_v16 = vsel %vm634_vm0, %v686_v35, %v688_v53  ;;  %v703_v47 = vrot.slane %v7138_v58, 1  ;;  %v4965_v49 = vunpack.c.h.bf16 %v3640_v22  ;;  %v7146_v24 = vunpack.c.l.bf16 %v4945_v56  ;;  %v3628_v56 = vld [vmem:[%s445_s30] sm:$0xff]  }
  0x3d   : > { %7218 = vst [vmem:[#allocation24_spill] sm:$0xff] %v4957_v61  ;;  %3882 = vrot.lane.b32.xlu1 %v4957_v61, %s4607_s20  ;;  %v4974_v34 = vpack.i.bf16 %v689_v16, %v687_v5  ;;  %v702_v62 = vsel %vm634_vm0, %v700_v11, %v701_v48  ;;  %v695_v35 = vrot.slane %v4953_v55, 1  ;;  %v4978_v53 = vunpack.c.l.bf16 %v520_v37  ;;  %v4990_v5 = vld [vmem:[%s4723_s19 + $0xb0] sm:$0x1] }
  0x3e   : > { %7219 = vst [vmem:[#allocation25_spill] sm:$0xff] %v4965_v49  ;;  %v704_v22 = vsel %vm634_vm0, %v701_v48, %v703_v47  ;;  %v696_v58 = vrot.slane %v4965_v49, 1  ;;  %v698_v0 = vrot.slane %v7146_v24, 1  ;;  %v4987_v61 = vunpack.c.h.bf16 %v520_v37 }
  0x3f   : > { %7221 = vst [vmem:[#allocation27_spill] sm:$0xff] %v4974_v34  ;;  %7222 = vst [vmem:[#allocation28_spill] sm:$0xff] %v4978_v53  ;;  %3877 = vrot.lane.b32.xlu0 %v4974_v34, %s4607_s20  ;;  %v4994_v11 = vpack.i.bf16 %v704_v22, %v702_v62  ;;  %v7154_v16 = vunpack.c.l.bf16 %v4969_v38  ;;  %v710_v21 = vrot.slane %v4978_v53, 1  ;;  %v4998_v32 = vunpack.c.l.bf16 %v3641_v19 }
  0x40   : > { %7223 = vst [vmem:[#allocation29_spill] sm:$0xff] %v4987_v61  ;;  %v697_v48 = vsel %vm634_vm0, %v695_v35, %v696_v58  ;;  %v699_v47 = vsel %vm634_vm0, %v696_v58, %v698_v0  ;;  %v711_v37 = vrot.slane %v4987_v61, 1  ;;  %v5003_v24 = vunpack.c.h.bf16 %v3641_v19  ;;  %v5017_v61 = vld [vmem:[%s445_s30 + $0x8] sm:$0x1] }
  0x41   : > { %7224 = vst [vmem:[#allocation30_spill] sm:$0xff] %v4994_v11  ;;  %7225 = vst [vmem:[#allocation31_spill] sm:$0xff] %v4998_v32  ;;  %3892 = vrot.lane.b32.xlu1 %v4994_v11, %s4607_s20  ;;  %v5007_v62 = vpack.i.bf16 %v699_v47, %v697_v48  ;;  %v713_v22 = vrot.slane %v7154_v16, 1  ;;  %v7164_v34 = vunpack.c.l.bf16 %v4990_v5  ;;  %v705_v53 = vrot.slane %v4998_v32, 1 }
  0x42   : > { %7226 = vst [vmem:[#allocation32_spill] sm:$0xff] %v5003_v24  ;;  %v712_v35 = vsel %vm634_vm0, %v710_v21, %v711_v37  ;;  %v706_v0 = vrot.slane %v5003_v24, 1  ;;  %v823_v58 = vrot.slane %v4735_v6, 2  ;;  %v824_v19 = vrot.slane %v4744_v10, 2 }
  0x43   : > { %7227 = vst [vmem:[#allocation33_spill] sm:$0xff] %v5007_v62  ;;  %3887 = vrot.lane.b32.xlu0 %v5007_v62, %s4607_s20  ;;  %v714_v48 = vsel %vm634_vm0, %v711_v37, %v713_v22  ;;  %v708_v47 = vrot.slane %v7164_v34, 1  ;;  %v7228_v16 = vunpack.c.l.bf16 %v4738_v7  ;;  %v5026_v21 = vunpack.c.l.bf16 %v3628_v56 }
  0x44   : > { %v5028_v38 = vpack.i.bf16 %v714_v48, %v712_v35  ;;  %v707_v6 = vsel %vm634_vm0, %v705_v53, %v706_v0  ;;  %v825_v10 = vsel %vm822_vm1, %v823_v58, %v824_v19  ;;  %v5032_v24 = vunpack.c.h.bf16 %v3628_v56 }
  0x45   : > { %v826_v11 = vrot.slane %v7228_v16, 2  ;;  %7229 = vst [vmem:[#allocation34_spill] sm:$0xff] %v5026_v21  ;;  %v709_v62 = vsel %vm634_vm0, %v706_v0, %v708_v47  ;;  %v7165_v22 = vunpack.c.l.bf16 %v5017_v61  ;;  %v715_v34 = vrot.slane %v5026_v21, 1 }
  0x46   : > { %7230 = vst [vmem:[#allocation35_spill] sm:$0xff] %v5028_v38  ;;  %3902 = vrot.lane.b32.xlu1 %v5028_v38, %s4607_s20  ;;  %v5040_v7 = vpack.i.bf16 %v709_v62, %v707_v6  ;;  %v716_v53 = vrot.slane %v5032_v24, 1  ;;  %v833_v35 = vrot.slane %v4730_v3, 2  ;;  %v834_v0 = vrot.slane %v4732_v4, 2 }
  0x47   : > { %v827_v37 = vsel %vm822_vm1, %v824_v19, %v826_v11  ;;  %v718_v56 = vrot.slane %v7165_v22, 1  ;;  %v7232_v11 = vunpack.c.l.bf16 %v4727_v1  ;;  %v828_v19 = vrot.slane %v4768_v27, 2 }
  0x48   : > { %7231 = vst [vmem:[#allocation36_spill] sm:$0xff] %v5040_v7  ;;  %v3911_v16 = vpack.i.bf16 %v827_v37, %v825_v10  ;;  %3897 = vrot.lane.b32.xlu0 %v5040_v7, %s4607_s20  ;;  %v717_v6 = vsel %vm634_vm0, %v715_v34, %v716_v53  ;;  %v829_v10 = vrot.slane %v4781_v36, 2  ;;  %v7233_v62 = vunpack.c.l.bf16 %v4763_v23 }
  0x49   : > { %v836_v58 = vrot.slane %v7232_v11, 2  ;;  %v843_v47 = vrot.slane %v4805_v50, 2  ;;  %v719_v37 = vsel %vm634_vm0, %v716_v53, %v718_v56  ;;  %v835_v22 = vsel %vm822_vm1, %v833_v35, %v834_v0 }
  0x4a   : > { %v831_v48 = vrot.slane %v7233_v62, 2  ;;  %v844_v11 = vrot.slane %v4807_v51, 2  ;;  %3912 = vrot.lane.b32.xlu1 %v3911_v16, %s4608_s8  ;;  %v5062_v38 = vpack.i.bf16 %v719_v37, %v717_v6  ;;  %v830_v23 = vsel %vm822_vm1, %v828_v19, %v829_v10 }
  0x4b   : > { %v837_v1 = vsel %vm822_vm1, %v834_v0, %v836_v58  ;;  %v7235_v35 = vunpack.c.l.bf16 %v4794_v43  ;;  %v838_v0 = vrot.slane %v4747_v12, 2  ;;  %v839_v16 = vrot.slane %v4749_v13, 2 }
  0x4c   : > { %7234 = vst [vmem:[#allocation37_spill] sm:$0xff] %v5062_v38  ;;  %v5064_v34 = vpack.i.bf16 %v837_v1, %v835_v22  ;;  %v832_v62 = vsel %vm822_vm1, %v829_v10, %v831_v48  ;;  %v845_v53 = vsel %vm822_vm1, %v843_v47, %v844_v11  ;;  %3907 = vrot.lane.b32.xlu0 %v5062_v38, %s4607_s20  ;;  %v7236_v22 = vunpack.c.l.bf16 %v4742_v9  ;;  %s4610_s20 = smov 20  }
  0x4d   : > { %v5068_v7 = vpack.i.bf16 %v832_v62, %v830_v23  ;;  %v846_v56 = vrot.slane %v7235_v35, 2  ;;  %v853_v19 = vrot.slane %v4842_v18, 2  ;;  %v854_v6 = vrot.slane %v4848_v25, 2 }
  0x4e   : > { %v841_v58 = vrot.slane %v7236_v22, 2  ;;  %v7237_v48 = vunpack.c.l.bf16 %v4834_v14  ;;  %v848_v47 = vrot.slane %v4789_v41, 2  ;;  %v849_v37 = vrot.slane %v4791_v42, 2  ;;  %3922 = vrot.lane.b32.xlu1 %v5064_v34, %s4608_s8 }
  0x4f   : > { %v847_v10 = vsel %vm822_vm1, %v844_v11, %v846_v56  ;;  %v840_v9 = vsel %vm822_vm1, %v838_v0, %v839_v16  ;;  %v855_v11 = vsel %vm822_vm1, %v853_v19, %v854_v6  ;;  %v7238_v35 = vunpack.c.l.bf16 %v4778_v33 }
  0x50   : > { %v856_v43 = vrot.slane %v7237_v48, 2  ;;  %v5088_v1 = vpack.i.bf16 %v847_v10, %v845_v53  ;;  %v842_v23 = vsel %vm822_vm1, %v839_v16, %v841_v58  ;;  %3917 = vrot.lane.b32.xlu0 %v5068_v7, %s4608_s8  ;;  %v850_v22 = vsel %vm822_vm1, %v848_v47, %v849_v37 }
  0x51   : > { %v5092_v62 = vpack.i.bf16 %v842_v23, %v840_v9  ;;  %v851_v56 = vrot.slane %v7238_v35, 2  ;;  %v863_v53 = vrot.slane %v4877_v52, 2  ;;  %v864_v0 = vrot.slane %v4888_v63, 2 }
  0x52   : > { %v857_v14 = vsel %vm822_vm1, %v854_v6, %v856_v43  ;;  %v7239_v16 = vunpack.c.l.bf16 %v4869_v45  ;;  %v858_v19 = vrot.slane %v4829_v2, 2  ;;  %v859_v6 = vrot.slane %v4831_v8, 2  ;;  %3932 = vrot.lane.b32.xlu1 %v5088_v1, %s4608_s8 }
  0x53   : > { %v852_v10 = vsel %vm822_vm1, %v849_v37, %v851_v56  ;;  %v7240_v33 = vunpack.c.l.bf16 %v4816_v57  ;;  %v5112_v43 = vpack.i.bf16 %v857_v14, %v855_v11  ;;  %v865_v47 = vsel %vm822_vm1, %v863_v53, %v864_v0 }
  0x54   : > { %v866_v58 = vrot.slane %v7239_v16, 2  ;;  %3927 = vrot.lane.b32.xlu0 %v5092_v62, %s4608_s8  ;;  %v5118_v45 = vpack.i.bf16 %v852_v10, %v850_v22  ;;  %v860_v37 = vsel %vm822_vm1, %v858_v19, %v859_v6  ;;  %v868_v57 = vrot.slane %v4864_v39, 2  ;;  %v4492_v10 = vld [vmem:[%s7116_s3 + $0x8] sm:$0xff]  }
  0x55   : > { %v861_v48 = vrot.slane %v7240_v33, 2  ;;  %v869_v35 = vrot.slane %v4866_v40, 2  ;;  %v7241_v11 = vunpack.c.l.bf16 %v4851_v26  ;;  %v3961_v26 = vpack.i.bf16 %v4781_v36, %v4768_v27 }
  0x56   : > { %v867_v9 = vsel %vm822_vm1, %v864_v0, %v866_v58  ;;  %3942 = vrot.lane.b32.xlu1 %v5112_v43, %s4608_s8  ;;  %v4491_v58 = vld [vmem:[%s7116_s3] sm:$0xff]   ;;  %v3981_v19 = vpack.i.bf16 %v4732_v4, %v4730_v3 }
  0x57   : > { %v862_v23 = vsel %vm822_vm1, %v859_v6, %v861_v48  ;;  %v871_v14 = vrot.slane %v7241_v11, 2  ;;  %v5128_v56 = vpack.i.bf16 %v867_v9, %v865_v47  ;;  %v870_v53 = vsel %vm822_vm1, %v868_v57, %v869_v35  ;;  %3677 = vmatprep.subr.bf16.mxu0 %v4491_v58  ;;  %3747 = vmatprep.subr.bf16.mxu1 %v4491_v58  ;;  %v4493_v6 = vld [vmem:[%s7116_s3 + $0x10] ss:$0 sps:$4 sm:$0x33]  }
  0x58   : > { %3937 = vrot.lane.b32.xlu0 %v5118_v45, %s4608_s8  ;;  %v5132_v22 = vpack.i.bf16 %v862_v23, %v860_v37  ;;  %3678 = vmatpush3.bf16.msra.mxu0 %v4491_v58  ;;  %v2235_v33 = vsel %vm2233_vm2, %v4493_v6, 0  ;;  %v4021_v48 = vpack.i.bf16 %v4749_v13, %v4747_v12  ;;  %v4171_v23 = vpack.i.bf16 %v4888_v63, %v4877_v52  ;;  %v7266_v52 = vld [vmem:[#allocation26_spill] sm:$0xff] }
  0x59   : > { %v872_v0 = vsel %vm822_vm1, %v869_v35, %v871_v14  ;;  %3679 = vmatprep.subr.bf16.mxu0 %v4492_v10  ;;  %3750 = vmatpush3.bf16.msra.mxu1 %v4491_v58  ;;  %v874_v58 = vrot.slane %v4924_v17, 2 }
  0x5a   : > { %3952 = vrot.lane.b32.xlu1 %v5128_v56, %s4608_s8  ;;  %v5142_v16 = vpack.i.bf16 %v872_v0, %v870_v53  ;;  %3748 = vmatprep.subr.bf16.mxu1 %v4492_v10  ;;  %v4201_v53 = vpack.i.bf16 %v4866_v40, %v4864_v39  ;;  %v7259_v39 = vld [vmem:[#allocation19_spill] sm:$0xff] }
  0x5b   : > { %v7260_v40 = vunpack.c.l.bf16 %v7259_v39 }
  0x5c   : > { %3947 = vrot.lane.b32.xlu0 %v5132_v22, %s4608_s8  ;;  %3680 = vmatpush3.bf16.msra.mxu0 %v4492_v10 }
  0x5d   : > { %3751 = vmatpush3.bf16.msra.mxu1 %v4492_v10  ;;  %3753 = vmatprep.subr.msk.bf16.mxu0 %vm2233_vm2, %v4493_v6  ;;  %v7250_v10 = vunpack.c.l.bf16 %v4910_v46  ;;  %v7252_v46 = vld [vmem:[#allocation13_spill] sm:$0xff] }
  0x5e   : > { %3962 = vrot.lane.b32.xlu1 %v3961_v26, %s4609_s17  ;;  %3754 = vmatprep.subr.msk.bf16.mxu1 %vm2233_vm2, %v4493_v6  ;;  %v878_v6 = vrot.slane %v4901_v31, 2 }
  0x60   : > { %3957 = vrot.lane.b32.xlu0 %v5142_v16, %s4608_s8  ;;  %3682 = vmatpush3.bf16.msra.mxu0 %v2235_v33 }
  0x61   : > { %3752 = vmatpush3.bf16.msra.mxu1 %v2235_v33  ;;  %v7251_v33 = vld [vmem:[#allocation15_spill] sm:$0xff] }
  0x62   : > { %3972 = vrot.lane.b32.xlu1 %v5068_v7, %s4610_s20 }
  0x64   : > { %3967 = vrot.lane.b32.xlu0 %v4821_v59, %s4611_s21 }
  0x66   : > { %3982 = vrot.lane.b32.xlu1 %v3981_v19, %s4612_s22 }
  0x68   : > { %3977 = vrot.lane.b32.xlu0 %v3961_v26, %s4612_s22  ;;  %v873_v26 = vrot.slane %v4918_v60, 2 }
  0x6a   : > { %3992 = vrot.lane.b32.xlu1 %v4771_v29, %s4613_s10 }
  0x6c   : > { %3987 = vrot.lane.b32.xlu0 %v4821_v59, %s4613_s10  ;;  %v4111_v59 = vpack.i.bf16 %v4848_v25, %v4842_v18 }
  0x6e   : > { %4002 = vrot.lane.b32.xlu1 %v5064_v34, %s4614_s12 }
  0x70   : > { %3997 = vrot.lane.b32.xlu0 %v5068_v7, %s4614_s12 }
  0x72   : > { %4012 = vrot.lane.b32.xlu1 %v4771_v29, %s4611_s21  ;;  %v4051_v29 = vpack.i.bf16 %v4807_v51, %v4805_v50 }
  0x74   : > { %4007 = vrot.lane.b32.xlu0 %v3981_v19, %s4609_s17  ;;  %v876_v19 = vrot.slane %v7250_v10, 2  ;;  %v884_v10 = vrot.slane %v4965_v49, 2 }
  0x76   : > { %4022 = vrot.lane.b32.xlu1 %v4021_v48, %s4612_s22 }
  0x78   : > { %4017 = vrot.lane.b32.xlu0 %v5064_v34, %s4610_s20 }
  0x7a   : > { %4032 = vrot.lane.b32.xlu1 %v5092_v62, %s4614_s12 }
  0x7c   : > { %4027 = vrot.lane.b32.xlu0 %v4797_v44, %s4613_s10 }
  0x7e   : > { %4042 = vrot.lane.b32.xlu1 %v4797_v44, %s4611_s21  ;;  %v4081_v44 = vpack.i.bf16 %v4791_v42, %v4789_v41 }
  0x80   : > { %4037 = vrot.lane.b32.xlu0 %v4021_v48, %s4609_s17  ;;  %v879_v48 = vrot.slane %v7251_v33, 2 }
  0x82   : > { %4052 = vrot.lane.b32.xlu1 %v4051_v29, %s4612_s22 }
  0x84   : > { %4047 = vrot.lane.b32.xlu0 %v5092_v62, %s4610_s20  ;;  %v4141_v62 = vpack.i.bf16 %v4831_v8, %v4829_v2 }
  0x86   : > { %4062 = vrot.lane.b32.xlu1 %v5088_v1, %s4614_s12 }
  0x88   : > { %4057 = vrot.lane.b32.xlu0 %v4856_v30, %s4613_s10 }
  0x8a   : > { %4072 = vrot.lane.b32.xlu1 %v4856_v30, %s4611_s21 }
  0x8c   : > { %4067 = vrot.lane.b32.xlu0 %v4051_v29, %s4609_s17 }
  0x8e   : > { %4082 = vrot.lane.b32.xlu1 %v4081_v44, %s4612_s22 }
  0x90   : > { %4077 = vrot.lane.b32.xlu0 %v5088_v1, %s4610_s20 }
  0x92   : > { %4092 = vrot.lane.b32.xlu1 %v5118_v45, %s4614_s12 }
  0x94   : > { %4087 = vrot.lane.b32.xlu0 %v4838_v15, %s4613_s10 }
  0x96   : > { %4102 = vrot.lane.b32.xlu1 %v4838_v15, %s4611_s21 }
  0x98   : > { %4097 = vrot.lane.b32.xlu0 %v4081_v44, %s4609_s17  ;;  %v875_v44 = vsel %vm822_vm1, %v873_v26, %v874_v58  ;;  %v4231_v26 = vpack.i.bf16 %v4924_v17, %v4918_v60 }
  0x9a   : > { %v5213_v30 = vpop.permute.xlu1 %3837  ;;  %4112 = vrot.lane.b32.xlu1 %v4111_v59, %s4612_s22  ;;  %v5216_v7 = vpop.permute.xlu0 %3827 }
  0x9c   : > { %4107 = vrot.lane.b32.xlu0 %v5118_v45, %s4610_s20 }
  0x9e   : > { %v5220_v34 = vpop.permute.xlu1 %3842  ;;  %4122 = vrot.lane.b32.xlu1 %v5112_v43, %s4614_s12 }
  0x9f   : > { %v5224_v15 = vpop.permute.xlu0 %3832 }
  0xa0   : > { %4117 = vrot.lane.b32.xlu0 %v4897_v20, %s4613_s10 }
  0xa2   : > { %v5228_v1 = vpop.permute.xlu1 %3852  ;;  %4132 = vrot.lane.b32.xlu1 %v4897_v20, %s4611_s21 }
  0xa3   : > { %v5234_v47 = vpop.permute.xlu0 %3847 }
  0xa4   : > { %4127 = vrot.lane.b32.xlu0 %v4111_v59, %s4609_s17  ;;  %v877_v59 = vsel %vm822_vm1, %v874_v58, %v876_v19  ;;  %v880_v58 = vsel %vm822_vm1, %v878_v6, %v879_v48  ;;  %v893_v6 = vrot.slane %v4998_v32, 2 }
  0xa6   : > { %4142 = vrot.lane.b32.xlu1 %v4141_v62, %s4612_s22  ;;  %v5238_v9 = vpop.permute.xlu1 %3862 }
  0xa8   : > { %4137 = vrot.lane.b32.xlu0 %v5112_v43, %s4610_s20  ;;  %v5242_v45 = vpop.permute.xlu0 %3857 }
  0xaa   : > { %4152 = vrot.lane.b32.xlu1 %v5132_v22, %s4614_s12  ;;  %v5246_v20 = vpop.permute.xlu1 %3872 }
  0xab   : > { %7242 = vst [vmem:[#allocation38_spill] sm:$0xff] %v5246_v20  ;;  %v891_v20 = vrot.slane %v7260_v40, 2 }
  0xac   : > { %4147 = vrot.lane.b32.xlu0 %v4880_v54, %s4613_s10  ;;  %v5250_v37 = vpop.permute.xlu0 %3867 }
  0xae   : > { %4162 = vrot.lane.b32.xlu1 %v4880_v54, %s4611_s21 }
  0xaf   : > { %v5256_v57 = vpop.permute.xlu1 %3882 }
  0xb0   : > { %7243 = vst [vmem:[#allocation39_spill] sm:$0xff] %v5256_v57  ;;  %4157 = vrot.lane.b32.xlu0 %v4141_v62, %s4609_s17  ;;  %v7253_v62 = vunpack.c.l.bf16 %v7252_v46  ;;  %v5314_v57 = vpack.i.bf16 %v877_v59, %v875_v44  ;;  %v7261_v59 = vld [vmem:[#allocation32_spill] sm:$0xff] }
  0xb1   : > { %v5259_v43 = vpop.permute.xlu0 %3877  ;;  %v894_v17 = vrot.slane %v7261_v59, 2 }
  0xb2   : > { %7244 = vst [vmem:[#allocation40_spill] sm:$0xff] %v5259_v43  ;;  %4172 = vrot.lane.b32.xlu1 %v4171_v23, %s4612_s22 }
  0xb3   : > { %v5262_v35 = vpop.permute.xlu1 %3892 }
  0xb4   : > { %7245 = vst [vmem:[#allocation41_spill] sm:$0xff] %v5262_v35  ;;  %4167 = vrot.lane.b32.xlu0 %v5132_v22, %s4610_s20  ;;  %v7256_v35 = vld [vmem:[#allocation16_spill] sm:$0xff] }
  0xb5   : > { %v5266_v11 = vpop.permute.xlu0 %3887 }
  0xb6   : > { %7246 = vst [vmem:[#allocation42_spill] sm:$0xff] %v5266_v11  ;;  %4182 = vrot.lane.b32.xlu1 %v5128_v56, %s4614_s12 }
  0xb8   : > { %4177 = vrot.lane.b32.xlu0 %v4932_v28, %s4613_s10  ;;  %v5272_v54 = vpop.permute.xlu1 %3902 }
  0xb9   : > { %7247 = vst [vmem:[#allocation43_spill] sm:$0xff] %v5272_v54 }
  0xba   : > { %v5274_v14 = vpop.permute.xlu0 %3897  ;;  %4192 = vrot.lane.b32.xlu1 %v4932_v28, %s4611_s21 }
  0xbb   : > { %7248 = vst [vmem:[#allocation44_spill] sm:$0xff] %v5274_v14 }
  0xbc   : > { %4187 = vrot.lane.b32.xlu0 %v4171_v23, %s4609_s17  ;;  %v5281_v22 = vpop.permute.xlu1 %3912  ;;  %v881_v23 = vrot.slane %v7253_v62, 2  ;;  %v7258_v62 = vld [vmem:[#allocation21_spill] sm:$0xff] }
  0xbd   : > { %v889_v43 = vrot.slane %v7258_v62, 2 }
  0xbe   : > { %v5283_v0 = vpop.permute.xlu0 %3907  ;;  %4202 = vrot.lane.b32.xlu1 %v4201_v53, %s4612_s22 }
  0xbf   : > { %7249 = vst [vmem:[#allocation45_spill] sm:$0xff] %v5283_v0  ;;  %v7254_v0 = vld [vmem:[#allocation22_spill] sm:$0xff] }
  0xc0   : > { %4197 = vrot.lane.b32.xlu0 %v5128_v56, %s4610_s20  ;;  %v5292_v28 = vpop.permute.xlu1 %3922  ;;  %v883_v56 = vrot.slane %v4953_v55, 2  ;;  %v7255_v54 = vunpack.c.l.bf16 %v7254_v0  ;;  %v882_v0 = vsel %vm822_vm1, %v879_v48, %v881_v23  ;;  %v5335_v48 = vpack.i.bf16 %v7251_v33, %v4901_v31 }
  0xc1   : > { %v7262_v23 = vunpack.c.l.bf16 %v4990_v5  ;;  %v5339_v40 = vpack.i.bf16 %v882_v0, %v880_v58  ;;  %v892_v31 = vsel %vm822_vm1, %v889_v43, %v891_v20  ;;  %v895_v5 = vsel %vm822_vm1, %v893_v6, %v894_v17 }
  0xc2   : > { %v5296_v29 = vpop.permute.xlu0 %3917  ;;  %4212 = vrot.lane.b32.xlu1 %v5142_v16, %s4614_s12  ;;  %v886_v14 = vrot.slane %v7255_v54, 2  ;;  %v7257_v54 = vld [vmem:[#allocation20_spill] sm:$0xff]  ;;  %v885_v60 = vsel %vm822_vm1, %v883_v56, %v884_v10 }
  0xc3   : > { %v888_v46 = vrot.slane %v7257_v54, 2  ;;  %v896_v39 = vrot.slane %v7262_v23, 2  ;;  %v7264_v23 = vld [vmem:[#allocation28_spill] sm:$0xff] }
  0xc4   : > { %4207 = vrot.lane.b32.xlu0 %v7256_v35, %s4613_s10  ;;  %v5310_v11 = vpop.permute.xlu1 %3932  ;;  %v887_v44 = vsel %vm822_vm1, %v884_v10, %v886_v14  ;;  %v5343_v14 = vpack.i.bf16 %v4965_v49, %v4953_v55  ;;  %v898_v55 = vrot.slane %v7264_v23, 2  ;;  %v7265_v49 = vld [vmem:[#allocation29_spill] sm:$0xff] }
  0xc5   : > { %v890_v10 = vsel %vm822_vm1, %v888_v46, %v889_v43  ;;  %v897_v0 = vsel %vm822_vm1, %v894_v17, %v896_v39  ;;  %v899_v33 = vrot.slane %v7265_v49, 2  ;;  %v5364_v46 = vpack.i.bf16 %v7258_v62, %v7257_v54  ;;  %v7272_v62 = vld [vmem:[#allocation8_spill] sm:$0xff] }
  0xc6   : > { %v5317_v19 = vpop.permute.xlu0 %3927  ;;  %4222 = vrot.lane.b32.xlu1 %v7256_v35, %s4611_s21  ;;  %v5366_v20 = vpack.i.bf16 %v892_v31, %v890_v10  ;;  %v5374_v17 = vpack.i.bf16 %v7261_v59, %v4998_v32  ;;  %v5378_v6 = vpack.i.bf16 %v897_v0, %v895_v5  ;;  %v3830_v39 = vunpack.i.h.bf16 %v5216_v7  ;;  %v7269_v10 = vld [vmem:[#allocation27_spill] sm:$0xff] }
  0xc7   : > { %v3829_v31 = vunpack.i.l.bf16 %v5216_v7  ;;  %v900_v54 = vsel %vm822_vm1, %v898_v55, %v899_v33  ;;  %v3845_v59 = vunpack.i.h.bf16 %v5220_v34  ;;  %v5393_v7 = vpack.i.bf16 %v7265_v49, %v7264_v23 }
  0xc8   : > { %4217 = vrot.lane.b32.xlu0 %v4201_v53, %s4609_s17  ;;  %v5331_v35 = vpop.permute.xlu1 %3942  ;;  %v5348_v53 = vpack.i.bf16 %v887_v44, %v885_v60  ;;  %v7267_v60 = vunpack.c.l.bf16 %v7266_v52  ;;  %v3839_v52 = vunpack.i.l.bf16 %v5213_v30  ;;  %v3855_v49 = vunpack.i.h.bf16 %v5228_v1 }
  0xca   : > { %v5345_v56 = vpop.permute.xlu0 %3937  ;;  %4232 = vrot.lane.b32.xlu1 %v4231_v26, %s4612_s22  ;;  %v901_v44 = vrot.slane %v7267_v60, 2  ;;  %v5401_v55 = vsel %vm1617_vm3, %v4730_v3, %v3839_v52  ;;  %v3920_v52 = vunpack.i.h.bf16 %v5296_v29 }
  0xcc   : > { %4227 = vrot.lane.b32.xlu0 %v5142_v16, %s4610_s20  ;;  %v5355_v58 = vpop.permute.xlu1 %3952  ;;  %v3840_v16 = vunpack.i.h.bf16 %v5213_v30  ;;  %v902_v32 = vsel %vm822_vm1, %v899_v33, %v901_v44  ;;  %v3844_v30 = vunpack.i.l.bf16 %v5220_v34  ;;  %v7271_v34 = vld [vmem:[#allocation9_spill] sm:$0xff] }
  0xcd   : > { %7263 = vst [vmem:[#allocation13_spill] sm:$0xff] %v5355_v58  ;;  %v5403_v33 = vpack.i.bf16 %v902_v32, %v900_v54  ;;  %v1619_v44 = vsel %vm1617_vm3, %v7271_v34, %v3830_v39  ;;  %v3835_v32 = vunpack.i.h.bf16 %v5224_v15  ;;  %v3834_v54 = vunpack.i.l.bf16 %v5224_v15 }
  0xce   : > { %v5368_v43 = vpop.permute.xlu0 %3947  ;;  %4242 = vrot.lane.b32.xlu1 %v5314_v57, %s4614_s12  ;;  %v5397_v0 = vsel %vm1617_vm3, %v4732_v4, %v3840_v16  ;;  %v5415_v4 = vsel %vm1617_vm3, %v4749_v13, %v3845_v59  ;;  %v5419_v3 = vsel %vm1617_vm3, %v4747_v12, %v3844_v30  ;;  %v3914_v16 = vunpack.i.l.bf16 %v5281_v22 }
  0xcf   : > { %7268 = vst [vmem:[#allocation22_spill] sm:$0xff] %v5368_v43  ;;  %v3919_v39 = vunpack.i.l.bf16 %v5296_v29  ;;  %v5431_v59 = vpack.i.bf16 %v5032_v24, %v5026_v21  ;;  %v903_v29 = vrot.slane %v5026_v21, 2  ;;  %v1620_v34 = vsel %vm1617_vm3, %v4768_v27, %v3834_v54 }
  0xd0   : > { %4237 = vrot.lane.b32.xlu0 %v7269_v10, %s4613_s10  ;;  %v3963_v60 = vpop.permute.xlu1 %3962 }
  0xd1   : > { %v3965_v13 = vunpack.i.h.bf16 %v3963_v60  ;;  %v3964_v12 = vunpack.i.l.bf16 %v3963_v60  ;;  %v1621_v60 = vsel %vm1617_vm3, %v4781_v36, %v3835_v32  ;;  %v5448_v58 = vsel %vm1652_vm4, %v1620_v34, %v3919_v39  ;;  %v7273_v36 = vld [vmem:[#allocation24_spill] sm:$0xff] }
  0xd2   : > { %v5388_v5 = vpop.permute.xlu0 %3957  ;;  %4252 = vrot.lane.b32.xlu1 %v4231_v26, %s4609_s17  ;;  %v1618_v26 = vsel %vm1617_vm3, %v7272_v62, %v3829_v31  ;;  %v3915_v62 = vunpack.i.h.bf16 %v5281_v22  ;;  %v5451_v21 = vsel %vm1652_vm4, %v1621_v60, %v3920_v52 }
  0xd3   : > { %7270 = vst [vmem:[#allocation16_spill] sm:$0xff] %v5388_v5  ;;  %v1653_v5 = vsel %vm1652_vm4, %v1618_v26, %v3914_v16  ;;  %v1690_v27 = vsel %vm1687_vm5, %v5448_v58, %v3964_v12  ;;  %v1691_v32 = vsel %vm1687_vm5, %v5451_v21, %v3965_v13 }
  0xd4   : > { %4247 = vrot.lane.b32.xlu0 %v5314_v57, %s4608_s8  ;;  %v5411_v23 = vpop.permute.xlu1 %3972  ;;  %v1688_v54 = vsel %vm1687_vm5, %v1653_v5, %v3964_v12 }
  0xd5   : > { %v3975_v26 = vunpack.i.h.bf16 %v5411_v23 }
  0xd6   : > { %v3968_v31 = vpop.permute.xlu0 %3967  ;;  %4262 = vrot.lane.b32.xlu1 %v5314_v57, %s4610_s20 }
  0xd7   : > { %v3970_v15 = vunpack.i.h.bf16 %v3968_v31  ;;  %v3969_v30 = vunpack.i.l.bf16 %v3968_v31 }
  0xd8   : > { %4257 = vrot.lane.b32.xlu0 %v7269_v10, %s4611_s21  ;;  %v5435_v22 = vpop.permute.xlu1 %3982  ;;  %v1654_v10 = vsel %vm1652_vm4, %v1619_v44, %v3915_v62  ;;  %v3974_v44 = vunpack.i.l.bf16 %v5411_v23 }
  0xd9   : > { %v1689_v62 = vsel %vm1687_vm5, %v1654_v10, %v3965_v13  ;;  %v1755_v16 = vsel %vm1752_vm6, %v1690_v27, %v3969_v30  ;;  %v1756_v52 = vsel %vm1752_vm6, %v1691_v32, %v3970_v15  ;;  %v1753_v60 = vsel %vm1752_vm6, %v1688_v54, %v3969_v30 }
  0xda   : > { %v3978_v57 = vpop.permute.xlu0 %3977  ;;  %4272 = vrot.lane.b32.xlu1 %v7273_v36, %s4613_s10  ;;  %v1754_v34 = vsel %vm1752_vm6, %v1689_v62, %v3970_v15  ;;  %v1820_v32 = vsel %vm1817_vm7, %v1755_v16, %v3974_v44  ;;  %v1821_v30 = vsel %vm1817_vm7, %v1756_v52, %v3975_v26  ;;  %v7274_v15 = vrot.slane %v5032_v24, 2 }
  0xdb   : > { %v3980_v5 = vunpack.i.h.bf16 %v3978_v57  ;;  %v3979_v13 = vunpack.i.l.bf16 %v3978_v57  ;;  %v7275_v62 = vunpack.c.l.bf16 %v5017_v61  ;;  %v1818_v10 = vsel %vm1817_vm7, %v1753_v60, %v3974_v44 }
  0xdc   : > { %4267 = vrot.lane.b32.xlu0 %v5335_v48, %s4612_s22  ;;  %v5467_v39 = vpop.permute.xlu1 %3992  ;;  %v905_v54 = vsel %vm822_vm1, %v903_v29, %v7274_v15  ;;  %v1819_v16 = vsel %vm1817_vm7, %v1754_v34, %v3975_v26  ;;  %v7276_v52 = vunpack.i.l.bf16 %v5435_v22  ;;  %v7277_v29 = vunpack.i.h.bf16 %v5435_v22 }
  0xdd   : > { %v906_v31 = vrot.slane %v7275_v62, 2  ;;  %v7278_v62 = vunpack.i.l.bf16 %v5467_v39  ;;  %v7279_v44 = vunpack.i.h.bf16 %v5467_v39  ;;  %v1883_v34 = vsel %vm1882_vm8, %v1818_v10, %v3979_v13 }
  0xde   : > { %v3988_v27 = vpop.permute.xlu0 %3987  ;;  %4282 = vrot.lane.b32.xlu1 %v5339_v40, %s4608_s8  ;;  %v1885_v38 = vsel %vm1882_vm8, %v1820_v32, %v7276_v52  ;;  %v1886_v61 = vsel %vm1882_vm8, %v1821_v30, %v7277_v29  ;;  %v1884_v32 = vsel %vm1882_vm8, %v1819_v16, %v3980_v5 }
  0xdf   : > { %v3990_v57 = vunpack.i.h.bf16 %v3988_v27  ;;  %v3989_v23 = vunpack.i.l.bf16 %v3988_v27  ;;  %v1950_v43 = vsel %vm1947_vm9, %v1885_v38, %v7278_v62  ;;  %v1951_v26 = vsel %vm1947_vm9, %v1886_v61, %v7279_v44 }
  0xe0   : > { %4277 = vrot.lane.b32.xlu0 %v5339_v40, %s4614_s12  ;;  %v5486_v12 = vpop.permute.xlu1 %4002  ;;  %v3925_v61 = vunpack.i.h.bf16 %v5292_v28  ;;  %v3924_v62 = vunpack.i.l.bf16 %v5292_v28 }
  0xe1   : > { %v4005_v15 = vunpack.i.h.bf16 %v5486_v12  ;;  %v4004_v27 = vunpack.i.l.bf16 %v5486_v12  ;;  %v1948_v5 = vsel %vm1947_vm9, %v1883_v34, %v3989_v23  ;;  %v1949_v13 = vsel %vm1947_vm9, %v1884_v32, %v3990_v57 }
  0xe2   : > { %v3998_v60 = vpop.permute.xlu0 %3997  ;;  %4292 = vrot.lane.b32.xlu1 %v7273_v36, %s4611_s21  ;;  %v3849_v23 = vunpack.i.l.bf16 %v5234_v47  ;;  %v7281_v34 = vrot.slane %v5032_v24, 2 }
  0xe3   : > { %v2015_v30 = vsel %vm2012_vm10, %v1950_v43, %v4004_v27  ;;  %v2016_v38 = vsel %vm2012_vm10, %v1951_v26, %v4005_v15  ;;  %v4000_v52 = vunpack.i.h.bf16 %v3998_v60  ;;  %v3999_v29 = vunpack.i.l.bf16 %v3998_v60 }
  0xe4   : > { %4287 = vrot.lane.b32.xlu0 %v5335_v48, %s4609_s17  ;;  %v4013_v36 = vpop.permute.xlu1 %4012  ;;  %v5522_v43 = vsel %vm1617_vm3, %v4791_v42, %v3855_v49  ;;  %v2078_v10 = vpack.c.bf16 %v2016_v38, %v2015_v30  ;;  %v7280_v26 = vunpack.i.l.bf16 %v5228_v1  ;;  %v3850_v48 = vunpack.i.h.bf16 %v5234_v47 }
  0xe5   : > { %v2013_v16 = vsel %vm2012_vm10, %v1948_v5, %v3999_v29  ;;  %v2014_v44 = vsel %vm2012_vm10, %v1949_v13, %v4000_v52  ;;  %v907_v32 = vsel %vm822_vm1, %v7281_v34, %v906_v31  ;;  %v5541_v1 = vsel %vm1652_vm4, %v5397_v0, %v3925_v61 }
  0xe6   : > { %v5530_v28 = vsel %vm1617_vm3, %v4789_v41, %v7280_v26  ;;  %v4008_v57 = vpop.permute.xlu0 %4007  ;;  %4302 = vrot.lane.b32.xlu1 %v5343_v14, %s4612_s22  ;;  %v2077_v42 = vpack.c.bf16 %v2014_v44, %v2013_v16  ;;  %v5545_v41 = vsel %vm1652_vm4, %v5401_v55, %v3924_v62  ;;  %v4015_v47 = vunpack.i.h.bf16 %v4013_v36  ;;  %v7282_v44 = vld [vmem:[#allocation33_spill] sm:$0xff] }
  0xe7   : > { %v4010_v49 = vunpack.i.h.bf16 %v4008_v57  ;;  %v4009_v60 = vunpack.i.l.bf16 %v4008_v57  ;;  %v4014_v30 = vunpack.i.l.bf16 %v4013_v36  ;;  %v5567_v29 = vsel %vm1617_vm3, %v4805_v50, %v3849_v23 }
  0xe8   : > { %4297 = vrot.lane.b32.xlu0 %v5339_v40, %s4610_s20  ;;  %3683 = vmatprep.mubr.msk.bf16.mxu0 %vm2136_vm11, %v2077_v42  ;;  %v5550_v38 = vpop.permute.xlu1 %4022  ;;  %v5563_v40 = vsel %vm1617_vm3, %v4807_v51, %v3850_v48  ;;  %v3865_v61 = vunpack.i.h.bf16 %v5238_v9  ;;  %v7283_v42 = vunpack.i.l.bf16 %v5435_v22 }
  0xe9   : > { %v1695_v31 = vsel %vm1687_vm5, %v5541_v1, %v4010_v49  ;;  %v1692_v0 = vsel %vm1687_vm5, %v5448_v58, %v4009_v60  ;;  %v1693_v52 = vsel %vm1687_vm5, %v5451_v21, %v4010_v49  ;;  %v1694_v55 = vsel %vm1687_vm5, %v5545_v41, %v4009_v60  ;;  %3684 = vmatmul.mubr.msk.bf16.vlgmr.msra.gmra.mrb[0].mxu0 %vm2136_vm11, %v2078_v10 }
  0xea   : > { %v4018_v62 = vpop.permute.xlu0 %4017  ;;  %4312 = vrot.lane.b32.xlu1 %v5348_v53, %s4614_s12  ;;  %v5572_v21 = vpack.i.bf16 %v907_v32, %v905_v54  ;;  %v4025_v58 = vunpack.i.h.bf16 %v5550_v38  ;;  %v4024_v36 = vunpack.i.l.bf16 %v5550_v38  ;;  %v1757_v51 = vsel %vm1752_vm6, %v1692_v0, %v4014_v30 }
  0xeb   : > { %v4020_v5 = vunpack.i.h.bf16 %v4018_v62  ;;  %v4019_v13 = vunpack.i.l.bf16 %v4018_v62  ;;  %v1758_v10 = vsel %vm1752_vm6, %v1693_v52, %v4015_v47  ;;  %v1759_v50 = vsel %vm1752_vm6, %v1694_v55, %v4014_v30 }
  0xec   : > { %v1760_v16 = vsel %vm1752_vm6, %v1695_v31, %v4015_v47  ;;  %4307 = vrot.lane.b32.xlu0 %v7282_v44, %s4613_s10  ;;  %v5582_v26 = vpop.permute.xlu1 %4032  ;;  %v7284_v60 = vunpack.i.h.bf16 %v5435_v22  ;;  %v3930_v31 = vunpack.i.h.bf16 %v5317_v19  ;;  %v3929_v0 = vunpack.i.l.bf16 %v5317_v19 }
  0xed   : > { %v1822_v54 = vsel %vm1817_vm7, %v1757_v51, %v4019_v13  ;;  %v1823_v48 = vsel %vm1817_vm7, %v1758_v10, %v4020_v5  ;;  %v1824_v23 = vsel %vm1817_vm7, %v1759_v50, %v4019_v13  ;;  %v1825_v57 = vsel %vm1817_vm7, %v1760_v16, %v4020_v5 }
  0xee   : > { %v1887_v49 = vsel %vm1882_vm8, %v1822_v54, %v7283_v42  ;;  %v1888_v34 = vsel %vm1882_vm8, %v1823_v48, %v7284_v60  ;;  %v4035_v32 = vunpack.i.h.bf16 %v5582_v26  ;;  %v4034_v47 = vunpack.i.l.bf16 %v5582_v26  ;;  %v5596_v30 = vpop.permute.xlu0 %4027  ;;  %4322 = vrot.lane.b32.xlu1 %v5343_v14, %s4609_s17 }
  0xef   : > { %v4030_v52 = vunpack.i.h.bf16 %v5596_v30  ;;  %v4029_v55 = vunpack.i.l.bf16 %v5596_v30  ;;  %v1889_v22 = vsel %vm1882_vm8, %v1824_v23, %v4024_v36  ;;  %v1890_v62 = vsel %vm1882_vm8, %v1825_v57, %v4025_v58 }
  0xf0   : > { %4317 = vrot.lane.b32.xlu0 %v5348_v53, %s4608_s8  ;;  %v4043_v14 = vpop.permute.xlu1 %4042  ;;  %v7285_v5 = vunpack.i.l.bf16 %v5467_v39  ;;  %v7286_v13 = vunpack.i.h.bf16 %v5467_v39  ;;  %v3864_v10 = vunpack.i.l.bf16 %v5238_v9  ;;  %v5641_v12 = vsel %vm1652_vm4, %v5415_v4, %v3930_v31 }
  0xf1   : > { %v1954_v50 = vsel %vm1947_vm9, %v1889_v22, %v4029_v55  ;;  %v1955_v16 = vsel %vm1947_vm9, %v1890_v62, %v4030_v52  ;;  %v5662_v31 = vsel %vm1617_vm3, %v4831_v8, %v3865_v61 }
  0xf2   : > { %v1952_v19 = vsel %vm1947_vm9, %v1887_v49, %v7285_v5  ;;  %v1953_v51 = vsel %vm1947_vm9, %v1888_v34, %v7286_v13  ;;  %v4038_v54 = vpop.permute.xlu0 %4037  ;;  %4332 = vrot.lane.b32.xlu1 %v5348_v53, %s4610_s20  ;;  %v2019_v9 = vsel %vm2012_vm10, %v1954_v50, %v4034_v47  ;;  %v2020_v23 = vsel %vm2012_vm10, %v1955_v16, %v4035_v32 }
  0xf3   : > { %v2017_v48 = vsel %vm2012_vm10, %v1952_v19, %v4004_v27  ;;  %v2018_v39 = vsel %vm2012_vm10, %v1953_v51, %v4005_v15  ;;  %v4040_v57 = vunpack.i.h.bf16 %v4038_v54  ;;  %v4039_v42 = vunpack.i.l.bf16 %v4038_v54 }
  0xf4   : > { %v2079_v49 = vpack.c.bf16 %v2018_v39, %v2017_v48  ;;  %v2080_v60 = vpack.c.bf16 %v2020_v23, %v2019_v9  ;;  %v5645_v15 = vsel %vm1652_vm4, %v5419_v3, %v3929_v0  ;;  %v4045_v53 = vunpack.i.h.bf16 %v4043_v14  ;;  %4327 = vrot.lane.b32.xlu0 %v7282_v44, %s4611_s21  ;;  %v5649_v34 = vpop.permute.xlu1 %4052 }
  0xf5   : > { %v4044_v27 = vunpack.i.l.bf16 %v4043_v14  ;;  %v1697_v22 = vsel %vm1687_vm5, %v5541_v1, %v4040_v57  ;;  %v1696_v62 = vsel %vm1687_vm5, %v5545_v41, %v4039_v42  ;;  %v1698_v4 = vsel %vm1687_vm5, %v5645_v15, %v4039_v42  ;;  %v7287_v41 = vld [vmem:[#allocation30_spill] sm:$0xff] }
  0xf6   : > { %v1699_v3 = vsel %vm1687_vm5, %v5641_v12, %v4040_v57  ;;  %3687 = vmatprep.mubr.msk.bf16.mxu0 %vm2136_vm11, %v2079_v49  ;;  %v5666_v44 = vsel %vm1617_vm3, %v4829_v2, %v3864_v10  ;;  %v4048_v1 = vpop.permute.xlu0 %4047  ;;  %4342 = vrot.lane.b32.xlu1 %v7287_v41, %s4613_s10  ;;  %v4055_v0 = vunpack.i.h.bf16 %v5649_v34  ;;  %v4054_v14 = vunpack.i.l.bf16 %v5649_v34 }
  0xf7   : > { %3688 = vmatmul.mubr.msk.bf16.gmra.mrb[4].mxu0 %vm2136_vm11, %v2080_v60  ;;  %v4050_v5 = vunpack.i.h.bf16 %v4048_v1  ;;  %v4049_v19 = vunpack.i.l.bf16 %v4048_v1  ;;  %v1761_v8 = vsel %vm1752_vm6, %v1696_v62, %v4044_v27  ;;  %v1762_v61 = vsel %vm1752_vm6, %v1697_v22, %v4045_v53 }
  0xf8   : > { %v1763_v2 = vsel %vm1752_vm6, %v1698_v4, %v4044_v27  ;;  %v1764_v13 = vsel %vm1752_vm6, %v1699_v3, %v4045_v53  ;;  %4337 = vrot.lane.b32.xlu0 %v5364_v46, %s4612_s22  ;;  %v5679_v51 = vpop.permute.xlu1 %4062  ;;  %v3935_v42 = vunpack.i.h.bf16 %v5310_v11  ;;  %v3934_v49 = vunpack.i.l.bf16 %v5310_v11 }
  0xf9   : > { %v1826_v10 = vsel %vm1817_vm7, %v1761_v8, %v4049_v19  ;;  %v1827_v50 = vsel %vm1817_vm7, %v1762_v61, %v4050_v5  ;;  %v1828_v16 = vsel %vm1817_vm7, %v1763_v2, %v4049_v19  ;;  %v1829_v54 = vsel %vm1817_vm7, %v1764_v13, %v4050_v5 }
  0xfa   : > { %v1891_v48 = vsel %vm1882_vm8, %v1826_v10, %v4024_v36  ;;  %v1892_v39 = vsel %vm1882_vm8, %v1827_v50, %v4025_v58  ;;  %v4065_v9 = vunpack.i.h.bf16 %v5679_v51  ;;  %v4064_v23 = vunpack.i.l.bf16 %v5679_v51  ;;  %v5694_v57 = vpop.permute.xlu0 %4057  ;;  %4352 = vrot.lane.b32.xlu1 %v5366_v20, %s4608_s8 }
  0xfb   : > { %v4060_v60 = vunpack.i.h.bf16 %v5694_v57  ;;  %v4059_v36 = vunpack.i.l.bf16 %v5694_v57  ;;  %v1893_v38 = vsel %vm1882_vm8, %v1828_v16, %v4054_v14  ;;  %v1894_v58 = vsel %vm1882_vm8, %v1829_v54, %v4055_v0 }
  0xfc   : > { %4347 = vrot.lane.b32.xlu0 %v5366_v20, %s4614_s12  ;;  %v4073_v53 = vpop.permute.xlu1 %4072  ;;  %v1956_v11 = vsel %vm1947_vm9, %v1891_v48, %v4029_v55  ;;  %v1957_v27 = vsel %vm1947_vm9, %v1892_v39, %v4030_v52  ;;  %v3860_v22 = vunpack.i.h.bf16 %v5242_v45  ;;  %v3859_v62 = vunpack.i.l.bf16 %v5242_v45 }
  0xfd   : > { %v1958_v4 = vsel %vm1947_vm9, %v1893_v38, %v4059_v36  ;;  %v1959_v30 = vsel %vm1947_vm9, %v1894_v58, %v4060_v60  ;;  %v2021_v52 = vsel %vm2012_vm10, %v1956_v11, %v4034_v47  ;;  %v2022_v3 = vsel %vm2012_vm10, %v1957_v27, %v4035_v32  ;;  %v3632_v47 = vld [vmem:[%s5719_s23] sm:$0xff]  }
  0xfe   : > { %v4068_v55 = vpop.permute.xlu0 %4067  ;;  %4362 = vrot.lane.b32.xlu1 %v7287_v41, %s4611_s21  ;;  %v2023_v45 = vsel %vm2012_vm10, %v1958_v4, %v4064_v23  ;;  %v2024_v1 = vsel %vm2012_vm10, %v1959_v30, %v4065_v9  ;;  %v2081_v8 = vpack.c.bf16 %v2022_v3, %v2021_v52  ;;  %v5746_v26 = vsel %vm1652_vm4, %v5567_v29, %v3934_v49  ;;  %v5805_v52 = vld [vmem:[%s5719_s23 + $0x8] sm:$0x1] }
  0xff   : > { %v4070_v5 = vunpack.i.h.bf16 %v4068_v55  ;;  %v4069_v19 = vunpack.i.l.bf16 %v4068_v55  ;;  %v2082_v61 = vpack.c.bf16 %v2024_v1, %v2023_v45  ;;  %v5750_v32 = vsel %vm1652_vm4, %v5563_v40, %v3935_v42 }
 0x100   : > { %v4075_v41 = vunpack.i.h.bf16 %v4073_v53  ;;  %v4074_v2 = vunpack.i.l.bf16 %v4073_v53  ;;  %4357 = vrot.lane.b32.xlu0 %v5364_v46, %s4609_s17  ;;  %v5754_v13 = vpop.permute.xlu1 %4082  ;;  %3691 = vmatprep.mubr.msk.bf16.mxu0 %vm2136_vm11, %v2081_v8  ;;  %v5767_v16 = vsel %vm1617_vm3, %v4848_v25, %v3860_v22  ;;  %v5771_v46 = vsel %vm1617_vm3, %v4842_v18, %v3859_v62 }
 0x101   : > { %v1700_v10 = vsel %vm1687_vm5, %v5645_v15, %v4069_v19  ;;  %v1701_v50 = vsel %vm1687_vm5, %v5641_v12, %v4070_v5  ;;  %v1702_v29 = vsel %vm1687_vm5, %v5746_v26, %v4069_v19  ;;  %v1703_v40 = vsel %vm1687_vm5, %v5750_v32, %v4070_v5  ;;  %3692 = vmatmul.mubr.msk.bf16.gmra.mrb[8].mxu0 %vm2136_vm11, %v2082_v61  ;;  %v7288_v5 = vld [vmem:[#allocation36_spill] sm:$0xff] }
 0x102   : > { %v4078_v15 = vpop.permute.xlu0 %4077  ;;  %4372 = vrot.lane.b32.xlu1 %v5374_v17, %s4612_s22  ;;  %v5776_v12 = vunpack.c.l.bf16 %v3632_v47  ;;  %v4085_v54 = vunpack.i.h.bf16 %v5754_v13  ;;  %v4084_v48 = vunpack.i.l.bf16 %v5754_v13  ;;  %v1765_v25 = vsel %vm1752_vm6, %v1700_v10, %v4074_v2 }
 0x103   : > { %v4080_v39 = vunpack.i.h.bf16 %v4078_v15  ;;  %v4079_v42 = vunpack.i.l.bf16 %v4078_v15  ;;  %v1766_v18 = vsel %vm1752_vm6, %v1701_v50, %v4075_v41  ;;  %v1767_v49 = vsel %vm1752_vm6, %v1702_v29, %v4074_v2 }
 0x104   : > { %v1768_v38 = vsel %vm1752_vm6, %v1703_v40, %v4075_v41  ;;  %4367 = vrot.lane.b32.xlu0 %v5366_v20, %s4610_s20  ;;  %v5786_v58 = vpop.permute.xlu1 %4092  ;;  %v3940_v3 = vunpack.i.h.bf16 %v5345_v56  ;;  %v3939_v45 = vunpack.i.l.bf16 %v5345_v56  ;;  %v5831_v2 = vunpack.c.h.bf16 %v3632_v47 }
 0x105   : > { %v1830_v53 = vsel %vm1817_vm7, %v1765_v25, %v4079_v42  ;;  %v1831_v11 = vsel %vm1817_vm7, %v1766_v18, %v4080_v39  ;;  %v1832_v27 = vsel %vm1817_vm7, %v1767_v49, %v4079_v42  ;;  %v1833_v22 = vsel %vm1817_vm7, %v1768_v38, %v4080_v39 }
 0x106   : > { %v1895_v62 = vsel %vm1882_vm8, %v1830_v53, %v4054_v14  ;;  %v1896_v4 = vsel %vm1882_vm8, %v1831_v11, %v4055_v0  ;;  %v4095_v20 = vunpack.i.h.bf16 %v5786_v58  ;;  %v4094_v30 = vunpack.i.l.bf16 %v5786_v58  ;;  %v5800_v55 = vpop.permute.xlu0 %4087  ;;  %4382 = vrot.lane.b32.xlu1 %v5378_v6, %s4614_s12 }
 0x107   : > { %v4090_v14 = vunpack.i.h.bf16 %v5800_v55  ;;  %v4089_v34 = vunpack.i.l.bf16 %v5800_v55  ;;  %v1897_v0 = vsel %vm1882_vm8, %v1832_v27, %v4084_v48  ;;  %v1898_v1 = vsel %vm1882_vm8, %v1833_v22, %v4085_v54 }
 0x108   : > { %4377 = vrot.lane.b32.xlu0 %v7288_v5, %s4613_s10  ;;  %v4103_v19 = vpop.permute.xlu1 %4102  ;;  %v1960_v56 = vsel %vm1947_vm9, %v1895_v62, %v4059_v36  ;;  %v1961_v8 = vsel %vm1947_vm9, %v1896_v4, %v4060_v60  ;;  %v582_v10 = vunpack.c.l.bf16 %v5805_v52  ;;  %v5850_v51 = vsel %vm1652_vm4, %v5522_v43, %v3940_v3 }
 0x109   : > { %v1962_v61 = vsel %vm1947_vm9, %v1897_v0, %v4089_v34  ;;  %v1963_v41 = vsel %vm1947_vm9, %v1898_v1, %v4090_v14  ;;  %v2025_v36 = vsel %vm2012_vm10, %v1960_v56, %v4064_v23  ;;  %v2026_v57 = vsel %vm2012_vm10, %v1961_v8, %v4065_v9 }
 0x10a   : > { %v4098_v50 = vpop.permute.xlu0 %4097  ;;  %4392 = vrot.lane.b32.xlu1 %v5374_v17, %s4609_s17  ;;  %v2027_v60 = vsel %vm2012_vm10, %v1962_v61, %v4094_v30  ;;  %v2028_v47 = vsel %vm2012_vm10, %v1963_v41, %v4095_v20  ;;  %v2083_v15 = vpack.c.bf16 %v2026_v57, %v2025_v36  ;;  %v5854_v9 = vsel %vm1652_vm4, %v5530_v28, %v3939_v45  ;;  %v7289_v36 = vld [vmem:[#allocation35_spill] sm:$0xff] }
 0x10b   : > { %v4100_v29 = vunpack.i.h.bf16 %v4098_v50  ;;  %v4099_v40 = vunpack.i.l.bf16 %v4098_v50  ;;  %v2084_v39 = vpack.c.bf16 %v2028_v47, %v2027_v60  ;;  %v4105_v17 = vunpack.i.h.bf16 %v4103_v19 }
 0x10c   : > { %v4104_v23 = vunpack.i.l.bf16 %v4103_v19  ;;  %4387 = vrot.lane.b32.xlu0 %v5378_v6, %s4608_s8  ;;  %v5858_v42 = vpop.permute.xlu1 %4112  ;;  %3695 = vmatprep.mubr.msk.bf16.mxu0 %vm2136_vm11, %v2083_v15  ;;  %v3870_v49 = vunpack.i.h.bf16 %v5250_v37  ;;  %v3945_v57 = vunpack.i.h.bf16 %v5331_v35  ;;  %v3944_v60 = vunpack.i.l.bf16 %v5331_v35 }
 0x10d   : > { %v1704_v25 = vsel %vm1687_vm5, %v5746_v26, %v4099_v40  ;;  %v1705_v18 = vsel %vm1687_vm5, %v5750_v32, %v4100_v29  ;;  %v1706_v43 = vsel %vm1687_vm5, %v5854_v9, %v4099_v40  ;;  %v1707_v28 = vsel %vm1687_vm5, %v5850_v51, %v4100_v29  ;;  %3696 = vmatmul.mubr.msk.bf16.gmra.mrb[12].mxu0 %vm2136_vm11, %v2084_v39 }
 0x10e   : > { %v4108_v38 = vpop.permute.xlu0 %4107  ;;  %4402 = vrot.lane.b32.xlu1 %v5378_v6, %s4610_s20  ;;  %v1403_v26 = vrot.slane %v5776_v12, 1  ;;  %v1404_v32 = vrot.slane %v5831_v2, 1  ;;  %v4115_v53 = vunpack.i.h.bf16 %v5858_v42  ;;  %v4114_v11 = vunpack.i.l.bf16 %v5858_v42 }
 0x10f   : > { %v4110_v27 = vunpack.i.h.bf16 %v4108_v38  ;;  %v4109_v22 = vunpack.i.l.bf16 %v4108_v38  ;;  %v1769_v62 = vsel %vm1752_vm6, %v1704_v25, %v4104_v23  ;;  %v1770_v4 = vsel %vm1752_vm6, %v1705_v18, %v4105_v17 }
 0x110   : > { %v1771_v3 = vsel %vm1752_vm6, %v1706_v43, %v4104_v23  ;;  %v1772_v45 = vsel %vm1752_vm6, %v1707_v28, %v4105_v17  ;;  %4397 = vrot.lane.b32.xlu0 %v7288_v5, %s4611_s21  ;;  %v5883_v6 = vpop.permute.xlu1 %4122  ;;  %v5921_v15 = vsel %vm1617_vm3, %v4888_v63, %v3870_v49  ;;  %v1406_v23 = vrot.slane %v582_v10, 1 }
 0x111   : > { %v1834_v0 = vsel %vm1817_vm7, %v1769_v62, %v4109_v22  ;;  %v1835_v1 = vsel %vm1817_vm7, %v1770_v4, %v4110_v27  ;;  %v1836_v19 = vsel %vm1817_vm7, %v1771_v3, %v4109_v22  ;;  %v1837_v56 = vsel %vm1817_vm7, %v1772_v45, %v4110_v27 }
 0x112   : > { %v1899_v8 = vsel %vm1882_vm8, %v1834_v0, %v4084_v48  ;;  %v1900_v61 = vsel %vm1882_vm8, %v1835_v1, %v4085_v54  ;;  %v4125_v5 = vunpack.i.h.bf16 %v5883_v6  ;;  %v4124_v41 = vunpack.i.l.bf16 %v5883_v6  ;;  %v5897_v50 = vpop.permute.xlu0 %4117  ;;  %4412 = vrot.lane.b32.xlu1 %v7289_v36, %s4613_s10 }
 0x113   : > { %v4120_v47 = vunpack.i.h.bf16 %v5897_v50  ;;  %v4119_v48 = vunpack.i.l.bf16 %v5897_v50  ;;  %v1901_v13 = vsel %vm1882_vm8, %v1836_v19, %v4114_v11  ;;  %v1902_v54 = vsel %vm1882_vm8, %v1837_v56, %v4115_v53 }
 0x114   : > { %4407 = vrot.lane.b32.xlu0 %v5393_v7, %s4612_s22  ;;  %v4133_v29 = vpop.permute.xlu1 %4132  ;;  %v1964_v35 = vsel %vm1947_vm9, %v1899_v8, %v4089_v34  ;;  %v1965_v40 = vsel %vm1947_vm9, %v1900_v61, %v4090_v14  ;;  %v5947_v58 = vsel %vm1652_vm4, %v5771_v46, %v3944_v60  ;;  %v5972_v3 = vsel %vm634_vm0, %v1403_v26, %v1404_v32 }
 0x115   : > { %v1966_v39 = vsel %vm1947_vm9, %v1901_v13, %v4119_v48  ;;  %v1967_v17 = vsel %vm1947_vm9, %v1902_v54, %v4120_v47  ;;  %v2029_v55 = vsel %vm2012_vm10, %v1964_v35, %v4094_v30  ;;  %v2030_v63 = vsel %vm2012_vm10, %v1965_v40, %v4095_v20 }
 0x116   : > { %v4128_v34 = vpop.permute.xlu0 %4127  ;;  %4422 = vrot.lane.b32.xlu1 %v5403_v33, %s4608_s8  ;;  %v2031_v14 = vsel %vm2012_vm10, %v1966_v39, %v4124_v41  ;;  %v2032_v25 = vsel %vm2012_vm10, %v1967_v17, %v4125_v5  ;;  %v2085_v28 = vpack.c.bf16 %v2030_v63, %v2029_v55  ;;  %v5951_v20 = vsel %vm1652_vm4, %v5767_v16, %v3945_v57  ;;  %v7290_v17 = vld [vmem:[#allocation22_spill] sm:$0xff] }
 0x117   : > { %v4130_v18 = vunpack.i.h.bf16 %v4128_v34  ;;  %v4129_v43 = vunpack.i.l.bf16 %v4128_v34  ;;  %v2086_v49 = vpack.c.bf16 %v2032_v25, %v2031_v14  ;;  %v4135_v30 = vunpack.i.h.bf16 %v4133_v29 }
 0x118   : > { %v4134_v38 = vunpack.i.l.bf16 %v4133_v29  ;;  %4417 = vrot.lane.b32.xlu0 %v5403_v33, %s4614_s12  ;;  %v5955_v27 = vpop.permute.xlu1 %4142  ;;  %3699 = vmatprep.mubr.msk.bf16.mxu0 %vm2136_vm11, %v2085_v28  ;;  %v1510_v45 = vrot.slane %v5776_v12, 2  ;;  %v3949_v34 = vunpack.i.l.bf16 %v7290_v17  ;;  %v1511_v28 = vrot.slane %v5831_v2, 2 }
 0x119   : > { %v1708_v22 = vsel %vm1687_vm5, %v5854_v9, %v4129_v43  ;;  %v1709_v62 = vsel %vm1687_vm5, %v5850_v51, %v4130_v18  ;;  %v1710_v46 = vsel %vm1687_vm5, %v5947_v58, %v4129_v43  ;;  %v1711_v16 = vsel %vm1687_vm5, %v5951_v20, %v4130_v18  ;;  %3700 = vmatmul.mubr.msk.bf16.gmra.mrb[16].mxu0 %vm2136_vm11, %v2086_v49 }
 0x11a   : > { %v4138_v4 = vpop.permute.xlu0 %4137  ;;  %4432 = vrot.lane.b32.xlu1 %v7289_v36, %s4611_s21  ;;  %v4476_v9 = vpack.i.bf16 %v5831_v2, %v5776_v12  ;;  %v5975_v51 = vsel %vm634_vm0, %v1404_v32, %v1406_v23  ;;  %v4145_v0 = vunpack.i.h.bf16 %v5955_v27  ;;  %v4144_v1 = vunpack.i.l.bf16 %v5955_v27 }
 0x11b   : > { %v4140_v19 = vunpack.i.h.bf16 %v4138_v4  ;;  %v4139_v56 = vunpack.i.l.bf16 %v4138_v4  ;;  %v1773_v8 = vsel %vm1752_vm6, %v1708_v22, %v4134_v38  ;;  %v1774_v61 = vsel %vm1752_vm6, %v1709_v62, %v4135_v30 }
 0x11c   : > { %v1775_v36 = vsel %vm1752_vm6, %v1710_v46, %v4134_v38  ;;  %v1776_v26 = vsel %vm1752_vm6, %v1711_v16, %v4135_v30  ;;  %4427 = vrot.lane.b32.xlu0 %v5393_v7, %s4609_s17  ;;  %v5986_v32 = vpop.permute.xlu1 %4152  ;;  %v3950_v23 = vunpack.i.h.bf16 %v7290_v17  ;;  %v7291_v46 = vld [vmem:[#allocation37_spill] sm:$0xff] }
 0x11d   : > { %v1838_v57 = vsel %vm1817_vm7, %v1773_v8, %v4139_v56  ;;  %v1839_v60 = vsel %vm1817_vm7, %v1774_v61, %v4140_v19  ;;  %v1840_v13 = vsel %vm1817_vm7, %v1775_v36, %v4139_v56  ;;  %v1841_v54 = vsel %vm1817_vm7, %v1776_v26, %v4140_v19 }
 0x11e   : > { %v1903_v29 = vsel %vm1882_vm8, %v1838_v57, %v4114_v11  ;;  %v1904_v35 = vsel %vm1882_vm8, %v1839_v60, %v4115_v53  ;;  %v4155_v7 = vunpack.i.h.bf16 %v5986_v32  ;;  %v4154_v40 = vunpack.i.l.bf16 %v5986_v32  ;;  %v6000_v39 = vpop.permute.xlu0 %4147  ;;  %4442 = vrot.lane.b32.xlu1 %v5431_v59, %s4612_s22 }
 0x11f   : > { %v4150_v55 = vunpack.i.h.bf16 %v6000_v39  ;;  %v4149_v11 = vunpack.i.l.bf16 %v6000_v39  ;;  %v1905_v42 = vsel %vm1882_vm8, %v1840_v13, %v4144_v1  ;;  %v1906_v53 = vsel %vm1882_vm8, %v1841_v54, %v4145_v0 }
 0x120   : > { %4437 = vrot.lane.b32.xlu0 %v5403_v33, %s4610_s20  ;;  %v4163_v63 = vpop.permute.xlu1 %4162  ;;  %v1968_v14 = vsel %vm1947_vm9, %v1903_v29, %v4119_v48  ;;  %v1969_v25 = vsel %vm1947_vm9, %v1904_v35, %v4120_v47  ;;  %v1513_v33 = vrot.slane %v582_v10, 2  ;;  %v6047_v6 = vsel %vm1652_vm4, %v5662_v31, %v3950_v23 }
 0x121   : > { %v1970_v18 = vsel %vm1947_vm9, %v1905_v42, %v4149_v11  ;;  %v1971_v43 = vsel %vm1947_vm9, %v1906_v53, %v4150_v55  ;;  %v2033_v50 = vsel %vm2012_vm10, %v1968_v14, %v4124_v41  ;;  %v2034_v47 = vsel %vm2012_vm10, %v1969_v25, %v4125_v5 }
 0x122   : > { %v4158_v49 = vpop.permute.xlu0 %4157  ;;  %4452 = vrot.lane.b32.xlu1 %v5572_v21, %s4614_s12  ;;  %v2035_v48 = vsel %vm2012_vm10, %v1970_v18, %v4154_v40  ;;  %v2036_v52 = vsel %vm2012_vm10, %v1971_v43, %v4155_v7  ;;  %v2087_v38 = vpack.c.bf16 %v2034_v47, %v2033_v50  ;;  %v6051_v5 = vsel %vm1652_vm4, %v5666_v44, %v3949_v34 }
 0x123   : > { %v4160_v10 = vunpack.i.h.bf16 %v4158_v49  ;;  %v4159_v30 = vunpack.i.l.bf16 %v4158_v49  ;;  %v2088_v22 = vpack.c.bf16 %v2036_v52, %v2035_v48  ;;  %v4165_v41 = vunpack.i.h.bf16 %v4163_v63 }
 0x124   : > { %v4164_v62 = vunpack.i.l.bf16 %v4163_v63  ;;  %4447 = vrot.lane.b32.xlu0 %v7291_v46, %s4613_s10  ;;  %v6055_v16 = vpop.permute.xlu1 %4172  ;;  %3703 = vmatprep.mubr.msk.bf16.mxu0 %vm2136_vm11, %v2087_v38  ;;  %v3869_v56 = vunpack.i.l.bf16 %v5250_v37  ;;  %v6076_v61 = vsel %vm822_vm1, %v1511_v28, %v1513_v33  ;;  %v7292_v63 = vld [vmem:[#allocation13_spill] sm:$0xff]  ;;  %v7293_v33 = vld [vmem:[#allocation12_spill] sm:$0xff] }
 0x125   : > { %v1712_v4 = vsel %vm1687_vm5, %v5947_v58, %v4159_v30  ;;  %v1713_v19 = vsel %vm1687_vm5, %v5951_v20, %v4160_v10  ;;  %v1714_v31 = vsel %vm1687_vm5, %v6051_v5, %v4159_v30  ;;  %v1715_v44 = vsel %vm1687_vm5, %v6047_v6, %v4160_v10  ;;  %3704 = vmatmul.mubr.msk.bf16.gmra.mrb[20].mxu0 %vm2136_vm11, %v2088_v22 }
 0x126   : > { %v4168_v8 = vpop.permute.xlu0 %4167  ;;  %4462 = vrot.lane.b32.xlu1 %v5431_v59, %s4609_s17  ;;  %v4481_v58 = vpack.i.bf16 %v5975_v51, %v5972_v3  ;;  %v6073_v20 = vsel %vm822_vm1, %v1510_v45, %v1511_v28  ;;  %v4175_v36 = vunpack.i.h.bf16 %v6055_v16  ;;  %v4174_v26 = vunpack.i.l.bf16 %v6055_v16  ;;  %s4615_s17 = smov [#allocation2]  }
 0x127   : > { %v4170_v37 = vunpack.i.h.bf16 %v4168_v8  ;;  %v4169_v57 = vunpack.i.l.bf16 %v4168_v8  ;;  %v1777_v60 = vsel %vm1752_vm6, %v1712_v4, %v4164_v62  ;;  %v1778_v13 = vsel %vm1752_vm6, %v1713_v19, %v4165_v41 }
 0x128   : > { %v1779_v59 = vsel %vm1752_vm6, %v1714_v31, %v4164_v62  ;;  %v1780_v3 = vsel %vm1752_vm6, %v1715_v44, %v4165_v41  ;;  %4457 = vrot.lane.b32.xlu0 %v5572_v21, %s4608_s8  ;;  %v6086_v51 = vpop.permute.xlu1 %4182  ;;  %v3955_v14 = vunpack.i.h.bf16 %v7292_v63  ;;  %v3954_v25 = vunpack.i.l.bf16 %v7292_v63 }
 0x129   : > { %v1842_v45 = vsel %vm1817_vm7, %v1777_v60, %v4169_v57  ;;  %v1843_v54 = vsel %vm1817_vm7, %v1778_v13, %v4170_v37  ;;  %v1844_v29 = vsel %vm1817_vm7, %v1779_v59, %v4169_v57  ;;  %v1845_v35 = vsel %vm1817_vm7, %v1780_v3, %v4170_v37 }
 0x12a   : > { %v1907_v17 = vsel %vm1882_vm8, %v1842_v45, %v4144_v1  ;;  %v1908_v23 = vsel %vm1882_vm8, %v1843_v54, %v4145_v0  ;;  %v4185_v34 = vunpack.i.h.bf16 %v6086_v51  ;;  %v4184_v42 = vunpack.i.l.bf16 %v6086_v51  ;;  %v6100_v53 = vpop.permute.xlu0 %4177  ;;  %4472 = vrot.lane.b32.xlu1 %v5572_v21, %s4610_s20  ;;  %s3530_s20 = sshll.u32 %s4714_s15, 8 }
 0x12b   : > { %v4180_v18 = vunpack.i.h.bf16 %v6100_v53  ;;  %v4179_v1 = vunpack.i.l.bf16 %v6100_v53  ;;  %v1909_v27 = vsel %vm1882_vm8, %v1844_v29, %v4174_v26  ;;  %v1910_v0 = vsel %vm1882_vm8, %v1845_v35, %v4175_v36  ;;  %s6703_s30 = scalar_lea.vmem %s7118_s5, %s3530_s20  ;;  %s4499_s20 = sshll.u32 %s4615_s17, 4  ;;  %s4500_s20 = int_to_ptr.vmem [resolvable:$false] %s4499_s20 }
 0x12c   : > { %4467 = vrot.lane.b32.xlu0 %v7291_v46, %s4611_s21  ;;  %v4193_v21 = vpop.permute.xlu1 %4192  ;;  %v1972_v43 = vsel %vm1947_vm9, %v1907_v17, %v4149_v11  ;;  %v1973_v28 = vsel %vm1947_vm9, %v1908_v23, %v4150_v55  ;;  %v1634_v49 = vsel %vm1617_vm3, %v7293_v33, %v3869_v56  ;;  %v4486_v48 = vpack.i.bf16 %v6076_v61, %v6073_v20  ;;  %v7295_v23 = vld [vmem:[#allocation16_spill] sm:$0xff]  ;;  %v7297_v33 = vld [vmem:[#allocation10_spill] sm:$0xff]  ;;  %s7032_s21 = scalar_lea.hbm %s7119_s6, %s3522_s18 }
 0x12d   : > { %v1974_v50 = vsel %vm1947_vm9, %v1909_v27, %v4179_v1  ;;  %v1975_v47 = vsel %vm1947_vm9, %v1910_v0, %v4180_v18  ;;  %v2037_v39 = vsel %vm2012_vm10, %v1972_v43, %v4154_v40  ;;  %v2038_v55 = vsel %vm2012_vm10, %v1973_v28, %v4155_v7  ;;  %v7296_v43 = vld [vmem:[#allocation11_spill] sm:$0xff] }
 0x12e   : > { %v4188_v52 = vpop.permute.xlu0 %4187  ;;  %4482 = vrot.lane.b32.xlu1 %v4481_v58, %s4613_s10  ;;  %v2039_v11 = vsel %vm2012_vm10, %v1974_v50, %v4184_v42  ;;  %v2040_v10 = vsel %vm2012_vm10, %v1975_v47, %v4185_v34  ;;  %v2089_v22 = vpack.c.bf16 %v2038_v55, %v2037_v39  ;;  %v1669_v40 = vsel %vm1652_vm4, %v1634_v49, %v3954_v25 }
 0x12f   : > { %v4190_v30 = vunpack.i.h.bf16 %v4188_v52  ;;  %v4189_v38 = vunpack.i.l.bf16 %v4188_v52  ;;  %v2090_v41 = vpack.c.bf16 %v2040_v10, %v2039_v11  ;;  %v1670_v32 = vsel %vm1652_vm4, %v5921_v15, %v3955_v14  ;;  %v7294_v15 = vld [vmem:[#allocation38_spill] sm:$0xff] }
 0x130   : > { %v4195_v7 = vunpack.i.h.bf16 %v4193_v21  ;;  %v4194_v62 = vunpack.i.l.bf16 %v4193_v21  ;;  %4477 = vrot.lane.b32.xlu0 %v4476_v9, %s4612_s22  ;;  %v6152_v46 = vpop.permute.xlu1 %4202  ;;  %3707 = vmatprep.mubr.msk.bf16.mxu0 %vm2136_vm11, %v2089_v22  ;;  %v3875_v56 = vunpack.i.h.bf16 %v7294_v15  ;;  %v3874_v8 = vunpack.i.l.bf16 %v7294_v15 }
 0x131   : > { %v1716_v4 = vsel %vm1687_vm5, %v6051_v5, %v4189_v38  ;;  %v1717_v19 = vsel %vm1687_vm5, %v6047_v6, %v4190_v30  ;;  %v1718_v31 = vsel %vm1687_vm5, %v1669_v40, %v4189_v38  ;;  %v1719_v44 = vsel %vm1687_vm5, %v1670_v32, %v4190_v30  ;;  %3708 = vmatmul.mubr.msk.bf16.gmra.mrb[24].mxu0 %vm2136_vm11, %v2090_v41 }
 0x132   : > { %v4198_v12 = vpop.permute.xlu0 %4197  ;;  %v4205_v2 = vunpack.i.h.bf16 %v6152_v46  ;;  %v4204_v9 = vunpack.i.l.bf16 %v6152_v46  ;;  %v1781_v6 = vsel %vm1752_vm6, %v1716_v4, %v4194_v62  ;;  %v1782_v20 = vsel %vm1752_vm6, %v1717_v19, %v4195_v7 }
 0x133   : > { %v4200_v5 = vunpack.i.h.bf16 %v4198_v12  ;;  %v4199_v58 = vunpack.i.l.bf16 %v4198_v12  ;;  %v1783_v61 = vsel %vm1752_vm6, %v1718_v31, %v4194_v62  ;;  %v1784_v37 = vsel %vm1752_vm6, %v1719_v44, %v4195_v7 }
 0x134   : > { %4487 = vrot.lane.b32.xlu0 %v4486_v48, %s4614_s12  ;;  %v6171_v57 = vpop.permute.xlu1 %4212  ;;  %v3960_v63 = vunpack.i.h.bf16 %v7295_v23  ;;  %v3959_v14 = vunpack.i.l.bf16 %v7295_v23  ;;  %v1637_v28 = vsel %vm1617_vm3, %v7296_v43, %v3875_v56  ;;  %v1636_v49 = vsel %vm1617_vm3, %v7297_v33, %v3874_v8  ;;  %v7300_v33 = vld [vmem:[#allocation17_spill] sm:$0xff]  ;;  %s7022_s12 = sand.u32 1, %s4589_s25  }
 0x135   : > { %v1846_v60 = vsel %vm1817_vm7, %v1781_v6, %v4199_v58  ;;  %v1847_v13 = vsel %vm1817_vm7, %v1782_v20, %v4200_v5  ;;  %v1848_v59 = vsel %vm1817_vm7, %v1783_v61, %v4199_v58  ;;  %v1849_v3 = vsel %vm1817_vm7, %v1784_v37, %v4200_v5  ;;  %v7298_v61 = vld [vmem:[#allocation40_spill] sm:$0xff]  ;;  %s407_s16 = scalar_lea.vmem [#allocation2], %s7022_s12  ;;  %s7199_s23 = scalar_lea.vmem [#allocation4], %s7022_s12 }
 0x136   : > { %v1911_v45 = vsel %vm1882_vm8, %v1846_v60, %v4174_v26  ;;  %v1912_v54 = vsel %vm1882_vm8, %v1847_v13, %v4175_v36  ;;  %v4215_v29 = vunpack.i.h.bf16 %v6171_v57  ;;  %v4214_v35 = vunpack.i.l.bf16 %v6171_v57  ;;  %v6185_v17 = vpop.permute.xlu0 %4207  ;;  %s3212_s19 = sshll.u32 %s407_s16, 4  ;;  %s3226_s8 = sshll.u32 %s7199_s23, 4  ;;  %s7034_s19 = int_to_ptr.vmem [resolvable:$true] %s3212_s19  ;;  %s7042_s8 = int_to_ptr.vmem [resolvable:$true] %s3226_s8 }
 0x137   : > { %v4210_v25 = vunpack.i.h.bf16 %v6185_v17  ;;  %v4209_v27 = vunpack.i.l.bf16 %v6185_v17  ;;  %v1913_v16 = vsel %vm1882_vm8, %v1848_v59, %v4204_v9  ;;  %v1914_v36 = vsel %vm1882_vm8, %v1849_v3, %v4205_v2  ;;  %s3191_s15 = scalar_lea.sflag [#allocation3], %s7022_s12  ;;  %s4495_s10 = scalar_lea.vmem %s7034_s19, 16 }
 0x138   : > { %v4223_v26 = vpop.permute.xlu1 %4222  ;;  %v1976_v0 = vsel %vm1947_vm9, %v1911_v45, %v4179_v1  ;;  %v1977_v21 = vsel %vm1947_vm9, %v1912_v54, %v4180_v18  ;;  %v6222_v30 = vsel %vm1652_vm4, %v1637_v28, %v3960_v63  ;;  %v3880_v37 = vunpack.i.h.bf16 %v7298_v61  ;;  %p4496_p12 = scmp.ne.s32.totalorder %s7034_s19, %s4495_s10  ;;  %s4501_s23 = scalar_lea.vmem %s4500_s20, 32 }
 0x139   : > { %v1978_v50 = vsel %vm1947_vm9, %v1913_v16, %v4209_v27  ;;  %v1979_v47 = vsel %vm1947_vm9, %v1914_v36, %v4210_v25  ;;  %v2041_v52 = vsel %vm2012_vm10, %v1976_v0, %v4184_v42  ;;  %v2042_v53 = vsel %vm2012_vm10, %v1977_v21, %v4185_v34  ;;  %p4502_p1 = scmp.lt.s32.totalorder %s7034_s19, %s4500_s20  ;;  %p4503_p2 = scmp.lt.s32.totalorder %s4501_s23, %s4495_s10 }
 0x13a   : > { %v4218_v48 = vpop.permute.xlu0 %4217  ;;  %v2043_v18 = vsel %vm2012_vm10, %v1978_v50, %v4214_v35  ;;  %v2044_v1 = vsel %vm2012_vm10, %v1979_v47, %v4215_v29  ;;  %v2091_v11 = vpack.c.bf16 %v2042_v53, %v2041_v52  ;;  %v6225_v42 = vsel %vm1652_vm4, %v1636_v49, %v3959_v14  ;;  %p4497_p13 = pnand %p4496_p12, %p4697_p4 }
 0x13b   : > { %v4220_v39 = vunpack.i.h.bf16 %v4218_v48  ;;  %v4219_v55 = vunpack.i.l.bf16 %v4218_v48  ;;  %v2092_v10 = vpack.c.bf16 %v2044_v1, %v2043_v18  ;;  %v4225_v51 = vunpack.i.h.bf16 %v4223_v26  ;;  %p4504_p3 = por %p4503_p2, %p4502_p1 }
 0x13c   : > { %v4224_v34 = vunpack.i.l.bf16 %v4223_v26  ;;  %v6227_v38 = vpop.permute.xlu1 %4232  ;;  %3711 = vmatprep.mubr.msk.bf16.mxu0 %vm2136_vm11, %v2091_v11  ;;  %v3879_v60 = vunpack.i.l.bf16 %v7298_v61  ;;  %p4498_p0 = pneg %p4497_p13 }
 0x13d   : > { %v1720_v22 = vsel %vm1687_vm5, %v1669_v40, %v4219_v55  ;;  %v1721_v41 = vsel %vm1687_vm5, %v1670_v32, %v4220_v39  ;;  %v1722_v7 = vsel %vm1687_vm5, %v6225_v42, %v4219_v55  ;;  %v1723_v62 = vsel %vm1687_vm5, %v6222_v30, %v4220_v39  ;;  %3712 = vmatmul.mubr.msk.bf16.gmra.mrb[28].mxu0 %vm2136_vm11, %v2092_v10 }
 0x13e   : > { %v4228_v4 = vpop.permute.xlu0 %4227  ;;  %v4235_v19 = vunpack.i.h.bf16 %v6227_v38  ;;  %v4234_v31 = vunpack.i.l.bf16 %v6227_v38  ;;  %v1785_v40 = vsel %vm1752_vm6, %v1720_v22, %v4224_v34  ;;  %v1786_v32 = vsel %vm1752_vm6, %v1721_v41, %v4225_v51  ;;  %p4505_p5 = pnand %p4504_p3, %p4498_p0 }
 0x13f   : > { %v4230_v44 = vunpack.i.h.bf16 %v4228_v4  ;;  %v4229_v15 = vunpack.i.l.bf16 %v4228_v4  ;;  %v1787_v56 = vsel %vm1752_vm6, %v1722_v7, %v4224_v34  ;;  %v1788_v8 = vsel %vm1752_vm6, %v1723_v62, %v4225_v51 }
 0x140   : > { %v6243_v12 = vpop.permute.xlu1 %4242  ;;  %v1638_v49 = vsel %vm1617_vm3, %v7300_v33, %v3879_v60 }
 0x141   : > { %v1850_v5 = vsel %vm1817_vm7, %v1785_v40, %v4229_v15  ;;  %v1851_v58 = vsel %vm1817_vm7, %v1786_v32, %v4230_v44  ;;  %v1852_v6 = vsel %vm1817_vm7, %v1787_v56, %v4229_v15  ;;  %v1853_v20 = vsel %vm1817_vm7, %v1788_v8, %v4230_v44 }
 0x142   : > { %v4245_v13 = vunpack.i.h.bf16 %v6243_v12  ;;  %v4244_v59 = vunpack.i.l.bf16 %v6243_v12  ;;  %v4238_v3 = vpop.permute.xlu0 %4237  ;;  %v1915_v17 = vsel %vm1882_vm8, %v1850_v5, %v4204_v9  ;;  %v1916_v23 = vsel %vm1882_vm8, %v1851_v58, %v4205_v2 }
 0x143   : > { %v4240_v45 = vunpack.i.h.bf16 %v4238_v3  ;;  %v4239_v54 = vunpack.i.l.bf16 %v4238_v3  ;;  %v1917_v63 = vsel %vm1882_vm8, %v1852_v6, %v4234_v31  ;;  %v1918_v14 = vsel %vm1882_vm8, %v1853_v20, %v4235_v19 }
 0x144   : > { %v4253_v16 = vpop.permute.xlu1 %4252  ;;  %v1980_v36 = vsel %vm1947_vm9, %v1915_v17, %v4209_v27  ;;  %v1981_v26 = vsel %vm1947_vm9, %v1916_v23, %v4210_v25  ;;  %v7299_v27 = vld [vmem:[#allocation18_spill] sm:$0xff] }
 0x145   : > { %v1982_v0 = vsel %vm1947_vm9, %v1917_v63, %v4239_v54  ;;  %v1983_v9 = vsel %vm1947_vm9, %v1918_v14, %v4240_v45  ;;  %v2045_v2 = vsel %vm2012_vm10, %v1980_v36, %v4214_v35  ;;  %v2046_v21 = vsel %vm2012_vm10, %v1981_v26, %v4215_v29 }
 0x146   : > { %v4248_v46 = vpop.permute.xlu0 %4247  ;;  %v2047_v43 = vsel %vm2012_vm10, %v1982_v0, %v4244_v59  ;;  %v2048_v25 = vsel %vm2012_vm10, %v1983_v9, %v4245_v13  ;;  %v1639_v28 = vsel %vm1617_vm3, %v7299_v27, %v3880_v37  ;;  %v4255_v47 = vunpack.i.h.bf16 %v4253_v16  ;;  %v7303_v27 = vld [vmem:[#allocation14_spill] sm:$0xff] }
 0x147   : > { %v4250_v50 = vunpack.i.h.bf16 %v4248_v46  ;;  %v4249_v35 = vunpack.i.l.bf16 %v4248_v46  ;;  %v4254_v57 = vunpack.i.l.bf16 %v4253_v16  ;;  %v2093_v48 = vpack.c.bf16 %v2046_v21, %v2045_v2 }
 0x148   : > { %v2094_v29 = vpack.c.bf16 %v2048_v25, %v2047_v43  ;;  %v4263_v52 = vpop.permute.xlu1 %4262  ;;  %v1725_v34 = vsel %vm1687_vm5, %v6222_v30, %v4255_v47  ;;  %v7302_v43 = vld [vmem:[#allocation15_spill] sm:$0xff] }
 0x149   : > { %v6286_v53 = vsel %vm1652_vm4, %v1638_v49, %v4249_v35  ;;  %v6289_v18 = vsel %vm1652_vm4, %v1639_v28, %v4250_v50  ;;  %3715 = vmatprep.mubr.msk.bf16.mxu1 %vm2136_vm11, %v2093_v48  ;;  %v4265_v1 = vunpack.i.h.bf16 %v4263_v52  ;;  %v4264_v39 = vunpack.i.l.bf16 %v4263_v52 }
 0x14a   : > { %v4258_v55 = vpop.permute.xlu0 %4257  ;;  %3716 = vmatmul.mubr.msk.bf16.vlgmr.msra.gmra.mrb[0].mxu1 %vm2136_vm11, %v2094_v29  ;;  %v1724_v51 = vsel %vm1687_vm5, %v6225_v42, %v4254_v57  ;;  %v1726_v22 = vsel %vm1687_vm5, %v6286_v53, %v4254_v57  ;;  %v1727_v41 = vsel %vm1687_vm5, %v6289_v18, %v4255_v47 }
 0x14b   : > { %v4260_v11 = vunpack.i.h.bf16 %v4258_v55  ;;  %v4259_v10 = vunpack.i.l.bf16 %v4258_v55 }
 0x14c   : > { %v6301_v7 = vpop.permute.xlu1 %4272 }
 0x14d   : > { %v1789_v62 = vsel %vm1752_vm6, %v1724_v51, %v4259_v10  ;;  %v1790_v4 = vsel %vm1752_vm6, %v1725_v34, %v4260_v11  ;;  %v1791_v44 = vsel %vm1752_vm6, %v1726_v22, %v4259_v10  ;;  %v1792_v15 = vsel %vm1752_vm6, %v1727_v41, %v4260_v11 }
 0x14e   : > { %v1854_v42 = vsel %vm1817_vm7, %v1789_v62, %v4264_v39  ;;  %v1855_v30 = vsel %vm1817_vm7, %v1790_v4, %v4265_v1  ;;  %v4275_v40 = vunpack.i.h.bf16 %v6301_v7  ;;  %v4274_v32 = vunpack.i.l.bf16 %v6301_v7  ;;  %v4268_v56 = vpop.permute.xlu0 %4267  ;;  %v7305_v7 = vld [vmem:[#allocation25_spill] sm:$0xff] }
 0x14f   : > { %v1919_v8 = vsel %vm1882_vm8, %v1854_v42, %v4234_v31  ;;  %v1920_v5 = vsel %vm1882_vm8, %v1855_v30, %v4235_v19  ;;  %v4270_v58 = vunpack.i.h.bf16 %v4268_v56  ;;  %v4269_v6 = vunpack.i.l.bf16 %v4268_v56  ;;  %v7301_v31 = vld [vmem:[#allocation39_spill] sm:$0xff] }
 0x150   : > { %v1856_v20 = vsel %vm1817_vm7, %v1791_v44, %v4264_v39  ;;  %v1857_v61 = vsel %vm1817_vm7, %v1792_v15, %v4265_v1  ;;  %v4283_v37 = vpop.permute.xlu1 %4282  ;;  %v1984_v60 = vsel %vm1947_vm9, %v1919_v8, %v4239_v54  ;;  %v1985_v3 = vsel %vm1947_vm9, %v1920_v5, %v4240_v45 }
 0x151   : > { %v1921_v17 = vsel %vm1882_vm8, %v1856_v20, %v4269_v6  ;;  %v1922_v23 = vsel %vm1882_vm8, %v1857_v61, %v4270_v58  ;;  %v3885_v63 = vunpack.i.h.bf16 %v7301_v31  ;;  %v2049_v19 = vsel %vm2012_vm10, %v1984_v60, %v4244_v59  ;;  %v7304_v61 = vld [vmem:[#allocation42_spill] sm:$0xff] }
 0x152   : > { %v6324_v38 = vpop.permute.xlu0 %4277  ;;  %v2050_v14 = vsel %vm2012_vm10, %v1985_v3, %v4245_v13  ;;  %v3884_v54 = vunpack.i.l.bf16 %v7301_v31  ;;  %v4285_v16 = vunpack.i.h.bf16 %v4283_v37  ;;  %v4284_v26 = vunpack.i.l.bf16 %v4283_v37 }
 0x153   : > { %v4280_v45 = vunpack.i.h.bf16 %v6324_v38  ;;  %v4279_v36 = vunpack.i.l.bf16 %v6324_v38  ;;  %v1986_v0 = vsel %vm1947_vm9, %v1921_v17, %v4274_v32  ;;  %v1987_v59 = vsel %vm1947_vm9, %v1922_v23, %v4275_v40 }
 0x154   : > { %v2095_v9 = vpack.c.bf16 %v2050_v14, %v2049_v19  ;;  %v4293_v12 = vpop.permute.xlu1 %4292  ;;  %v1641_v25 = vsel %vm1617_vm3, %v7302_v43, %v3885_v63  ;;  %v1640_v28 = vsel %vm1617_vm3, %v7303_v27, %v3884_v54  ;;  %v3890_v37 = vunpack.i.h.bf16 %v7304_v61 }
 0x155   : > { %v2051_v13 = vsel %vm2012_vm10, %v1986_v0, %v4279_v36  ;;  %v2052_v46 = vsel %vm2012_vm10, %v1987_v59, %v4280_v45  ;;  %v6349_v50 = vsel %vm1652_vm4, %v1641_v25, %v4285_v16  ;;  %v6352_v35 = vsel %vm1652_vm4, %v1640_v28, %v4284_v26  ;;  %v7306_v0 = vld [vmem:[#allocation23_spill] sm:$0xff] }
 0x156   : > { %v2096_v2 = vpack.c.bf16 %v2052_v46, %v2051_v13  ;;  %3719 = vmatprep.mubr.msk.bf16.mxu1 %vm2136_vm11, %v2095_v9  ;;  %v4288_v21 = vpop.permute.xlu0 %4287  ;;  %v4295_v47 = vunpack.i.h.bf16 %v4293_v12  ;;  %v4294_v57 = vunpack.i.l.bf16 %v4293_v12  ;;  %v3889_v60 = vunpack.i.l.bf16 %v7304_v61 }
 0x157   : > { %v4290_v33 = vunpack.i.h.bf16 %v4288_v21  ;;  %v4289_v49 = vunpack.i.l.bf16 %v4288_v21 }
 0x158   : > { %3720 = vmatmul.mubr.msk.bf16.gmra.mrb[4].mxu1 %vm2136_vm11, %v2096_v2  ;;  %v6355_v48 = vpop.permute.xlu1 %4302  ;;  %v1642_v59 = vsel %vm1617_vm3, %v7306_v0, %v3889_v60 }
 0x159   : > { %v1731_v29 = vsel %vm1687_vm5, %v6349_v50, %v4290_v33  ;;  %v1728_v52 = vsel %vm1687_vm5, %v6286_v53, %v4289_v49  ;;  %v1729_v1 = vsel %vm1687_vm5, %v6289_v18, %v4290_v33  ;;  %v1730_v39 = vsel %vm1687_vm5, %v6352_v35, %v4289_v49 }
 0x15a   : > { %v4298_v55 = vpop.permute.xlu0 %4297  ;;  %v4305_v11 = vunpack.i.h.bf16 %v6355_v48  ;;  %v4304_v10 = vunpack.i.l.bf16 %v6355_v48  ;;  %v1793_v22 = vsel %vm1752_vm6, %v1728_v52, %v4294_v57  ;;  %v1794_v41 = vsel %vm1752_vm6, %v1729_v1, %v4295_v47 }
 0x15b   : > { %v4300_v51 = vunpack.i.h.bf16 %v4298_v55  ;;  %v4299_v34 = vunpack.i.l.bf16 %v4298_v55  ;;  %v1795_v62 = vsel %vm1752_vm6, %v1730_v39, %v4294_v57  ;;  %v1796_v53 = vsel %vm1752_vm6, %v1731_v29, %v4295_v47 }
 0x15c   : > { %v6371_v4 = vpop.permute.xlu1 %4312 }
 0x15d   : > { %v1858_v18 = vsel %vm1817_vm7, %v1793_v22, %v4299_v34  ;;  %v1859_v44 = vsel %vm1817_vm7, %v1794_v41, %v4300_v51  ;;  %v1860_v15 = vsel %vm1817_vm7, %v1795_v62, %v4299_v34  ;;  %v1861_v42 = vsel %vm1817_vm7, %v1796_v53, %v4300_v51 }
 0x15e   : > { %v1923_v30 = vsel %vm1882_vm8, %v1858_v18, %v4269_v6  ;;  %v1924_v56 = vsel %vm1882_vm8, %v1859_v44, %v4270_v58  ;;  %v4315_v8 = vunpack.i.h.bf16 %v6371_v4  ;;  %v4314_v5 = vunpack.i.l.bf16 %v6371_v4  ;;  %v4308_v20 = vpop.permute.xlu0 %4307 }
 0x15f   : > { %v4310_v3 = vunpack.i.h.bf16 %v4308_v20  ;;  %v4309_v17 = vunpack.i.l.bf16 %v4308_v20  ;;  %v1925_v23 = vsel %vm1882_vm8, %v1860_v15, %v4304_v10  ;;  %v1926_v6 = vsel %vm1882_vm8, %v1861_v42, %v4305_v11 }
 0x160   : > { %v4323_v58 = vpop.permute.xlu1 %4322  ;;  %v1988_v31 = vsel %vm1947_vm9, %v1923_v30, %v4274_v32  ;;  %v1989_v63 = vsel %vm1947_vm9, %v1924_v56, %v4275_v40  ;;  %v1643_v40 = vsel %vm1617_vm3, %v7305_v7, %v3890_v37  ;;  %v7309_v7 = vld [vmem:[#allocation20_spill] sm:$0xff] }
 0x161   : > { %v1990_v38 = vsel %vm1947_vm9, %v1925_v23, %v4309_v17  ;;  %v1991_v19 = vsel %vm1947_vm9, %v1926_v6, %v4310_v3  ;;  %v2053_v54 = vsel %vm2012_vm10, %v1988_v31, %v4279_v36  ;;  %v2054_v16 = vsel %vm2012_vm10, %v1989_v63, %v4280_v45 }
 0x162   : > { %v4318_v14 = vpop.permute.xlu0 %4317  ;;  %v2055_v26 = vsel %vm2012_vm10, %v1990_v38, %v4314_v5  ;;  %v2056_v32 = vsel %vm2012_vm10, %v1991_v19, %v4315_v8  ;;  %v4325_v13 = vunpack.i.h.bf16 %v4323_v58  ;;  %v4324_v36 = vunpack.i.l.bf16 %v4323_v58 }
 0x163   : > { %v4320_v9 = vunpack.i.h.bf16 %v4318_v14  ;;  %v4319_v12 = vunpack.i.l.bf16 %v4318_v14  ;;  %v2097_v46 = vpack.c.bf16 %v2054_v16, %v2053_v54  ;;  %v2098_v45 = vpack.c.bf16 %v2056_v32, %v2055_v26  ;;  %v7308_v26 = vld [vmem:[#allocation21_spill] sm:$0xff] }
 0x164   : > { %v4333_v2 = vpop.permute.xlu1 %4332  ;;  %v1732_v47 = vsel %vm1687_vm5, %v6352_v35, %v4324_v36  ;;  %v1733_v57 = vsel %vm1687_vm5, %v6349_v50, %v4325_v13 }
 0x165   : > { %v6410_v21 = vsel %vm1652_vm4, %v1642_v59, %v4319_v12  ;;  %v6413_v43 = vsel %vm1652_vm4, %v1643_v40, %v4320_v9  ;;  %3723 = vmatprep.mubr.msk.bf16.mxu1 %vm2136_vm11, %v2097_v46  ;;  %v4335_v25 = vunpack.i.h.bf16 %v4333_v2  ;;  %v4334_v27 = vunpack.i.l.bf16 %v4333_v2 }
 0x166   : > { %v4328_v28 = vpop.permute.xlu0 %4327  ;;  %3724 = vmatmul.mubr.msk.bf16.gmra.mrb[8].mxu1 %vm2136_vm11, %v2098_v45  ;;  %v1734_v29 = vsel %vm1687_vm5, %v6410_v21, %v4324_v36  ;;  %v1735_v52 = vsel %vm1687_vm5, %v6413_v43, %v4325_v13 }
 0x167   : > { %v4330_v33 = vunpack.i.h.bf16 %v4328_v28  ;;  %v4329_v49 = vunpack.i.l.bf16 %v4328_v28 }
 0x168   : > { %v6425_v1 = vpop.permute.xlu1 %4342 }
 0x169   : > { %v1798_v39 = vsel %vm1752_vm6, %v1733_v57, %v4330_v33  ;;  %v1797_v55 = vsel %vm1752_vm6, %v1732_v47, %v4329_v49  ;;  %v1799_v51 = vsel %vm1752_vm6, %v1734_v29, %v4329_v49  ;;  %v1800_v34 = vsel %vm1752_vm6, %v1735_v52, %v4330_v33 }
 0x16a   : > { %v1863_v35 = vsel %vm1817_vm7, %v1798_v39, %v4335_v25  ;;  %v1862_v50 = vsel %vm1817_vm7, %v1797_v55, %v4334_v27  ;;  %v4345_v22 = vunpack.i.h.bf16 %v6425_v1  ;;  %v4344_v41 = vunpack.i.l.bf16 %v6425_v1  ;;  %v4338_v62 = vpop.permute.xlu0 %4337  ;;  %v7311_v1 = vld [vmem:[#allocation32_spill] sm:$0xff] }
 0x16b   : > { %v1928_v53 = vsel %vm1882_vm8, %v1863_v35, %v4305_v11  ;;  %v1927_v18 = vsel %vm1882_vm8, %v1862_v50, %v4304_v10  ;;  %v4340_v44 = vunpack.i.h.bf16 %v4338_v62  ;;  %v4339_v15 = vunpack.i.l.bf16 %v4338_v62  ;;  %v7307_v11 = vld [vmem:[#allocation41_spill] sm:$0xff] }
 0x16c   : > { %v1864_v42 = vsel %vm1817_vm7, %v1799_v51, %v4334_v27  ;;  %v1865_v30 = vsel %vm1817_vm7, %v1800_v34, %v4335_v25  ;;  %v4353_v56 = vpop.permute.xlu1 %4352  ;;  %v1992_v20 = vsel %vm1947_vm9, %v1927_v18, %v4309_v17  ;;  %v1993_v61 = vsel %vm1947_vm9, %v1928_v53, %v4310_v3 }
 0x16d   : > { %v1929_v37 = vsel %vm1882_vm8, %v1864_v42, %v4339_v15  ;;  %v1930_v60 = vsel %vm1882_vm8, %v1865_v30, %v4340_v44  ;;  %v3895_v23 = vunpack.i.h.bf16 %v7307_v11  ;;  %v2057_v10 = vsel %vm2012_vm10, %v1992_v20, %v4314_v5  ;;  %v7310_v30 = vld [vmem:[#allocation44_spill] sm:$0xff] }
 0x16e   : > { %v6448_v48 = vpop.permute.xlu0 %4347  ;;  %v2058_v6 = vsel %vm2012_vm10, %v1993_v61, %v4315_v8  ;;  %v3894_v17 = vunpack.i.l.bf16 %v7307_v11  ;;  %v4355_v58 = vunpack.i.h.bf16 %v4353_v56  ;;  %v4354_v63 = vunpack.i.l.bf16 %v4353_v56 }
 0x16f   : > { %v4350_v3 = vunpack.i.h.bf16 %v6448_v48  ;;  %v4349_v31 = vunpack.i.l.bf16 %v6448_v48  ;;  %v1994_v38 = vsel %vm1947_vm9, %v1929_v37, %v4344_v41  ;;  %v1995_v5 = vsel %vm1947_vm9, %v1930_v60, %v4345_v22 }
 0x170   : > { %v2099_v19 = vpack.c.bf16 %v2058_v6, %v2057_v10  ;;  %v4363_v4 = vpop.permute.xlu1 %4362  ;;  %v1645_v32 = vsel %vm1617_vm3, %v7308_v26, %v3895_v23  ;;  %v1644_v40 = vsel %vm1617_vm3, %v7309_v7, %v3894_v17  ;;  %v3900_v56 = vunpack.i.h.bf16 %v7310_v30 }
 0x171   : > { %v2059_v8 = vsel %vm2012_vm10, %v1994_v38, %v4349_v31  ;;  %v2060_v14 = vsel %vm2012_vm10, %v1995_v5, %v4350_v3  ;;  %v6473_v9 = vsel %vm1652_vm4, %v1645_v32, %v4355_v58  ;;  %v6476_v12 = vsel %vm1652_vm4, %v1644_v40, %v4354_v63  ;;  %v7312_v38 = vld [vmem:[#allocation31_spill] sm:$0xff] }
 0x172   : > { %v2100_v54 = vpack.c.bf16 %v2060_v14, %v2059_v8  ;;  %3727 = vmatprep.mubr.msk.bf16.mxu1 %vm2136_vm11, %v2099_v19  ;;  %v4358_v16 = vpop.permute.xlu0 %4357  ;;  %v4365_v13 = vunpack.i.h.bf16 %v4363_v4  ;;  %v4364_v36 = vunpack.i.l.bf16 %v4363_v4  ;;  %v3899_v20 = vunpack.i.l.bf16 %v7310_v30 }
 0x173   : > { %v4360_v0 = vunpack.i.h.bf16 %v4358_v16  ;;  %v4359_v59 = vunpack.i.l.bf16 %v4358_v16 }
 0x174   : > { %3728 = vmatmul.mubr.msk.bf16.gmra.mrb[12].mxu1 %vm2136_vm11, %v2100_v54  ;;  %v6479_v46 = vpop.permute.xlu1 %4372  ;;  %v1646_v5 = vsel %vm1617_vm3, %v7312_v38, %v3899_v20 }
 0x175   : > { %v1739_v45 = vsel %vm1687_vm5, %v6473_v9, %v4360_v0  ;;  %v1736_v2 = vsel %vm1687_vm5, %v6410_v21, %v4359_v59  ;;  %v1737_v25 = vsel %vm1687_vm5, %v6413_v43, %v4360_v0  ;;  %v1738_v27 = vsel %vm1687_vm5, %v6476_v12, %v4359_v59 }
 0x176   : > { %v4368_v28 = vpop.permute.xlu0 %4367  ;;  %v4375_v33 = vunpack.i.h.bf16 %v6479_v46  ;;  %v4374_v49 = vunpack.i.l.bf16 %v6479_v46  ;;  %v1801_v29 = vsel %vm1752_vm6, %v1736_v2, %v4364_v36  ;;  %v1802_v52 = vsel %vm1752_vm6, %v1737_v25, %v4365_v13 }
 0x177   : > { %v4370_v47 = vunpack.i.h.bf16 %v4368_v28  ;;  %v4369_v57 = vunpack.i.l.bf16 %v4368_v28  ;;  %v1803_v39 = vsel %vm1752_vm6, %v1738_v27, %v4364_v36  ;;  %v1804_v21 = vsel %vm1752_vm6, %v1739_v45, %v4365_v13 }
 0x178   : > { %v6495_v55 = vpop.permute.xlu1 %4382 }
 0x179   : > { %v1866_v43 = vsel %vm1817_vm7, %v1801_v29, %v4369_v57  ;;  %v1867_v51 = vsel %vm1817_vm7, %v1802_v52, %v4370_v47  ;;  %v1868_v34 = vsel %vm1817_vm7, %v1803_v39, %v4369_v57  ;;  %v1869_v35 = vsel %vm1817_vm7, %v1804_v21, %v4370_v47 }
 0x17a   : > { %v1931_v50 = vsel %vm1882_vm8, %v1866_v43, %v4339_v15  ;;  %v1932_v62 = vsel %vm1882_vm8, %v1867_v51, %v4340_v44  ;;  %v4385_v53 = vunpack.i.h.bf16 %v6495_v55  ;;  %v4384_v18 = vunpack.i.l.bf16 %v6495_v55  ;;  %v4378_v42 = vpop.permute.xlu0 %4377 }
 0x17b   : > { %v4380_v61 = vunpack.i.h.bf16 %v4378_v42  ;;  %v4379_v37 = vunpack.i.l.bf16 %v4378_v42  ;;  %v1933_v60 = vsel %vm1882_vm8, %v1868_v34, %v4374_v49  ;;  %v1934_v15 = vsel %vm1882_vm8, %v1869_v35, %v4375_v33 }
 0x17c   : > { %v4393_v44 = vpop.permute.xlu1 %4392  ;;  %v1996_v11 = vsel %vm1947_vm9, %v1931_v50, %v4344_v41  ;;  %v1997_v23 = vsel %vm1947_vm9, %v1932_v62, %v4345_v22  ;;  %v1647_v22 = vsel %vm1617_vm3, %v7311_v1, %v3900_v56  ;;  %v7315_v1 = vld [vmem:[#allocation28_spill] sm:$0xff] }
 0x17d   : > { %v1998_v48 = vsel %vm1947_vm9, %v1933_v60, %v4379_v37  ;;  %v1999_v10 = vsel %vm1947_vm9, %v1934_v15, %v4380_v61  ;;  %v2061_v17 = vsel %vm2012_vm10, %v1996_v11, %v4349_v31  ;;  %v2062_v58 = vsel %vm2012_vm10, %v1997_v23, %v4350_v3 }
 0x17e   : > { %v4388_v6 = vpop.permute.xlu0 %4387  ;;  %v2063_v63 = vsel %vm2012_vm10, %v1998_v48, %v4384_v18  ;;  %v2064_v41 = vsel %vm2012_vm10, %v1999_v10, %v4385_v53  ;;  %v4395_v8 = vunpack.i.h.bf16 %v4393_v44  ;;  %v4394_v31 = vunpack.i.l.bf16 %v4393_v44 }
 0x17f   : > { %v4390_v19 = vunpack.i.h.bf16 %v4388_v6  ;;  %v4389_v4 = vunpack.i.l.bf16 %v4388_v6  ;;  %v2101_v14 = vpack.c.bf16 %v2062_v58, %v2061_v17  ;;  %v2102_v3 = vpack.c.bf16 %v2064_v41, %v2063_v63  ;;  %v7314_v63 = vld [vmem:[#allocation29_spill] sm:$0xff] }
 0x180   : > { %v4403_v54 = vpop.permute.xlu1 %4402  ;;  %v1740_v13 = vsel %vm1687_vm5, %v6476_v12, %v4394_v31  ;;  %v1741_v36 = vsel %vm1687_vm5, %v6473_v9, %v4395_v8 }
 0x181   : > { %v6534_v16 = vsel %vm1652_vm4, %v1646_v5, %v4389_v4  ;;  %v6537_v26 = vsel %vm1652_vm4, %v1647_v22, %v4390_v19  ;;  %3731 = vmatprep.mubr.msk.bf16.mxu1 %vm2136_vm11, %v2101_v14  ;;  %v4405_v32 = vunpack.i.h.bf16 %v4403_v54  ;;  %v4404_v7 = vunpack.i.l.bf16 %v4403_v54 }
 0x182   : > { %v4398_v40 = vpop.permute.xlu0 %4397  ;;  %3732 = vmatmul.mubr.msk.bf16.gmra.mrb[16].mxu1 %vm2136_vm11, %v2102_v3  ;;  %v1742_v45 = vsel %vm1687_vm5, %v6534_v16, %v4394_v31  ;;  %v1743_v2 = vsel %vm1687_vm5, %v6537_v26, %v4395_v8 }
 0x183   : > { %v4400_v0 = vunpack.i.h.bf16 %v4398_v40  ;;  %v4399_v59 = vunpack.i.l.bf16 %v4398_v40 }
 0x184   : > { %v6549_v25 = vpop.permute.xlu1 %4412 }
 0x185   : > { %v1806_v27 = vsel %vm1752_vm6, %v1741_v36, %v4400_v0  ;;  %v1805_v28 = vsel %vm1752_vm6, %v1740_v13, %v4399_v59  ;;  %v1807_v47 = vsel %vm1752_vm6, %v1742_v45, %v4399_v59  ;;  %v1808_v57 = vsel %vm1752_vm6, %v1743_v2, %v4400_v0 }
 0x186   : > { %v1871_v12 = vsel %vm1817_vm7, %v1806_v27, %v4405_v32  ;;  %v1870_v9 = vsel %vm1817_vm7, %v1805_v28, %v4404_v7  ;;  %v4415_v29 = vunpack.i.h.bf16 %v6549_v25  ;;  %v4414_v52 = vunpack.i.l.bf16 %v6549_v25  ;;  %v4408_v39 = vpop.permute.xlu0 %4407 }
 0x187   : > { %v1936_v21 = vsel %vm1882_vm8, %v1871_v12, %v4375_v33  ;;  %v1935_v43 = vsel %vm1882_vm8, %v1870_v9, %v4374_v49  ;;  %v4410_v51 = vunpack.i.h.bf16 %v4408_v39  ;;  %v4409_v34 = vunpack.i.l.bf16 %v4408_v39  ;;  %v7313_v33 = vld [vmem:[#allocation43_spill] sm:$0xff] }
 0x188   : > { %v1872_v35 = vsel %vm1817_vm7, %v1807_v47, %v4404_v7  ;;  %v1873_v50 = vsel %vm1817_vm7, %v1808_v57, %v4405_v32  ;;  %v4423_v62 = vpop.permute.xlu1 %4422  ;;  %v2000_v42 = vsel %vm1947_vm9, %v1935_v43, %v4379_v37  ;;  %v2001_v30 = vsel %vm1947_vm9, %v1936_v21, %v4380_v61 }
 0x189   : > { %v1937_v56 = vsel %vm1882_vm8, %v1872_v35, %v4409_v34  ;;  %v1938_v20 = vsel %vm1882_vm8, %v1873_v50, %v4410_v51  ;;  %v3905_v60 = vunpack.i.h.bf16 %v7313_v33  ;;  %v2065_v49 = vsel %vm2012_vm10, %v2000_v42, %v4384_v18  ;;  %v7316_v50 = vld [vmem:[#allocation45_spill] sm:$0xff] }
 0x18a   : > { %v6572_v46 = vpop.permute.xlu0 %4417  ;;  %v2066_v15 = vsel %vm2012_vm10, %v2001_v30, %v4385_v53  ;;  %v3904_v37 = vunpack.i.l.bf16 %v7313_v33  ;;  %v4425_v44 = vunpack.i.h.bf16 %v4423_v62  ;;  %v4424_v23 = vunpack.i.l.bf16 %v4423_v62 }
 0x18b   : > { %v4420_v61 = vunpack.i.h.bf16 %v6572_v46  ;;  %v4419_v11 = vunpack.i.l.bf16 %v6572_v46  ;;  %v2002_v48 = vsel %vm1947_vm9, %v1937_v56, %v4414_v52  ;;  %v2003_v18 = vsel %vm1947_vm9, %v1938_v20, %v4415_v29 }
 0x18c   : > { %v2103_v10 = vpack.c.bf16 %v2066_v15, %v2065_v49  ;;  %v4433_v55 = vpop.permute.xlu1 %4432  ;;  %v1649_v41 = vsel %vm1617_vm3, %v7314_v63, %v3905_v60  ;;  %v1648_v22 = vsel %vm1617_vm3, %v7315_v1, %v3904_v37  ;;  %v3910_v62 = vunpack.i.h.bf16 %v7316_v50 }
 0x18d   : > { %v2067_v53 = vsel %vm2012_vm10, %v2002_v48, %v4419_v11  ;;  %v2068_v6 = vsel %vm2012_vm10, %v2003_v18, %v4420_v61  ;;  %v6597_v19 = vsel %vm1652_vm4, %v1649_v41, %v4425_v44  ;;  %v6600_v4 = vsel %vm1652_vm4, %v1648_v22, %v4424_v23 }
 0x18e   : > { %v2104_v17 = vpack.c.bf16 %v2068_v6, %v2067_v53  ;;  %3735 = vmatprep.mubr.msk.bf16.mxu1 %vm2136_vm11, %v2103_v10  ;;  %v4428_v58 = vpop.permute.xlu0 %4427  ;;  %v4435_v8 = vunpack.i.h.bf16 %v4433_v55  ;;  %v4434_v31 = vunpack.i.l.bf16 %v4433_v55  ;;  %v3909_v42 = vunpack.i.l.bf16 %v7316_v50 }
 0x18f   : > { %v4430_v38 = vunpack.i.h.bf16 %v4428_v58  ;;  %v4429_v5 = vunpack.i.l.bf16 %v4428_v58  ;;  %v1651_v25 = vsel %vm1617_vm3, %v5032_v24, %v3910_v62 }
 0x190   : > { %3736 = vmatmul.mubr.msk.bf16.gmra.mrb[20].mxu1 %vm2136_vm11, %v2104_v17  ;;  %v6603_v14 = vpop.permute.xlu1 %4442 }
 0x191   : > { %v1747_v3 = vsel %vm1687_vm5, %v6597_v19, %v4430_v38  ;;  %v1744_v54 = vsel %vm1687_vm5, %v6534_v16, %v4429_v5  ;;  %v1745_v32 = vsel %vm1687_vm5, %v6537_v26, %v4430_v38  ;;  %v1746_v7 = vsel %vm1687_vm5, %v6600_v4, %v4429_v5 }
 0x192   : > { %v4438_v40 = vpop.permute.xlu0 %4437  ;;  %v4445_v0 = vunpack.i.h.bf16 %v6603_v14  ;;  %v4444_v59 = vunpack.i.l.bf16 %v6603_v14  ;;  %v1809_v45 = vsel %vm1752_vm6, %v1744_v54, %v4434_v31  ;;  %v1810_v2 = vsel %vm1752_vm6, %v1745_v32, %v4435_v8 }
 0x193   : > { %v4440_v13 = vunpack.i.h.bf16 %v4438_v40  ;;  %v4439_v36 = vunpack.i.l.bf16 %v4438_v40  ;;  %v1811_v27 = vsel %vm1752_vm6, %v1746_v7, %v4434_v31  ;;  %v1812_v16 = vsel %vm1752_vm6, %v1747_v3, %v4435_v8 }
 0x194   : > { %v6619_v28 = vpop.permute.xlu1 %4452 }
 0x195   : > { %v1874_v26 = vsel %vm1817_vm7, %v1809_v45, %v4439_v36  ;;  %v1875_v47 = vsel %vm1817_vm7, %v1810_v2, %v4440_v13  ;;  %v1876_v57 = vsel %vm1817_vm7, %v1811_v27, %v4439_v36  ;;  %v1877_v12 = vsel %vm1817_vm7, %v1812_v16, %v4440_v13 }
 0x196   : > { %v1939_v9 = vsel %vm1882_vm8, %v1874_v26, %v4409_v34  ;;  %v1940_v39 = vsel %vm1882_vm8, %v1875_v47, %v4410_v51  ;;  %v4455_v21 = vunpack.i.h.bf16 %v6619_v28  ;;  %v4454_v43 = vunpack.i.l.bf16 %v6619_v28  ;;  %v4448_v35 = vpop.permute.xlu0 %4447  ;;  %v6696_v28 = vld [vmem:[%s7117_s4] ss:$0 sm:$0xff] }
 0x197   : > { %v4450_v30 = vunpack.i.h.bf16 %v4448_v35  ;;  %v4449_v56 = vunpack.i.l.bf16 %v4448_v35  ;;  %v1941_v20 = vsel %vm1882_vm8, %v1876_v57, %v4444_v59  ;;  %v1942_v34 = vsel %vm1882_vm8, %v1877_v12, %v4445_v0 }
 0x198   : > { %v4463_v51 = vpop.permute.xlu1 %4462  ;;  %v2004_v33 = vsel %vm1947_vm9, %v1939_v9, %v4414_v52  ;;  %v2005_v60 = vsel %vm1947_vm9, %v1940_v39, %v4415_v29  ;;  %v7317_v52 = vld [vmem:[#allocation34_spill] sm:$0xff] }
 0x199   : > { %v2006_v46 = vsel %vm1947_vm9, %v1941_v20, %v4449_v56  ;;  %v2007_v49 = vsel %vm1947_vm9, %v1942_v34, %v4450_v30  ;;  %v2069_v37 = vsel %vm2012_vm10, %v2004_v33, %v4419_v11  ;;  %v2070_v44 = vsel %vm2012_vm10, %v2005_v60, %v4420_v61 }
 0x19a   : > { %v4458_v15 = vpop.permute.xlu0 %4457  ;;  %v2071_v23 = vsel %vm2012_vm10, %v2006_v46, %v4454_v43  ;;  %v2072_v48 = vsel %vm2012_vm10, %v2007_v49, %v4455_v21  ;;  %v1650_v29 = vsel %vm1617_vm3, %v7317_v52, %v3909_v42  ;;  %v4465_v55 = vunpack.i.h.bf16 %v4463_v51 }
 0x19b   : > { %v4460_v18 = vunpack.i.h.bf16 %v4458_v15  ;;  %v4459_v10 = vunpack.i.l.bf16 %v4458_v15  ;;  %v4464_v53 = vunpack.i.l.bf16 %v4463_v51  ;;  %v2105_v6 = vpack.c.bf16 %v2070_v44, %v2069_v37 }
 0x19c   : > { %v2106_v11 = vpack.c.bf16 %v2072_v48, %v2071_v23  ;;  %v4473_v17 = vpop.permute.xlu1 %4472  ;;  %v1749_v5 = vsel %vm1687_vm5, %v6597_v19, %v4465_v55 }
 0x19d   : > { %v1685_v61 = vsel %vm1652_vm4, %v1650_v29, %v4459_v10  ;;  %v1686_v58 = vsel %vm1652_vm4, %v1651_v25, %v4460_v18  ;;  %3739 = vmatprep.mubr.msk.bf16.mxu1 %vm2136_vm11, %v2105_v6  ;;  %v4475_v41 = vunpack.i.h.bf16 %v4473_v17  ;;  %v4474_v1 = vunpack.i.l.bf16 %v4473_v17 }
 0x19e   : > { %v4468_v63 = vpop.permute.xlu0 %4467  ;;  %3740 = vmatmul.mubr.msk.bf16.gmra.mrb[24].mxu1 %vm2136_vm11, %v2106_v11  ;;  %v1748_v38 = vsel %vm1687_vm5, %v6600_v4, %v4464_v53  ;;  %v1750_v8 = vsel %vm1687_vm5, %v1685_v61, %v4464_v53  ;;  %v1751_v31 = vsel %vm1687_vm5, %v1686_v58, %v4465_v55 }
 0x19f   : > { %v4470_v24 = vunpack.i.h.bf16 %v4468_v63  ;;  %v4469_v22 = vunpack.i.l.bf16 %v4468_v63 }
 0x1a0   : > { %v4483_v40 = vpop.permute.xlu1 %4482 }
 0x1a1   : > { %v1814_v3 = vsel %vm1752_vm6, %v1749_v5, %v4470_v24  ;;  %v1813_v54 = vsel %vm1752_vm6, %v1748_v38, %v4469_v22  ;;  %v1815_v32 = vsel %vm1752_vm6, %v1750_v8, %v4469_v22  ;;  %v1816_v7 = vsel %vm1752_vm6, %v1751_v31, %v4470_v24 }
 0x1a2   : > { %v1878_v13 = vsel %vm1817_vm7, %v1813_v54, %v4474_v1  ;;  %v1879_v4 = vsel %vm1817_vm7, %v1814_v3, %v4475_v41  ;;  %v1880_v36 = vsel %vm1817_vm7, %v1815_v32, %v4474_v1  ;;  %v1881_v19 = vsel %vm1817_vm7, %v1816_v7, %v4475_v41  ;;  %v4478_v45 = vpop.permute.xlu0 %4477 }
 0x1a3   : > { %v1943_v2 = vsel %vm1882_vm8, %v1878_v13, %v4444_v59  ;;  %v1944_v27 = vsel %vm1882_vm8, %v1879_v4, %v4445_v0  ;;  %v4480_v16 = vunpack.i.h.bf16 %v4478_v45  ;;  %v4479_v26 = vunpack.i.l.bf16 %v4478_v45 }
 0x1a4   : > { %v4485_v47 = vunpack.i.h.bf16 %v4483_v40  ;;  %v4484_v57 = vunpack.i.l.bf16 %v4483_v40  ;;  %v2008_v12 = vsel %vm1947_vm9, %v1943_v2, %v4449_v56  ;;  %v2009_v9 = vsel %vm1947_vm9, %v1944_v27, %v4450_v30 }
 0x1a5   : > { %v1945_v39 = vsel %vm1882_vm8, %v1880_v36, %v4479_v26  ;;  %v1946_v35 = vsel %vm1882_vm8, %v1881_v19, %v4480_v16  ;;  %v2073_v50 = vsel %vm2012_vm10, %v2008_v12, %v4454_v43  ;;  %v2074_v14 = vsel %vm2012_vm10, %v2009_v9, %v4455_v21 }
 0x1a6   : > { %v4488_v0 = vpop.permute.xlu0 %4487  ;;  %v2107_v59 = vpack.c.bf16 %v2074_v14, %v2073_v50  ;;  %v2010_v20 = vsel %vm1947_vm9, %v1945_v39, %v4484_v57  ;;  %v2011_v56 = vsel %vm1947_vm9, %v1946_v35, %v4485_v47 }
 0x1a7   : > { %v4490_v62 = vunpack.i.h.bf16 %v4488_v0  ;;  %v4489_v42 = vunpack.i.l.bf16 %v4488_v0 }
 0x1a8   : > { %3743 = vmatprep.mubr.msk.bf16.mxu1 %vm2136_vm11, %v2107_v59 }
 0x1a9   : > { %v2075_v30 = vsel %vm2012_vm10, %v2010_v20, %v4489_v42  ;;  %v2076_v34 = vsel %vm2012_vm10, %v2011_v56, %v4490_v62 }
 0x1aa   : > { %v2108_v51 = vpack.c.bf16 %v2076_v34, %v2075_v30 }
 0x1ac   : > { %3744 = vmatmul.mubr.msk.bf16.gmra.mrb[28].mxu1 %vm2136_vm11, %v2108_v51 }
 0x1bc   : > { %v3685_v21 = vpop.f32.mrb[0].mxu0 }
 0x1bd   : > { %v2280_v43 = vadd.f32 %v3685_v21, %v6696_v28  ;;  %v2271_v33 = vpop.f32.mrb[1].mxu0 }
 0x1be   : > { %v2272_v60 = vadd.f32 %v6696_v28, %v2271_v33  ;;  %v3686_v46 = vpop.f32.mrb[2].mxu0 }
 0x1bf   : > { %v3533_v49 = vpack.c.bf16 %v2280_v43, %v2280_v43  ;;  %v2283_v15 = vadd.f32 %v3686_v46, %v6696_v28  ;;  %v2274_v37 = vpop.f32.mrb[3].mxu0  ;;  %v2984_v25 = vmul.f32 %v2280_v43, %v2280_v43  ;;  %v2850_v6 = vsel %vm2012_vm10, %v2280_v43, 0.0 }
 0x1c0   : > { %v3531_v44 = vpack.c.bf16 %v2272_v60, %v2272_v60  ;;  %v2982_v23 = vmul.f32 %v2272_v60, %v2272_v60  ;;  %v2275_v48 = vadd.f32 %v6696_v28, %v2274_v37  ;;  %v2847_v29 = vsel %vm2012_vm10, %v2272_v60, 0.0 }
 0x1c1   : > { %2785 = vst.msk [vmem:[%s6703_s30 + $0x8] sm:$0xf] %vm2782_vm12, %v3533_v49  ;;  %v3534_v52 = vpack.c.bf16 %v2283_v15, %v2283_v15  ;;  %v2985_v17 = vmul.f32 %v2283_v15, %v2283_v15  ;;  %v3049_v41 = vsel %vm2012_vm10, %v2984_v25, 0.0  ;;  %v2852_v1 = vsel %vm2012_vm10, %v2283_v15, 0.0 }
 0x1c2   : > { %2783 = vst.msk [vmem:[%s6703_s30] sm:$0xf] %vm2782_vm12, %v3531_v44  ;;  %v3532_v18 = vpack.c.bf16 %v2275_v48, %v2275_v48  ;;  %v2848_v10 = vsel %vm2012_vm10, %v2275_v48, 0.0  ;;  %v2983_v55 = vmul.f32 %v2275_v48, %v2275_v48  ;;  %v3046_v11 = vsel %vm2012_vm10, %v2982_v23, 0.0 }
 0x1c3   : > { %2786 = vst.msk [vmem:[%s6703_s30 + $0xc] sm:$0xf] %vm2782_vm12, %v3534_v52  ;;  %v2849_v53 = vadd.f32 %v2848_v10, %v2847_v29  ;;  %v3051_v38 = vsel %vm2012_vm10, %v2985_v17, 0.0 }
 0x1c4   : > { %2784 = vst.msk [vmem:[%s6703_s30 + $0x4] sm:$0xf] %vm2782_vm12, %v3532_v18  ;;  %v3047_v61 = vsel %vm2012_vm10, %v2983_v55, 0.0 }
 0x1c5   : > { %v2851_v58 = vadd.f32 %v2850_v6, %v2849_v53  ;;  %v3048_v63 = vadd.f32 %v3047_v61, %v3046_v11 }
 0x1c7   : > { %v3050_v24 = vadd.f32 %v3049_v41, %v3048_v63  ;;  %v2853_v22 = vadd.f32 %v2852_v1, %v2851_v58 }
 0x1c9   : > { %v3052_v8 = vadd.f32 %v3051_v38, %v3050_v24 }
 0x1ca   : > { %v3689_v5 = vpop.f32.mrb[4].mxu0 }
 0x1cb   : > { %v2296_v31 = vadd.f32 %v3689_v5, %v6696_v28  ;;  %v2287_v3 = vpop.f32.mrb[5].mxu0 }
 0x1cc   : > { %v2288_v54 = vadd.f32 %v6696_v28, %v2287_v3  ;;  %v3690_v32 = vpop.f32.mrb[6].mxu0 }
 0x1cd   : > { %v3537_v7 = vpack.c.bf16 %v2296_v31, %v2296_v31  ;;  %v2299_v40 = vadd.f32 %v3690_v32, %v6696_v28  ;;  %v2290_v13 = vpop.f32.mrb[7].mxu0  ;;  %v2988_v57 = vmul.f32 %v2296_v31, %v2296_v31  ;;  %v2858_v35 = vsel %vm2012_vm10, %v2296_v31, 0.0 }
 0x1ce   : > { %v3535_v4 = vpack.c.bf16 %v2288_v54, %v2288_v54  ;;  %v2854_v36 = vsel %vm2012_vm10, %v2288_v54, 0.0  ;;  %v2986_v19 = vmul.f32 %v2288_v54, %v2288_v54  ;;  %v2291_v45 = vadd.f32 %v6696_v28, %v2290_v13 }
 0x1cf   : > { %2789 = vst.msk [vmem:[%s6703_s30 + $0x18] sm:$0xf] %vm2782_vm12, %v3537_v7  ;;  %v2855_v2 = vadd.f32 %v2854_v36, %v2853_v22  ;;  %v3538_v27 = vpack.c.bf16 %v2299_v40, %v2299_v40  ;;  %v2989_v50 = vmul.f32 %v2299_v40, %v2299_v40  ;;  %v2860_v59 = vsel %vm2012_vm10, %v2299_v40, 0.0 }
 0x1d0   : > { %2787 = vst.msk [vmem:[%s6703_s30 + $0x10] sm:$0xf] %vm2782_vm12, %v3535_v4  ;;  %v3053_v16 = vsel %vm2012_vm10, %v2986_v19, 0.0  ;;  %v3536_v26 = vpack.c.bf16 %v2291_v45, %v2291_v45  ;;  %v2856_v47 = vsel %vm2012_vm10, %v2291_v45, 0.0  ;;  %v2987_v39 = vmul.f32 %v2291_v45, %v2291_v45 }
 0x1d1   : > { %v3054_v12 = vadd.f32 %v3053_v16, %v3052_v8  ;;  %2790 = vst.msk [vmem:[%s6703_s30 + $0x1c] sm:$0xf] %vm2782_vm12, %v3538_v27  ;;  %v2857_v9 = vadd.f32 %v2856_v47, %v2855_v2  ;;  %v3057_v42 = vsel %vm2012_vm10, %v2988_v57, 0.0  ;;  %v3059_v34 = vsel %vm2012_vm10, %v2989_v50, 0.0 }
 0x1d2   : > { %2788 = vst.msk [vmem:[%s6703_s30 + $0x14] sm:$0xf] %vm2782_vm12, %v3536_v26  ;;  %v3055_v0 = vsel %vm2012_vm10, %v2987_v39, 0.0 }
 0x1d3   : > { %v2859_v14 = vadd.f32 %v2858_v35, %v2857_v9  ;;  %v3056_v62 = vadd.f32 %v3055_v0, %v3054_v12 }
 0x1d4   : > { %v3693_v30 = vpop.f32.mrb[8].mxu0 }
 0x1d5   : > { %v2861_v20 = vadd.f32 %v2860_v59, %v2859_v14  ;;  %v3058_v56 = vadd.f32 %v3057_v42, %v3056_v62  ;;  %v2312_v51 = vadd.f32 %v3693_v30, %v6696_v28  ;;  %v2303_v21 = vpop.f32.mrb[9].mxu0 }
 0x1d6   : > { %v2304_v43 = vadd.f32 %v6696_v28, %v2303_v21  ;;  %v3694_v60 = vpop.f32.mrb[10].mxu0 }
 0x1d7   : > { %v3060_v33 = vadd.f32 %v3059_v34, %v3058_v56  ;;  %v3541_v46 = vpack.c.bf16 %v2312_v51, %v2312_v51  ;;  %v2315_v49 = vadd.f32 %v3694_v60, %v6696_v28  ;;  %v2306_v15 = vpop.f32.mrb[11].mxu0  ;;  %v2992_v55 = vmul.f32 %v2312_v51, %v2312_v51 }
 0x1d8   : > { %v3539_v37 = vpack.c.bf16 %v2304_v43, %v2304_v43  ;;  %v2862_v44 = vsel %vm2012_vm10, %v2304_v43, 0.0  ;;  %v2990_v23 = vmul.f32 %v2304_v43, %v2304_v43  ;;  %v2307_v48 = vadd.f32 %v6696_v28, %v2306_v15 }
 0x1d9   : > { %2793 = vst.msk [vmem:[%s6703_s30 + $0x28] sm:$0xf] %vm2782_vm12, %v3541_v46  ;;  %v2863_v25 = vadd.f32 %v2862_v44, %v2861_v20  ;;  %v3542_v52 = vpack.c.bf16 %v2315_v49, %v2315_v49  ;;  %v2866_v17 = vsel %vm2012_vm10, %v2312_v51, 0.0  ;;  %v2993_v61 = vmul.f32 %v2315_v49, %v2315_v49 }
 0x1da   : > { %2791 = vst.msk [vmem:[%s6703_s30 + $0x20] sm:$0xf] %vm2782_vm12, %v3539_v37  ;;  %v3061_v29 = vsel %vm2012_vm10, %v2990_v23, 0.0  ;;  %v3540_v18 = vpack.c.bf16 %v2307_v48, %v2307_v48  ;;  %v2864_v10 = vsel %vm2012_vm10, %v2307_v48, 0.0  ;;  %v2991_v11 = vmul.f32 %v2307_v48, %v2307_v48 }
 0x1db   : > { %v3062_v53 = vadd.f32 %v3061_v29, %v3060_v33  ;;  %2794 = vst.msk [vmem:[%s6703_s30 + $0x2c] sm:$0xf] %vm2782_vm12, %v3542_v52  ;;  %v2865_v6 = vadd.f32 %v2864_v10, %v2863_v25  ;;  %v2868_v41 = vsel %vm2012_vm10, %v2315_v49, 0.0  ;;  %v3065_v24 = vsel %vm2012_vm10, %v2992_v55, 0.0 }
 0x1dc   : > { %2792 = vst.msk [vmem:[%s6703_s30 + $0x24] sm:$0xf] %vm2782_vm12, %v3540_v18  ;;  %v3063_v63 = vsel %vm2012_vm10, %v2991_v11, 0.0  ;;  %v3067_v8 = vsel %vm2012_vm10, %v2993_v61, 0.0 }
 0x1dd   : > { %v2867_v58 = vadd.f32 %v2866_v17, %v2865_v6  ;;  %v3064_v1 = vadd.f32 %v3063_v63, %v3062_v53 }
 0x1df   : > { %v2869_v22 = vadd.f32 %v2868_v41, %v2867_v58  ;;  %v3066_v38 = vadd.f32 %v3065_v24, %v3064_v1 }
 0x1e0   : > { %v3697_v5 = vpop.f32.mrb[12].mxu0 }
 0x1e1   : > { %v2328_v31 = vadd.f32 %v3697_v5, %v6696_v28  ;;  %v2319_v3 = vpop.f32.mrb[13].mxu0  ;;  %v3068_v32 = vadd.f32 %v3067_v8, %v3066_v38 }
 0x1e2   : > { %v2320_v54 = vadd.f32 %v6696_v28, %v2319_v3  ;;  %v3698_v7 = vpop.f32.mrb[14].mxu0 }
 0x1e3   : > { %v3545_v40 = vpack.c.bf16 %v2328_v31, %v2328_v31  ;;  %v2331_v13 = vadd.f32 %v3698_v7, %v6696_v28  ;;  %v2322_v4 = vpop.f32.mrb[15].mxu0  ;;  %v2996_v12 = vmul.f32 %v2328_v31, %v2328_v31  ;;  %v2874_v50 = vsel %vm2012_vm10, %v2328_v31, 0.0 }
 0x1e4   : > { %v3543_v36 = vpack.c.bf16 %v2320_v54, %v2320_v54  ;;  %v2870_v19 = vsel %vm2012_vm10, %v2320_v54, 0.0  ;;  %v2994_v45 = vmul.f32 %v2320_v54, %v2320_v54  ;;  %v2323_v2 = vadd.f32 %v6696_v28, %v2322_v4 }
 0x1e5   : > { %2797 = vst.msk [vmem:[%s6703_s30 + $0x38] sm:$0xf] %vm2782_vm12, %v3545_v40  ;;  %v2871_v27 = vadd.f32 %v2870_v19, %v2869_v22  ;;  %v3546_v16 = vpack.c.bf16 %v2331_v13, %v2331_v13  ;;  %v2997_v14 = vmul.f32 %v2331_v13, %v2331_v13  ;;  %v2876_v62 = vsel %vm2012_vm10, %v2331_v13, 0.0 }
 0x1e6   : > { %2795 = vst.msk [vmem:[%s6703_s30 + $0x30] sm:$0xf] %vm2782_vm12, %v3543_v36  ;;  %v3069_v26 = vsel %vm2012_vm10, %v2994_v45, 0.0  ;;  %v3544_v47 = vpack.c.bf16 %v2323_v2, %v2323_v2  ;;  %v2872_v57 = vsel %vm2012_vm10, %v2323_v2, 0.0  ;;  %v2995_v35 = vmul.f32 %v2323_v2, %v2323_v2 }
 0x1e7   : > { %v3070_v9 = vadd.f32 %v3069_v26, %v3068_v32  ;;  %2798 = vst.msk [vmem:[%s6703_s30 + $0x3c] sm:$0xf] %vm2782_vm12, %v3546_v16  ;;  %v2873_v39 = vadd.f32 %v2872_v57, %v2871_v27  ;;  %v3073_v20 = vsel %vm2012_vm10, %v2996_v12, 0.0  ;;  %v3075_v51 = vsel %vm2012_vm10, %v2997_v14, 0.0 }
 0x1e8   : > { %2796 = vst.msk [vmem:[%s6703_s30 + $0x34] sm:$0xf] %vm2782_vm12, %v3544_v47  ;;  %v3071_v59 = vsel %vm2012_vm10, %v2995_v35, 0.0 }
 0x1e9   : > { %v2875_v0 = vadd.f32 %v2874_v50, %v2873_v39  ;;  %v3072_v42 = vadd.f32 %v3071_v59, %v3070_v9 }
 0x1eb   : > { %v2877_v56 = vadd.f32 %v2876_v62, %v2875_v0  ;;  %v3074_v30 = vadd.f32 %v3073_v20, %v3072_v42 }
 0x1ec   : > { %v3701_v34 = vpop.f32.mrb[16].mxu0 }
 0x1ed   : > { %v2344_v21 = vadd.f32 %v3701_v34, %v6696_v28  ;;  %v2335_v43 = vpop.f32.mrb[17].mxu0  ;;  %v3076_v60 = vadd.f32 %v3075_v51, %v3074_v30 }
 0x1ee   : > { %v2336_v33 = vadd.f32 %v6696_v28, %v2335_v43  ;;  %v3702_v46 = vpop.f32.mrb[18].mxu0 }
 0x1ef   : > { %v3549_v49 = vpack.c.bf16 %v2344_v21, %v2344_v21  ;;  %v2347_v15 = vadd.f32 %v3702_v46, %v6696_v28  ;;  %v2338_v37 = vpop.f32.mrb[19].mxu0  ;;  %v3000_v53 = vmul.f32 %v2344_v21, %v2344_v21  ;;  %v2882_v61 = vsel %vm2012_vm10, %v2344_v21, 0.0 }
 0x1f0   : > { %v3547_v44 = vpack.c.bf16 %v2336_v33, %v2336_v33  ;;  %v2878_v23 = vsel %vm2012_vm10, %v2336_v33, 0.0  ;;  %v2998_v48 = vmul.f32 %v2336_v33, %v2336_v33  ;;  %v2339_v25 = vadd.f32 %v6696_v28, %v2338_v37 }
 0x1f1   : > { %2801 = vst.msk [vmem:[%s6703_s30 + $0x48] sm:$0xf] %vm2782_vm12, %v3549_v49  ;;  %v2879_v52 = vadd.f32 %v2878_v23, %v2877_v56  ;;  %v3550_v29 = vpack.c.bf16 %v2347_v15, %v2347_v15  ;;  %v3001_v58 = vmul.f32 %v2347_v15, %v2347_v15  ;;  %v2884_v1 = vsel %vm2012_vm10, %v2347_v15, 0.0 }
 0x1f2   : > { %2799 = vst.msk [vmem:[%s6703_s30 + $0x40] sm:$0xf] %vm2782_vm12, %v3547_v44  ;;  %v3077_v18 = vsel %vm2012_vm10, %v2998_v48, 0.0  ;;  %v3548_v10 = vpack.c.bf16 %v2339_v25, %v2339_v25  ;;  %v2880_v55 = vsel %vm2012_vm10, %v2339_v25, 0.0  ;;  %v2999_v17 = vmul.f32 %v2339_v25, %v2339_v25 }
 0x1f3   : > { %v3078_v6 = vadd.f32 %v3077_v18, %v3076_v60  ;;  %2802 = vst.msk [vmem:[%s6703_s30 + $0x4c] sm:$0xf] %vm2782_vm12, %v3550_v29  ;;  %v2881_v11 = vadd.f32 %v2880_v55, %v2879_v52  ;;  %v3081_v22 = vsel %vm2012_vm10, %v3000_v53, 0.0  ;;  %v3083_v31 = vsel %vm2012_vm10, %v3001_v58, 0.0 }
 0x1f4   : > { %2800 = vst.msk [vmem:[%s6703_s30 + $0x44] sm:$0xf] %vm2782_vm12, %v3548_v10  ;;  %v3079_v41 = vsel %vm2012_vm10, %v2999_v17, 0.0 }
 0x1f5   : > { %v2883_v63 = vadd.f32 %v2882_v61, %v2881_v11  ;;  %v3080_v24 = vadd.f32 %v3079_v41, %v3078_v6 }
 0x1f7   : > { %v2885_v38 = vadd.f32 %v2884_v1, %v2883_v63  ;;  %v3082_v5 = vadd.f32 %v3081_v22, %v3080_v24 }
 0x1f8   : > { %v3705_v8 = vpop.f32.mrb[20].mxu0 }
 0x1f9   : > { %v2360_v3 = vadd.f32 %v3705_v8, %v6696_v28  ;;  %v2351_v54 = vpop.f32.mrb[21].mxu0  ;;  %v3084_v7 = vadd.f32 %v3083_v31, %v3082_v5 }
 0x1fa   : > { %v2352_v32 = vadd.f32 %v6696_v28, %v2351_v54  ;;  %v3706_v40 = vpop.f32.mrb[22].mxu0 }
 0x1fb   : > { %v3553_v13 = vpack.c.bf16 %v2360_v3, %v2360_v3  ;;  %v2363_v4 = vadd.f32 %v3706_v40, %v6696_v28  ;;  %v2354_v36 = vpop.f32.mrb[23].mxu0  ;;  %v3004_v9 = vmul.f32 %v2360_v3, %v2360_v3  ;;  %v2890_v14 = vsel %vm2012_vm10, %v2360_v3, 0.0 }
 0x1fc   : > { %v3551_v19 = vpack.c.bf16 %v2352_v32, %v2352_v32  ;;  %v2886_v45 = vsel %vm2012_vm10, %v2352_v32, 0.0  ;;  %v3002_v2 = vmul.f32 %v2352_v32, %v2352_v32  ;;  %v2355_v27 = vadd.f32 %v6696_v28, %v2354_v36 }
 0x1fd   : > { %2805 = vst.msk [vmem:[%s6703_s30 + $0x58] sm:$0xf] %vm2782_vm12, %v3553_v13  ;;  %v2887_v16 = vadd.f32 %v2886_v45, %v2885_v38  ;;  %v3554_v26 = vpack.c.bf16 %v2363_v4, %v2363_v4  ;;  %v3005_v0 = vmul.f32 %v2363_v4, %v2363_v4  ;;  %v2892_v42 = vsel %vm2012_vm10, %v2363_v4, 0.0 }
 0x1fe   : > { %2803 = vst.msk [vmem:[%s6703_s30 + $0x50] sm:$0xf] %vm2782_vm12, %v3551_v19  ;;  %v3085_v47 = vsel %vm2012_vm10, %v3002_v2, 0.0  ;;  %v3552_v57 = vpack.c.bf16 %v2355_v27, %v2355_v27  ;;  %v2888_v12 = vsel %vm2012_vm10, %v2355_v27, 0.0  ;;  %v3003_v50 = vmul.f32 %v2355_v27, %v2355_v27 }
 0x1ff   : > { %v3086_v39 = vadd.f32 %v3085_v47, %v3084_v7  ;;  %2806 = vst.msk [vmem:[%s6703_s30 + $0x5c] sm:$0xf] %vm2782_vm12, %v3554_v26  ;;  %v2889_v35 = vadd.f32 %v2888_v12, %v2887_v16  ;;  %v3089_v56 = vsel %vm2012_vm10, %v3004_v9, 0.0  ;;  %v3091_v21 = vsel %vm2012_vm10, %v3005_v0, 0.0 }
 0x200   : > { %2804 = vst.msk [vmem:[%s6703_s30 + $0x54] sm:$0xf] %vm2782_vm12, %v3552_v57  ;;  %v3087_v62 = vsel %vm2012_vm10, %v3003_v50, 0.0 }
 0x201   : > { %v2891_v59 = vadd.f32 %v2890_v14, %v2889_v35  ;;  %v3088_v20 = vadd.f32 %v3087_v62, %v3086_v39 }
 0x203   : > { %v2893_v30 = vadd.f32 %v2892_v42, %v2891_v59  ;;  %v3090_v34 = vadd.f32 %v3089_v56, %v3088_v20 }
 0x204   : > { %v3709_v51 = vpop.f32.mrb[24].mxu0 }
 0x205   : > { %v2376_v43 = vadd.f32 %v3709_v51, %v6696_v28  ;;  %v2367_v33 = vpop.f32.mrb[25].mxu0  ;;  %v3092_v46 = vadd.f32 %v3091_v21, %v3090_v34 }
 0x206   : > { %v2368_v60 = vadd.f32 %v6696_v28, %v2367_v33  ;;  %v3710_v49 = vpop.f32.mrb[26].mxu0 }
 0x207   : > { %v3557_v15 = vpack.c.bf16 %v2376_v43, %v2376_v43  ;;  %v2379_v37 = vadd.f32 %v3710_v49, %v6696_v28  ;;  %v2370_v44 = vpop.f32.mrb[27].mxu0  ;;  %v3008_v6 = vmul.f32 %v2376_v43, %v2376_v43  ;;  %v2898_v58 = vsel %vm2012_vm10, %v2376_v43, 0.0 }
 0x208   : > { %v3555_v23 = vpack.c.bf16 %v2368_v60, %v2368_v60  ;;  %v2894_v48 = vsel %vm2012_vm10, %v2368_v60, 0.0  ;;  %v3006_v25 = vmul.f32 %v2368_v60, %v2368_v60  ;;  %v2371_v52 = vadd.f32 %v6696_v28, %v2370_v44 }
 0x209   : > { %2809 = vst.msk [vmem:[%s6703_s30 + $0x68] sm:$0xf] %vm2782_vm12, %v3557_v15  ;;  %v2895_v29 = vadd.f32 %v2894_v48, %v2893_v30  ;;  %v3558_v18 = vpack.c.bf16 %v2379_v37, %v2379_v37  ;;  %v3009_v63 = vmul.f32 %v2379_v37, %v2379_v37  ;;  %v2900_v24 = vsel %vm2012_vm10, %v2379_v37, 0.0 }
 0x20a   : > { %2807 = vst.msk [vmem:[%s6703_s30 + $0x60] sm:$0xf] %vm2782_vm12, %v3555_v23  ;;  %v3093_v10 = vsel %vm2012_vm10, %v3006_v25, 0.0  ;;  %v3556_v55 = vpack.c.bf16 %v2371_v52, %v2371_v52  ;;  %v2896_v53 = vsel %vm2012_vm10, %v2371_v52, 0.0  ;;  %v3007_v61 = vmul.f32 %v2371_v52, %v2371_v52 }
 0x20b   : > { %v3094_v11 = vadd.f32 %v3093_v10, %v3092_v46  ;;  %2810 = vst.msk [vmem:[%s6703_s30 + $0x6c] sm:$0xf] %vm2782_vm12, %v3558_v18  ;;  %v2897_v17 = vadd.f32 %v2896_v53, %v2895_v29  ;;  %v3097_v38 = vsel %vm2012_vm10, %v3008_v6, 0.0  ;;  %v3099_v3 = vsel %vm2012_vm10, %v3009_v63, 0.0 }
 0x20c   : > { %2808 = vst.msk [vmem:[%s6703_s30 + $0x64] sm:$0xf] %vm2782_vm12, %v3556_v55  ;;  %v3095_v1 = vsel %vm2012_vm10, %v3007_v61, 0.0 }
 0x20d   : > { %v2899_v41 = vadd.f32 %v2898_v58, %v2897_v17  ;;  %v3096_v22 = vadd.f32 %v3095_v1, %v3094_v11 }
 0x20f   : > { %v2901_v5 = vadd.f32 %v2900_v24, %v2899_v41  ;;  %v3098_v8 = vadd.f32 %v3097_v38, %v3096_v22 }
 0x210   : > { %v3713_v31 = vpop.f32.mrb[28].mxu0 }
 0x211   : > { %v2392_v54 = vadd.f32 %v3713_v31, %v6696_v28  ;;  %v2383_v32 = vpop.f32.mrb[29].mxu0  ;;  %v3100_v40 = vadd.f32 %v3099_v3, %v3098_v8 }
 0x212   : > { %v2384_v7 = vadd.f32 %v6696_v28, %v2383_v32  ;;  %v3714_v13 = vpop.f32.mrb[30].mxu0 }
 0x213   : > { %v3561_v4 = vpack.c.bf16 %v2392_v54, %v2392_v54  ;;  %v2395_v36 = vadd.f32 %v3714_v13, %v6696_v28  ;;  %v2386_v19 = vpop.f32.mrb[31].mxu0  ;;  %v3012_v39 = vmul.f32 %v2392_v54, %v2392_v54  ;;  %v2906_v0 = vsel %vm2012_vm10, %v2392_v54, 0.0 }
 0x214   : > { %v3559_v45 = vpack.c.bf16 %v2384_v7, %v2384_v7  ;;  %v2902_v2 = vsel %vm2012_vm10, %v2384_v7, 0.0  ;;  %v3010_v27 = vmul.f32 %v2384_v7, %v2384_v7  ;;  %v2387_v16 = vadd.f32 %v6696_v28, %v2386_v19 }
 0x215   : > { %2813 = vst.msk [vmem:[%s6703_s30 + $0x78] sm:$0xf] %vm2782_vm12, %v3561_v4  ;;  %v2903_v26 = vadd.f32 %v2902_v2, %v2901_v5  ;;  %v3562_v47 = vpack.c.bf16 %v2395_v36, %v2395_v36  ;;  %v3013_v59 = vmul.f32 %v2395_v36, %v2395_v36  ;;  %v2908_v20 = vsel %vm2012_vm10, %v2395_v36, 0.0 }
 0x216   : > { %2811 = vst.msk [vmem:[%s6703_s30 + $0x70] sm:$0xf] %vm2782_vm12, %v3559_v45  ;;  %v3101_v57 = vsel %vm2012_vm10, %v3010_v27, 0.0  ;;  %v3560_v12 = vpack.c.bf16 %v2387_v16, %v2387_v16  ;;  %v2904_v9 = vsel %vm2012_vm10, %v2387_v16, 0.0  ;;  %v3011_v14 = vmul.f32 %v2387_v16, %v2387_v16 }
 0x217   : > { %v3102_v35 = vadd.f32 %v3101_v57, %v3100_v40  ;;  %2814 = vst.msk [vmem:[%s6703_s30 + $0x7c] sm:$0xf] %vm2782_vm12, %v3562_v47  ;;  %v2905_v50 = vadd.f32 %v2904_v9, %v2903_v26  ;;  %v3105_v30 = vsel %vm2012_vm10, %v3012_v39, 0.0  ;;  %v3107_v21 = vsel %vm2012_vm10, %v3013_v59, 0.0 }
 0x218   : > { %2812 = vst.msk [vmem:[%s6703_s30 + $0x74] sm:$0xf] %vm2782_vm12, %v3560_v12  ;;  %v3103_v42 = vsel %vm2012_vm10, %v3011_v14, 0.0 }
 0x219   : > { %v2907_v62 = vadd.f32 %v2906_v0, %v2905_v50  ;;  %v3104_v56 = vadd.f32 %v3103_v42, %v3102_v35 }
 0x21b   : > { %v2909_v34 = vadd.f32 %v2908_v20, %v2907_v62  ;;  %v3106_v51 = vadd.f32 %v3105_v30, %v3104_v56 }
 0x21d   : > { %v3717_v43 = vpop.f32.mrb[0].mxu1  ;;  %v3108_v46 = vadd.f32 %v3107_v21, %v3106_v51 }
 0x21e   : > { %v2408_v33 = vadd.f32 %v3717_v43, %v6696_v28  ;;  %v2399_v60 = vpop.f32.mrb[1].mxu1 }
 0x21f   : > { %v2400_v49 = vadd.f32 %v6696_v28, %v2399_v60  ;;  %v3718_v15 = vpop.f32.mrb[2].mxu1 }
 0x220   : > { %v3565_v37 = vpack.c.bf16 %v2408_v33, %v2408_v33  ;;  %v2411_v44 = vadd.f32 %v3718_v15, %v6696_v28  ;;  %v2402_v23 = vpop.f32.mrb[3].mxu1  ;;  %v3016_v11 = vmul.f32 %v2408_v33, %v2408_v33  ;;  %v2914_v63 = vsel %vm2012_vm10, %v2408_v33, 0.0 }
 0x221   : > { %v3563_v48 = vpack.c.bf16 %v2400_v49, %v2400_v49  ;;  %v2910_v25 = vsel %vm2012_vm10, %v2400_v49, 0.0  ;;  %v3014_v52 = vmul.f32 %v2400_v49, %v2400_v49  ;;  %v2403_v29 = vadd.f32 %v6696_v28, %v2402_v23 }
 0x222   : > { %2817 = vst.msk [vmem:[%s6703_s30 + $0x88] sm:$0xf] %vm2782_vm12, %v3565_v37  ;;  %v2911_v18 = vadd.f32 %v2910_v25, %v2909_v34  ;;  %v3566_v10 = vpack.c.bf16 %v2411_v44, %v2411_v44  ;;  %v3017_v41 = vmul.f32 %v2411_v44, %v2411_v44  ;;  %v2916_v22 = vsel %vm2012_vm10, %v2411_v44, 0.0 }
 0x223   : > { %2815 = vst.msk [vmem:[%s6703_s30 + $0x80] sm:$0xf] %vm2782_vm12, %v3563_v48  ;;  %v3109_v55 = vsel %vm2012_vm10, %v3014_v52, 0.0  ;;  %v3564_v53 = vpack.c.bf16 %v2403_v29, %v2403_v29  ;;  %v2912_v6 = vsel %vm2012_vm10, %v2403_v29, 0.0  ;;  %v3015_v58 = vmul.f32 %v2403_v29, %v2403_v29 }
 0x224   : > { %v3110_v17 = vadd.f32 %v3109_v55, %v3108_v46  ;;  %2818 = vst.msk [vmem:[%s6703_s30 + $0x8c] sm:$0xf] %vm2782_vm12, %v3566_v10  ;;  %v2913_v61 = vadd.f32 %v2912_v6, %v2911_v18  ;;  %v3113_v5 = vsel %vm2012_vm10, %v3016_v11, 0.0  ;;  %v3115_v3 = vsel %vm2012_vm10, %v3017_v41, 0.0 }
 0x225   : > { %2816 = vst.msk [vmem:[%s6703_s30 + $0x84] sm:$0xf] %vm2782_vm12, %v3564_v53  ;;  %v3111_v24 = vsel %vm2012_vm10, %v3015_v58, 0.0 }
 0x226   : > { %v2915_v1 = vadd.f32 %v2914_v63, %v2913_v61  ;;  %v3112_v38 = vadd.f32 %v3111_v24, %v3110_v17 }
 0x228   : > { %v2917_v8 = vadd.f32 %v2916_v22, %v2915_v1  ;;  %v3114_v31 = vadd.f32 %v3113_v5, %v3112_v38 }
 0x22a   : > { %v3116_v40 = vadd.f32 %v3115_v3, %v3114_v31 }
 0x22b   : > { %v3721_v54 = vpop.f32.mrb[4].mxu1 }
 0x22c   : > { %v2424_v32 = vadd.f32 %v3721_v54, %v6696_v28  ;;  %v2415_v7 = vpop.f32.mrb[5].mxu1 }
 0x22d   : > { %v2416_v13 = vadd.f32 %v6696_v28, %v2415_v7  ;;  %v3722_v4 = vpop.f32.mrb[6].mxu1 }
 0x22e   : > { %v3569_v36 = vpack.c.bf16 %v2424_v32, %v2424_v32  ;;  %v2427_v19 = vadd.f32 %v3722_v4, %v6696_v28  ;;  %v2418_v45 = vpop.f32.mrb[7].mxu1  ;;  %v3020_v35 = vmul.f32 %v2424_v32, %v2424_v32  ;;  %v2922_v59 = vsel %vm2012_vm10, %v2424_v32, 0.0 }
 0x22f   : > { %v3567_v2 = vpack.c.bf16 %v2416_v13, %v2416_v13  ;;  %v2918_v27 = vsel %vm2012_vm10, %v2416_v13, 0.0  ;;  %v3018_v16 = vmul.f32 %v2416_v13, %v2416_v13  ;;  %v2419_v26 = vadd.f32 %v6696_v28, %v2418_v45 }
 0x230   : > { %2821 = vst.msk [vmem:[%s6703_s30 + $0x98] sm:$0xf] %vm2782_vm12, %v3569_v36  ;;  %v2919_v47 = vadd.f32 %v2918_v27, %v2917_v8  ;;  %v3570_v57 = vpack.c.bf16 %v2427_v19, %v2427_v19  ;;  %v3021_v62 = vmul.f32 %v2427_v19, %v2427_v19  ;;  %v2924_v56 = vsel %vm2012_vm10, %v2427_v19, 0.0 }
 0x231   : > { %2819 = vst.msk [vmem:[%s6703_s30 + $0x90] sm:$0xf] %vm2782_vm12, %v3567_v2  ;;  %v3117_v12 = vsel %vm2012_vm10, %v3018_v16, 0.0  ;;  %v3568_v9 = vpack.c.bf16 %v2419_v26, %v2419_v26  ;;  %v2920_v39 = vsel %vm2012_vm10, %v2419_v26, 0.0  ;;  %v3019_v0 = vmul.f32 %v2419_v26, %v2419_v26 }
 0x232   : > { %v3118_v50 = vadd.f32 %v3117_v12, %v3116_v40  ;;  %2822 = vst.msk [vmem:[%s6703_s30 + $0x9c] sm:$0xf] %vm2782_vm12, %v3570_v57  ;;  %v2921_v14 = vadd.f32 %v2920_v39, %v2919_v47  ;;  %v3121_v34 = vsel %vm2012_vm10, %v3020_v35, 0.0  ;;  %v3123_v43 = vsel %vm2012_vm10, %v3021_v62, 0.0 }
 0x233   : > { %2820 = vst.msk [vmem:[%s6703_s30 + $0x94] sm:$0xf] %vm2782_vm12, %v3568_v9  ;;  %v3119_v20 = vsel %vm2012_vm10, %v3019_v0, 0.0 }
 0x234   : > { %v2923_v42 = vadd.f32 %v2922_v59, %v2921_v14  ;;  %v3120_v30 = vadd.f32 %v3119_v20, %v3118_v50 }
 0x236   : > { %v2925_v51 = vadd.f32 %v2924_v56, %v2923_v42  ;;  %v3122_v21 = vadd.f32 %v3121_v34, %v3120_v30 }
 0x238   : > { %v3124_v33 = vadd.f32 %v3123_v43, %v3122_v21 }
 0x239   : > { %v3725_v60 = vpop.f32.mrb[8].mxu1 }
 0x23a   : > { %v2440_v46 = vadd.f32 %v3725_v60, %v6696_v28  ;;  %v2431_v49 = vpop.f32.mrb[9].mxu1 }
 0x23b   : > { %v2432_v15 = vadd.f32 %v6696_v28, %v2431_v49  ;;  %v3726_v37 = vpop.f32.mrb[10].mxu1 }
 0x23c   : > { %v3573_v44 = vpack.c.bf16 %v2440_v46, %v2440_v46  ;;  %v2443_v23 = vadd.f32 %v3726_v37, %v6696_v28  ;;  %v2434_v48 = vpop.f32.mrb[11].mxu1  ;;  %v3024_v17 = vmul.f32 %v2440_v46, %v2440_v46  ;;  %v2930_v41 = vsel %vm2012_vm10, %v2440_v46, 0.0 }
 0x23d   : > { %v3571_v25 = vpack.c.bf16 %v2432_v15, %v2432_v15  ;;  %v2926_v52 = vsel %vm2012_vm10, %v2432_v15, 0.0  ;;  %v3022_v29 = vmul.f32 %v2432_v15, %v2432_v15  ;;  %v2435_v18 = vadd.f32 %v6696_v28, %v2434_v48 }
 0x23e   : > { %2825 = vst.msk [vmem:[%s6703_s30 + $0xa8] sm:$0xf] %vm2782_vm12, %v3573_v44  ;;  %v2927_v10 = vadd.f32 %v2926_v52, %v2925_v51  ;;  %v3574_v55 = vpack.c.bf16 %v2443_v23, %v2443_v23  ;;  %v3025_v1 = vmul.f32 %v2443_v23, %v2443_v23  ;;  %v2932_v38 = vsel %vm2012_vm10, %v2443_v23, 0.0 }
 0x23f   : > { %2823 = vst.msk [vmem:[%s6703_s30 + $0xa0] sm:$0xf] %vm2782_vm12, %v3571_v25  ;;  %v3125_v53 = vsel %vm2012_vm10, %v3022_v29, 0.0  ;;  %v3572_v6 = vpack.c.bf16 %v2435_v18, %v2435_v18  ;;  %v2928_v11 = vsel %vm2012_vm10, %v2435_v18, 0.0  ;;  %v3023_v63 = vmul.f32 %v2435_v18, %v2435_v18 }
 0x240   : > { %v3126_v61 = vadd.f32 %v3125_v53, %v3124_v33  ;;  %2826 = vst.msk [vmem:[%s6703_s30 + $0xac] sm:$0xf] %vm2782_vm12, %v3574_v55  ;;  %v2929_v58 = vadd.f32 %v2928_v11, %v2927_v10  ;;  %v3129_v8 = vsel %vm2012_vm10, %v3024_v17, 0.0  ;;  %v3131_v54 = vsel %vm2012_vm10, %v3025_v1, 0.0 }
 0x241   : > { %2824 = vst.msk [vmem:[%s6703_s30 + $0xa4] sm:$0xf] %vm2782_vm12, %v3572_v6  ;;  %v3127_v22 = vsel %vm2012_vm10, %v3023_v63, 0.0 }
 0x242   : > { %v2931_v24 = vadd.f32 %v2930_v41, %v2929_v58  ;;  %v3128_v5 = vadd.f32 %v3127_v22, %v3126_v61 }
 0x244   : > { %v2933_v31 = vadd.f32 %v2932_v38, %v2931_v24  ;;  %v3130_v3 = vadd.f32 %v3129_v8, %v3128_v5 }
 0x246   : > { %v3132_v13 = vadd.f32 %v3131_v54, %v3130_v3 }
 0x247   : > { %v3729_v32 = vpop.f32.mrb[12].mxu1 }
 0x248   : > { %v2456_v7 = vadd.f32 %v3729_v32, %v6696_v28  ;;  %v2447_v40 = vpop.f32.mrb[13].mxu1 }
 0x249   : > { %v2448_v4 = vadd.f32 %v6696_v28, %v2447_v40  ;;  %v3730_v36 = vpop.f32.mrb[14].mxu1 }
 0x24a   : > { %v3577_v19 = vpack.c.bf16 %v2456_v7, %v2456_v7  ;;  %v2459_v45 = vadd.f32 %v3730_v36, %v6696_v28  ;;  %v2450_v2 = vpop.f32.mrb[15].mxu1  ;;  %v3028_v50 = vmul.f32 %v2456_v7, %v2456_v7  ;;  %v2938_v62 = vsel %vm2012_vm10, %v2456_v7, 0.0 }
 0x24b   : > { %v3575_v27 = vpack.c.bf16 %v2448_v4, %v2448_v4  ;;  %v2934_v16 = vsel %vm2012_vm10, %v2448_v4, 0.0  ;;  %v3026_v26 = vmul.f32 %v2448_v4, %v2448_v4  ;;  %v2451_v47 = vadd.f32 %v6696_v28, %v2450_v2 }
 0x24c   : > { %2829 = vst.msk [vmem:[%s6703_s30 + $0xb8] sm:$0xf] %vm2782_vm12, %v3577_v19  ;;  %v2935_v57 = vadd.f32 %v2934_v16, %v2933_v31  ;;  %v3578_v12 = vpack.c.bf16 %v2459_v45, %v2459_v45  ;;  %v3029_v42 = vmul.f32 %v2459_v45, %v2459_v45  ;;  %v2940_v30 = vsel %vm2012_vm10, %v2459_v45, 0.0 }
 0x24d   : > { %2827 = vst.msk [vmem:[%s6703_s30 + $0xb0] sm:$0xf] %vm2782_vm12, %v3575_v27  ;;  %v3133_v9 = vsel %vm2012_vm10, %v3026_v26, 0.0  ;;  %v3576_v39 = vpack.c.bf16 %v2451_v47, %v2451_v47  ;;  %v2936_v35 = vsel %vm2012_vm10, %v2451_v47, 0.0  ;;  %v3027_v59 = vmul.f32 %v2451_v47, %v2451_v47 }
 0x24e   : > { %v3134_v14 = vadd.f32 %v3133_v9, %v3132_v13  ;;  %2830 = vst.msk [vmem:[%s6703_s30 + $0xbc] sm:$0xf] %vm2782_vm12, %v3578_v12  ;;  %v2937_v0 = vadd.f32 %v2936_v35, %v2935_v57  ;;  %v3137_v51 = vsel %vm2012_vm10, %v3028_v50, 0.0  ;;  %v3139_v33 = vsel %vm2012_vm10, %v3029_v42, 0.0 }
 0x24f   : > { %2828 = vst.msk [vmem:[%s6703_s30 + $0xb4] sm:$0xf] %vm2782_vm12, %v3576_v39  ;;  %v3135_v56 = vsel %vm2012_vm10, %v3027_v59, 0.0 }
 0x250   : > { %v2939_v20 = vadd.f32 %v2938_v62, %v2937_v0  ;;  %v3136_v34 = vadd.f32 %v3135_v56, %v3134_v14 }
 0x252   : > { %v2941_v21 = vadd.f32 %v2940_v30, %v2939_v20  ;;  %v3138_v43 = vadd.f32 %v3137_v51, %v3136_v34 }
 0x254   : > { %v3140_v60 = vadd.f32 %v3139_v33, %v3138_v43 }
 0x255   : > { %v3733_v46 = vpop.f32.mrb[16].mxu1 }
 0x256   : > { %v2472_v49 = vadd.f32 %v3733_v46, %v6696_v28  ;;  %v2463_v15 = vpop.f32.mrb[17].mxu1 }
 0x257   : > { %v2464_v37 = vadd.f32 %v6696_v28, %v2463_v15  ;;  %v3734_v44 = vpop.f32.mrb[18].mxu1 }
 0x258   : > { %v3581_v23 = vpack.c.bf16 %v2472_v49, %v2472_v49  ;;  %v2475_v48 = vadd.f32 %v3734_v44, %v6696_v28  ;;  %v2466_v25 = vpop.f32.mrb[19].mxu1  ;;  %v3032_v61 = vmul.f32 %v2472_v49, %v2472_v49  ;;  %v2946_v1 = vsel %vm2012_vm10, %v2472_v49, 0.0 }
 0x259   : > { %v3579_v52 = vpack.c.bf16 %v2464_v37, %v2464_v37  ;;  %v2942_v29 = vsel %vm2012_vm10, %v2464_v37, 0.0  ;;  %v3030_v18 = vmul.f32 %v2464_v37, %v2464_v37  ;;  %v2467_v10 = vadd.f32 %v6696_v28, %v2466_v25  ;;  %v4494_v25 = vld [vmem:[%s7117_s4] ss:$0 sm:$0xff] }
 0x25a   : > { %2833 = vst.msk [vmem:[%s6703_s30 + $0xc8] sm:$0xf] %vm2782_vm12, %v3581_v23  ;;  %v2943_v55 = vadd.f32 %v2942_v29, %v2941_v21  ;;  %v3582_v53 = vpack.c.bf16 %v2475_v48, %v2475_v48  ;;  %v3033_v24 = vmul.f32 %v2475_v48, %v2475_v48  ;;  %v2948_v5 = vsel %vm2012_vm10, %v2475_v48, 0.0 }
 0x25b   : > { %2831 = vst.msk [vmem:[%s6703_s30 + $0xc0] sm:$0xf] %vm2782_vm12, %v3579_v52  ;;  %v3141_v6 = vsel %vm2012_vm10, %v3030_v18, 0.0  ;;  %v3580_v11 = vpack.c.bf16 %v2467_v10, %v2467_v10  ;;  %v2944_v17 = vsel %vm2012_vm10, %v2467_v10, 0.0  ;;  %v3031_v41 = vmul.f32 %v2467_v10, %v2467_v10 }
 0x25c   : > { %v3142_v58 = vadd.f32 %v3141_v6, %v3140_v60  ;;  %2834 = vst.msk [vmem:[%s6703_s30 + $0xcc] sm:$0xf] %vm2782_vm12, %v3582_v53  ;;  %v2945_v63 = vadd.f32 %v2944_v17, %v2943_v55  ;;  %v3145_v31 = vsel %vm2012_vm10, %v3032_v61, 0.0  ;;  %v3147_v32 = vsel %vm2012_vm10, %v3033_v24, 0.0 }
 0x25d   : > { %2832 = vst.msk [vmem:[%s6703_s30 + $0xc4] sm:$0xf] %vm2782_vm12, %v3580_v11  ;;  %v3143_v38 = vsel %vm2012_vm10, %v3031_v41, 0.0 }
 0x25e   : > { %v2947_v22 = vadd.f32 %v2946_v1, %v2945_v63  ;;  %v3144_v8 = vadd.f32 %v3143_v38, %v3142_v58 }
 0x260   : > { %v2949_v3 = vadd.f32 %v2948_v5, %v2947_v22  ;;  %v3146_v54 = vadd.f32 %v3145_v31, %v3144_v8 }
 0x262   : > { %v3148_v4 = vadd.f32 %v3147_v32, %v3146_v54 }
 0x263   : > { %v3737_v7 = vpop.f32.mrb[20].mxu1 }
 0x264   : > { %v2488_v40 = vadd.f32 %v3737_v7, %v6696_v28  ;;  %v2479_v13 = vpop.f32.mrb[21].mxu1 }
 0x265   : > { %v2480_v36 = vadd.f32 %v6696_v28, %v2479_v13  ;;  %v3738_v19 = vpop.f32.mrb[22].mxu1 }
 0x266   : > { %v3585_v45 = vpack.c.bf16 %v2488_v40, %v2488_v40  ;;  %v2491_v2 = vadd.f32 %v3738_v19, %v6696_v28  ;;  %v2482_v27 = vpop.f32.mrb[23].mxu1  ;;  %v3036_v14 = vmul.f32 %v2488_v40, %v2488_v40  ;;  %v2954_v42 = vsel %vm2012_vm10, %v2488_v40, 0.0 }
 0x267   : > { %v3583_v16 = vpack.c.bf16 %v2480_v36, %v2480_v36  ;;  %v2950_v26 = vsel %vm2012_vm10, %v2480_v36, 0.0  ;;  %v3034_v47 = vmul.f32 %v2480_v36, %v2480_v36  ;;  %v2483_v57 = vadd.f32 %v6696_v28, %v2482_v27 }
 0x268   : > { %2837 = vst.msk [vmem:[%s6703_s30 + $0xd8] sm:$0xf] %vm2782_vm12, %v3585_v45  ;;  %v2951_v12 = vadd.f32 %v2950_v26, %v2949_v3  ;;  %v3586_v9 = vpack.c.bf16 %v2491_v2, %v2491_v2  ;;  %v3037_v20 = vmul.f32 %v2491_v2, %v2491_v2  ;;  %v2956_v34 = vsel %vm2012_vm10, %v2491_v2, 0.0 }
 0x269   : > { %2835 = vst.msk [vmem:[%s6703_s30 + $0xd0] sm:$0xf] %vm2782_vm12, %v3583_v16  ;;  %v3149_v39 = vsel %vm2012_vm10, %v3034_v47, 0.0  ;;  %v3584_v35 = vpack.c.bf16 %v2483_v57, %v2483_v57  ;;  %v2952_v50 = vsel %vm2012_vm10, %v2483_v57, 0.0  ;;  %v3035_v62 = vmul.f32 %v2483_v57, %v2483_v57 }
 0x26a   : > { %v3150_v0 = vadd.f32 %v3149_v39, %v3148_v4  ;;  %2838 = vst.msk [vmem:[%s6703_s30 + $0xdc] sm:$0xf] %vm2782_vm12, %v3586_v9  ;;  %v2953_v59 = vadd.f32 %v2952_v50, %v2951_v12  ;;  %v3153_v21 = vsel %vm2012_vm10, %v3036_v14, 0.0  ;;  %v3155_v60 = vsel %vm2012_vm10, %v3037_v20, 0.0 }
 0x26b   : > { %2836 = vst.msk [vmem:[%s6703_s30 + $0xd4] sm:$0xf] %vm2782_vm12, %v3584_v35  ;;  %v3151_v30 = vsel %vm2012_vm10, %v3035_v62, 0.0 }
 0x26c   : > { %v2955_v56 = vadd.f32 %v2954_v42, %v2953_v59  ;;  %v3152_v51 = vadd.f32 %v3151_v30, %v3150_v0 }
 0x26e   : > { %v2957_v43 = vadd.f32 %v2956_v34, %v2955_v56  ;;  %v3154_v33 = vadd.f32 %v3153_v21, %v3152_v51 }
 0x270   : > { %v3156_v46 = vadd.f32 %v3155_v60, %v3154_v33 }
 0x271   : > { %v3741_v49 = vpop.f32.mrb[24].mxu1 }
 0x272   : > { %v2504_v15 = vadd.f32 %v3741_v49, %v6696_v28  ;;  %v2495_v37 = vpop.f32.mrb[25].mxu1 }
 0x273   : > { %v2496_v44 = vadd.f32 %v6696_v28, %v2495_v37  ;;  %v3742_v23 = vpop.f32.mrb[26].mxu1 }
 0x274   : > { %v3589_v48 = vpack.c.bf16 %v2504_v15, %v2504_v15  ;;  %v2507_v52 = vadd.f32 %v4494_v25, %v3742_v23  ;;  %v2498_v29 = vpop.f32.mrb[27].mxu1  ;;  %v3040_v58 = vmul.f32 %v2504_v15, %v2504_v15  ;;  %v2962_v24 = vsel %vm2012_vm10, %v2504_v15, 0.0 }
 0x275   : > { %v3587_v18 = vpack.c.bf16 %v2496_v44, %v2496_v44  ;;  %v2958_v10 = vsel %vm2012_vm10, %v2496_v44, 0.0  ;;  %v3038_v55 = vmul.f32 %v2496_v44, %v2496_v44  ;;  %v2499_v53 = vadd.f32 %v4494_v25, %v2498_v29 }
 0x276   : > { %2841 = vst.msk [vmem:[%s6703_s30 + $0xe8] sm:$0xf] %vm2782_vm12, %v3589_v48  ;;  %v2959_v6 = vadd.f32 %v2958_v10, %v2957_v43  ;;  %v3590_v11 = vpack.c.bf16 %v2507_v52, %v2507_v52  ;;  %v3041_v22 = vmul.f32 %v2507_v52, %v2507_v52  ;;  %v2964_v8 = vsel %vm2012_vm10, %v2507_v52, 0.0 }
 0x277   : > { %2839 = vst.msk [vmem:[%s6703_s30 + $0xe0] sm:$0xf] %vm2782_vm12, %v3587_v18  ;;  %v3157_v28 = vsel %vm2012_vm10, %v3038_v55, 0.0  ;;  %v3588_v17 = vpack.c.bf16 %v2499_v53, %v2499_v53  ;;  %v2960_v61 = vsel %vm2012_vm10, %v2499_v53, 0.0  ;;  %v3039_v1 = vmul.f32 %v2499_v53, %v2499_v53 }
 0x278   : > { %v3158_v63 = vadd.f32 %v3157_v28, %v3156_v46  ;;  %2842 = vst.msk [vmem:[%s6703_s30 + $0xec] sm:$0xf] %vm2782_vm12, %v3590_v11  ;;  %v2961_v41 = vadd.f32 %v2960_v61, %v2959_v6  ;;  %v3161_v3 = vsel %vm2012_vm10, %v3040_v58, 0.0  ;;  %v3163_v7 = vsel %vm2012_vm10, %v3041_v22, 0.0 }
 0x279   : > { %2840 = vst.msk [vmem:[%s6703_s30 + $0xe4] sm:$0xf] %vm2782_vm12, %v3588_v17  ;;  %v3159_v5 = vsel %vm2012_vm10, %v3039_v1, 0.0 }
 0x27a   : > { %v2963_v38 = vadd.f32 %v2962_v24, %v2961_v41  ;;  %v3160_v31 = vadd.f32 %v3159_v5, %v3158_v63 }
 0x27c   : > { %v2965_v54 = vadd.f32 %v2964_v8, %v2963_v38  ;;  %v3162_v32 = vadd.f32 %v3161_v3, %v3160_v31 }
 0x27e   : > { %v3164_v36 = vadd.f32 %v3163_v7, %v3162_v32 }
 0x27f   : > { %v3745_v40 = vpop.f32.mrb[28].mxu1 }
 0x280   : > { %v2520_v13 = vadd.f32 %v4494_v25, %v3745_v40  ;;  %v2511_v4 = vpop.f32.mrb[29].mxu1 }
 0x281   : > { %v2512_v19 = vadd.f32 %v4494_v25, %v2511_v4  ;;  %v3746_v45 = vpop.f32.mrb[30].mxu1 }
 0x282   : > { %v3593_v2 = vpack.c.bf16 %v2520_v13, %v2520_v13  ;;  %v2523_v27 = vadd.f32 %v4494_v25, %v3746_v45  ;;  %v2514_v16 = vpop.f32.mrb[31].mxu1  ;;  %v3044_v0 = vmul.f32 %v2520_v13, %v2520_v13  ;;  %v2970_v20 = vsel %vm2012_vm10, %v2520_v13, 0.0 }
 0x283   : > { %v3591_v26 = vpack.c.bf16 %v2512_v19, %v2512_v19  ;;  %v2966_v47 = vsel %vm2012_vm10, %v2512_v19, 0.0  ;;  %v3042_v57 = vmul.f32 %v2512_v19, %v2512_v19  ;;  %v2515_v12 = vadd.f32 %v4494_v25, %v2514_v16 }
 0x284   : > { %2845 = vst.msk [vmem:[%s6703_s30 + $0xf8] sm:$0xf] %vm2782_vm12, %v3593_v2  ;;  %v2967_v9 = vadd.f32 %v2966_v47, %v2965_v54  ;;  %v3594_v39 = vpack.c.bf16 %v2523_v27, %v2523_v27  ;;  %v3045_v56 = vmul.f32 %v2523_v27, %v2523_v27  ;;  %v2972_v51 = vsel %vm2012_vm10, %v2523_v27, 0.0 }
 0x285   : > { %2843 = vst.msk [vmem:[%s6703_s30 + $0xf0] sm:$0xf] %vm2782_vm12, %v3591_v26  ;;  %v3165_v35 = vsel %vm2012_vm10, %v3042_v57, 0.0  ;;  %v3592_v50 = vpack.c.bf16 %v2515_v12, %v2515_v12  ;;  %v2968_v14 = vsel %vm2012_vm10, %v2515_v12, 0.0  ;;  %v3043_v42 = vmul.f32 %v2515_v12, %v2515_v12 }
 0x286   : > { %v3166_v59 = vadd.f32 %v3165_v35, %v3164_v36  ;;  %2846 = vst.msk [vmem:[%s6703_s30 + $0xfc] sm:$0xf] %vm2782_vm12, %v3594_v39  ;;  %v2969_v62 = vadd.f32 %v2968_v14, %v2967_v9  ;;  %v3169_v43 = vsel %vm2012_vm10, %v3044_v0, 0.0  ;;  %v3171_v46 = vsel %vm2012_vm10, %v3045_v56, 0.0 }
 0x287   : > { %2844 = vst.msk [vmem:[%s6703_s30 + $0xf4] sm:$0xf] %vm2782_vm12, %v3592_v50  ;;  %v3167_v34 = vsel %vm2012_vm10, %v3043_v42, 0.0  ;;  %s7040_s30 = scalar_lea.hbm %s7120_s7, %s3522_s18 }
 0x288   : > { %v2971_v30 = vadd.f32 %v2970_v20, %v2969_v62  ;;  %v3168_v21 = vadd.f32 %v3167_v34, %v3166_v59 }
 0x28a   : > { %v2973_v33 = vadd.f32 %v2972_v51, %v2971_v30  ;;  %v3170_v60 = vadd.f32 %v3169_v43, %v3168_v21 }
 0x28c   : > { %v2974_v49 = vrot.slane %v2973_v33, 4  ;;  %v3172_v15 = vadd.f32 %v3171_v46, %v3170_v60 }
 0x28e   : > { %v2975_v37 = vadd.f32 %v2974_v49, %v2973_v33  ;;  %v3173_v44 = vrot.slane %v3172_v15, 4 }
 0x290   : > { %v2976_v23 = vrot.slane %v2975_v37, 2  ;;  %v3174_v48 = vadd.f32 %v3173_v44, %v3172_v15 }
 0x292   : > { %v2977_v25 = vadd.f32 %v2976_v23, %v2975_v37  ;;  %v3175_v52 = vrot.slane %v3174_v48, 2 }
 0x294   : > { %v2978_v29 = vrot.slane %v2977_v25, 1  ;;  %v3176_v18 = vadd.f32 %v3175_v52, %v3174_v48 }
 0x296   : > { %v2979_v10 = vadd.f32 %v2978_v29, %v2977_v25  ;;  %v3177_v55 = vrot.slane %v3176_v18, 1 }
 0x298   : > { %2981 = vst.msk [vmem:[%s407_s16] sm:$0x1] %vm2980_vm13, %v2979_v10 }
 0x299   : > { %4508 = shalt.err (!%p4505_p5)
}
 0x29a   : > { %s4509_s18 = scalar_lea.hbm %s7032_s21, 16  ;;  %s4513_s22 = scalar_lea.hbm %s7119_s6, 32 }
 0x29b   : > { %p4510_p6 = scmp.ne.s32.totalorder %s7032_s21, %s4509_s18  ;;  %p4514_p10 = scmp.lt.u32.totalorder %s7032_s21, %s7119_s6 }
 0x29c   : > { %p4515_p11 = scmp.lt.u32.totalorder %s4513_s22, %s4509_s18  ;;  %p4517_p13 = scmp.lt.u32.totalorder %s4509_s18, %s7032_s21 }
 0x29d   : > { %p4511_p7 = pnand %p4510_p6, %p4697_p4 }
 0x29e   : > { %p4516_p12 = por %p4515_p11, %p4514_p10 }
 0x29f   : > { %p4512_p9 = pneg %p4511_p7 }
 0x2a0   : > { %p4518_p0 = por %p4517_p13, %p4516_p12 }
 0x2a2   : > { %p4519_p1 = pnand %p4518_p0, %p4512_p9 }
 0x2a4   : > { %4522 = shalt.err (!%p4519_p1)
}
 0x2a5   : > { %3757 = dma.vmem_to_hbm [thread:$0]  (%p4697_p4), %s7034_s19, 16, %s7032_s21, %s3191_s15   ;;  %v3178_v53 = vadd.f32 %v3177_v55, %v3176_v18 }
 0x2a6   : > { %s7318_s23 = scalar_lea.vmem [#allocation4], %s7022_s12  ;;  %s3195_s10 = scalar_lea.sflag [#allocation5], %s7022_s12 }
 0x2a7   : > { %3179 = vst.msk [vmem:[%s7318_s23] sm:$0x1] %vm2980_vm13, %v3178_v53  ;;  %s4523_s18 = scalar_lea.vmem %s7042_s8, 16  ;;  %s4616_s16 = smov [#allocation4]  }
 0x2a8   : > { %p4524_p2 = scmp.ne.s32.totalorder %s7042_s8, %s4523_s18  ;;  %s4527_s27 = sshll.u32 %s4616_s16, 4  ;;  %s4528_s27 = int_to_ptr.vmem [resolvable:$false] %s4527_s27 }
 0x2a9   : > { %s4529_s22 = scalar_lea.vmem %s4528_s27, 32  ;;  %p4530_p6 = scmp.lt.s32.totalorder %s7042_s8, %s4528_s27 }
 0x2aa   : > { %p4525_p3 = pnand %p4524_p2, %p4697_p4  ;;  %p4531_p7 = scmp.lt.s32.totalorder %s4529_s22, %s4523_s18 }
 0x2ac   : > { %p4526_p5 = pneg %p4525_p3  ;;  %p4532_p9 = por %p4531_p7, %p4530_p6 }
 0x2ae   : > { %p4533_p10 = pnand %p4532_p9, %p4526_p5 }
 0x2b0   : > { %4536 = shalt.err (!%p4533_p10)
}
 0x2b1   : > { %s4537_s12 = scalar_lea.hbm %s7040_s30, 16  ;;  %s4541_s15 = scalar_lea.hbm %s7120_s7, 32 }
 0x2b2   : > { %p4538_p11 = scmp.ne.s32.totalorder %s7040_s30, %s4537_s12  ;;  %p4542_p0 = scmp.lt.u32.totalorder %s7040_s30, %s7120_s7 }
 0x2b3   : > { %p4543_p1 = scmp.lt.u32.totalorder %s4541_s15, %s4537_s12  ;;  %p4545_p3 = scmp.lt.u32.totalorder %s4537_s12, %s7040_s30 }
 0x2b4   : > { %p4539_p12 = pnand %p4538_p11, %p4697_p4 }
 0x2b5   : > { %p4544_p2 = por %p4543_p1, %p4542_p0 }
 0x2b6   : > { %p4540_p13 = pneg %p4539_p12 }
 0x2b7   : > { %p4546_p5 = por %p4545_p3, %p4544_p2 }
 0x2b9   : > { %p4547_p6 = pnand %p4546_p5, %p4540_p13 }
 0x2bb   : > { %4550 = shalt.err (!%p4547_p6)
}
 0x2bc   : > { %3758 = dma.vmem_to_hbm [thread:$0]  (%p4697_p4), %s7042_s8, 16, %s7040_s30, %s3195_s10  }
 0x2bd PF: > { %p3769_p7 = scmp.ge.s32.totalorder %s4605_s29, 2  ;;  %s3251_s23 = sand.u32 1, %s4585_s24  }
 0x2be   : > { %s3252_s18 = scalar_lea.sflag [#allocation3], %s3251_s23 }
 0x2bf   : > { %p3762_p9 = pnand %p3769_p7, %p4704_p8 }
 0x2c1   : > { %4576 = dma.done.wait (!%p3762_p9), %s3252_s18, 16  }
 0x2c2   : > { %4578 = vsyncadd (!%p3762_p9), %s3252_s18, 4294967280  ;;  %s3260_s16 = scalar_lea.sflag [#allocation5], %s3251_s23 }
 0x2c3   : > { %4580 = dma.done.wait (!%p3762_p9), %s3260_s16, 16  }
 0x2c4   : > { %4582 = vsyncadd (!%p3762_p9), %s3260_s16, 4294967280  ;;  %s24_s29 = sadd.s32 1, %s4605_s29   ;;  %s7319_s24 = smov %s4589_s25 }
 0x2c5   : > { %p21_p10 = scmp.ge.s32.totalorder %s24_s29, 4   ;;  %s7320_s25 = smov %s4593_s26 }
 0x2c6   : > { %s7321_s26 = smov %s4710_s14  ;;  %s7322_s27 = smov %s4601_s28 }
 0x2c7   : > { %s7323_s28 = smov %s7325_s9  ;;  %23 = sbr.rel (!%p21_p10) target bundleno = 6 (0x6), region = 110 }
 0x2ce   :  { %3264 = vsyncpa [#allocation3], 1 }
 0x2cf   :  { %3266 = vsyncpa [#allocation3 + $0x1], 1 }
 0x2d0   :  { %3267 = vsyncpa [#allocation5], 1 }
 0x2d1   :  { %3269 = vsyncpa [#allocation5 + $0x1], 1 }

// kernel: res_up_forward.9
= control target key start
LH: loop header
LB: loop body
LE: loop exit
PB: predicated region body
PF: predicated region fallthrough
CT: control target
= control target key end

     0   :  { %s842_s0 = inlined_call_operand.vmem [shape: bf16[256,128], index: 0, kind: input, shape index: {}]   ;;  %s843_s1 = inlined_call_operand.vmem [shape: bf16[256,128], index: 1, kind: input, shape index: {}]   ;;  %s844_s2 = inlined_call_operand.vmem [shape: f32[1,128], index: 2, kind: input, shape index: {}]   ;;  %s845_s3 = inlined_call_operand.vmem [shape: f32[1,128], index: 3, kind: input, shape index: {}]   ;;  %s846_s4 = inlined_call_operand.vmem [shape: f32[256,128], index: 4, kind: output, shape index: {}]  }
   0x1   :  { %v390_v0 = vld [vmem:[%s842_s0] sm:$0xff]   ;;  %v517_v5 = vld [vmem:[%s842_s0 + $0x8] sm:$0xff]   ;;  %v518_v12 = vld [vmem:[%s842_s0 + $0x10] sm:$0xff]  }
   0x2   :  { %v578_v1 = vld [vmem:[%s844_s2] ss:$0 sm:$0xff]  ;;  %v391_v2 = vunpack.c.l.bf16 %v390_v0  ;;  %v392_v4 = vunpack.c.h.bf16 %v390_v0  ;;  %v532_v6 = vld [vmem:[%s843_s1 + $0x8] sm:$0xff]   ;;  %v395_v10 = vunpack.c.l.bf16 %v517_v5  ;;  %v533_v13 = vld [vmem:[%s843_s1 + $0x10] sm:$0xff]   ;;  %v396_v16 = vunpack.c.h.bf16 %v517_v5 }
   0x3   :  { %v454_v3 = vld [vmem:[%s843_s1] sm:$0xff]   ;;  %v459_v11 = vunpack.c.l.bf16 %v532_v6  ;;  %v460_v17 = vunpack.c.h.bf16 %v532_v6  ;;  %v519_v18 = vld [vmem:[%s842_s0 + $0x18] sm:$0xff]   ;;  %v399_v20 = vunpack.c.l.bf16 %v518_v12  ;;  %v463_v21 = vunpack.c.l.bf16 %v533_v13  ;;  %v521_v60 = vld [vmem:[%s842_s0 + $0x28] sm:$0xff]  }
   0x4   :  { %v592_v7 = vld [vmem:[%s845_s3] ss:$0 sm:$0xff]  ;;  %v455_v8 = vunpack.c.l.bf16 %v454_v3  ;;  %v456_v9 = vunpack.c.h.bf16 %v454_v3  ;;  %v88_v14 = vmul.f32 %v391_v2, %v578_v1  ;;  %v89_v15 = vmul.f32 %v392_v4, %v578_v1  ;;  %v609_v23 = vld [vmem:[%s843_s1 + $0x18] sm:$0xff]   ;;  %v536_v61 = vld [vmem:[%s843_s1 + $0x28] sm:$0xff]  }
   0x5   :  { %v90_v19 = vmul.f32 %v395_v10, %v578_v1  ;;  %v400_v22 = vunpack.c.h.bf16 %v518_v12  ;;  %v91_v26 = vmul.f32 %v396_v16, %v578_v1  ;;  %v464_v27 = vunpack.c.h.bf16 %v533_v13  ;;  %v520_v49 = vld [vmem:[%s842_s0 + $0x20] sm:$0xff]   ;;  %v522_v6 = vld [vmem:[%s842_s0 + $0x30] sm:$0xff]  }
   0x6   :  { %v127_v24 = vadd.f32 %v592_v7, %v88_v14  ;;  %v128_v25 = vadd.f32 %v592_v7, %v89_v15  ;;  %v92_v29 = vmul.f32 %v399_v20, %v578_v1  ;;  %v403_v31 = vunpack.c.l.bf16 %v519_v18  ;;  %v535_v55 = vld [vmem:[%s843_s1 + $0x20] sm:$0xff]  }
   0x7   :  { %v129_v28 = vadd.f32 %v592_v7, %v90_v19  ;;  %v93_v30 = vmul.f32 %v400_v22, %v578_v1  ;;  %v130_v34 = vadd.f32 %v592_v7, %v91_v26  ;;  %v467_v35 = vunpack.c.l.bf16 %v609_v23 }
   0x8   :  { %v223_v32 = vadd.f32 %v455_v8, %v127_v24  ;;  %v224_v33 = vadd.f32 %v456_v9, %v128_v25  ;;  %v131_v37 = vadd.f32 %v592_v7, %v92_v29  ;;  %v94_v39 = vmul.f32 %v403_v31, %v578_v1  ;;  %v537_v8 = vld [vmem:[%s843_s1 + $0x30] sm:$0xff]   ;;  %v523_v29 = vld [vmem:[%s842_s0 + $0x38] sm:$0xff]  }
   0x9   :  { %v225_v36 = vadd.f32 %v459_v11, %v129_v28  ;;  %v132_v38 = vadd.f32 %v592_v7, %v93_v30  ;;  %v226_v43 = vadd.f32 %v460_v17, %v130_v34  ;;  %v404_v57 = vunpack.c.h.bf16 %v519_v18 }
   0xa   :  { %vm255_vm0 = vcmp.ge.f32.partialorder %v223_v32, 0.0  ;;  %v287_v40 = vmul.f32 0.22916667, %v223_v32  ;;  %vm256_vm1 = vcmp.ge.f32.partialorder %v224_v33, 0.0  ;;  %v288_v41 = vmul.f32 0.22916667, %v224_v33 }
   0xb   :  { %vm257_vm2 = vcmp.ge.f32.partialorder %v225_v36, 0.0  ;;  %v289_v42 = vmul.f32 0.22916667, %v225_v36  ;;  %v227_v44 = vadd.f32 %v463_v21, %v131_v37  ;;  %v228_v47 = vadd.f32 %v464_v27, %v132_v38 }
   0xc   :  { %v319_v45 = vsel %vm255_vm0, %v223_v32, %v287_v40  ;;  %v320_v46 = vsel %vm256_vm1, %v224_v33, %v288_v41  ;;  %v133_v48 = vadd.f32 %v592_v7, %v94_v39  ;;  %vm258_vm3 = vcmp.ge.f32.partialorder %v226_v43, 0.0  ;;  %v538_v40 = vld [vmem:[%s843_s1 + $0x38] sm:$0xff]  }
   0xd   :  { %351 = vst [vmem:[%s846_s4] sm:$0xff] %v319_v45  ;;  %352 = vst [vmem:[%s846_s4 + $0x8] sm:$0xff] %v320_v46  ;;  %v321_v50 = vsel %vm257_vm2, %v225_v36, %v289_v42  ;;  %v290_v51 = vmul.f32 0.22916667, %v226_v43  ;;  %vm259_vm4 = vcmp.ge.f32.partialorder %v227_v44, 0.0  ;;  %v291_v52 = vmul.f32 0.22916667, %v227_v44 }
   0xe   :  { %353 = vst [vmem:[%s846_s4 + $0x10] sm:$0xff] %v321_v50  ;;  %vm260_vm5 = vcmp.ge.f32.partialorder %v228_v47, 0.0  ;;  %v292_v53 = vmul.f32 0.22916667, %v228_v47  ;;  %v229_v54 = vadd.f32 %v467_v35, %v133_v48  ;;  %v468_v58 = vunpack.c.h.bf16 %v609_v23 }
   0xf   :  { %v322_v56 = vsel %vm258_vm3, %v226_v43, %v290_v51  ;;  %v407_v59 = vunpack.c.l.bf16 %v520_v49  ;;  %v323_v62 = vsel %vm259_vm4, %v227_v44, %v291_v52  ;;  %v95_v2 = vmul.f32 %v404_v57, %v578_v1  ;;  %v524_v51 = vld [vmem:[%s842_s0 + $0x40] sm:$0xff]  }
  0x10   :  { %354 = vst [vmem:[%s846_s4 + $0x18] sm:$0xff] %v322_v56  ;;  %v324_v63 = vsel %vm260_vm5, %v228_v47, %v292_v53  ;;  %vm261_vm6 = vcmp.ge.f32.partialorder %v229_v54, 0.0  ;;  %v293_v0 = vmul.f32 0.22916667, %v229_v54  ;;  %355 = vst [vmem:[%s846_s4 + $0x20] sm:$0xff] %v323_v62  ;;  %v471_v4 = vunpack.c.l.bf16 %v535_v55  ;;  %v539_v52 = vld [vmem:[%s843_s1 + $0x40] sm:$0xff]  }
  0x11   :  { %356 = vst [vmem:[%s846_s4 + $0x28] sm:$0xff] %v324_v63  ;;  %v96_v3 = vmul.f32 %v407_v59, %v578_v1  ;;  %v408_v5 = vunpack.c.h.bf16 %v520_v49  ;;  %v472_v10 = vunpack.c.h.bf16 %v535_v55  ;;  %v411_v11 = vunpack.c.l.bf16 %v521_v60  ;;  %v525_v59 = vld [vmem:[%s842_s0 + $0x48] sm:$0xff]  }
  0x12   :  { %v325_v9 = vsel %vm261_vm6, %v229_v54, %v293_v0  ;;  %v475_v12 = vunpack.c.l.bf16 %v536_v61  ;;  %v134_v13 = vadd.f32 %v592_v7, %v95_v2  ;;  %v412_v16 = vunpack.c.h.bf16 %v521_v60 }
  0x13   :  { %357 = vst [vmem:[%s846_s4 + $0x30] sm:$0xff] %v325_v9  ;;  %v135_v14 = vadd.f32 %v592_v7, %v96_v3  ;;  %v97_v15 = vmul.f32 %v408_v5, %v578_v1  ;;  %v98_v17 = vmul.f32 %v411_v11, %v578_v1  ;;  %v476_v18 = vunpack.c.h.bf16 %v536_v61 }
  0x14   :  { %v415_v19 = vunpack.c.l.bf16 %v522_v6  ;;  %v479_v20 = vunpack.c.l.bf16 %v537_v8  ;;  %v230_v21 = vadd.f32 %v468_v58, %v134_v13  ;;  %v99_v24 = vmul.f32 %v412_v16, %v578_v1 }
  0x15   :  { %v231_v22 = vadd.f32 %v471_v4, %v135_v14  ;;  %v136_v23 = vadd.f32 %v592_v7, %v97_v15  ;;  %v137_v25 = vadd.f32 %v592_v7, %v98_v17  ;;  %v416_v27 = vunpack.c.h.bf16 %v522_v6  ;;  %v540_v4 = vld [vmem:[%s843_s1 + $0x48] sm:$0xff]   ;;  %v526_v17 = vld [vmem:[%s842_s0 + $0x50] sm:$0xff]  }
  0x16   :  { %v100_v26 = vmul.f32 %v415_v19, %v578_v1  ;;  %v480_v28 = vunpack.c.h.bf16 %v537_v8  ;;  %vm262_vm7 = vcmp.ge.f32.partialorder %v230_v21, 0.0  ;;  %v294_v30 = vmul.f32 0.22916667, %v230_v21 }
  0x17   :  { %vm263_vm8 = vcmp.ge.f32.partialorder %v231_v22, 0.0  ;;  %v295_v31 = vmul.f32 0.22916667, %v231_v22  ;;  %v232_v32 = vadd.f32 %v472_v10, %v136_v23  ;;  %v233_v33 = vadd.f32 %v475_v12, %v137_v25 }
  0x18   :  { %v138_v34 = vadd.f32 %v592_v7, %v99_v24  ;;  %v139_v35 = vadd.f32 %v592_v7, %v100_v26  ;;  %v326_v36 = vsel %vm262_vm7, %v230_v21, %v294_v30  ;;  %v101_v38 = vmul.f32 %v416_v27, %v578_v1 }
  0x19   :  { %v327_v37 = vsel %vm263_vm8, %v231_v22, %v295_v31  ;;  %v419_v39 = vunpack.c.l.bf16 %v523_v29  ;;  %358 = vst [vmem:[%s846_s4 + $0x38] sm:$0xff] %v326_v36  ;;  %vm264_vm9 = vcmp.ge.f32.partialorder %v232_v32, 0.0  ;;  %v296_v41 = vmul.f32 0.22916667, %v232_v32 }
  0x1a   :  { %359 = vst [vmem:[%s846_s4 + $0x40] sm:$0xff] %v327_v37  ;;  %vm265_vm10 = vcmp.ge.f32.partialorder %v233_v33, 0.0  ;;  %v297_v42 = vmul.f32 0.22916667, %v233_v33  ;;  %v234_v43 = vadd.f32 %v476_v18, %v138_v34  ;;  %v235_v44 = vadd.f32 %v479_v20, %v139_v35  ;;  %v541_v18 = vld [vmem:[%s843_s1 + $0x50] sm:$0xff]   ;;  %v527_v37 = vld [vmem:[%s842_s0 + $0x58] sm:$0xff]  }
  0x1b   :  { %v140_v45 = vadd.f32 %v592_v7, %v101_v38  ;;  %v102_v46 = vmul.f32 %v419_v39, %v578_v1  ;;  %v328_v47 = vsel %vm264_vm9, %v232_v32, %v296_v41  ;;  %v483_v49 = vunpack.c.l.bf16 %v538_v40  ;;  %v542_v38 = vld [vmem:[%s843_s1 + $0x58] sm:$0xff]  }
  0x1c   :  { %v329_v48 = vsel %vm265_vm10, %v233_v33, %v297_v42  ;;  %v420_v50 = vunpack.c.h.bf16 %v523_v29  ;;  %360 = vst [vmem:[%s846_s4 + $0x48] sm:$0xff] %v328_v47  ;;  %vm266_vm11 = vcmp.ge.f32.partialorder %v234_v43, 0.0  ;;  %v298_v53 = vmul.f32 0.22916667, %v234_v43 }
  0x1d   :  { %361 = vst [vmem:[%s846_s4 + $0x50] sm:$0xff] %v329_v48  ;;  %vm267_vm12 = vcmp.ge.f32.partialorder %v235_v44, 0.0  ;;  %v299_v54 = vmul.f32 0.22916667, %v235_v44  ;;  %v236_v55 = vadd.f32 %v480_v28, %v140_v45  ;;  %v141_v56 = vadd.f32 %v592_v7, %v102_v46 }
  0x1e   :  { %v103_v57 = vmul.f32 %v420_v50, %v578_v1  ;;  %v484_v58 = vunpack.c.h.bf16 %v538_v40  ;;  %v330_v60 = vsel %vm266_vm11, %v234_v43, %v298_v53  ;;  %v423_v62 = vunpack.c.l.bf16 %v524_v51  ;;  %v543_v53 = vld [vmem:[%s843_s1 + $0x60] sm:$0xff]  }
  0x1f   :  { %v331_v61 = vsel %vm267_vm12, %v235_v44, %v299_v54  ;;  %v487_v63 = vunpack.c.l.bf16 %v539_v52  ;;  %362 = vst [vmem:[%s846_s4 + $0x58] sm:$0xff] %v330_v60  ;;  %vm268_vm13 = vcmp.ge.f32.partialorder %v236_v55, 0.0  ;;  %v300_v0 = vmul.f32 0.22916667, %v236_v55 }
  0x20   :  { %363 = vst [vmem:[%s846_s4 + $0x60] sm:$0xff] %v331_v61  ;;  %v237_v2 = vadd.f32 %v483_v49, %v141_v56  ;;  %v142_v3 = vadd.f32 %v592_v7, %v103_v57  ;;  %v104_v5 = vmul.f32 %v423_v62, %v578_v1  ;;  %v424_v6 = vunpack.c.h.bf16 %v524_v51  ;;  %v528_v49 = vld [vmem:[%s842_s0 + $0x60] sm:$0xff]  }
  0x21   :  { %v488_v8 = vunpack.c.h.bf16 %v539_v52  ;;  %v427_v9 = vunpack.c.l.bf16 %v525_v59  ;;  %v332_v10 = vsel %vm268_vm13, %v236_v55, %v300_v0  ;;  %v491_v16 = vunpack.c.l.bf16 %v540_v4 }
  0x22   :  { %vm269_vm14 = vcmp.ge.f32.partialorder %v237_v2, 0.0  ;;  %v301_v11 = vmul.f32 0.22916667, %v237_v2  ;;  %v238_v12 = vadd.f32 %v484_v58, %v142_v3  ;;  %364 = vst [vmem:[%s846_s4 + $0x68] sm:$0xff] %v332_v10  ;;  %v143_v13 = vadd.f32 %v592_v7, %v104_v5  ;;  %v544_v3 = vld [vmem:[%s843_s1 + $0x68] sm:$0xff]  }
  0x23   :  { %v105_v14 = vmul.f32 %v424_v6, %v578_v1  ;;  %v106_v15 = vmul.f32 %v427_v9, %v578_v1  ;;  %v428_v21 = vunpack.c.h.bf16 %v525_v59  ;;  %v492_v25 = vunpack.c.h.bf16 %v540_v4 }
  0x24   :  { %v333_v19 = vsel %vm269_vm14, %v237_v2, %v301_v11  ;;  %vm270_vm15 = vcmp.ge.f32.partialorder %v238_v12, 0.0  ;;  %v302_v20 = vmul.f32 0.22916667, %v238_v12  ;;  %v239_v22 = vadd.f32 %v487_v63, %v143_v13  ;;  %v529_v2 = vld [vmem:[%s842_s0 + $0x68] sm:$0xff]  }
  0x25   :  { %365 = vst [vmem:[%s846_s4 + $0x70] sm:$0xff] %v333_v19  ;;  %v144_v23 = vadd.f32 %v592_v7, %v105_v14  ;;  %v145_v24 = vadd.f32 %v592_v7, %v106_v15  ;;  %v107_v27 = vmul.f32 %v428_v21, %v578_v1  ;;  %v431_v28 = vunpack.c.l.bf16 %v526_v17 }
  0x26   :  { %v334_v26 = vsel %vm270_vm15, %v238_v12, %v302_v20  ;;  %v495_v29 = vunpack.c.l.bf16 %v541_v18  ;;  %vm271_vm0 = vcmp.ge.f32.partialorder %v239_v22, 0.0  ;;  %v303_v30 = vmul.f32 0.22916667, %v239_v22 }
  0x27   :  { %366 = vst [vmem:[%s846_s4 + $0x78] sm:$0xff] %v334_v26  ;;  %v240_v31 = vadd.f32 %v488_v8, %v144_v23  ;;  %v241_v32 = vadd.f32 %v491_v16, %v145_v24  ;;  %v146_v33 = vadd.f32 %v592_v7, %v107_v27  ;;  %v108_v34 = vmul.f32 %v431_v28, %v578_v1  ;;  %v530_v16 = vld [vmem:[%s842_s0 + $0x70] sm:$0xff]  }
  0x28   :  { %v432_v35 = vunpack.c.h.bf16 %v526_v17  ;;  %v496_v36 = vunpack.c.h.bf16 %v541_v18  ;;  %v335_v39 = vsel %vm271_vm0, %v239_v22, %v303_v30  ;;  %v435_v46 = vunpack.c.l.bf16 %v527_v37  ;;  %v545_v23 = vld [vmem:[%s843_s1 + $0x70] sm:$0xff]  }
  0x29   :  { %vm272_vm1 = vcmp.ge.f32.partialorder %v240_v31, 0.0  ;;  %v304_v40 = vmul.f32 0.22916667, %v240_v31  ;;  %vm273_vm2 = vcmp.ge.f32.partialorder %v241_v32, 0.0  ;;  %367 = vst [vmem:[%s846_s4 + $0x80] sm:$0xff] %v335_v39  ;;  %v242_v42 = vadd.f32 %v492_v25, %v146_v33 }
  0x2a   :  { %v305_v41 = vmul.f32 0.22916667, %v241_v32  ;;  %v147_v43 = vadd.f32 %v592_v7, %v108_v34  ;;  %v109_v44 = vmul.f32 %v432_v35, %v578_v1  ;;  %v499_v47 = vunpack.c.l.bf16 %v542_v38  ;;  %v531_v35 = vld [vmem:[%s842_s0 + $0x78] sm:$0xff]  }
  0x2b   :  { %v336_v45 = vsel %vm272_vm1, %v240_v31, %v304_v40  ;;  %v436_v48 = vunpack.c.h.bf16 %v527_v37  ;;  %vm274_vm3 = vcmp.ge.f32.partialorder %v242_v42, 0.0  ;;  %v306_v51 = vmul.f32 0.22916667, %v242_v42 }
  0x2c   :  { %368 = vst [vmem:[%s846_s4 + $0x88] sm:$0xff] %v336_v45  ;;  %v337_v50 = vsel %vm273_vm2, %v241_v32, %v305_v41  ;;  %v243_v52 = vadd.f32 %v495_v29, %v147_v43  ;;  %v148_v54 = vadd.f32 %v592_v7, %v109_v44  ;;  %v110_v55 = vmul.f32 %v435_v46, %v578_v1 }
  0x2d   :  { %369 = vst [vmem:[%s846_s4 + $0x90] sm:$0xff] %v337_v50  ;;  %v111_v56 = vmul.f32 %v436_v48, %v578_v1  ;;  %v500_v57 = vunpack.c.h.bf16 %v542_v38  ;;  %v338_v58 = vsel %vm274_vm3, %v242_v42, %v306_v51  ;;  %v439_v60 = vunpack.c.l.bf16 %v528_v49  ;;  %v546_v42 = vld [vmem:[%s843_s1 + $0x78] sm:$0xff]  }
  0x2e   :  { %vm275_vm4 = vcmp.ge.f32.partialorder %v243_v52, 0.0  ;;  %v307_v59 = vmul.f32 0.22916667, %v243_v52  ;;  %370 = vst [vmem:[%s846_s4 + $0x98] sm:$0xff] %v338_v58  ;;  %v244_v61 = vadd.f32 %v496_v36, %v148_v54  ;;  %v149_v62 = vadd.f32 %v592_v7, %v110_v55 }
  0x2f   :  { %v150_v63 = vadd.f32 %v592_v7, %v111_v56  ;;  %v503_v0 = vunpack.c.l.bf16 %v543_v53  ;;  %v112_v5 = vmul.f32 %v439_v60, %v578_v1  ;;  %v440_v6 = vunpack.c.h.bf16 %v528_v49 }
  0x30   :  { %v339_v4 = vsel %vm275_vm4, %v243_v52, %v307_v59  ;;  %v504_v8 = vunpack.c.h.bf16 %v543_v53  ;;  %vm276_vm5 = vcmp.ge.f32.partialorder %v244_v61, 0.0  ;;  %v308_v9 = vmul.f32 0.22916667, %v244_v61 }
  0x31   :  { %371 = vst [vmem:[%s846_s4 + $0xa0] sm:$0xff] %v339_v4  ;;  %v245_v10 = vadd.f32 %v499_v47, %v149_v62  ;;  %v246_v11 = vadd.f32 %v500_v57, %v150_v63  ;;  %v151_v12 = vadd.f32 %v592_v7, %v112_v5  ;;  %v113_v13 = vmul.f32 %v440_v6, %v578_v1 }
  0x32   :  { %v443_v14 = vunpack.c.l.bf16 %v529_v2  ;;  %v507_v15 = vunpack.c.l.bf16 %v544_v3  ;;  %v340_v17 = vsel %vm276_vm5, %v244_v61, %v308_v9  ;;  %v444_v25 = vunpack.c.h.bf16 %v529_v2 }
  0x33   :  { %vm277_vm6 = vcmp.ge.f32.partialorder %v245_v10, 0.0  ;;  %v309_v18 = vmul.f32 0.22916667, %v245_v10  ;;  %vm278_vm7 = vcmp.ge.f32.partialorder %v246_v11, 0.0  ;;  %372 = vst [vmem:[%s846_s4 + $0xa8] sm:$0xff] %v340_v17  ;;  %v247_v20 = vadd.f32 %v503_v0, %v151_v12 }
  0x34   :  { %v310_v19 = vmul.f32 0.22916667, %v246_v11  ;;  %v152_v21 = vadd.f32 %v592_v7, %v113_v13  ;;  %v114_v22 = vmul.f32 %v443_v14, %v578_v1  ;;  %v508_v26 = vunpack.c.h.bf16 %v544_v3 }
  0x35   :  { %v341_v24 = vsel %vm277_vm6, %v245_v10, %v309_v18  ;;  %v447_v27 = vunpack.c.l.bf16 %v530_v16  ;;  %vm279_vm8 = vcmp.ge.f32.partialorder %v247_v20, 0.0  ;;  %v311_v29 = vmul.f32 0.22916667, %v247_v20 }
  0x36   :  { %373 = vst [vmem:[%s846_s4 + $0xb0] sm:$0xff] %v341_v24  ;;  %v342_v28 = vsel %vm278_vm7, %v246_v11, %v310_v19  ;;  %v248_v30 = vadd.f32 %v504_v8, %v152_v21  ;;  %v153_v31 = vadd.f32 %v592_v7, %v114_v22  ;;  %v115_v32 = vmul.f32 %v444_v25, %v578_v1 }
  0x37   :  { %374 = vst [vmem:[%s846_s4 + $0xb8] sm:$0xff] %v342_v28  ;;  %v116_v33 = vmul.f32 %v447_v27, %v578_v1  ;;  %v511_v34 = vunpack.c.l.bf16 %v545_v23  ;;  %v343_v36 = vsel %vm279_vm8, %v247_v20, %v311_v29  ;;  %v448_v38 = vunpack.c.h.bf16 %v530_v16 }
  0x38   :  { %vm280_vm9 = vcmp.ge.f32.partialorder %v248_v30, 0.0  ;;  %v312_v37 = vmul.f32 0.22916667, %v248_v30  ;;  %375 = vst [vmem:[%s846_s4 + $0xc0] sm:$0xff] %v343_v36  ;;  %v249_v39 = vadd.f32 %v507_v15, %v153_v31  ;;  %v154_v40 = vadd.f32 %v592_v7, %v115_v32 }
  0x39   :  { %v155_v41 = vadd.f32 %v592_v7, %v116_v33  ;;  %v117_v44 = vmul.f32 %v448_v38, %v578_v1  ;;  %v512_v45 = vunpack.c.h.bf16 %v545_v23  ;;  %v451_v46 = vunpack.c.l.bf16 %v531_v35 }
  0x3a   :  { %v344_v43 = vsel %vm280_vm9, %v248_v30, %v312_v37  ;;  %vm281_vm10 = vcmp.ge.f32.partialorder %v249_v39, 0.0  ;;  %v313_v47 = vmul.f32 0.22916667, %v249_v39  ;;  %v250_v48 = vadd.f32 %v508_v26, %v154_v40 }
  0x3b   :  { %376 = vst [vmem:[%s846_s4 + $0xc8] sm:$0xff] %v344_v43  ;;  %v251_v49 = vadd.f32 %v511_v34, %v155_v41  ;;  %v156_v50 = vadd.f32 %v592_v7, %v117_v44  ;;  %v118_v51 = vmul.f32 %v451_v46, %v578_v1  ;;  %v515_v52 = vunpack.c.l.bf16 %v546_v42 }
  0x3c   :  { %v452_v53 = vunpack.c.h.bf16 %v531_v35  ;;  %v345_v54 = vsel %vm281_vm10, %v249_v39, %v313_v47  ;;  %vm282_vm11 = vcmp.ge.f32.partialorder %v250_v48, 0.0  ;;  %v314_v55 = vmul.f32 0.22916667, %v250_v48 }
  0x3d   :  { %vm283_vm12 = vcmp.ge.f32.partialorder %v251_v49, 0.0  ;;  %377 = vst [vmem:[%s846_s4 + $0xd0] sm:$0xff] %v345_v54  ;;  %v315_v56 = vmul.f32 0.22916667, %v251_v49  ;;  %v252_v57 = vadd.f32 %v512_v45, %v156_v50  ;;  %v157_v58 = vadd.f32 %v592_v7, %v118_v51 }
  0x3e   :  { %v119_v59 = vmul.f32 %v452_v53, %v578_v1  ;;  %v346_v60 = vsel %vm282_vm11, %v250_v48, %v314_v55  ;;  %v516_v61 = vunpack.c.h.bf16 %v546_v42 }
  0x3f   :  { %378 = vst [vmem:[%s846_s4 + $0xd8] sm:$0xff] %v346_v60  ;;  %v347_v62 = vsel %vm283_vm12, %v251_v49, %v315_v56  ;;  %vm284_vm13 = vcmp.ge.f32.partialorder %v252_v57, 0.0  ;;  %v316_v63 = vmul.f32 0.22916667, %v252_v57  ;;  %v253_v0 = vadd.f32 %v515_v52, %v157_v58 }
  0x40   :  { %379 = vst [vmem:[%s846_s4 + $0xe0] sm:$0xff] %v347_v62  ;;  %v158_v2 = vadd.f32 %v592_v7, %v119_v59 }
  0x41   :  { %v348_v3 = vsel %vm284_vm13, %v252_v57, %v316_v63  ;;  %vm285_vm14 = vcmp.ge.f32.partialorder %v253_v0, 0.0  ;;  %v317_v4 = vmul.f32 0.22916667, %v253_v0 }
  0x42   :  { %380 = vst [vmem:[%s846_s4 + $0xe8] sm:$0xff] %v348_v3  ;;  %v254_v1 = vadd.f32 %v516_v61, %v158_v2 }
  0x43   :  { %v349_v5 = vsel %vm285_vm14, %v253_v0, %v317_v4 }
  0x44   :  { %381 = vst [vmem:[%s846_s4 + $0xf0] sm:$0xff] %v349_v5  ;;  %vm286_vm15 = vcmp.ge.f32.partialorder %v254_v1, 0.0  ;;  %v318_v6 = vmul.f32 0.22916667, %v254_v1 }
  0x46   :  { %v350_v8 = vsel %vm286_vm15, %v254_v1, %v318_v6 }
  0x47   :  { %382 = vst [vmem:[%s846_s4 + $0xf8] sm:$0xff] %v350_v8 }

// kernel: res_up_forward.8
= control target key start
LH: loop header
LB: loop body
LE: loop exit
PB: predicated region body
PF: predicated region fallthrough
CT: control target
= control target key end

     0   :  { %s4545_s24 = smov 0   ;;  %s4547_s25 = smov 0   ;;  %s6893_s0 = inlined_call_operand.vmem [shape: bf16[2,18,18,8], index: 0, kind: input, shape index: {}, may-alias: {0,1,2}]   ;;  %s6894_s1 = inlined_call_operand.vmem [shape: bf16[2,18,18,8], index: 1, kind: input, shape index: {}, may-alias: {0,1,2}]   ;;  %s6895_s2 = inlined_call_operand.vmem [shape: bf16[2,18,18,8], index: 2, kind: input, shape index: {}, may-alias: {0,1,2}]   ;;  %s6896_s3 = inlined_call_operand.vmem [shape: bf16[72,32], index: 3, kind: input, shape index: {}]   ;;  %s6897_s4 = inlined_call_operand.vmem [shape: f32[1,32], index: 4, kind: input, shape index: {}]   ;;  %s6898_s5 = inlined_call_operand.vmem [shape: bf16[2,32,16,32], index: 5, kind: output, shape index: {0}]   ;;  %s6899_s6 = inlined_call_operand.vmem [shape: f32[2,1,1,32], index: 6, kind: output, shape index: {1}]   ;;  %s6900_s7 = inlined_call_operand.vmem [shape: f32[2,1,1,32], index: 7, kind: output, shape index: {2}]  }
   0x1   :  { %s4549_s26 = smov 0  }
   0x2 LB: > { %s30_s27 = sadd.s32 1, %s4491_s25  ;;  %p3418_p0 = scmp.ge.s32.totalorder %s4495_s26, 1  ;;  %s4495_s26 = sphi %s4549_s26, %s18_s26   ;;  %s4491_s25 = sphi %s4547_s25, %s7096_s25   ;;  %s4487_s24 = sphi %s4545_s24, %s7095_s24  }
   0x3   : > { %p32_p1 = scmp.ge.s32.totalorder %s30_s27, 2  ;;  %p330_p2 = scmp.lt.s32.totalorder %s4495_s26, 3 }
   0x5   : > { %s7098_s27 = smov (%p32_p1, %s30_s27), 0  ;;  %p331_p3 = pnand %p3418_p0, %p330_p2 }
   0x7   : > { %334 = sbr.rel (%p331_p3) target bundleno = 656 (0x290), region = 40 }
   0xe   : > { %p418_p4 = scmp.lt.s32.totalorder %s4487_s24, 1  ;;  %vm644_vm0 = vcmask 1046528   ;;  %s4497_s9 = smov 8   ;;  %vm832_vm1 = vcmask 1045504   ;;  %vm2259_vm2 = vcmask 1043456   ;;  %vm1627_vm3 = vcmask 64512  }
   0xf   : > { %s4498_s14 = smov 16   ;;  %s4499_s21 = smov 24   ;;  %vm1662_vm4 = vcmask 130048   ;;  %vm1697_vm5 = vcmask 195584   ;;  %vm1762_vm6 = vcmask 261120   ;;  %vm1827_vm7 = vcmask 326656  }
  0x10   : > { %s7100_s24 = smov (!%p418_p4, %s4487_s24), 1  ;;  %s4500_s29 = smov 40   ;;  %vm1892_vm8 = vcmask 392192   ;;  %vm1957_vm9 = vcmask 457728   ;;  %vm2022_vm10 = vcmask 523264   ;;  %vm2162_vm11 = vcmask 588800  }
  0x11   : > { %s4566_s28 = smul.u32 216, %s7100_s24  ;;  %s4501_s30 = smov 32   ;;  %vm2808_vm12 = vcmask 257024   ;;  %vm3006_vm13 = vcmask 253952  }
  0x12   : > { %s4503_s11 = smov 56   ;;  %s4504_s12 = smov 64  }
  0x13   : > { %s4572_s8 = scalar_lea.vmem %s6893_s0, %s4566_s28  ;;  %s3529_s10 = sadd.s32 192, %s4566_s28 }
  0x14   : > { %v3637_v0 = vld [vmem:[%s4572_s8 + $0x18] sm:$0xff]   ;;  %v4576_v1 = vld [vmem:[%s4572_s8 + $0x20] sm:$0x1]  ;;  %v4587_v7 = vld [vmem:[%s4572_s8 + $0x8] sm:$0x1]  ;;  %s443_s13 = scalar_lea.vmem %s6894_s1, %s3529_s10  ;;  %s3532_s18 = sshll.u32 %s7100_s24, 8 }
  0x15   : > { %v3598_v2 = vld [vmem:[%s4572_s8] sm:$0xff]   ;;  %v4579_v3 = vunpack.c.l.bf16 %v3637_v0  ;;  %v4581_v4 = vunpack.c.h.bf16 %v3637_v0  ;;  %v6910_v5 = vunpack.c.l.bf16 %v4576_v1  ;;  %v4591_v9 = vld [vmem:[%s4572_s8 + $0x2c] sm:$0x1]  ;;  %v6911_v11 = vunpack.c.l.bf16 %v4587_v7  ;;  %v4612_v23 = vld [vmem:[%s4572_s8 + $0x14] sm:$0x1] }
  0x16   : > { %v4584_v6 = vunpack.c.l.bf16 %v3598_v2  ;;  %v494_v8 = vld [vmem:[%s4572_s8 + $0x24] sm:$0xff]   ;;  %v4593_v10 = vunpack.c.h.bf16 %v3598_v2  ;;  %v488_v14 = vld [vmem:[%s4572_s8 + $0xc] sm:$0xff]   ;;  %v6906_v21 = vunpack.c.l.bf16 %v4591_v9  ;;  %v500_v28 = vld [vmem:[%s4572_s8 + $0x3c] sm:$0xff]   ;;  %v6909_v37 = vunpack.c.l.bf16 %v4612_v23 }
  0x17   : > { %v4596_v12 = vunpack.c.l.bf16 %v494_v8  ;;  %v4598_v13 = vunpack.c.h.bf16 %v494_v8  ;;  %v655_v15 = vrot.slane %v4579_v3, 1  ;;  %v656_v16 = vrot.slane %v4581_v4, 1  ;;  %v4627_v33 = vld [vmem:[%s4572_s8 + $0x44] sm:$0x1]  ;;  %v3638_v38 = vld [vmem:[%s4572_s8 + $0x30] sm:$0xff]   ;;  %v3639_v58 = vld [vmem:[%s4572_s8 + $0x48] sm:$0xff]  }
  0x18   : > { %6979 = vst [vmem:[#allocation2_spill] sm:$0xff] %v4584_v6  ;;  %6980 = vst [vmem:[#allocation3_spill] sm:$0xff] %v4593_v10  ;;  %v658_v17 = vrot.slane %v6910_v5, 1  ;;  %v645_v18 = vrot.slane %v4584_v6, 1  ;;  %v646_v19 = vrot.slane %v4593_v10, 1  ;;  %v648_v20 = vrot.slane %v6911_v11, 1 }
  0x19   : > { %v660_v22 = vrot.slane %v4596_v12, 1  ;;  %v657_v24 = vsel %vm644_vm0, %v655_v15, %v656_v16  ;;  %v661_v26 = vrot.slane %v4598_v13, 1  ;;  %v4617_v27 = vunpack.c.l.bf16 %v488_v14  ;;  %v4643_v43 = vld [vmem:[%s4572_s8 + $0x38] sm:$0x1]  ;;  %v4665_v57 = vld [vmem:[%s4572_s8 + $0x5c] sm:$0x1] }
  0x1a   : > { %v659_v25 = vsel %vm644_vm0, %v656_v16, %v658_v17  ;;  %v647_v30 = vsel %vm644_vm0, %v645_v18, %v646_v19  ;;  %v649_v31 = vsel %vm644_vm0, %v646_v19, %v648_v20  ;;  %v663_v32 = vrot.slane %v6906_v21, 1  ;;  %v506_v52 = vld [vmem:[%s4572_s8 + $0x54] sm:$0xff]   ;;  %v512_v19 = vld [vmem:[%s4572_s8 + $0x6c] sm:$0xff]  }
  0x1b   : > { %v4620_v29 = vpack.i.bf16 %v659_v25, %v657_v24  ;;  %v3802_v34 = vpack.i.bf16 %v649_v31, %v647_v30  ;;  %v662_v35 = vsel %vm644_vm0, %v660_v22, %v661_v26  ;;  %v4630_v36 = vunpack.c.h.bf16 %v488_v14  ;;  %v4683_v14 = vld [vmem:[%s4572_s8 + $0x50] sm:$0x1] }
  0x1c   : > { %v664_v39 = vsel %vm644_vm0, %v661_v26, %v663_v32  ;;  %v650_v40 = vrot.slane %v4617_v27, 1  ;;  %v4638_v41 = vunpack.c.l.bf16 %v500_v28  ;;  %v4640_v42 = vunpack.c.h.bf16 %v500_v28  ;;  %v4700_v26 = vld [vmem:[%s4572_s8 + $0x74] sm:$0x1]  ;;  %v3640_v28 = vld [vmem:[%s4572_s8 + $0x60] sm:$0xff]  }
  0x1d   : > { %3813 = vrot.lane.b32.xlu1 %v4620_v29, %s4497_s9  ;;  %3803 = vrot.lane.b32.xlu0 %v3802_v34, %s4497_s9  ;;  %v4646_v44 = vpack.i.bf16 %v664_v39, %v662_v35  ;;  %v651_v45 = vrot.slane %v4630_v36, 1  ;;  %v653_v46 = vrot.slane %v6909_v37, 1  ;;  %v6904_v47 = vunpack.c.l.bf16 %v4627_v33  ;;  %v530_v37 = vld [vmem:[%s4572_s8 + $0xb4] sm:$0xff]  }
  0x1e   : > { %v670_v48 = vrot.slane %v4638_v41, 1  ;;  %v671_v49 = vrot.slane %v4640_v42, 1  ;;  %v4654_v50 = vunpack.c.l.bf16 %v3638_v38  ;;  %v4656_v51 = vunpack.c.h.bf16 %v3638_v38 }
  0x1f   : > { %v652_v53 = vsel %vm644_vm0, %v650_v40, %v651_v45  ;;  %v654_v54 = vsel %vm644_vm0, %v651_v45, %v653_v46  ;;  %v673_v55 = vrot.slane %v6904_v47, 1  ;;  %v6907_v56 = vunpack.c.l.bf16 %v4643_v43  ;;  %v4718_v45 = vld [vmem:[%s4572_s8 + $0x68] sm:$0x1] }
  0x20   : > { %v4670_v59 = vpack.i.bf16 %v654_v54, %v652_v53  ;;  %v672_v60 = vsel %vm644_vm0, %v670_v48, %v671_v49  ;;  %v665_v61 = vrot.slane %v4654_v50, 1  ;;  %v666_v62 = vrot.slane %v4656_v51, 1  ;;  %v518_v53 = vld [vmem:[%s4572_s8 + $0x84] sm:$0xff]  }
  0x21   : > { %3818 = vrot.lane.b32.xlu1 %v4646_v44, %s4497_s9  ;;  %v674_v63 = vsel %vm644_vm0, %v671_v49, %v673_v55  ;;  %v668_v0 = vrot.slane %v6907_v56, 1  ;;  %v4678_v2 = vunpack.c.l.bf16 %v506_v52  ;;  %v4680_v8 = vunpack.c.h.bf16 %v506_v52  ;;  %v4794_v56 = vld [vmem:[%s4572_s8 + $0x98] sm:$0x1] }
  0x22   : > { %3808 = vrot.lane.b32.xlu0 %v4670_v59, %s4497_s9  ;;  %v4687_v15 = vpack.i.bf16 %v674_v63, %v672_v60  ;;  %v667_v16 = vsel %vm644_vm0, %v665_v61, %v666_v62  ;;  %v6902_v17 = vunpack.c.l.bf16 %v4665_v57  ;;  %v4691_v18 = vunpack.c.l.bf16 %v3639_v58  ;;  %6993 = vst [vmem:[#allocation16_spill] sm:$0xff] %v4794_v56 }
  0x23   : > { %v669_v20 = vsel %vm644_vm0, %v666_v62, %v668_v0  ;;  %v680_v22 = vrot.slane %v4678_v2, 1  ;;  %v681_v24 = vrot.slane %v4680_v8, 1  ;;  %v4697_v25 = vunpack.c.h.bf16 %v3639_v58 }
  0x24   : > { %v4705_v30 = vpack.i.bf16 %v669_v20, %v667_v16  ;;  %v683_v31 = vrot.slane %v6902_v17, 1  ;;  %v6905_v32 = vunpack.c.l.bf16 %v4683_v14  ;;  %v675_v34 = vrot.slane %v4691_v18, 1  ;;  %v4741_v16 = vld [vmem:[%s4572_s8 + $0x8c] sm:$0x1] }
  0x25   : > { %3828 = vrot.lane.b32.xlu1 %v4687_v15, %s4497_s9  ;;  %v682_v35 = vsel %vm644_vm0, %v680_v22, %v681_v24  ;;  %v676_v38 = vrot.slane %v4697_v25, 1  ;;  %v4713_v39 = vunpack.c.l.bf16 %v512_v19  ;;  %v4715_v40 = vunpack.c.h.bf16 %v512_v19  ;;  %6984 = vst [vmem:[#allocation7_spill] sm:$0xff] %v4741_v16  ;;  %v3641_v19 = vld [vmem:[%s4572_s8 + $0x78] sm:$0xff]  }
  0x26   : > { %3823 = vrot.lane.b32.xlu0 %v4705_v30, %s4497_s9  ;;  %v684_v46 = vsel %vm644_vm0, %v681_v24, %v683_v31  ;;  %v678_v48 = vrot.slane %v6905_v32, 1  ;;  %v6901_v49 = vunpack.c.l.bf16 %v4700_v26  ;;  %v4726_v52 = vunpack.c.l.bf16 %v3640_v28 }
  0x27   : > { %6981 = vst [vmem:[#allocation4_spill] sm:$0xff] %v4713_v39  ;;  %6982 = vst [vmem:[#allocation5_spill] sm:$0xff] %v4715_v40  ;;  %v4729_v54 = vpack.i.bf16 %v684_v46, %v682_v35  ;;  %v677_v55 = vsel %vm644_vm0, %v675_v34, %v676_v38  ;;  %v690_v58 = vrot.slane %v4713_v39, 1  ;;  %v691_v60 = vrot.slane %v4715_v40, 1  ;;  %v4759_v46 = vld [vmem:[%s4572_s8 + $0x80] sm:$0x1] }
  0x28   : > { %6983 = vst [vmem:[#allocation6_spill] sm:$0xff] %v4726_v52  ;;  %v679_v61 = vsel %vm644_vm0, %v676_v38, %v678_v48  ;;  %v693_v62 = vrot.slane %v6901_v49, 1  ;;  %v4737_v63 = vunpack.c.h.bf16 %v3640_v28  ;;  %v6903_v0 = vunpack.c.l.bf16 %v4718_v45 }
  0x29   : > { %3838 = vrot.lane.b32.xlu1 %v4729_v54, %s4497_s9  ;;  %v4746_v20 = vpack.i.bf16 %v679_v61, %v677_v55  ;;  %v692_v22 = vsel %vm644_vm0, %v690_v58, %v691_v60  ;;  %v685_v24 = vrot.slane %v4726_v52, 1  ;;  %v4750_v31 = vunpack.c.l.bf16 %v518_v53  ;;  %v524_v61 = vld [vmem:[%s4572_s8 + $0x9c] sm:$0xff]  }
  0x2a   : > { %v694_v28 = vsel %vm644_vm0, %v691_v60, %v693_v62  ;;  %v686_v34 = vrot.slane %v4737_v63, 1  ;;  %v688_v35 = vrot.slane %v6903_v0, 1  ;;  %v4756_v38 = vunpack.c.h.bf16 %v518_v53  ;;  %v4776_v0 = vld [vmem:[%s4572_s8 + $0xa4] sm:$0x1] }
  0x2b   : > { %6985 = vst [vmem:[#allocation8_spill] sm:$0xff] %v4750_v31  ;;  %3833 = vrot.lane.b32.xlu0 %v4746_v20, %s4497_s9  ;;  %v4763_v48 = vpack.i.bf16 %v694_v28, %v692_v22  ;;  %v6908_v55 = vunpack.c.l.bf16 %v4741_v16  ;;  %v700_v58 = vrot.slane %v4750_v31, 1  ;;  %v4767_v60 = vunpack.c.l.bf16 %v3641_v19  ;;  %6990 = vst [vmem:[#allocation13_spill] sm:$0xff] %v4776_v0  ;;  %v3642_v22 = vld [vmem:[%s4572_s8 + $0x90] sm:$0xff]  }
  0x2c   : > { %6986 = vst [vmem:[#allocation9_spill] sm:$0xff] %v4756_v38  ;;  %v687_v62 = vsel %vm644_vm0, %v685_v24, %v686_v34  ;;  %v689_v53 = vsel %vm644_vm0, %v686_v34, %v688_v35  ;;  %v701_v49 = vrot.slane %v4756_v38, 1  ;;  %v4773_v17 = vunpack.c.h.bf16 %v3641_v19  ;;  %v4818_v38 = vld [vmem:[%s4572_s8 + $0xbc] sm:$0x1] }
  0x2d   : > { %6987 = vst [vmem:[#allocation10_spill] sm:$0xff] %v4763_v48  ;;  %6988 = vst [vmem:[#allocation11_spill] sm:$0xff] %v4767_v60  ;;  %3848 = vrot.lane.b32.xlu1 %v4763_v48, %s4497_s9  ;;  %v4781_v28 = vpack.i.bf16 %v689_v53, %v687_v62  ;;  %v703_v47 = vrot.slane %v6908_v55, 1  ;;  %v6915_v24 = vunpack.c.l.bf16 %v4759_v46  ;;  %v695_v34 = vrot.slane %v4767_v60, 1 }
  0x2e   : > { %6989 = vst [vmem:[#allocation12_spill] sm:$0xff] %v4773_v17  ;;  %v702_v19 = vsel %vm644_vm0, %v700_v58, %v701_v49  ;;  %v696_v35 = vrot.slane %v4773_v17, 1  ;;  %v4789_v32 = vunpack.c.l.bf16 %v524_v61  ;;  %v4791_v21 = vunpack.c.h.bf16 %v524_v61  ;;  %6997 = vst [vmem:[#allocation20_spill] sm:$0xff] %v4818_v38 }
  0x2f   : > { %3843 = vrot.lane.b32.xlu0 %v4781_v28, %s4497_s9  ;;  %v704_v62 = vsel %vm644_vm0, %v701_v49, %v703_v47  ;;  %v698_v53 = vrot.slane %v6915_v24, 1  ;;  %v6918_v58 = vunpack.c.l.bf16 %v4776_v0  ;;  %v4802_v55 = vunpack.c.l.bf16 %v3642_v22 }
  0x30   : > { %6991 = vst [vmem:[#allocation14_spill] sm:$0xff] %v4789_v32  ;;  %6992 = vst [vmem:[#allocation15_spill] sm:$0xff] %v4791_v21  ;;  %v4806_v61 = vpack.i.bf16 %v704_v62, %v702_v19  ;;  %v697_v5 = vsel %vm644_vm0, %v695_v34, %v696_v35  ;;  %v710_v11 = vrot.slane %v4789_v32, 1  ;;  %v711_v48 = vrot.slane %v4791_v21, 1  ;;  %v3643_v19 = vld [vmem:[%s4572_s8 + $0xa8] sm:$0xff]  }
  0x31   : > { %6994 = vst [vmem:[#allocation17_spill] sm:$0xff] %v4802_v55  ;;  %v699_v16 = vsel %vm644_vm0, %v696_v35, %v698_v53  ;;  %v713_v47 = vrot.slane %v6918_v58, 1  ;;  %v4814_v49 = vunpack.c.h.bf16 %v3642_v22  ;;  %v6926_v24 = vunpack.c.l.bf16 %v4794_v56  ;;  %v3630_v56 = vld [vmem:[%s443_s13] sm:$0xff]  }
  0x32   : > { %6995 = vst [vmem:[#allocation18_spill] sm:$0xff] %v4806_v61  ;;  %3858 = vrot.lane.b32.xlu1 %v4806_v61, %s4497_s9  ;;  %v4823_v34 = vpack.i.bf16 %v699_v16, %v697_v5  ;;  %v712_v62 = vsel %vm644_vm0, %v710_v11, %v711_v48  ;;  %v705_v35 = vrot.slane %v4802_v55, 1  ;;  %v4827_v53 = vunpack.c.l.bf16 %v530_v37  ;;  %v4839_v5 = vld [vmem:[%s4572_s8 + $0xb0] sm:$0x1]  ;;  %s4502_s8 = smov 48  }
  0x33   : > { %6996 = vst [vmem:[#allocation19_spill] sm:$0xff] %v4814_v49  ;;  %v714_v22 = vsel %vm644_vm0, %v711_v48, %v713_v47  ;;  %v706_v58 = vrot.slane %v4814_v49, 1  ;;  %v708_v0 = vrot.slane %v6926_v24, 1  ;;  %v4836_v61 = vunpack.c.h.bf16 %v530_v37 }
  0x34   : > { %6998 = vst [vmem:[#allocation21_spill] sm:$0xff] %v4823_v34  ;;  %6999 = vst [vmem:[#allocation22_spill] sm:$0xff] %v4827_v53  ;;  %3853 = vrot.lane.b32.xlu0 %v4823_v34, %s4497_s9  ;;  %v4843_v11 = vpack.i.bf16 %v714_v22, %v712_v62  ;;  %v6934_v16 = vunpack.c.l.bf16 %v4818_v38  ;;  %v720_v21 = vrot.slane %v4827_v53, 1  ;;  %v4847_v32 = vunpack.c.l.bf16 %v3643_v19 }
  0x35   : > { %7000 = vst [vmem:[#allocation23_spill] sm:$0xff] %v4836_v61  ;;  %v707_v48 = vsel %vm644_vm0, %v705_v35, %v706_v58  ;;  %v709_v47 = vsel %vm644_vm0, %v706_v58, %v708_v0  ;;  %v721_v37 = vrot.slane %v4836_v61, 1  ;;  %v4852_v24 = vunpack.c.h.bf16 %v3643_v19  ;;  %v4866_v61 = vld [vmem:[%s443_s13 + $0x8] sm:$0x1]  ;;  %s3531_s13 = sadd.s32 204, %s4566_s28 }
  0x36   : > { %7001 = vst [vmem:[#allocation24_spill] sm:$0xff] %v4843_v11  ;;  %7002 = vst [vmem:[#allocation25_spill] sm:$0xff] %v4847_v32  ;;  %3868 = vrot.lane.b32.xlu1 %v4843_v11, %s4497_s9  ;;  %v4856_v62 = vpack.i.bf16 %v709_v47, %v707_v48  ;;  %v723_v22 = vrot.slane %v6934_v16, 1  ;;  %v6944_v34 = vunpack.c.l.bf16 %v4839_v5  ;;  %v715_v53 = vrot.slane %v4847_v32, 1  ;;  %s5574_s16 = scalar_lea.vmem %s6895_s2, %s3531_s13 }
  0x37   : > { %7003 = vst [vmem:[#allocation26_spill] sm:$0xff] %v4852_v24  ;;  %v722_v35 = vsel %vm644_vm0, %v720_v21, %v721_v37  ;;  %v716_v0 = vrot.slane %v4852_v24, 1  ;;  %v833_v58 = vrot.slane %v4584_v6, 2  ;;  %v834_v19 = vrot.slane %v4593_v10, 2 }
  0x38   : > { %7004 = vst [vmem:[#allocation27_spill] sm:$0xff] %v4856_v62  ;;  %3863 = vrot.lane.b32.xlu0 %v4856_v62, %s4497_s9  ;;  %v724_v48 = vsel %vm644_vm0, %v721_v37, %v723_v22  ;;  %v718_v47 = vrot.slane %v6944_v34, 1  ;;  %v7005_v16 = vunpack.c.l.bf16 %v4587_v7  ;;  %v4875_v21 = vunpack.c.l.bf16 %v3630_v56 }
  0x39   : > { %v4877_v38 = vpack.i.bf16 %v724_v48, %v722_v35  ;;  %v717_v6 = vsel %vm644_vm0, %v715_v53, %v716_v0  ;;  %v835_v10 = vsel %vm832_vm1, %v833_v58, %v834_v19  ;;  %v4881_v24 = vunpack.c.h.bf16 %v3630_v56 }
  0x3a   : > { %v836_v11 = vrot.slane %v7005_v16, 2  ;;  %7006 = vst [vmem:[#allocation28_spill] sm:$0xff] %v4875_v21  ;;  %v719_v62 = vsel %vm644_vm0, %v716_v0, %v718_v47  ;;  %v6945_v22 = vunpack.c.l.bf16 %v4866_v61  ;;  %v725_v34 = vrot.slane %v4875_v21, 1 }
  0x3b   : > { %7007 = vst [vmem:[#allocation29_spill] sm:$0xff] %v4877_v38  ;;  %3878 = vrot.lane.b32.xlu1 %v4877_v38, %s4497_s9  ;;  %v4889_v7 = vpack.i.bf16 %v719_v62, %v717_v6  ;;  %v726_v53 = vrot.slane %v4881_v24, 1  ;;  %v843_v35 = vrot.slane %v4579_v3, 2  ;;  %v844_v0 = vrot.slane %v4581_v4, 2 }
  0x3c   : > { %v837_v37 = vsel %vm832_vm1, %v834_v19, %v836_v11  ;;  %v728_v56 = vrot.slane %v6945_v22, 1  ;;  %v7009_v11 = vunpack.c.l.bf16 %v4576_v1  ;;  %v838_v19 = vrot.slane %v4617_v27, 2 }
  0x3d   : > { %7008 = vst [vmem:[#allocation30_spill] sm:$0xff] %v4889_v7  ;;  %v3887_v16 = vpack.i.bf16 %v837_v37, %v835_v10  ;;  %3873 = vrot.lane.b32.xlu0 %v4889_v7, %s4497_s9  ;;  %v727_v6 = vsel %vm644_vm0, %v725_v34, %v726_v53  ;;  %v839_v10 = vrot.slane %v4630_v36, 2  ;;  %v7010_v62 = vunpack.c.l.bf16 %v4612_v23 }
  0x3e   : > { %v846_v58 = vrot.slane %v7009_v11, 2  ;;  %v853_v47 = vrot.slane %v4654_v50, 2  ;;  %v729_v37 = vsel %vm644_vm0, %v726_v53, %v728_v56  ;;  %v845_v22 = vsel %vm832_vm1, %v843_v35, %v844_v0 }
  0x3f   : > { %v841_v48 = vrot.slane %v7010_v62, 2  ;;  %v854_v11 = vrot.slane %v4656_v51, 2  ;;  %3888 = vrot.lane.b32.xlu1 %v3887_v16, %s4498_s14  ;;  %v4911_v38 = vpack.i.bf16 %v729_v37, %v727_v6  ;;  %v840_v23 = vsel %vm832_vm1, %v838_v19, %v839_v10 }
  0x40   : > { %v847_v1 = vsel %vm832_vm1, %v844_v0, %v846_v58  ;;  %v7012_v35 = vunpack.c.l.bf16 %v4643_v43  ;;  %v848_v0 = vrot.slane %v4596_v12, 2  ;;  %v849_v16 = vrot.slane %v4598_v13, 2 }
  0x41   : > { %7011 = vst [vmem:[#allocation31_spill] sm:$0xff] %v4911_v38  ;;  %v4913_v34 = vpack.i.bf16 %v847_v1, %v845_v22  ;;  %v842_v62 = vsel %vm832_vm1, %v839_v10, %v841_v48  ;;  %v855_v53 = vsel %vm832_vm1, %v853_v47, %v854_v11  ;;  %3883 = vrot.lane.b32.xlu0 %v4911_v38, %s4497_s9  ;;  %v7013_v22 = vunpack.c.l.bf16 %v4591_v9 }
  0x42   : > { %v4917_v7 = vpack.i.bf16 %v842_v62, %v840_v23  ;;  %v856_v56 = vrot.slane %v7012_v35, 2  ;;  %v863_v19 = vrot.slane %v4691_v18, 2  ;;  %v864_v6 = vrot.slane %v4697_v25, 2 }
  0x43   : > { %v851_v58 = vrot.slane %v7013_v22, 2  ;;  %v7014_v48 = vunpack.c.l.bf16 %v4683_v14  ;;  %v858_v47 = vrot.slane %v4638_v41, 2  ;;  %v859_v37 = vrot.slane %v4640_v42, 2  ;;  %3898 = vrot.lane.b32.xlu1 %v4913_v34, %s4498_s14 }
  0x44   : > { %v857_v10 = vsel %vm832_vm1, %v854_v11, %v856_v56  ;;  %v850_v9 = vsel %vm832_vm1, %v848_v0, %v849_v16  ;;  %v865_v11 = vsel %vm832_vm1, %v863_v19, %v864_v6  ;;  %v7015_v35 = vunpack.c.l.bf16 %v4627_v33 }
  0x45   : > { %v866_v43 = vrot.slane %v7014_v48, 2  ;;  %v4937_v1 = vpack.i.bf16 %v857_v10, %v855_v53  ;;  %v852_v23 = vsel %vm832_vm1, %v849_v16, %v851_v58  ;;  %3893 = vrot.lane.b32.xlu0 %v4917_v7, %s4498_s14  ;;  %v860_v22 = vsel %vm832_vm1, %v858_v47, %v859_v37 }
  0x46   : > { %v4941_v62 = vpack.i.bf16 %v852_v23, %v850_v9  ;;  %v861_v56 = vrot.slane %v7015_v35, 2  ;;  %v873_v53 = vrot.slane %v4726_v52, 2  ;;  %v874_v0 = vrot.slane %v4737_v63, 2 }
  0x47   : > { %v867_v14 = vsel %vm832_vm1, %v864_v6, %v866_v43  ;;  %v7016_v16 = vunpack.c.l.bf16 %v4718_v45  ;;  %v868_v19 = vrot.slane %v4678_v2, 2  ;;  %v869_v6 = vrot.slane %v4680_v8, 2  ;;  %3908 = vrot.lane.b32.xlu1 %v4937_v1, %s4498_s14 }
  0x48   : > { %v862_v10 = vsel %vm832_vm1, %v859_v37, %v861_v56  ;;  %v7017_v33 = vunpack.c.l.bf16 %v4665_v57  ;;  %v4961_v43 = vpack.i.bf16 %v867_v14, %v865_v11  ;;  %v875_v47 = vsel %vm832_vm1, %v873_v53, %v874_v0  ;;  %v4467_v57 = vld [vmem:[%s6896_s3] sm:$0xff]  }
  0x49   : > { %v876_v58 = vrot.slane %v7016_v16, 2  ;;  %3903 = vrot.lane.b32.xlu0 %v4941_v62, %s4498_s14  ;;  %v4967_v45 = vpack.i.bf16 %v862_v10, %v860_v22  ;;  %v870_v37 = vsel %vm832_vm1, %v868_v19, %v869_v6  ;;  %v878_v11 = vrot.slane %v4713_v39, 2  ;;  %3681 = vmatprep.subr.bf16.mxu0 %v4467_v57  ;;  %v4469_v19 = vld [vmem:[%s6896_s3 + $0x10] sm:$0xff]  }
  0x4a   : > { %v871_v48 = vrot.slane %v7017_v33, 2  ;;  %v879_v14 = vrot.slane %v4715_v40, 2  ;;  %v7018_v35 = vunpack.c.l.bf16 %v4700_v26  ;;  %3682 = vmatpush3.bf16.msra.mxu0 %v4467_v57  ;;  %3755 = vmatprep.subr.bf16.mxu1 %v4467_v57  ;;  %v3957_v33 = vpack.i.bf16 %v4581_v4, %v4579_v3 }
  0x4b   : > { %v877_v9 = vsel %vm832_vm1, %v874_v0, %v876_v58  ;;  %3918 = vrot.lane.b32.xlu1 %v4961_v43, %s4498_s14  ;;  %v4468_v0 = vld [vmem:[%s6896_s3 + $0x8] sm:$0xff]   ;;  %v3937_v58 = vpack.i.bf16 %v4630_v36, %v4617_v27  ;;  %3760 = vmatpush3.bf16.msra.mxu1 %v4467_v57 }
  0x4c   : > { %v872_v23 = vsel %vm832_vm1, %v869_v6, %v871_v48  ;;  %v881_v56 = vrot.slane %v7018_v35, 2  ;;  %v4980_v22 = vpack.i.bf16 %v877_v9, %v875_v47  ;;  %v880_v16 = vsel %vm832_vm1, %v878_v11, %v879_v14  ;;  %3683 = vmatprep.subr.bf16.mxu0 %v4468_v0  ;;  %v4470_v6 = vld [vmem:[%s6896_s3 + $0x18] sm:$0xff]   ;;  %3756 = vmatprep.subr.bf16.mxu1 %v4468_v0  ;;  %v4471_v48 = vld [vmem:[%s6896_s3 + $0x20] ss:$0 sps:$4 sm:$0xff]  }
  0x4d   : > { %3913 = vrot.lane.b32.xlu0 %v4967_v45, %s4498_s14  ;;  %v4984_v53 = vpack.i.bf16 %v872_v23, %v870_v37  ;;  %v2261_v47 = vsel %vm2259_vm2, %v4471_v48, 0  ;;  %v3997_v9 = vpack.i.bf16 %v4598_v13, %v4596_v12  ;;  %v4147_v11 = vpack.i.bf16 %v4737_v63, %v4726_v52  ;;  %v7043_v52 = vld [vmem:[#allocation20_spill] sm:$0xff] }
  0x4e   : > { %v882_v26 = vsel %vm832_vm1, %v879_v14, %v881_v56  ;;  %3684 = vmatpush3.bf16.msra.mxu0 %v4468_v0 }
  0x4f   : > { %3928 = vrot.lane.b32.xlu1 %v4980_v22, %s4498_s14  ;;  %v4997_v10 = vpack.i.bf16 %v882_v26, %v880_v16  ;;  %3685 = vmatprep.subr.bf16.mxu0 %v4469_v19  ;;  %v4177_v16 = vpack.i.bf16 %v4715_v40, %v4713_v39  ;;  %v7036_v39 = vld [vmem:[#allocation13_spill] sm:$0xff] }
  0x50   : > { %3761 = vmatpush3.bf16.msra.mxu1 %v4468_v0  ;;  %v7037_v40 = vunpack.c.l.bf16 %v7036_v39 }
  0x51   : > { %3923 = vrot.lane.b32.xlu0 %v4984_v53, %s4498_s14  ;;  %3757 = vmatprep.subr.bf16.mxu1 %v4469_v19 }
  0x52   : > { %3686 = vmatpush3.bf16.msra.mxu0 %v4469_v19 }
  0x53   : > { %3938 = vrot.lane.b32.xlu1 %v3937_v58, %s4499_s21  ;;  %3687 = vmatprep.subr.bf16.mxu0 %v4470_v6 }
  0x54   : > { %3762 = vmatpush3.bf16.msra.mxu1 %v4469_v19  ;;  %v884_v19 = vrot.slane %v4773_v17, 2 }
  0x55   : > { %3933 = vrot.lane.b32.xlu0 %v4997_v10, %s4498_s14  ;;  %3758 = vmatprep.subr.bf16.mxu1 %v4470_v6 }
  0x56   : > { %3688 = vmatpush3.bf16.msra.mxu0 %v4470_v6 }
  0x57   : > { %3948 = vrot.lane.b32.xlu1 %v4917_v7, %s4500_s29  ;;  %3765 = vmatprep.subr.msk.bf16.mxu0 %vm2259_vm2, %v4471_v48 }
  0x58   : > { %3763 = vmatpush3.bf16.msra.mxu1 %v4470_v6  ;;  %v7027_v6 = vunpack.c.l.bf16 %v4759_v46  ;;  %v7029_v46 = vld [vmem:[#allocation7_spill] sm:$0xff] }
  0x59   : > { %3943 = vrot.lane.b32.xlu0 %v4670_v59, %s4501_s30  ;;  %3766 = vmatprep.subr.msk.bf16.mxu1 %vm2259_vm2, %v4471_v48  ;;  %v888_v48 = vrot.slane %v4750_v31, 2 }
  0x5a   : > { %3690 = vmatpush3.bf16.msra.mxu0 %v2261_v47 }
  0x5b   : > { %3958 = vrot.lane.b32.xlu1 %v3957_v33, %s4502_s8 }
  0x5c   : > { %3764 = vmatpush3.bf16.msra.mxu1 %v2261_v47  ;;  %v7028_v47 = vld [vmem:[#allocation9_spill] sm:$0xff] }
  0x5d   : > { %3953 = vrot.lane.b32.xlu0 %v3937_v58, %s4502_s8  ;;  %v883_v58 = vrot.slane %v4767_v60, 2 }
  0x5f   : > { %3968 = vrot.lane.b32.xlu1 %v4620_v29, %s4503_s11 }
  0x61   : > { %3963 = vrot.lane.b32.xlu0 %v4670_v59, %s4503_s11  ;;  %v4087_v59 = vpack.i.bf16 %v4697_v25, %v4691_v18 }
  0x63   : > { %3978 = vrot.lane.b32.xlu1 %v4913_v34, %s4504_s12 }
  0x65   : > { %3973 = vrot.lane.b32.xlu0 %v4917_v7, %s4504_s12 }
  0x67   : > { %3988 = vrot.lane.b32.xlu1 %v4620_v29, %s4501_s30  ;;  %v4027_v29 = vpack.i.bf16 %v4656_v51, %v4654_v50 }
  0x69   : > { %3983 = vrot.lane.b32.xlu0 %v3957_v33, %s4499_s21  ;;  %v886_v33 = vrot.slane %v7027_v6, 2  ;;  %v894_v6 = vrot.slane %v4814_v49, 2 }
  0x6b   : > { %3998 = vrot.lane.b32.xlu1 %v3997_v9, %s4502_s8 }
  0x6d   : > { %3993 = vrot.lane.b32.xlu0 %v4913_v34, %s4500_s29 }
  0x6f   : > { %4008 = vrot.lane.b32.xlu1 %v4941_v62, %s4504_s12 }
  0x71   : > { %4003 = vrot.lane.b32.xlu0 %v4646_v44, %s4503_s11 }
  0x73   : > { %4018 = vrot.lane.b32.xlu1 %v4646_v44, %s4501_s30  ;;  %v4057_v44 = vpack.i.bf16 %v4640_v42, %v4638_v41 }
  0x75   : > { %4013 = vrot.lane.b32.xlu0 %v3997_v9, %s4499_s21  ;;  %v889_v9 = vrot.slane %v7028_v47, 2 }
  0x77   : > { %4028 = vrot.lane.b32.xlu1 %v4027_v29, %s4502_s8 }
  0x79   : > { %4023 = vrot.lane.b32.xlu0 %v4941_v62, %s4500_s29  ;;  %v4117_v62 = vpack.i.bf16 %v4680_v8, %v4678_v2 }
  0x7b   : > { %4038 = vrot.lane.b32.xlu1 %v4937_v1, %s4504_s12 }
  0x7d   : > { %4033 = vrot.lane.b32.xlu0 %v4705_v30, %s4503_s11 }
  0x7f   : > { %4048 = vrot.lane.b32.xlu1 %v4705_v30, %s4501_s30 }
  0x81   : > { %4043 = vrot.lane.b32.xlu0 %v4027_v29, %s4499_s21 }
  0x83   : > { %4058 = vrot.lane.b32.xlu1 %v4057_v44, %s4502_s8 }
  0x85   : > { %4053 = vrot.lane.b32.xlu0 %v4937_v1, %s4500_s29 }
  0x87   : > { %4068 = vrot.lane.b32.xlu1 %v4967_v45, %s4504_s12 }
  0x89   : > { %4063 = vrot.lane.b32.xlu0 %v4687_v15, %s4503_s11 }
  0x8b   : > { %4078 = vrot.lane.b32.xlu1 %v4687_v15, %s4501_s30 }
  0x8d   : > { %4073 = vrot.lane.b32.xlu0 %v4057_v44, %s4499_s21  ;;  %v885_v44 = vsel %vm832_vm1, %v883_v58, %v884_v19  ;;  %v4207_v58 = vpack.i.bf16 %v4773_v17, %v4767_v60 }
  0x8f   : > { %v5068_v30 = vpop.permute.xlu1 %3813  ;;  %4088 = vrot.lane.b32.xlu1 %v4087_v59, %s4502_s8  ;;  %v5071_v7 = vpop.permute.xlu0 %3803 }
  0x91   : > { %4083 = vrot.lane.b32.xlu0 %v4967_v45, %s4500_s29 }
  0x93   : > { %v5075_v34 = vpop.permute.xlu1 %3818  ;;  %4098 = vrot.lane.b32.xlu1 %v4961_v43, %s4504_s12 }
  0x94   : > { %v5079_v15 = vpop.permute.xlu0 %3808 }
  0x95   : > { %4093 = vrot.lane.b32.xlu0 %v4746_v20, %s4503_s11 }
  0x97   : > { %v5083_v1 = vpop.permute.xlu1 %3828  ;;  %4108 = vrot.lane.b32.xlu1 %v4746_v20, %s4501_s30 }
  0x98   : > { %v5089_v37 = vpop.permute.xlu0 %3823 }
  0x99   : > { %4103 = vrot.lane.b32.xlu0 %v4087_v59, %s4499_s21  ;;  %v887_v59 = vsel %vm832_vm1, %v884_v19, %v886_v33  ;;  %v890_v19 = vsel %vm832_vm1, %v888_v48, %v889_v9  ;;  %v903_v48 = vrot.slane %v4847_v32, 2 }
  0x9b   : > { %4118 = vrot.lane.b32.xlu1 %v4117_v62, %s4502_s8  ;;  %v5093_v45 = vpop.permute.xlu1 %3838 }
  0x9d   : > { %4113 = vrot.lane.b32.xlu0 %v4961_v43, %s4500_s29  ;;  %v5097_v23 = vpop.permute.xlu0 %3833 }
  0x9f   : > { %4128 = vrot.lane.b32.xlu1 %v4984_v53, %s4504_s12  ;;  %v5101_v20 = vpop.permute.xlu1 %3848 }
  0xa0   : > { %7019 = vst [vmem:[#allocation32_spill] sm:$0xff] %v5101_v20  ;;  %v901_v20 = vrot.slane %v7037_v40, 2 }
  0xa1   : > { %4123 = vrot.lane.b32.xlu0 %v4729_v54, %s4503_s11  ;;  %v5105_v57 = vpop.permute.xlu0 %3843 }
  0xa3   : > { %4138 = vrot.lane.b32.xlu1 %v4729_v54, %s4501_s30 }
  0xa4   : > { %v5111_v14 = vpop.permute.xlu1 %3858 }
  0xa5   : > { %7020 = vst [vmem:[#allocation33_spill] sm:$0xff] %v5111_v14  ;;  %4133 = vrot.lane.b32.xlu0 %v4117_v62, %s4499_s21  ;;  %v7030_v62 = vunpack.c.l.bf16 %v7029_v46  ;;  %v5169_v14 = vpack.i.bf16 %v887_v59, %v885_v44  ;;  %v7038_v59 = vld [vmem:[#allocation26_spill] sm:$0xff] }
  0xa6   : > { %v5114_v43 = vpop.permute.xlu0 %3853  ;;  %v904_v17 = vrot.slane %v7038_v59, 2 }
  0xa7   : > { %7021 = vst [vmem:[#allocation34_spill] sm:$0xff] %v5114_v43  ;;  %4148 = vrot.lane.b32.xlu1 %v4147_v11, %s4502_s8 }
  0xa8   : > { %v5117_v35 = vpop.permute.xlu1 %3868 }
  0xa9   : > { %7022 = vst [vmem:[#allocation35_spill] sm:$0xff] %v5117_v35  ;;  %4143 = vrot.lane.b32.xlu0 %v4984_v53, %s4500_s29  ;;  %v7033_v35 = vld [vmem:[#allocation10_spill] sm:$0xff] }
  0xaa   : > { %v5121_v56 = vpop.permute.xlu0 %3863 }
  0xab   : > { %7023 = vst [vmem:[#allocation36_spill] sm:$0xff] %v5121_v56  ;;  %4158 = vrot.lane.b32.xlu1 %v4980_v22, %s4504_s12 }
  0xad   : > { %4153 = vrot.lane.b32.xlu0 %v4781_v28, %s4503_s11  ;;  %v5127_v54 = vpop.permute.xlu1 %3878 }
  0xae   : > { %7024 = vst [vmem:[#allocation37_spill] sm:$0xff] %v5127_v54 }
  0xaf   : > { %v5129_v0 = vpop.permute.xlu0 %3873  ;;  %4168 = vrot.lane.b32.xlu1 %v4781_v28, %s4501_s30 }
  0xb0   : > { %7025 = vst [vmem:[#allocation38_spill] sm:$0xff] %v5129_v0 }
  0xb1   : > { %4163 = vrot.lane.b32.xlu0 %v4147_v11, %s4499_s21  ;;  %v5136_v53 = vpop.permute.xlu1 %3888  ;;  %v891_v11 = vrot.slane %v7030_v62, 2  ;;  %v7035_v62 = vld [vmem:[#allocation15_spill] sm:$0xff] }
  0xb2   : > { %v899_v43 = vrot.slane %v7035_v62, 2 }
  0xb3   : > { %v5138_v26 = vpop.permute.xlu0 %3883  ;;  %4178 = vrot.lane.b32.xlu1 %v4177_v16, %s4502_s8 }
  0xb4   : > { %7026 = vst [vmem:[#allocation39_spill] sm:$0xff] %v5138_v26  ;;  %v7031_v26 = vld [vmem:[#allocation16_spill] sm:$0xff] }
  0xb5   : > { %4173 = vrot.lane.b32.xlu0 %v4980_v22, %s4500_s29  ;;  %v5147_v28 = vpop.permute.xlu1 %3898  ;;  %v893_v22 = vrot.slane %v4802_v55, 2  ;;  %v7032_v54 = vunpack.c.l.bf16 %v7031_v26  ;;  %v892_v26 = vsel %vm832_vm1, %v889_v9, %v891_v11  ;;  %v5190_v9 = vpack.i.bf16 %v7028_v47, %v4750_v31 }
  0xb6   : > { %v7039_v11 = vunpack.c.l.bf16 %v4839_v5  ;;  %v5194_v40 = vpack.i.bf16 %v892_v26, %v890_v19  ;;  %v902_v31 = vsel %vm832_vm1, %v899_v43, %v901_v20  ;;  %v905_v5 = vsel %vm832_vm1, %v903_v48, %v904_v17 }
  0xb7   : > { %v5151_v29 = vpop.permute.xlu0 %3893  ;;  %4188 = vrot.lane.b32.xlu1 %v4997_v10, %s4504_s12  ;;  %v896_v0 = vrot.slane %v7032_v54, 2  ;;  %v7034_v54 = vld [vmem:[#allocation14_spill] sm:$0xff]  ;;  %v895_v60 = vsel %vm832_vm1, %v893_v22, %v894_v6 }
  0xb8   : > { %v898_v46 = vrot.slane %v7034_v54, 2  ;;  %v906_v39 = vrot.slane %v7039_v11, 2  ;;  %v7041_v11 = vld [vmem:[#allocation22_spill] sm:$0xff] }
  0xb9   : > { %4183 = vrot.lane.b32.xlu0 %v7033_v35, %s4503_s11  ;;  %v5165_v56 = vpop.permute.xlu1 %3908  ;;  %v897_v44 = vsel %vm832_vm1, %v894_v6, %v896_v0  ;;  %v5198_v0 = vpack.i.bf16 %v4814_v49, %v4802_v55  ;;  %v908_v55 = vrot.slane %v7041_v11, 2  ;;  %v7042_v49 = vld [vmem:[#allocation23_spill] sm:$0xff] }
  0xba   : > { %v900_v6 = vsel %vm832_vm1, %v898_v46, %v899_v43  ;;  %v907_v26 = vsel %vm832_vm1, %v904_v17, %v906_v39  ;;  %v909_v47 = vrot.slane %v7042_v49, 2  ;;  %v5219_v46 = vpack.i.bf16 %v7035_v62, %v7034_v54  ;;  %v7049_v62 = vld [vmem:[#allocation2_spill] sm:$0xff] }
  0xbb   : > { %v5172_v33 = vpop.permute.xlu0 %3903  ;;  %4198 = vrot.lane.b32.xlu1 %v7033_v35, %s4501_s30  ;;  %v5221_v20 = vpack.i.bf16 %v902_v31, %v900_v6  ;;  %v5229_v17 = vpack.i.bf16 %v7038_v59, %v4847_v32  ;;  %v5233_v48 = vpack.i.bf16 %v907_v26, %v905_v5  ;;  %v3806_v39 = vunpack.i.h.bf16 %v5071_v7  ;;  %v7046_v6 = vld [vmem:[#allocation21_spill] sm:$0xff] }
  0xbc   : > { %v3805_v31 = vunpack.i.l.bf16 %v5071_v7  ;;  %v910_v54 = vsel %vm832_vm1, %v908_v55, %v909_v47  ;;  %v3821_v59 = vunpack.i.h.bf16 %v5075_v34  ;;  %v5248_v7 = vpack.i.bf16 %v7042_v49, %v7041_v11 }
  0xbd   : > { %4193 = vrot.lane.b32.xlu0 %v4177_v16, %s4499_s21  ;;  %v5186_v35 = vpop.permute.xlu1 %3918  ;;  %v5203_v16 = vpack.i.bf16 %v897_v44, %v895_v60  ;;  %v7044_v60 = vunpack.c.l.bf16 %v7043_v52  ;;  %v3815_v52 = vunpack.i.l.bf16 %v5068_v30  ;;  %v3831_v49 = vunpack.i.h.bf16 %v5083_v1 }
  0xbf   : > { %v5200_v22 = vpop.permute.xlu0 %3913  ;;  %4208 = vrot.lane.b32.xlu1 %v4207_v58, %s4502_s8  ;;  %v911_v44 = vrot.slane %v7044_v60, 2  ;;  %v5256_v55 = vsel %vm1627_vm3, %v4579_v3, %v3815_v52  ;;  %v3896_v52 = vunpack.i.h.bf16 %v5151_v29 }
  0xc1   : > { %4203 = vrot.lane.b32.xlu0 %v4997_v10, %s4500_s29  ;;  %v5210_v19 = vpop.permute.xlu1 %3928  ;;  %v3816_v10 = vunpack.i.h.bf16 %v5068_v30  ;;  %v912_v32 = vsel %vm832_vm1, %v909_v47, %v911_v44  ;;  %v3820_v30 = vunpack.i.l.bf16 %v5075_v34  ;;  %v7048_v34 = vld [vmem:[#allocation3_spill] sm:$0xff] }
  0xc2   : > { %7040 = vst [vmem:[#allocation7_spill] sm:$0xff] %v5210_v19  ;;  %v5258_v47 = vpack.i.bf16 %v912_v32, %v910_v54  ;;  %v1629_v44 = vsel %vm1627_vm3, %v7048_v34, %v3806_v39  ;;  %v3811_v32 = vunpack.i.h.bf16 %v5079_v15  ;;  %v3810_v54 = vunpack.i.l.bf16 %v5079_v15 }
  0xc3   : > { %v5223_v43 = vpop.permute.xlu0 %3923  ;;  %4218 = vrot.lane.b32.xlu1 %v5169_v14, %s4504_s12  ;;  %v5252_v26 = vsel %vm1627_vm3, %v4581_v4, %v3816_v10  ;;  %v5270_v4 = vsel %vm1627_vm3, %v4598_v13, %v3821_v59  ;;  %v5274_v3 = vsel %vm1627_vm3, %v4596_v12, %v3820_v30  ;;  %v3890_v10 = vunpack.i.l.bf16 %v5136_v53 }
  0xc4   : > { %7045 = vst [vmem:[#allocation16_spill] sm:$0xff] %v5223_v43  ;;  %v3895_v39 = vunpack.i.l.bf16 %v5151_v29  ;;  %v5286_v59 = vpack.i.bf16 %v4881_v24, %v4875_v21  ;;  %v913_v29 = vrot.slane %v4875_v21, 2  ;;  %v1630_v34 = vsel %vm1627_vm3, %v4617_v27, %v3810_v54 }
  0xc5   : > { %4213 = vrot.lane.b32.xlu0 %v7046_v6, %s4503_s11  ;;  %v3939_v60 = vpop.permute.xlu1 %3938 }
  0xc6   : > { %v3941_v13 = vunpack.i.h.bf16 %v3939_v60  ;;  %v3940_v12 = vunpack.i.l.bf16 %v3939_v60  ;;  %v1631_v60 = vsel %vm1627_vm3, %v4630_v36, %v3811_v32  ;;  %v5303_v19 = vsel %vm1662_vm4, %v1630_v34, %v3895_v39  ;;  %v7050_v36 = vld [vmem:[#allocation18_spill] sm:$0xff] }
  0xc7   : > { %v5243_v5 = vpop.permute.xlu0 %3933  ;;  %4228 = vrot.lane.b32.xlu1 %v4207_v58, %s4499_s21  ;;  %v1628_v58 = vsel %vm1627_vm3, %v7049_v62, %v3805_v31  ;;  %v3891_v62 = vunpack.i.h.bf16 %v5136_v53  ;;  %v5306_v21 = vsel %vm1662_vm4, %v1631_v60, %v3896_v52 }
  0xc8   : > { %7047 = vst [vmem:[#allocation10_spill] sm:$0xff] %v5243_v5  ;;  %v1663_v5 = vsel %vm1662_vm4, %v1628_v58, %v3890_v10  ;;  %v1700_v27 = vsel %vm1697_vm5, %v5303_v19, %v3940_v12  ;;  %v1701_v32 = vsel %vm1697_vm5, %v5306_v21, %v3941_v13 }
  0xc9   : > { %4223 = vrot.lane.b32.xlu0 %v5169_v14, %s4498_s14  ;;  %v5266_v11 = vpop.permute.xlu1 %3948  ;;  %v1698_v54 = vsel %vm1697_vm5, %v1663_v5, %v3940_v12 }
  0xca   : > { %v3951_v58 = vunpack.i.h.bf16 %v5266_v11 }
  0xcb   : > { %v3944_v31 = vpop.permute.xlu0 %3943  ;;  %4238 = vrot.lane.b32.xlu1 %v5169_v14, %s4500_s29 }
  0xcc   : > { %v3946_v15 = vunpack.i.h.bf16 %v3944_v31  ;;  %v3945_v30 = vunpack.i.l.bf16 %v3944_v31 }
  0xcd   : > { %4233 = vrot.lane.b32.xlu0 %v7046_v6, %s4501_s30  ;;  %v5290_v53 = vpop.permute.xlu1 %3958  ;;  %v1664_v6 = vsel %vm1662_vm4, %v1629_v44, %v3891_v62  ;;  %v3950_v44 = vunpack.i.l.bf16 %v5266_v11 }
  0xce   : > { %v1699_v62 = vsel %vm1697_vm5, %v1664_v6, %v3941_v13  ;;  %v1765_v10 = vsel %vm1762_vm6, %v1700_v27, %v3945_v30  ;;  %v1766_v52 = vsel %vm1762_vm6, %v1701_v32, %v3946_v15  ;;  %v1763_v60 = vsel %vm1762_vm6, %v1698_v54, %v3945_v30 }
  0xcf   : > { %v3954_v14 = vpop.permute.xlu0 %3953  ;;  %4248 = vrot.lane.b32.xlu1 %v7050_v36, %s4503_s11  ;;  %v1764_v34 = vsel %vm1762_vm6, %v1699_v62, %v3946_v15  ;;  %v1830_v32 = vsel %vm1827_vm7, %v1765_v10, %v3950_v44  ;;  %v1831_v30 = vsel %vm1827_vm7, %v1766_v52, %v3951_v58  ;;  %v7051_v15 = vrot.slane %v4881_v24, 2 }
  0xd0   : > { %v3956_v5 = vunpack.i.h.bf16 %v3954_v14  ;;  %v3955_v13 = vunpack.i.l.bf16 %v3954_v14  ;;  %v7052_v62 = vunpack.c.l.bf16 %v4866_v61  ;;  %v1828_v6 = vsel %vm1827_vm7, %v1763_v60, %v3950_v44 }
  0xd1   : > { %4243 = vrot.lane.b32.xlu0 %v5190_v9, %s4502_s8  ;;  %v5322_v39 = vpop.permute.xlu1 %3968  ;;  %v915_v54 = vsel %vm832_vm1, %v913_v29, %v7051_v15  ;;  %v1829_v10 = vsel %vm1827_vm7, %v1764_v34, %v3951_v58  ;;  %v7053_v52 = vunpack.i.l.bf16 %v5290_v53  ;;  %v7054_v29 = vunpack.i.h.bf16 %v5290_v53 }
  0xd2   : > { %v916_v31 = vrot.slane %v7052_v62, 2  ;;  %v7055_v62 = vunpack.i.l.bf16 %v5322_v39  ;;  %v7056_v44 = vunpack.i.h.bf16 %v5322_v39  ;;  %v1893_v34 = vsel %vm1892_vm8, %v1828_v6, %v3955_v13 }
  0xd3   : > { %v3964_v27 = vpop.permute.xlu0 %3963  ;;  %4258 = vrot.lane.b32.xlu1 %v5194_v40, %s4498_s14  ;;  %v1895_v38 = vsel %vm1892_vm8, %v1830_v32, %v7053_v52  ;;  %v1896_v61 = vsel %vm1892_vm8, %v1831_v30, %v7054_v29  ;;  %v1894_v32 = vsel %vm1892_vm8, %v1829_v10, %v3956_v5 }
  0xd4   : > { %v3966_v14 = vunpack.i.h.bf16 %v3964_v27  ;;  %v3965_v11 = vunpack.i.l.bf16 %v3964_v27  ;;  %v1960_v43 = vsel %vm1957_vm9, %v1895_v38, %v7055_v62  ;;  %v1961_v58 = vsel %vm1957_vm9, %v1896_v61, %v7056_v44 }
  0xd5   : > { %4253 = vrot.lane.b32.xlu0 %v5194_v40, %s4504_s12  ;;  %v5341_v12 = vpop.permute.xlu1 %3978  ;;  %v3901_v61 = vunpack.i.h.bf16 %v5147_v28  ;;  %v3900_v62 = vunpack.i.l.bf16 %v5147_v28 }
  0xd6   : > { %v3981_v15 = vunpack.i.h.bf16 %v5341_v12  ;;  %v3980_v27 = vunpack.i.l.bf16 %v5341_v12  ;;  %v1958_v5 = vsel %vm1957_vm9, %v1893_v34, %v3965_v11  ;;  %v1959_v13 = vsel %vm1957_vm9, %v1894_v32, %v3966_v14 }
  0xd7   : > { %v3974_v60 = vpop.permute.xlu0 %3973  ;;  %4268 = vrot.lane.b32.xlu1 %v7050_v36, %s4501_s30  ;;  %v3825_v11 = vunpack.i.l.bf16 %v5089_v37  ;;  %v7058_v34 = vrot.slane %v4881_v24, 2 }
  0xd8   : > { %v2025_v30 = vsel %vm2022_vm10, %v1960_v43, %v3980_v27  ;;  %v2026_v38 = vsel %vm2022_vm10, %v1961_v58, %v3981_v15  ;;  %v3976_v52 = vunpack.i.h.bf16 %v3974_v60  ;;  %v3975_v29 = vunpack.i.l.bf16 %v3974_v60 }
  0xd9   : > { %4263 = vrot.lane.b32.xlu0 %v5190_v9, %s4499_s21  ;;  %v3989_v36 = vpop.permute.xlu1 %3988  ;;  %v5377_v43 = vsel %vm1627_vm3, %v4640_v42, %v3831_v49  ;;  %v2088_v6 = vpack.c.bf16 %v2026_v38, %v2025_v30  ;;  %v7057_v58 = vunpack.i.l.bf16 %v5083_v1  ;;  %v3826_v9 = vunpack.i.h.bf16 %v5089_v37 }
  0xda   : > { %v2023_v10 = vsel %vm2022_vm10, %v1958_v5, %v3975_v29  ;;  %v2024_v44 = vsel %vm2022_vm10, %v1959_v13, %v3976_v52  ;;  %v917_v32 = vsel %vm832_vm1, %v7058_v34, %v916_v31  ;;  %v5396_v1 = vsel %vm1662_vm4, %v5252_v26, %v3901_v61 }
  0xdb   : > { %v5385_v28 = vsel %vm1627_vm3, %v4638_v41, %v7057_v58  ;;  %v3984_v14 = vpop.permute.xlu0 %3983  ;;  %4278 = vrot.lane.b32.xlu1 %v5198_v0, %s4502_s8  ;;  %v2087_v42 = vpack.c.bf16 %v2024_v44, %v2023_v10  ;;  %v5400_v41 = vsel %vm1662_vm4, %v5256_v55, %v3900_v62  ;;  %v3991_v37 = vunpack.i.h.bf16 %v3989_v36  ;;  %v7059_v44 = vld [vmem:[#allocation27_spill] sm:$0xff] }
  0xdc   : > { %v3986_v49 = vunpack.i.h.bf16 %v3984_v14  ;;  %v3985_v60 = vunpack.i.l.bf16 %v3984_v14  ;;  %v3990_v30 = vunpack.i.l.bf16 %v3989_v36  ;;  %v5422_v29 = vsel %vm1627_vm3, %v4654_v50, %v3825_v11 }
  0xdd   : > { %4273 = vrot.lane.b32.xlu0 %v5194_v40, %s4500_s29  ;;  %3691 = vmatprep.mubr.msk.bf16.mxu0 %vm2162_vm11, %v2087_v42  ;;  %v5405_v38 = vpop.permute.xlu1 %3998  ;;  %v5418_v40 = vsel %vm1627_vm3, %v4656_v51, %v3826_v9  ;;  %v3841_v61 = vunpack.i.h.bf16 %v5093_v45  ;;  %v7060_v42 = vunpack.i.l.bf16 %v5290_v53 }
  0xde   : > { %v1705_v31 = vsel %vm1697_vm5, %v5396_v1, %v3986_v49  ;;  %v1702_v26 = vsel %vm1697_vm5, %v5303_v19, %v3985_v60  ;;  %v1703_v52 = vsel %vm1697_vm5, %v5306_v21, %v3986_v49  ;;  %v1704_v55 = vsel %vm1697_vm5, %v5400_v41, %v3985_v60  ;;  %3692 = vmatmul.mubr.msk.bf16.vlgmr.msra.gmra.mrb[0].mxu0 %vm2162_vm11, %v2088_v6 }
  0xdf   : > { %v3994_v62 = vpop.permute.xlu0 %3993  ;;  %4288 = vrot.lane.b32.xlu1 %v5203_v16, %s4504_s12  ;;  %v5427_v21 = vpack.i.bf16 %v917_v32, %v915_v54  ;;  %v4001_v19 = vunpack.i.h.bf16 %v5405_v38  ;;  %v4000_v36 = vunpack.i.l.bf16 %v5405_v38  ;;  %v1767_v51 = vsel %vm1762_vm6, %v1702_v26, %v3990_v30 }
  0xe0   : > { %v3996_v5 = vunpack.i.h.bf16 %v3994_v62  ;;  %v3995_v13 = vunpack.i.l.bf16 %v3994_v62  ;;  %v1768_v6 = vsel %vm1762_vm6, %v1703_v52, %v3991_v37  ;;  %v1769_v50 = vsel %vm1762_vm6, %v1704_v55, %v3990_v30 }
  0xe1   : > { %v1770_v10 = vsel %vm1762_vm6, %v1705_v31, %v3991_v37  ;;  %4283 = vrot.lane.b32.xlu0 %v7059_v44, %s4503_s11  ;;  %v5437_v58 = vpop.permute.xlu1 %4008  ;;  %v7061_v60 = vunpack.i.h.bf16 %v5290_v53  ;;  %v3906_v31 = vunpack.i.h.bf16 %v5172_v33  ;;  %v3905_v26 = vunpack.i.l.bf16 %v5172_v33 }
  0xe2   : > { %v1832_v54 = vsel %vm1827_vm7, %v1767_v51, %v3995_v13  ;;  %v1833_v9 = vsel %vm1827_vm7, %v1768_v6, %v3996_v5  ;;  %v1834_v11 = vsel %vm1827_vm7, %v1769_v50, %v3995_v13  ;;  %v1835_v14 = vsel %vm1827_vm7, %v1770_v10, %v3996_v5 }
  0xe3   : > { %v1897_v49 = vsel %vm1892_vm8, %v1832_v54, %v7060_v42  ;;  %v1898_v34 = vsel %vm1892_vm8, %v1833_v9, %v7061_v60  ;;  %v4011_v32 = vunpack.i.h.bf16 %v5437_v58  ;;  %v4010_v37 = vunpack.i.l.bf16 %v5437_v58  ;;  %v5451_v30 = vpop.permute.xlu0 %4003  ;;  %4298 = vrot.lane.b32.xlu1 %v5198_v0, %s4499_s21 }
  0xe4   : > { %v4006_v52 = vunpack.i.h.bf16 %v5451_v30  ;;  %v4005_v55 = vunpack.i.l.bf16 %v5451_v30  ;;  %v1899_v53 = vsel %vm1892_vm8, %v1834_v11, %v4000_v36  ;;  %v1900_v62 = vsel %vm1892_vm8, %v1835_v14, %v4001_v19 }
  0xe5   : > { %4293 = vrot.lane.b32.xlu0 %v5203_v16, %s4498_s14  ;;  %v4019_v0 = vpop.permute.xlu1 %4018  ;;  %v7062_v5 = vunpack.i.l.bf16 %v5322_v39  ;;  %v7063_v13 = vunpack.i.h.bf16 %v5322_v39  ;;  %v3840_v6 = vunpack.i.l.bf16 %v5093_v45  ;;  %v5496_v12 = vsel %vm1662_vm4, %v5270_v4, %v3906_v31 }
  0xe6   : > { %v1964_v50 = vsel %vm1957_vm9, %v1899_v53, %v4005_v55  ;;  %v1965_v10 = vsel %vm1957_vm9, %v1900_v62, %v4006_v52  ;;  %v5517_v31 = vsel %vm1627_vm3, %v4680_v8, %v3841_v61 }
  0xe7   : > { %v1962_v33 = vsel %vm1957_vm9, %v1897_v49, %v7062_v5  ;;  %v1963_v51 = vsel %vm1957_vm9, %v1898_v34, %v7063_v13  ;;  %v4014_v54 = vpop.permute.xlu0 %4013  ;;  %4308 = vrot.lane.b32.xlu1 %v5203_v16, %s4500_s29  ;;  %v2029_v45 = vsel %vm2022_vm10, %v1964_v50, %v4010_v37  ;;  %v2030_v11 = vsel %vm2022_vm10, %v1965_v10, %v4011_v32 }
  0xe8   : > { %v2027_v9 = vsel %vm2022_vm10, %v1962_v33, %v3980_v27  ;;  %v2028_v39 = vsel %vm2022_vm10, %v1963_v51, %v3981_v15  ;;  %v4016_v14 = vunpack.i.h.bf16 %v4014_v54  ;;  %v4015_v42 = vunpack.i.l.bf16 %v4014_v54 }
  0xe9   : > { %v2089_v49 = vpack.c.bf16 %v2028_v39, %v2027_v9  ;;  %v2090_v60 = vpack.c.bf16 %v2030_v11, %v2029_v45  ;;  %v5500_v15 = vsel %vm1662_vm4, %v5274_v3, %v3905_v26  ;;  %v4021_v16 = vunpack.i.h.bf16 %v4019_v0  ;;  %4303 = vrot.lane.b32.xlu0 %v7059_v44, %s4501_s30  ;;  %v5504_v34 = vpop.permute.xlu1 %4028 }
  0xea   : > { %v4020_v27 = vunpack.i.l.bf16 %v4019_v0  ;;  %v1707_v53 = vsel %vm1697_vm5, %v5396_v1, %v4016_v14  ;;  %v1706_v62 = vsel %vm1697_vm5, %v5400_v41, %v4015_v42  ;;  %v1708_v4 = vsel %vm1697_vm5, %v5500_v15, %v4015_v42  ;;  %v7064_v41 = vld [vmem:[#allocation24_spill] sm:$0xff] }
  0xeb   : > { %v1709_v3 = vsel %vm1697_vm5, %v5496_v12, %v4016_v14  ;;  %3695 = vmatprep.mubr.msk.bf16.mxu0 %vm2162_vm11, %v2089_v49  ;;  %v5521_v44 = vsel %vm1627_vm3, %v4678_v2, %v3840_v6  ;;  %v4024_v1 = vpop.permute.xlu0 %4023  ;;  %4318 = vrot.lane.b32.xlu1 %v7064_v41, %s4503_s11  ;;  %v4031_v26 = vunpack.i.h.bf16 %v5504_v34  ;;  %v4030_v0 = vunpack.i.l.bf16 %v5504_v34 }
  0xec   : > { %3696 = vmatmul.mubr.msk.bf16.gmra.mrb[4].mxu0 %vm2162_vm11, %v2090_v60  ;;  %v4026_v5 = vunpack.i.h.bf16 %v4024_v1  ;;  %v4025_v33 = vunpack.i.l.bf16 %v4024_v1  ;;  %v1771_v8 = vsel %vm1762_vm6, %v1706_v62, %v4020_v27  ;;  %v1772_v61 = vsel %vm1762_vm6, %v1707_v53, %v4021_v16 }
  0xed   : > { %v1773_v2 = vsel %vm1762_vm6, %v1708_v4, %v4020_v27  ;;  %v1774_v13 = vsel %vm1762_vm6, %v1709_v3, %v4021_v16  ;;  %4313 = vrot.lane.b32.xlu0 %v5219_v46, %s4502_s8  ;;  %v5534_v51 = vpop.permute.xlu1 %4038  ;;  %v3911_v42 = vunpack.i.h.bf16 %v5165_v56  ;;  %v3910_v49 = vunpack.i.l.bf16 %v5165_v56 }
  0xee   : > { %v1836_v6 = vsel %vm1827_vm7, %v1771_v8, %v4025_v33  ;;  %v1837_v50 = vsel %vm1827_vm7, %v1772_v61, %v4026_v5  ;;  %v1838_v10 = vsel %vm1827_vm7, %v1773_v2, %v4025_v33  ;;  %v1839_v54 = vsel %vm1827_vm7, %v1774_v13, %v4026_v5 }
  0xef   : > { %v1901_v9 = vsel %vm1892_vm8, %v1836_v6, %v4000_v36  ;;  %v1902_v39 = vsel %vm1892_vm8, %v1837_v50, %v4001_v19  ;;  %v4041_v45 = vunpack.i.h.bf16 %v5534_v51  ;;  %v4040_v11 = vunpack.i.l.bf16 %v5534_v51  ;;  %v5549_v14 = vpop.permute.xlu0 %4033  ;;  %4328 = vrot.lane.b32.xlu1 %v5221_v20, %s4498_s14 }
  0xf0   : > { %v4036_v60 = vunpack.i.h.bf16 %v5549_v14  ;;  %v4035_v36 = vunpack.i.l.bf16 %v5549_v14  ;;  %v1903_v38 = vsel %vm1892_vm8, %v1838_v10, %v4030_v0  ;;  %v1904_v19 = vsel %vm1892_vm8, %v1839_v54, %v4031_v26 }
  0xf1   : > { %4323 = vrot.lane.b32.xlu0 %v5221_v20, %s4504_s12  ;;  %v4049_v16 = vpop.permute.xlu1 %4048  ;;  %v1966_v56 = vsel %vm1957_vm9, %v1901_v9, %v4005_v55  ;;  %v1967_v27 = vsel %vm1957_vm9, %v1902_v39, %v4006_v52  ;;  %v3836_v53 = vunpack.i.h.bf16 %v5097_v23  ;;  %v3835_v62 = vunpack.i.l.bf16 %v5097_v23 }
  0xf2   : > { %v1968_v4 = vsel %vm1957_vm9, %v1903_v38, %v4035_v36  ;;  %v1969_v30 = vsel %vm1957_vm9, %v1904_v19, %v4036_v60  ;;  %v2031_v52 = vsel %vm2022_vm10, %v1966_v56, %v4010_v37  ;;  %v2032_v3 = vsel %vm2022_vm10, %v1967_v27, %v4011_v32  ;;  %v3634_v37 = vld [vmem:[%s5574_s16] sm:$0xff]  }
  0xf3   : > { %v4044_v55 = vpop.permute.xlu0 %4043  ;;  %4338 = vrot.lane.b32.xlu1 %v7064_v41, %s4501_s30  ;;  %v2033_v23 = vsel %vm2022_vm10, %v1968_v4, %v4040_v11  ;;  %v2034_v1 = vsel %vm2022_vm10, %v1969_v30, %v4041_v45  ;;  %v2091_v8 = vpack.c.bf16 %v2032_v3, %v2031_v52  ;;  %v5601_v58 = vsel %vm1662_vm4, %v5422_v29, %v3910_v49  ;;  %v5660_v52 = vld [vmem:[%s5574_s16 + $0x8] sm:$0x1] }
  0xf4   : > { %v4046_v5 = vunpack.i.h.bf16 %v4044_v55  ;;  %v4045_v33 = vunpack.i.l.bf16 %v4044_v55  ;;  %v2092_v61 = vpack.c.bf16 %v2034_v1, %v2033_v23  ;;  %v5605_v32 = vsel %vm1662_vm4, %v5418_v40, %v3911_v42 }
  0xf5   : > { %v4051_v41 = vunpack.i.h.bf16 %v4049_v16  ;;  %v4050_v2 = vunpack.i.l.bf16 %v4049_v16  ;;  %4333 = vrot.lane.b32.xlu0 %v5219_v46, %s4499_s21  ;;  %v5609_v13 = vpop.permute.xlu1 %4058  ;;  %3699 = vmatprep.mubr.msk.bf16.mxu0 %vm2162_vm11, %v2091_v8  ;;  %v5622_v10 = vsel %vm1627_vm3, %v4697_v25, %v3836_v53  ;;  %v5626_v46 = vsel %vm1627_vm3, %v4691_v18, %v3835_v62 }
  0xf6   : > { %v1710_v6 = vsel %vm1697_vm5, %v5500_v15, %v4045_v33  ;;  %v1711_v50 = vsel %vm1697_vm5, %v5496_v12, %v4046_v5  ;;  %v1712_v29 = vsel %vm1697_vm5, %v5601_v58, %v4045_v33  ;;  %v1713_v40 = vsel %vm1697_vm5, %v5605_v32, %v4046_v5  ;;  %3700 = vmatmul.mubr.msk.bf16.gmra.mrb[8].mxu0 %vm2162_vm11, %v2092_v61  ;;  %v7065_v5 = vld [vmem:[#allocation30_spill] sm:$0xff] }
  0xf7   : > { %v4054_v15 = vpop.permute.xlu0 %4053  ;;  %4348 = vrot.lane.b32.xlu1 %v5229_v17, %s4502_s8  ;;  %v5631_v12 = vunpack.c.l.bf16 %v3634_v37  ;;  %v4061_v54 = vunpack.i.h.bf16 %v5609_v13  ;;  %v4060_v9 = vunpack.i.l.bf16 %v5609_v13  ;;  %v1775_v25 = vsel %vm1762_vm6, %v1710_v6, %v4050_v2 }
  0xf8   : > { %v4056_v39 = vunpack.i.h.bf16 %v4054_v15  ;;  %v4055_v42 = vunpack.i.l.bf16 %v4054_v15  ;;  %v1776_v18 = vsel %vm1762_vm6, %v1711_v50, %v4051_v41  ;;  %v1777_v49 = vsel %vm1762_vm6, %v1712_v29, %v4050_v2 }
  0xf9   : > { %v1778_v38 = vsel %vm1762_vm6, %v1713_v40, %v4051_v41  ;;  %4343 = vrot.lane.b32.xlu0 %v5221_v20, %s4500_s29  ;;  %v5641_v19 = vpop.permute.xlu1 %4068  ;;  %v3916_v3 = vunpack.i.h.bf16 %v5200_v22  ;;  %v3915_v23 = vunpack.i.l.bf16 %v5200_v22  ;;  %v5686_v2 = vunpack.c.h.bf16 %v3634_v37 }
  0xfa   : > { %v1840_v16 = vsel %vm1827_vm7, %v1775_v25, %v4055_v42  ;;  %v1841_v56 = vsel %vm1827_vm7, %v1776_v18, %v4056_v39  ;;  %v1842_v27 = vsel %vm1827_vm7, %v1777_v49, %v4055_v42  ;;  %v1843_v53 = vsel %vm1827_vm7, %v1778_v38, %v4056_v39 }
  0xfb   : > { %v1905_v62 = vsel %vm1892_vm8, %v1840_v16, %v4030_v0  ;;  %v1906_v4 = vsel %vm1892_vm8, %v1841_v56, %v4031_v26  ;;  %v4071_v20 = vunpack.i.h.bf16 %v5641_v19  ;;  %v4070_v30 = vunpack.i.l.bf16 %v5641_v19  ;;  %v5655_v55 = vpop.permute.xlu0 %4063  ;;  %4358 = vrot.lane.b32.xlu1 %v5233_v48, %s4504_s12 }
  0xfc   : > { %v4066_v0 = vunpack.i.h.bf16 %v5655_v55  ;;  %v4065_v34 = vunpack.i.l.bf16 %v5655_v55  ;;  %v1907_v26 = vsel %vm1892_vm8, %v1842_v27, %v4060_v9  ;;  %v1908_v1 = vsel %vm1892_vm8, %v1843_v53, %v4061_v54 }
  0xfd   : > { %4353 = vrot.lane.b32.xlu0 %v7065_v5, %s4503_s11  ;;  %v4079_v33 = vpop.permute.xlu1 %4078  ;;  %v1970_v22 = vsel %vm1957_vm9, %v1905_v62, %v4035_v36  ;;  %v1971_v8 = vsel %vm1957_vm9, %v1906_v4, %v4036_v60  ;;  %v592_v6 = vunpack.c.l.bf16 %v5660_v52  ;;  %v5705_v51 = vsel %vm1662_vm4, %v5377_v43, %v3916_v3 }
  0xfe   : > { %v1972_v61 = vsel %vm1957_vm9, %v1907_v26, %v4065_v34  ;;  %v1973_v41 = vsel %vm1957_vm9, %v1908_v1, %v4066_v0  ;;  %v2035_v36 = vsel %vm2022_vm10, %v1970_v22, %v4040_v11  ;;  %v2036_v14 = vsel %vm2022_vm10, %v1971_v8, %v4041_v45 }
  0xff   : > { %v4074_v50 = vpop.permute.xlu0 %4073  ;;  %4368 = vrot.lane.b32.xlu1 %v5229_v17, %s4499_s21  ;;  %v2037_v60 = vsel %vm2022_vm10, %v1972_v61, %v4070_v30  ;;  %v2038_v37 = vsel %vm2022_vm10, %v1973_v41, %v4071_v20  ;;  %v2093_v15 = vpack.c.bf16 %v2036_v14, %v2035_v36  ;;  %v5709_v45 = vsel %vm1662_vm4, %v5385_v28, %v3915_v23  ;;  %v7066_v36 = vld [vmem:[#allocation29_spill] sm:$0xff] }
 0x100   : > { %v4076_v29 = vunpack.i.h.bf16 %v4074_v50  ;;  %v4075_v40 = vunpack.i.l.bf16 %v4074_v50  ;;  %v2094_v39 = vpack.c.bf16 %v2038_v37, %v2037_v60  ;;  %v4081_v17 = vunpack.i.h.bf16 %v4079_v33 }
 0x101   : > { %v4080_v11 = vunpack.i.l.bf16 %v4079_v33  ;;  %4363 = vrot.lane.b32.xlu0 %v5233_v48, %s4498_s14  ;;  %v5713_v42 = vpop.permute.xlu1 %4088  ;;  %3703 = vmatprep.mubr.msk.bf16.mxu0 %vm2162_vm11, %v2093_v15  ;;  %v3846_v49 = vunpack.i.h.bf16 %v5105_v57  ;;  %v3921_v14 = vunpack.i.h.bf16 %v5186_v35  ;;  %v3920_v60 = vunpack.i.l.bf16 %v5186_v35 }
 0x102   : > { %v1714_v25 = vsel %vm1697_vm5, %v5601_v58, %v4075_v40  ;;  %v1715_v18 = vsel %vm1697_vm5, %v5605_v32, %v4076_v29  ;;  %v1716_v43 = vsel %vm1697_vm5, %v5709_v45, %v4075_v40  ;;  %v1717_v28 = vsel %vm1697_vm5, %v5705_v51, %v4076_v29  ;;  %3704 = vmatmul.mubr.msk.bf16.gmra.mrb[12].mxu0 %vm2162_vm11, %v2094_v39 }
 0x103   : > { %v4084_v38 = vpop.permute.xlu0 %4083  ;;  %4378 = vrot.lane.b32.xlu1 %v5233_v48, %s4500_s29  ;;  %v1413_v58 = vrot.slane %v5631_v12, 1  ;;  %v1414_v32 = vrot.slane %v5686_v2, 1  ;;  %v4091_v16 = vunpack.i.h.bf16 %v5713_v42  ;;  %v4090_v56 = vunpack.i.l.bf16 %v5713_v42 }
 0x104   : > { %v4086_v27 = vunpack.i.h.bf16 %v4084_v38  ;;  %v4085_v53 = vunpack.i.l.bf16 %v4084_v38  ;;  %v1779_v62 = vsel %vm1762_vm6, %v1714_v25, %v4080_v11  ;;  %v1780_v4 = vsel %vm1762_vm6, %v1715_v18, %v4081_v17 }
 0x105   : > { %v1781_v3 = vsel %vm1762_vm6, %v1716_v43, %v4080_v11  ;;  %v1782_v23 = vsel %vm1762_vm6, %v1717_v28, %v4081_v17  ;;  %4373 = vrot.lane.b32.xlu0 %v7065_v5, %s4501_s30  ;;  %v5738_v48 = vpop.permute.xlu1 %4098  ;;  %v5776_v15 = vsel %vm1627_vm3, %v4737_v63, %v3846_v49  ;;  %v1416_v11 = vrot.slane %v592_v6, 1 }
 0x106   : > { %v1844_v26 = vsel %vm1827_vm7, %v1779_v62, %v4085_v53  ;;  %v1845_v1 = vsel %vm1827_vm7, %v1780_v4, %v4086_v27  ;;  %v1846_v33 = vsel %vm1827_vm7, %v1781_v3, %v4085_v53  ;;  %v1847_v22 = vsel %vm1827_vm7, %v1782_v23, %v4086_v27 }
 0x107   : > { %v1909_v8 = vsel %vm1892_vm8, %v1844_v26, %v4060_v9  ;;  %v1910_v61 = vsel %vm1892_vm8, %v1845_v1, %v4061_v54  ;;  %v4101_v5 = vunpack.i.h.bf16 %v5738_v48  ;;  %v4100_v41 = vunpack.i.l.bf16 %v5738_v48  ;;  %v5752_v50 = vpop.permute.xlu0 %4093  ;;  %4388 = vrot.lane.b32.xlu1 %v7066_v36, %s4503_s11 }
 0x108   : > { %v4096_v37 = vunpack.i.h.bf16 %v5752_v50  ;;  %v4095_v9 = vunpack.i.l.bf16 %v5752_v50  ;;  %v1911_v13 = vsel %vm1892_vm8, %v1846_v33, %v4090_v56  ;;  %v1912_v54 = vsel %vm1892_vm8, %v1847_v22, %v4091_v16 }
 0x109   : > { %4383 = vrot.lane.b32.xlu0 %v5248_v7, %s4502_s8  ;;  %v4109_v29 = vpop.permute.xlu1 %4108  ;;  %v1974_v35 = vsel %vm1957_vm9, %v1909_v8, %v4065_v34  ;;  %v1975_v40 = vsel %vm1957_vm9, %v1910_v61, %v4066_v0  ;;  %v5802_v19 = vsel %vm1662_vm4, %v5626_v46, %v3920_v60  ;;  %v5827_v3 = vsel %vm644_vm0, %v1413_v58, %v1414_v32 }
 0x10a   : > { %v1976_v39 = vsel %vm1957_vm9, %v1911_v13, %v4095_v9  ;;  %v1977_v17 = vsel %vm1957_vm9, %v1912_v54, %v4096_v37  ;;  %v2039_v55 = vsel %vm2022_vm10, %v1974_v35, %v4070_v30  ;;  %v2040_v63 = vsel %vm2022_vm10, %v1975_v40, %v4071_v20 }
 0x10b   : > { %v4104_v34 = vpop.permute.xlu0 %4103  ;;  %4398 = vrot.lane.b32.xlu1 %v5258_v47, %s4498_s14  ;;  %v2041_v0 = vsel %vm2022_vm10, %v1976_v39, %v4100_v41  ;;  %v2042_v25 = vsel %vm2022_vm10, %v1977_v17, %v4101_v5  ;;  %v2095_v28 = vpack.c.bf16 %v2040_v63, %v2039_v55  ;;  %v5806_v20 = vsel %vm1662_vm4, %v5622_v10, %v3921_v14  ;;  %v7067_v17 = vld [vmem:[#allocation16_spill] sm:$0xff] }
 0x10c   : > { %v4106_v18 = vunpack.i.h.bf16 %v4104_v34  ;;  %v4105_v43 = vunpack.i.l.bf16 %v4104_v34  ;;  %v2096_v49 = vpack.c.bf16 %v2042_v25, %v2041_v0  ;;  %v4111_v30 = vunpack.i.h.bf16 %v4109_v29 }
 0x10d   : > { %v4110_v38 = vunpack.i.l.bf16 %v4109_v29  ;;  %4393 = vrot.lane.b32.xlu0 %v5258_v47, %s4504_s12  ;;  %v5810_v27 = vpop.permute.xlu1 %4118  ;;  %3707 = vmatprep.mubr.msk.bf16.mxu0 %vm2162_vm11, %v2095_v28  ;;  %v1520_v23 = vrot.slane %v5631_v12, 2  ;;  %v3925_v34 = vunpack.i.l.bf16 %v7067_v17  ;;  %v1521_v28 = vrot.slane %v5686_v2, 2 }
 0x10e   : > { %v1718_v53 = vsel %vm1697_vm5, %v5709_v45, %v4105_v43  ;;  %v1719_v62 = vsel %vm1697_vm5, %v5705_v51, %v4106_v18  ;;  %v1720_v46 = vsel %vm1697_vm5, %v5802_v19, %v4105_v43  ;;  %v1721_v10 = vsel %vm1697_vm5, %v5806_v20, %v4106_v18  ;;  %3708 = vmatmul.mubr.msk.bf16.gmra.mrb[16].mxu0 %vm2162_vm11, %v2096_v49 }
 0x10f   : > { %v4114_v4 = vpop.permute.xlu0 %4113  ;;  %4408 = vrot.lane.b32.xlu1 %v7066_v36, %s4501_s30  ;;  %v4452_v45 = vpack.i.bf16 %v5686_v2, %v5631_v12  ;;  %v5830_v51 = vsel %vm644_vm0, %v1414_v32, %v1416_v11  ;;  %v4121_v26 = vunpack.i.h.bf16 %v5810_v27  ;;  %v4120_v1 = vunpack.i.l.bf16 %v5810_v27 }
 0x110   : > { %v4116_v33 = vunpack.i.h.bf16 %v4114_v4  ;;  %v4115_v22 = vunpack.i.l.bf16 %v4114_v4  ;;  %v1783_v8 = vsel %vm1762_vm6, %v1718_v53, %v4110_v38  ;;  %v1784_v61 = vsel %vm1762_vm6, %v1719_v62, %v4111_v30 }
 0x111   : > { %v1785_v36 = vsel %vm1762_vm6, %v1720_v46, %v4110_v38  ;;  %v1786_v58 = vsel %vm1762_vm6, %v1721_v10, %v4111_v30  ;;  %4403 = vrot.lane.b32.xlu0 %v5248_v7, %s4499_s21  ;;  %v5841_v32 = vpop.permute.xlu1 %4128  ;;  %v3926_v11 = vunpack.i.h.bf16 %v7067_v17  ;;  %v7068_v46 = vld [vmem:[#allocation31_spill] sm:$0xff] }
 0x112   : > { %v1848_v14 = vsel %vm1827_vm7, %v1783_v8, %v4115_v22  ;;  %v1849_v60 = vsel %vm1827_vm7, %v1784_v61, %v4116_v33  ;;  %v1850_v13 = vsel %vm1827_vm7, %v1785_v36, %v4115_v22  ;;  %v1851_v54 = vsel %vm1827_vm7, %v1786_v58, %v4116_v33 }
 0x113   : > { %v1913_v29 = vsel %vm1892_vm8, %v1848_v14, %v4090_v56  ;;  %v1914_v35 = vsel %vm1892_vm8, %v1849_v60, %v4091_v16  ;;  %v4131_v7 = vunpack.i.h.bf16 %v5841_v32  ;;  %v4130_v40 = vunpack.i.l.bf16 %v5841_v32  ;;  %v5855_v39 = vpop.permute.xlu0 %4123  ;;  %4418 = vrot.lane.b32.xlu1 %v5286_v59, %s4502_s8 }
 0x114   : > { %v4126_v55 = vunpack.i.h.bf16 %v5855_v39  ;;  %v4125_v56 = vunpack.i.l.bf16 %v5855_v39  ;;  %v1915_v42 = vsel %vm1892_vm8, %v1850_v13, %v4120_v1  ;;  %v1916_v16 = vsel %vm1892_vm8, %v1851_v54, %v4121_v26 }
 0x115   : > { %4413 = vrot.lane.b32.xlu0 %v5258_v47, %s4500_s29  ;;  %v4139_v63 = vpop.permute.xlu1 %4138  ;;  %v1978_v0 = vsel %vm1957_vm9, %v1913_v29, %v4095_v9  ;;  %v1979_v25 = vsel %vm1957_vm9, %v1914_v35, %v4096_v37  ;;  %v1523_v47 = vrot.slane %v592_v6, 2  ;;  %v5902_v48 = vsel %vm1662_vm4, %v5517_v31, %v3926_v11 }
 0x116   : > { %v1980_v18 = vsel %vm1957_vm9, %v1915_v42, %v4125_v56  ;;  %v1981_v43 = vsel %vm1957_vm9, %v1916_v16, %v4126_v55  ;;  %v2043_v50 = vsel %vm2022_vm10, %v1978_v0, %v4100_v41  ;;  %v2044_v37 = vsel %vm2022_vm10, %v1979_v25, %v4101_v5 }
 0x117   : > { %v4134_v49 = vpop.permute.xlu0 %4133  ;;  %4428 = vrot.lane.b32.xlu1 %v5427_v21, %s4504_s12  ;;  %v2045_v9 = vsel %vm2022_vm10, %v1980_v18, %v4130_v40  ;;  %v2046_v52 = vsel %vm2022_vm10, %v1981_v43, %v4131_v7  ;;  %v2097_v38 = vpack.c.bf16 %v2044_v37, %v2043_v50  ;;  %v5906_v5 = vsel %vm1662_vm4, %v5521_v44, %v3925_v34 }
 0x118   : > { %v4136_v6 = vunpack.i.h.bf16 %v4134_v49  ;;  %v4135_v30 = vunpack.i.l.bf16 %v4134_v49  ;;  %v2098_v53 = vpack.c.bf16 %v2046_v52, %v2045_v9  ;;  %v4141_v41 = vunpack.i.h.bf16 %v4139_v63 }
 0x119   : > { %v4140_v62 = vunpack.i.l.bf16 %v4139_v63  ;;  %4423 = vrot.lane.b32.xlu0 %v7068_v46, %s4503_s11  ;;  %v5910_v10 = vpop.permute.xlu1 %4148  ;;  %3711 = vmatprep.mubr.msk.bf16.mxu0 %vm2162_vm11, %v2097_v38  ;;  %v3845_v22 = vunpack.i.l.bf16 %v5105_v57  ;;  %v5931_v61 = vsel %vm832_vm1, %v1521_v28, %v1523_v47  ;;  %v7069_v63 = vld [vmem:[#allocation7_spill] sm:$0xff]  ;;  %v7070_v47 = vld [vmem:[#allocation6_spill] sm:$0xff] }
 0x11a   : > { %v1722_v4 = vsel %vm1697_vm5, %v5802_v19, %v4135_v30  ;;  %v1723_v33 = vsel %vm1697_vm5, %v5806_v20, %v4136_v6  ;;  %v1724_v31 = vsel %vm1697_vm5, %v5906_v5, %v4135_v30  ;;  %v1725_v44 = vsel %vm1697_vm5, %v5902_v48, %v4136_v6  ;;  %3712 = vmatmul.mubr.msk.bf16.gmra.mrb[20].mxu0 %vm2162_vm11, %v2098_v53 }
 0x11b   : > { %v4144_v8 = vpop.permute.xlu0 %4143  ;;  %4438 = vrot.lane.b32.xlu1 %v5286_v59, %s4499_s21  ;;  %v4457_v19 = vpack.i.bf16 %v5830_v51, %v5827_v3  ;;  %v5928_v20 = vsel %vm832_vm1, %v1520_v23, %v1521_v28  ;;  %v4151_v36 = vunpack.i.h.bf16 %v5910_v10  ;;  %v4150_v58 = vunpack.i.l.bf16 %v5910_v10  ;;  %s6558_s21 = scalar_lea.vmem %s6898_s5, %s3532_s18 }
 0x11c   : > { %v4146_v57 = vunpack.i.h.bf16 %v4144_v8  ;;  %v4145_v14 = vunpack.i.l.bf16 %v4144_v8  ;;  %v1787_v60 = vsel %vm1762_vm6, %v1722_v4, %v4140_v62  ;;  %v1788_v13 = vsel %vm1762_vm6, %v1723_v33, %v4141_v41 }
 0x11d   : > { %v1789_v59 = vsel %vm1762_vm6, %v1724_v31, %v4140_v62  ;;  %v1790_v3 = vsel %vm1762_vm6, %v1725_v44, %v4141_v41  ;;  %4433 = vrot.lane.b32.xlu0 %v5427_v21, %s4498_s14  ;;  %v5941_v51 = vpop.permute.xlu1 %4158  ;;  %v3931_v0 = vunpack.i.h.bf16 %v7069_v63  ;;  %v3930_v25 = vunpack.i.l.bf16 %v7069_v63 }
 0x11e   : > { %v1852_v23 = vsel %vm1827_vm7, %v1787_v60, %v4145_v14  ;;  %v1853_v54 = vsel %vm1827_vm7, %v1788_v13, %v4146_v57  ;;  %v1854_v29 = vsel %vm1827_vm7, %v1789_v59, %v4145_v14  ;;  %v1855_v35 = vsel %vm1827_vm7, %v1790_v3, %v4146_v57 }
 0x11f   : > { %v1917_v17 = vsel %vm1892_vm8, %v1852_v23, %v4120_v1  ;;  %v1918_v11 = vsel %vm1892_vm8, %v1853_v54, %v4121_v26  ;;  %v4161_v34 = vunpack.i.h.bf16 %v5941_v51  ;;  %v4160_v42 = vunpack.i.l.bf16 %v5941_v51  ;;  %v5955_v16 = vpop.permute.xlu0 %4153  ;;  %4448 = vrot.lane.b32.xlu1 %v5427_v21, %s4500_s29 }
 0x120   : > { %v4156_v18 = vunpack.i.h.bf16 %v5955_v16  ;;  %v4155_v1 = vunpack.i.l.bf16 %v5955_v16  ;;  %v1919_v27 = vsel %vm1892_vm8, %v1854_v29, %v4150_v58  ;;  %v1920_v26 = vsel %vm1892_vm8, %v1855_v35, %v4151_v36 }
 0x121   : > { %4443 = vrot.lane.b32.xlu0 %v7068_v46, %s4501_s30  ;;  %v4169_v21 = vpop.permute.xlu1 %4168  ;;  %v1982_v43 = vsel %vm1957_vm9, %v1917_v17, %v4125_v56  ;;  %v1983_v28 = vsel %vm1957_vm9, %v1918_v11, %v4126_v55  ;;  %v1644_v49 = vsel %vm1627_vm3, %v7070_v47, %v3845_v22  ;;  %v4462_v9 = vpack.i.bf16 %v5931_v61, %v5928_v20  ;;  %v7072_v11 = vld [vmem:[#allocation10_spill] sm:$0xff]  ;;  %v7074_v47 = vld [vmem:[#allocation4_spill] sm:$0xff] }
 0x122   : > { %v1984_v50 = vsel %vm1957_vm9, %v1919_v27, %v4155_v1  ;;  %v1985_v37 = vsel %vm1957_vm9, %v1920_v26, %v4156_v18  ;;  %v2047_v39 = vsel %vm2022_vm10, %v1982_v43, %v4130_v40  ;;  %v2048_v55 = vsel %vm2022_vm10, %v1983_v28, %v4131_v7  ;;  %v7073_v43 = vld [vmem:[#allocation5_spill] sm:$0xff] }
 0x123   : > { %v4164_v52 = vpop.permute.xlu0 %4163  ;;  %4458 = vrot.lane.b32.xlu1 %v4457_v19, %s4503_s11  ;;  %v2049_v56 = vsel %vm2022_vm10, %v1984_v50, %v4160_v42  ;;  %v2050_v6 = vsel %vm2022_vm10, %v1985_v37, %v4161_v34  ;;  %v2099_v53 = vpack.c.bf16 %v2048_v55, %v2047_v39  ;;  %v1679_v40 = vsel %vm1662_vm4, %v1644_v49, %v3930_v25  ;;  %s483_s11 = scalar_lea.vmem %s6900_s7, %s7100_s24 }
 0x124   : > { %v4166_v30 = vunpack.i.h.bf16 %v4164_v52  ;;  %v4165_v38 = vunpack.i.l.bf16 %v4164_v52  ;;  %v2100_v41 = vpack.c.bf16 %v2050_v6, %v2049_v56  ;;  %v1680_v32 = vsel %vm1662_vm4, %v5776_v15, %v3931_v0  ;;  %v7071_v15 = vld [vmem:[#allocation32_spill] sm:$0xff] }
 0x125   : > { %v4171_v7 = vunpack.i.h.bf16 %v4169_v21  ;;  %v4170_v62 = vunpack.i.l.bf16 %v4169_v21  ;;  %4453 = vrot.lane.b32.xlu0 %v4452_v45, %s4502_s8  ;;  %v6007_v46 = vpop.permute.xlu1 %4178  ;;  %3715 = vmatprep.mubr.msk.bf16.mxu0 %vm2162_vm11, %v2099_v53  ;;  %v3851_v22 = vunpack.i.h.bf16 %v7071_v15  ;;  %v3850_v8 = vunpack.i.l.bf16 %v7071_v15  ;;  %s477_s8 = scalar_lea.vmem %s6899_s6, %s7100_s24 }
 0x126   : > { %v1726_v4 = vsel %vm1697_vm5, %v5906_v5, %v4165_v38  ;;  %v1727_v33 = vsel %vm1697_vm5, %v5902_v48, %v4166_v30  ;;  %v1728_v31 = vsel %vm1697_vm5, %v1679_v40, %v4165_v38  ;;  %v1729_v44 = vsel %vm1697_vm5, %v1680_v32, %v4166_v30  ;;  %3716 = vmatmul.mubr.msk.bf16.gmra.mrb[24].mxu0 %vm2162_vm11, %v2100_v41 }
 0x127   : > { %v4174_v12 = vpop.permute.xlu0 %4173  ;;  %v4181_v2 = vunpack.i.h.bf16 %v6007_v46  ;;  %v4180_v45 = vunpack.i.l.bf16 %v6007_v46  ;;  %v1791_v48 = vsel %vm1762_vm6, %v1726_v4, %v4170_v62  ;;  %v1792_v20 = vsel %vm1762_vm6, %v1727_v33, %v4171_v7 }
 0x128   : > { %v4176_v5 = vunpack.i.h.bf16 %v4174_v12  ;;  %v4175_v19 = vunpack.i.l.bf16 %v4174_v12  ;;  %v1793_v61 = vsel %vm1762_vm6, %v1728_v31, %v4170_v62  ;;  %v1794_v57 = vsel %vm1762_vm6, %v1729_v44, %v4171_v7 }
 0x129   : > { %4463 = vrot.lane.b32.xlu0 %v4462_v9, %s4504_s12  ;;  %v6026_v14 = vpop.permute.xlu1 %4188  ;;  %v3936_v63 = vunpack.i.h.bf16 %v7072_v11  ;;  %v3935_v0 = vunpack.i.l.bf16 %v7072_v11  ;;  %v1647_v28 = vsel %vm1627_vm3, %v7073_v43, %v3851_v22  ;;  %v1646_v49 = vsel %vm1627_vm3, %v7074_v47, %v3850_v8  ;;  %v7077_v47 = vld [vmem:[#allocation11_spill] sm:$0xff] }
 0x12a   : > { %v1856_v60 = vsel %vm1827_vm7, %v1791_v48, %v4175_v19  ;;  %v1857_v13 = vsel %vm1827_vm7, %v1792_v20, %v4176_v5  ;;  %v1858_v59 = vsel %vm1827_vm7, %v1793_v61, %v4175_v19  ;;  %v1859_v3 = vsel %vm1827_vm7, %v1794_v57, %v4176_v5  ;;  %v7075_v61 = vld [vmem:[#allocation34_spill] sm:$0xff] }
 0x12b   : > { %v1921_v23 = vsel %vm1892_vm8, %v1856_v60, %v4150_v58  ;;  %v1922_v54 = vsel %vm1892_vm8, %v1857_v13, %v4151_v36  ;;  %v4191_v29 = vunpack.i.h.bf16 %v6026_v14  ;;  %v4190_v35 = vunpack.i.l.bf16 %v6026_v14  ;;  %v6040_v17 = vpop.permute.xlu0 %4183 }
 0x12c   : > { %v4186_v25 = vunpack.i.h.bf16 %v6040_v17  ;;  %v4185_v27 = vunpack.i.l.bf16 %v6040_v17  ;;  %v1923_v10 = vsel %vm1892_vm8, %v1858_v59, %v4180_v45  ;;  %v1924_v36 = vsel %vm1892_vm8, %v1859_v3, %v4181_v2 }
 0x12d   : > { %v4199_v58 = vpop.permute.xlu1 %4198  ;;  %v1986_v26 = vsel %vm1957_vm9, %v1921_v23, %v4155_v1  ;;  %v1987_v21 = vsel %vm1957_vm9, %v1922_v54, %v4156_v18  ;;  %v6077_v30 = vsel %vm1662_vm4, %v1647_v28, %v3936_v63  ;;  %v3856_v57 = vunpack.i.h.bf16 %v7075_v61 }
 0x12e   : > { %v1988_v50 = vsel %vm1957_vm9, %v1923_v10, %v4185_v27  ;;  %v1989_v37 = vsel %vm1957_vm9, %v1924_v36, %v4186_v25  ;;  %v2051_v52 = vsel %vm2022_vm10, %v1986_v26, %v4160_v42  ;;  %v2052_v16 = vsel %vm2022_vm10, %v1987_v21, %v4161_v34 }
 0x12f   : > { %v4194_v9 = vpop.permute.xlu0 %4193  ;;  %v2053_v18 = vsel %vm2022_vm10, %v1988_v50, %v4190_v35  ;;  %v2054_v1 = vsel %vm2022_vm10, %v1989_v37, %v4191_v29  ;;  %v2101_v56 = vpack.c.bf16 %v2052_v16, %v2051_v52  ;;  %v6080_v42 = vsel %vm1662_vm4, %v1646_v49, %v3935_v0 }
 0x130   : > { %v4196_v39 = vunpack.i.h.bf16 %v4194_v9  ;;  %v4195_v55 = vunpack.i.l.bf16 %v4194_v9  ;;  %v2102_v6 = vpack.c.bf16 %v2054_v1, %v2053_v18  ;;  %v4201_v51 = vunpack.i.h.bf16 %v4199_v58 }
 0x131   : > { %v4200_v34 = vunpack.i.l.bf16 %v4199_v58  ;;  %v6082_v38 = vpop.permute.xlu1 %4208  ;;  %3719 = vmatprep.mubr.msk.bf16.mxu0 %vm2162_vm11, %v2101_v56  ;;  %v3855_v60 = vunpack.i.l.bf16 %v7075_v61 }
 0x132   : > { %v1730_v53 = vsel %vm1697_vm5, %v1679_v40, %v4195_v55  ;;  %v1731_v41 = vsel %vm1697_vm5, %v1680_v32, %v4196_v39  ;;  %v1732_v7 = vsel %vm1697_vm5, %v6080_v42, %v4195_v55  ;;  %v1733_v62 = vsel %vm1697_vm5, %v6077_v30, %v4196_v39  ;;  %3720 = vmatmul.mubr.msk.bf16.gmra.mrb[28].mxu0 %vm2162_vm11, %v2102_v6 }
 0x133   : > { %v4204_v4 = vpop.permute.xlu0 %4203  ;;  %v4211_v33 = vunpack.i.h.bf16 %v6082_v38  ;;  %v4210_v31 = vunpack.i.l.bf16 %v6082_v38  ;;  %v1795_v40 = vsel %vm1762_vm6, %v1730_v53, %v4200_v34  ;;  %v1796_v32 = vsel %vm1762_vm6, %v1731_v41, %v4201_v51 }
 0x134   : > { %v4206_v44 = vunpack.i.h.bf16 %v4204_v4  ;;  %v4205_v15 = vunpack.i.l.bf16 %v4204_v4  ;;  %v1797_v22 = vsel %vm1762_vm6, %v1732_v7, %v4200_v34  ;;  %v1798_v8 = vsel %vm1762_vm6, %v1733_v62, %v4201_v51 }
 0x135   : > { %v6098_v12 = vpop.permute.xlu1 %4218  ;;  %v1648_v49 = vsel %vm1627_vm3, %v7077_v47, %v3855_v60 }
 0x136   : > { %v1860_v5 = vsel %vm1827_vm7, %v1795_v40, %v4205_v15  ;;  %v1861_v19 = vsel %vm1827_vm7, %v1796_v32, %v4206_v44  ;;  %v1862_v48 = vsel %vm1827_vm7, %v1797_v22, %v4205_v15  ;;  %v1863_v20 = vsel %vm1827_vm7, %v1798_v8, %v4206_v44 }
 0x137   : > { %v4221_v13 = vunpack.i.h.bf16 %v6098_v12  ;;  %v4220_v59 = vunpack.i.l.bf16 %v6098_v12  ;;  %v4214_v3 = vpop.permute.xlu0 %4213  ;;  %v1925_v17 = vsel %vm1892_vm8, %v1860_v5, %v4180_v45  ;;  %v1926_v11 = vsel %vm1892_vm8, %v1861_v19, %v4181_v2 }
 0x138   : > { %v4216_v23 = vunpack.i.h.bf16 %v4214_v3  ;;  %v4215_v54 = vunpack.i.l.bf16 %v4214_v3  ;;  %v1927_v63 = vsel %vm1892_vm8, %v1862_v48, %v4210_v31  ;;  %v1928_v0 = vsel %vm1892_vm8, %v1863_v20, %v4211_v33 }
 0x139   : > { %v4229_v10 = vpop.permute.xlu1 %4228  ;;  %v1990_v36 = vsel %vm1957_vm9, %v1925_v17, %v4185_v27  ;;  %v1991_v58 = vsel %vm1957_vm9, %v1926_v11, %v4186_v25  ;;  %v7076_v27 = vld [vmem:[#allocation12_spill] sm:$0xff] }
 0x13a   : > { %v1992_v26 = vsel %vm1957_vm9, %v1927_v63, %v4215_v54  ;;  %v1993_v45 = vsel %vm1957_vm9, %v1928_v0, %v4216_v23  ;;  %v2055_v2 = vsel %vm2022_vm10, %v1990_v36, %v4190_v35  ;;  %v2056_v21 = vsel %vm2022_vm10, %v1991_v58, %v4191_v29 }
 0x13b   : > { %v4224_v46 = vpop.permute.xlu0 %4223  ;;  %v2057_v43 = vsel %vm2022_vm10, %v1992_v26, %v4220_v59  ;;  %v2058_v25 = vsel %vm2022_vm10, %v1993_v45, %v4221_v13  ;;  %v1649_v28 = vsel %vm1627_vm3, %v7076_v27, %v3856_v57  ;;  %v4231_v37 = vunpack.i.h.bf16 %v4229_v10  ;;  %v7080_v27 = vld [vmem:[#allocation8_spill] sm:$0xff] }
 0x13c   : > { %v4226_v50 = vunpack.i.h.bf16 %v4224_v46  ;;  %v4225_v35 = vunpack.i.l.bf16 %v4224_v46  ;;  %v4230_v14 = vunpack.i.l.bf16 %v4229_v10  ;;  %v2103_v9 = vpack.c.bf16 %v2056_v21, %v2055_v2 }
 0x13d   : > { %v2104_v29 = vpack.c.bf16 %v2058_v25, %v2057_v43  ;;  %v4239_v52 = vpop.permute.xlu1 %4238  ;;  %v1735_v34 = vsel %vm1697_vm5, %v6077_v30, %v4231_v37  ;;  %v7079_v43 = vld [vmem:[#allocation9_spill] sm:$0xff] }
 0x13e   : > { %v6141_v16 = vsel %vm1662_vm4, %v1648_v49, %v4225_v35  ;;  %v6144_v18 = vsel %vm1662_vm4, %v1649_v28, %v4226_v50  ;;  %3723 = vmatprep.mubr.msk.bf16.mxu1 %vm2162_vm11, %v2103_v9  ;;  %v4241_v1 = vunpack.i.h.bf16 %v4239_v52  ;;  %v4240_v39 = vunpack.i.l.bf16 %v4239_v52 }
 0x13f   : > { %v4234_v55 = vpop.permute.xlu0 %4233  ;;  %3724 = vmatmul.mubr.msk.bf16.vlgmr.msra.gmra.mrb[0].mxu1 %vm2162_vm11, %v2104_v29  ;;  %v1734_v51 = vsel %vm1697_vm5, %v6080_v42, %v4230_v14  ;;  %v1736_v53 = vsel %vm1697_vm5, %v6141_v16, %v4230_v14  ;;  %v1737_v41 = vsel %vm1697_vm5, %v6144_v18, %v4231_v37 }
 0x140   : > { %v4236_v56 = vunpack.i.h.bf16 %v4234_v55  ;;  %v4235_v6 = vunpack.i.l.bf16 %v4234_v55 }
 0x141   : > { %v6156_v7 = vpop.permute.xlu1 %4248 }
 0x142   : > { %v1799_v62 = vsel %vm1762_vm6, %v1734_v51, %v4235_v6  ;;  %v1800_v4 = vsel %vm1762_vm6, %v1735_v34, %v4236_v56  ;;  %v1801_v44 = vsel %vm1762_vm6, %v1736_v53, %v4235_v6  ;;  %v1802_v15 = vsel %vm1762_vm6, %v1737_v41, %v4236_v56 }
 0x143   : > { %v1864_v42 = vsel %vm1827_vm7, %v1799_v62, %v4240_v39  ;;  %v1865_v30 = vsel %vm1827_vm7, %v1800_v4, %v4241_v1  ;;  %v4251_v40 = vunpack.i.h.bf16 %v6156_v7  ;;  %v4250_v32 = vunpack.i.l.bf16 %v6156_v7  ;;  %v4244_v22 = vpop.permute.xlu0 %4243  ;;  %v7082_v7 = vld [vmem:[#allocation19_spill] sm:$0xff] }
 0x144   : > { %v1929_v8 = vsel %vm1892_vm8, %v1864_v42, %v4210_v31  ;;  %v1930_v5 = vsel %vm1892_vm8, %v1865_v30, %v4211_v33  ;;  %v4246_v19 = vunpack.i.h.bf16 %v4244_v22  ;;  %v4245_v48 = vunpack.i.l.bf16 %v4244_v22  ;;  %v7078_v31 = vld [vmem:[#allocation33_spill] sm:$0xff] }
 0x145   : > { %v1866_v20 = vsel %vm1827_vm7, %v1801_v44, %v4240_v39  ;;  %v1867_v61 = vsel %vm1827_vm7, %v1802_v15, %v4241_v1  ;;  %v4259_v57 = vpop.permute.xlu1 %4258  ;;  %v1994_v60 = vsel %vm1957_vm9, %v1929_v8, %v4215_v54  ;;  %v1995_v3 = vsel %vm1957_vm9, %v1930_v5, %v4216_v23 }
 0x146   : > { %v1931_v17 = vsel %vm1892_vm8, %v1866_v20, %v4245_v48  ;;  %v1932_v11 = vsel %vm1892_vm8, %v1867_v61, %v4246_v19  ;;  %v3861_v63 = vunpack.i.h.bf16 %v7078_v31  ;;  %v2059_v33 = vsel %vm2022_vm10, %v1994_v60, %v4220_v59  ;;  %v7081_v61 = vld [vmem:[#allocation36_spill] sm:$0xff] }
 0x147   : > { %v6179_v38 = vpop.permute.xlu0 %4253  ;;  %v2060_v0 = vsel %vm2022_vm10, %v1995_v3, %v4221_v13  ;;  %v3860_v54 = vunpack.i.l.bf16 %v7078_v31  ;;  %v4261_v10 = vunpack.i.h.bf16 %v4259_v57  ;;  %v4260_v58 = vunpack.i.l.bf16 %v4259_v57 }
 0x148   : > { %v4256_v23 = vunpack.i.h.bf16 %v6179_v38  ;;  %v4255_v36 = vunpack.i.l.bf16 %v6179_v38  ;;  %v1996_v26 = vsel %vm1957_vm9, %v1931_v17, %v4250_v32  ;;  %v1997_v59 = vsel %vm1957_vm9, %v1932_v11, %v4251_v40 }
 0x149   : > { %v2105_v45 = vpack.c.bf16 %v2060_v0, %v2059_v33  ;;  %v4269_v12 = vpop.permute.xlu1 %4268  ;;  %v1651_v25 = vsel %vm1627_vm3, %v7079_v43, %v3861_v63  ;;  %v1650_v28 = vsel %vm1627_vm3, %v7080_v27, %v3860_v54  ;;  %v3866_v57 = vunpack.i.h.bf16 %v7081_v61 }
 0x14a   : > { %v2061_v13 = vsel %vm2022_vm10, %v1996_v26, %v4255_v36  ;;  %v2062_v46 = vsel %vm2022_vm10, %v1997_v59, %v4256_v23  ;;  %v6204_v50 = vsel %vm1662_vm4, %v1651_v25, %v4261_v10  ;;  %v6207_v35 = vsel %vm1662_vm4, %v1650_v28, %v4260_v58  ;;  %v7083_v26 = vld [vmem:[#allocation17_spill] sm:$0xff] }
 0x14b   : > { %v2106_v2 = vpack.c.bf16 %v2062_v46, %v2061_v13  ;;  %3727 = vmatprep.mubr.msk.bf16.mxu1 %vm2162_vm11, %v2105_v45  ;;  %v4264_v21 = vpop.permute.xlu0 %4263  ;;  %v4271_v37 = vunpack.i.h.bf16 %v4269_v12  ;;  %v4270_v14 = vunpack.i.l.bf16 %v4269_v12  ;;  %v3865_v60 = vunpack.i.l.bf16 %v7081_v61 }
 0x14c   : > { %v4266_v47 = vunpack.i.h.bf16 %v4264_v21  ;;  %v4265_v49 = vunpack.i.l.bf16 %v4264_v21 }
 0x14d   : > { %3728 = vmatmul.mubr.msk.bf16.gmra.mrb[4].mxu1 %vm2162_vm11, %v2106_v2  ;;  %v6210_v9 = vpop.permute.xlu1 %4278  ;;  %v1652_v59 = vsel %vm1627_vm3, %v7083_v26, %v3865_v60 }
 0x14e   : > { %v1741_v29 = vsel %vm1697_vm5, %v6204_v50, %v4266_v47  ;;  %v1738_v52 = vsel %vm1697_vm5, %v6141_v16, %v4265_v49  ;;  %v1739_v1 = vsel %vm1697_vm5, %v6144_v18, %v4266_v47  ;;  %v1740_v39 = vsel %vm1697_vm5, %v6207_v35, %v4265_v49 }
 0x14f   : > { %v4274_v55 = vpop.permute.xlu0 %4273  ;;  %v4281_v56 = vunpack.i.h.bf16 %v6210_v9  ;;  %v4280_v6 = vunpack.i.l.bf16 %v6210_v9  ;;  %v1803_v53 = vsel %vm1762_vm6, %v1738_v52, %v4270_v14  ;;  %v1804_v41 = vsel %vm1762_vm6, %v1739_v1, %v4271_v37 }
 0x150   : > { %v4276_v51 = vunpack.i.h.bf16 %v4274_v55  ;;  %v4275_v34 = vunpack.i.l.bf16 %v4274_v55  ;;  %v1805_v62 = vsel %vm1762_vm6, %v1740_v39, %v4270_v14  ;;  %v1806_v16 = vsel %vm1762_vm6, %v1741_v29, %v4271_v37 }
 0x151   : > { %v6226_v4 = vpop.permute.xlu1 %4288 }
 0x152   : > { %v1868_v18 = vsel %vm1827_vm7, %v1803_v53, %v4275_v34  ;;  %v1869_v44 = vsel %vm1827_vm7, %v1804_v41, %v4276_v51  ;;  %v1870_v15 = vsel %vm1827_vm7, %v1805_v62, %v4275_v34  ;;  %v1871_v42 = vsel %vm1827_vm7, %v1806_v16, %v4276_v51 }
 0x153   : > { %v1933_v30 = vsel %vm1892_vm8, %v1868_v18, %v4245_v48  ;;  %v1934_v22 = vsel %vm1892_vm8, %v1869_v44, %v4246_v19  ;;  %v4291_v8 = vunpack.i.h.bf16 %v6226_v4  ;;  %v4290_v5 = vunpack.i.l.bf16 %v6226_v4  ;;  %v4284_v20 = vpop.permute.xlu0 %4283 }
 0x154   : > { %v4286_v3 = vunpack.i.h.bf16 %v4284_v20  ;;  %v4285_v17 = vunpack.i.l.bf16 %v4284_v20  ;;  %v1935_v11 = vsel %vm1892_vm8, %v1870_v15, %v4280_v6  ;;  %v1936_v48 = vsel %vm1892_vm8, %v1871_v42, %v4281_v56 }
 0x155   : > { %v4299_v19 = vpop.permute.xlu1 %4298  ;;  %v1998_v31 = vsel %vm1957_vm9, %v1933_v30, %v4250_v32  ;;  %v1999_v63 = vsel %vm1957_vm9, %v1934_v22, %v4251_v40  ;;  %v1653_v40 = vsel %vm1627_vm3, %v7082_v7, %v3866_v57  ;;  %v7086_v7 = vld [vmem:[#allocation14_spill] sm:$0xff] }
 0x156   : > { %v2000_v38 = vsel %vm1957_vm9, %v1935_v11, %v4285_v17  ;;  %v2001_v33 = vsel %vm1957_vm9, %v1936_v48, %v4286_v3  ;;  %v2063_v54 = vsel %vm2022_vm10, %v1998_v31, %v4255_v36  ;;  %v2064_v10 = vsel %vm2022_vm10, %v1999_v63, %v4256_v23 }
 0x157   : > { %v4294_v0 = vpop.permute.xlu0 %4293  ;;  %v2065_v58 = vsel %vm2022_vm10, %v2000_v38, %v4290_v5  ;;  %v2066_v32 = vsel %vm2022_vm10, %v2001_v33, %v4291_v8  ;;  %v4301_v13 = vunpack.i.h.bf16 %v4299_v19  ;;  %v4300_v36 = vunpack.i.l.bf16 %v4299_v19 }
 0x158   : > { %v4296_v45 = vunpack.i.h.bf16 %v4294_v0  ;;  %v4295_v12 = vunpack.i.l.bf16 %v4294_v0  ;;  %v2107_v46 = vpack.c.bf16 %v2064_v10, %v2063_v54  ;;  %v2108_v23 = vpack.c.bf16 %v2066_v32, %v2065_v58  ;;  %v7085_v58 = vld [vmem:[#allocation15_spill] sm:$0xff] }
 0x159   : > { %v4309_v2 = vpop.permute.xlu1 %4308  ;;  %v1742_v37 = vsel %vm1697_vm5, %v6207_v35, %v4300_v36  ;;  %v1743_v14 = vsel %vm1697_vm5, %v6204_v50, %v4301_v13 }
 0x15a   : > { %v6265_v21 = vsel %vm1662_vm4, %v1652_v59, %v4295_v12  ;;  %v6268_v43 = vsel %vm1662_vm4, %v1653_v40, %v4296_v45  ;;  %3731 = vmatprep.mubr.msk.bf16.mxu1 %vm2162_vm11, %v2107_v46  ;;  %v4311_v25 = vunpack.i.h.bf16 %v4309_v2  ;;  %v4310_v27 = vunpack.i.l.bf16 %v4309_v2 }
 0x15b   : > { %v4304_v28 = vpop.permute.xlu0 %4303  ;;  %3732 = vmatmul.mubr.msk.bf16.gmra.mrb[8].mxu1 %vm2162_vm11, %v2108_v23  ;;  %v1744_v29 = vsel %vm1697_vm5, %v6265_v21, %v4300_v36  ;;  %v1745_v52 = vsel %vm1697_vm5, %v6268_v43, %v4301_v13 }
 0x15c   : > { %v4306_v47 = vunpack.i.h.bf16 %v4304_v28  ;;  %v4305_v49 = vunpack.i.l.bf16 %v4304_v28 }
 0x15d   : > { %v6280_v1 = vpop.permute.xlu1 %4318 }
 0x15e   : > { %v1808_v39 = vsel %vm1762_vm6, %v1743_v14, %v4306_v47  ;;  %v1807_v55 = vsel %vm1762_vm6, %v1742_v37, %v4305_v49  ;;  %v1809_v51 = vsel %vm1762_vm6, %v1744_v29, %v4305_v49  ;;  %v1810_v34 = vsel %vm1762_vm6, %v1745_v52, %v4306_v47 }
 0x15f   : > { %v1873_v35 = vsel %vm1827_vm7, %v1808_v39, %v4311_v25  ;;  %v1872_v50 = vsel %vm1827_vm7, %v1807_v55, %v4310_v27  ;;  %v4321_v53 = vunpack.i.h.bf16 %v6280_v1  ;;  %v4320_v41 = vunpack.i.l.bf16 %v6280_v1  ;;  %v4314_v62 = vpop.permute.xlu0 %4313  ;;  %v7088_v1 = vld [vmem:[#allocation26_spill] sm:$0xff] }
 0x160   : > { %v1938_v16 = vsel %vm1892_vm8, %v1873_v35, %v4281_v56  ;;  %v1937_v18 = vsel %vm1892_vm8, %v1872_v50, %v4280_v6  ;;  %v4316_v44 = vunpack.i.h.bf16 %v4314_v62  ;;  %v4315_v15 = vunpack.i.l.bf16 %v4314_v62  ;;  %v7084_v56 = vld [vmem:[#allocation35_spill] sm:$0xff] }
 0x161   : > { %v1874_v42 = vsel %vm1827_vm7, %v1809_v51, %v4310_v27  ;;  %v1875_v30 = vsel %vm1827_vm7, %v1810_v34, %v4311_v25  ;;  %v4329_v22 = vpop.permute.xlu1 %4328  ;;  %v2002_v20 = vsel %vm1957_vm9, %v1937_v18, %v4285_v17  ;;  %v2003_v61 = vsel %vm1957_vm9, %v1938_v16, %v4286_v3 }
 0x162   : > { %v1939_v57 = vsel %vm1892_vm8, %v1874_v42, %v4315_v15  ;;  %v1940_v60 = vsel %vm1892_vm8, %v1875_v30, %v4316_v44  ;;  %v3871_v11 = vunpack.i.h.bf16 %v7084_v56  ;;  %v2067_v6 = vsel %vm2022_vm10, %v2002_v20, %v4290_v5  ;;  %v7087_v30 = vld [vmem:[#allocation38_spill] sm:$0xff] }
 0x163   : > { %v6303_v9 = vpop.permute.xlu0 %4323  ;;  %v2068_v48 = vsel %vm2022_vm10, %v2003_v61, %v4291_v8  ;;  %v3870_v17 = vunpack.i.l.bf16 %v7084_v56  ;;  %v4331_v19 = vunpack.i.h.bf16 %v4329_v22  ;;  %v4330_v63 = vunpack.i.l.bf16 %v4329_v22 }
 0x164   : > { %v4326_v3 = vunpack.i.h.bf16 %v6303_v9  ;;  %v4325_v31 = vunpack.i.l.bf16 %v6303_v9  ;;  %v2004_v38 = vsel %vm1957_vm9, %v1939_v57, %v4320_v41  ;;  %v2005_v5 = vsel %vm1957_vm9, %v1940_v60, %v4321_v53 }
 0x165   : > { %v2109_v33 = vpack.c.bf16 %v2068_v48, %v2067_v6  ;;  %v4339_v4 = vpop.permute.xlu1 %4338  ;;  %v1655_v32 = vsel %vm1627_vm3, %v7085_v58, %v3871_v11  ;;  %v1654_v40 = vsel %vm1627_vm3, %v7086_v7, %v3870_v17  ;;  %v3876_v22 = vunpack.i.h.bf16 %v7087_v30 }
 0x166   : > { %v2069_v8 = vsel %vm2022_vm10, %v2004_v38, %v4325_v31  ;;  %v2070_v0 = vsel %vm2022_vm10, %v2005_v5, %v4326_v3  ;;  %v6328_v45 = vsel %vm1662_vm4, %v1655_v32, %v4331_v19  ;;  %v6331_v12 = vsel %vm1662_vm4, %v1654_v40, %v4330_v63  ;;  %v7089_v38 = vld [vmem:[#allocation25_spill] sm:$0xff] }
 0x167   : > { %v2110_v54 = vpack.c.bf16 %v2070_v0, %v2069_v8  ;;  %3735 = vmatprep.mubr.msk.bf16.mxu1 %vm2162_vm11, %v2109_v33  ;;  %v4334_v10 = vpop.permute.xlu0 %4333  ;;  %v4341_v13 = vunpack.i.h.bf16 %v4339_v4  ;;  %v4340_v36 = vunpack.i.l.bf16 %v4339_v4  ;;  %v3875_v20 = vunpack.i.l.bf16 %v7087_v30 }
 0x168   : > { %v4336_v26 = vunpack.i.h.bf16 %v4334_v10  ;;  %v4335_v59 = vunpack.i.l.bf16 %v4334_v10 }
 0x169   : > { %3736 = vmatmul.mubr.msk.bf16.gmra.mrb[12].mxu1 %vm2162_vm11, %v2110_v54  ;;  %v6334_v46 = vpop.permute.xlu1 %4348  ;;  %v1656_v5 = vsel %vm1627_vm3, %v7089_v38, %v3875_v20 }
 0x16a   : > { %v1749_v23 = vsel %vm1697_vm5, %v6328_v45, %v4336_v26  ;;  %v1746_v2 = vsel %vm1697_vm5, %v6265_v21, %v4335_v59  ;;  %v1747_v25 = vsel %vm1697_vm5, %v6268_v43, %v4336_v26  ;;  %v1748_v27 = vsel %vm1697_vm5, %v6331_v12, %v4335_v59 }
 0x16b   : > { %v4344_v28 = vpop.permute.xlu0 %4343  ;;  %v4351_v47 = vunpack.i.h.bf16 %v6334_v46  ;;  %v4350_v49 = vunpack.i.l.bf16 %v6334_v46  ;;  %v1811_v29 = vsel %vm1762_vm6, %v1746_v2, %v4340_v36  ;;  %v1812_v52 = vsel %vm1762_vm6, %v1747_v25, %v4341_v13 }
 0x16c   : > { %v4346_v37 = vunpack.i.h.bf16 %v4344_v28  ;;  %v4345_v14 = vunpack.i.l.bf16 %v4344_v28  ;;  %v1813_v39 = vsel %vm1762_vm6, %v1748_v27, %v4340_v36  ;;  %v1814_v21 = vsel %vm1762_vm6, %v1749_v23, %v4341_v13 }
 0x16d   : > { %v6350_v55 = vpop.permute.xlu1 %4358 }
 0x16e   : > { %v1876_v43 = vsel %vm1827_vm7, %v1811_v29, %v4345_v14  ;;  %v1877_v51 = vsel %vm1827_vm7, %v1812_v52, %v4346_v37  ;;  %v1878_v34 = vsel %vm1827_vm7, %v1813_v39, %v4345_v14  ;;  %v1879_v35 = vsel %vm1827_vm7, %v1814_v21, %v4346_v37 }
 0x16f   : > { %v1941_v50 = vsel %vm1892_vm8, %v1876_v43, %v4315_v15  ;;  %v1942_v62 = vsel %vm1892_vm8, %v1877_v51, %v4316_v44  ;;  %v4361_v16 = vunpack.i.h.bf16 %v6350_v55  ;;  %v4360_v18 = vunpack.i.l.bf16 %v6350_v55  ;;  %v4354_v42 = vpop.permute.xlu0 %4353 }
 0x170   : > { %v4356_v61 = vunpack.i.h.bf16 %v4354_v42  ;;  %v4355_v57 = vunpack.i.l.bf16 %v4354_v42  ;;  %v1943_v60 = vsel %vm1892_vm8, %v1878_v34, %v4350_v49  ;;  %v1944_v15 = vsel %vm1892_vm8, %v1879_v35, %v4351_v47 }
 0x171   : > { %v4369_v44 = vpop.permute.xlu1 %4368  ;;  %v2006_v56 = vsel %vm1957_vm9, %v1941_v50, %v4320_v41  ;;  %v2007_v11 = vsel %vm1957_vm9, %v1942_v62, %v4321_v53  ;;  %v1657_v53 = vsel %vm1627_vm3, %v7088_v1, %v3876_v22  ;;  %v7092_v1 = vld [vmem:[#allocation22_spill] sm:$0xff] }
 0x172   : > { %v2008_v9 = vsel %vm1957_vm9, %v1943_v60, %v4355_v57  ;;  %v2009_v6 = vsel %vm1957_vm9, %v1944_v15, %v4356_v61  ;;  %v2071_v17 = vsel %vm2022_vm10, %v2006_v56, %v4325_v31  ;;  %v2072_v19 = vsel %vm2022_vm10, %v2007_v11, %v4326_v3 }
 0x173   : > { %v4364_v48 = vpop.permute.xlu0 %4363  ;;  %v2073_v63 = vsel %vm2022_vm10, %v2008_v9, %v4360_v18  ;;  %v2074_v41 = vsel %vm2022_vm10, %v2009_v6, %v4361_v16  ;;  %v4371_v8 = vunpack.i.h.bf16 %v4369_v44  ;;  %v4370_v31 = vunpack.i.l.bf16 %v4369_v44 }
 0x174   : > { %v4366_v33 = vunpack.i.h.bf16 %v4364_v48  ;;  %v4365_v4 = vunpack.i.l.bf16 %v4364_v48  ;;  %v2111_v0 = vpack.c.bf16 %v2072_v19, %v2071_v17  ;;  %v2112_v3 = vpack.c.bf16 %v2074_v41, %v2073_v63  ;;  %v7091_v63 = vld [vmem:[#allocation23_spill] sm:$0xff] }
 0x175   : > { %v4379_v54 = vpop.permute.xlu1 %4378  ;;  %v1750_v13 = vsel %vm1697_vm5, %v6331_v12, %v4370_v31  ;;  %v1751_v36 = vsel %vm1697_vm5, %v6328_v45, %v4371_v8 }
 0x176   : > { %v6389_v10 = vsel %vm1662_vm4, %v1656_v5, %v4365_v4  ;;  %v6392_v58 = vsel %vm1662_vm4, %v1657_v53, %v4366_v33  ;;  %3739 = vmatprep.mubr.msk.bf16.mxu1 %vm2162_vm11, %v2111_v0  ;;  %v4381_v32 = vunpack.i.h.bf16 %v4379_v54  ;;  %v4380_v7 = vunpack.i.l.bf16 %v4379_v54 }
 0x177   : > { %v4374_v40 = vpop.permute.xlu0 %4373  ;;  %3740 = vmatmul.mubr.msk.bf16.gmra.mrb[16].mxu1 %vm2162_vm11, %v2112_v3  ;;  %v1752_v23 = vsel %vm1697_vm5, %v6389_v10, %v4370_v31  ;;  %v1753_v2 = vsel %vm1697_vm5, %v6392_v58, %v4371_v8 }
 0x178   : > { %v4376_v26 = vunpack.i.h.bf16 %v4374_v40  ;;  %v4375_v59 = vunpack.i.l.bf16 %v4374_v40 }
 0x179   : > { %v6404_v25 = vpop.permute.xlu1 %4388 }
 0x17a   : > { %v1816_v27 = vsel %vm1762_vm6, %v1751_v36, %v4376_v26  ;;  %v1815_v28 = vsel %vm1762_vm6, %v1750_v13, %v4375_v59  ;;  %v1817_v37 = vsel %vm1762_vm6, %v1752_v23, %v4375_v59  ;;  %v1818_v14 = vsel %vm1762_vm6, %v1753_v2, %v4376_v26 }
 0x17b   : > { %v1881_v12 = vsel %vm1827_vm7, %v1816_v27, %v4381_v32  ;;  %v1880_v45 = vsel %vm1827_vm7, %v1815_v28, %v4380_v7  ;;  %v4391_v29 = vunpack.i.h.bf16 %v6404_v25  ;;  %v4390_v52 = vunpack.i.l.bf16 %v6404_v25  ;;  %v4384_v39 = vpop.permute.xlu0 %4383 }
 0x17c   : > { %v1946_v21 = vsel %vm1892_vm8, %v1881_v12, %v4351_v47  ;;  %v1945_v43 = vsel %vm1892_vm8, %v1880_v45, %v4350_v49  ;;  %v4386_v51 = vunpack.i.h.bf16 %v4384_v39  ;;  %v4385_v34 = vunpack.i.l.bf16 %v4384_v39  ;;  %v7090_v47 = vld [vmem:[#allocation37_spill] sm:$0xff] }
 0x17d   : > { %v1882_v35 = vsel %vm1827_vm7, %v1817_v37, %v4380_v7  ;;  %v1883_v50 = vsel %vm1827_vm7, %v1818_v14, %v4381_v32  ;;  %v4399_v62 = vpop.permute.xlu1 %4398  ;;  %v2010_v42 = vsel %vm1957_vm9, %v1945_v43, %v4355_v57  ;;  %v2011_v30 = vsel %vm1957_vm9, %v1946_v21, %v4356_v61 }
 0x17e   : > { %v1947_v22 = vsel %vm1892_vm8, %v1882_v35, %v4385_v34  ;;  %v1948_v20 = vsel %vm1892_vm8, %v1883_v50, %v4386_v51  ;;  %v3881_v60 = vunpack.i.h.bf16 %v7090_v47  ;;  %v2075_v49 = vsel %vm2022_vm10, %v2010_v42, %v4360_v18  ;;  %v7093_v50 = vld [vmem:[#allocation39_spill] sm:$0xff] }
 0x17f   : > { %v6427_v46 = vpop.permute.xlu0 %4393  ;;  %v2076_v15 = vsel %vm2022_vm10, %v2011_v30, %v4361_v16  ;;  %v3880_v57 = vunpack.i.l.bf16 %v7090_v47  ;;  %v4401_v44 = vunpack.i.h.bf16 %v4399_v62  ;;  %v4400_v11 = vunpack.i.l.bf16 %v4399_v62 }
 0x180   : > { %v4396_v61 = vunpack.i.h.bf16 %v6427_v46  ;;  %v4395_v56 = vunpack.i.l.bf16 %v6427_v46  ;;  %v2012_v9 = vsel %vm1957_vm9, %v1947_v22, %v4390_v52  ;;  %v2013_v18 = vsel %vm1957_vm9, %v1948_v20, %v4391_v29 }
 0x181   : > { %v2113_v6 = vpack.c.bf16 %v2076_v15, %v2075_v49  ;;  %v4409_v55 = vpop.permute.xlu1 %4408  ;;  %v1659_v41 = vsel %vm1627_vm3, %v7091_v63, %v3881_v60  ;;  %v1658_v53 = vsel %vm1627_vm3, %v7092_v1, %v3880_v57  ;;  %v3886_v62 = vunpack.i.h.bf16 %v7093_v50 }
 0x182   : > { %v2077_v16 = vsel %vm2022_vm10, %v2012_v9, %v4395_v56  ;;  %v2078_v48 = vsel %vm2022_vm10, %v2013_v18, %v4396_v61  ;;  %v6452_v33 = vsel %vm1662_vm4, %v1659_v41, %v4401_v44  ;;  %v6455_v4 = vsel %vm1662_vm4, %v1658_v53, %v4400_v11 }
 0x183   : > { %v2114_v17 = vpack.c.bf16 %v2078_v48, %v2077_v16  ;;  %3743 = vmatprep.mubr.msk.bf16.mxu1 %vm2162_vm11, %v2113_v6  ;;  %v4404_v19 = vpop.permute.xlu0 %4403  ;;  %v4411_v8 = vunpack.i.h.bf16 %v4409_v55  ;;  %v4410_v31 = vunpack.i.l.bf16 %v4409_v55  ;;  %v3885_v42 = vunpack.i.l.bf16 %v7093_v50 }
 0x184   : > { %v4406_v38 = vunpack.i.h.bf16 %v4404_v19  ;;  %v4405_v5 = vunpack.i.l.bf16 %v4404_v19  ;;  %v1661_v25 = vsel %vm1627_vm3, %v4881_v24, %v3886_v62 }
 0x185   : > { %3744 = vmatmul.mubr.msk.bf16.gmra.mrb[20].mxu1 %vm2162_vm11, %v2114_v17  ;;  %v6458_v0 = vpop.permute.xlu1 %4418 }
 0x186   : > { %v1757_v3 = vsel %vm1697_vm5, %v6452_v33, %v4406_v38  ;;  %v1754_v54 = vsel %vm1697_vm5, %v6389_v10, %v4405_v5  ;;  %v1755_v32 = vsel %vm1697_vm5, %v6392_v58, %v4406_v38  ;;  %v1756_v7 = vsel %vm1697_vm5, %v6455_v4, %v4405_v5 }
 0x187   : > { %v4414_v40 = vpop.permute.xlu0 %4413  ;;  %v4421_v26 = vunpack.i.h.bf16 %v6458_v0  ;;  %v4420_v59 = vunpack.i.l.bf16 %v6458_v0  ;;  %v1819_v23 = vsel %vm1762_vm6, %v1754_v54, %v4410_v31  ;;  %v1820_v2 = vsel %vm1762_vm6, %v1755_v32, %v4411_v8 }
 0x188   : > { %v4416_v13 = vunpack.i.h.bf16 %v4414_v40  ;;  %v4415_v36 = vunpack.i.l.bf16 %v4414_v40  ;;  %v1821_v27 = vsel %vm1762_vm6, %v1756_v7, %v4410_v31  ;;  %v1822_v10 = vsel %vm1762_vm6, %v1757_v3, %v4411_v8 }
 0x189   : > { %v6474_v28 = vpop.permute.xlu1 %4428 }
 0x18a   : > { %v1884_v58 = vsel %vm1827_vm7, %v1819_v23, %v4415_v36  ;;  %v1885_v37 = vsel %vm1827_vm7, %v1820_v2, %v4416_v13  ;;  %v1886_v14 = vsel %vm1827_vm7, %v1821_v27, %v4415_v36  ;;  %v1887_v12 = vsel %vm1827_vm7, %v1822_v10, %v4416_v13 }
 0x18b   : > { %v1949_v45 = vsel %vm1892_vm8, %v1884_v58, %v4385_v34  ;;  %v1950_v39 = vsel %vm1892_vm8, %v1885_v37, %v4386_v51  ;;  %v4431_v21 = vunpack.i.h.bf16 %v6474_v28  ;;  %v4430_v43 = vunpack.i.l.bf16 %v6474_v28  ;;  %v4424_v35 = vpop.permute.xlu0 %4423  ;;  %v6551_v28 = vld [vmem:[%s6897_s4] ss:$0 sm:$0xff] }
 0x18c   : > { %v4426_v30 = vunpack.i.h.bf16 %v4424_v35  ;;  %v4425_v22 = vunpack.i.l.bf16 %v4424_v35  ;;  %v1951_v20 = vsel %vm1892_vm8, %v1886_v14, %v4420_v59  ;;  %v1952_v34 = vsel %vm1892_vm8, %v1887_v12, %v4421_v26 }
 0x18d   : > { %v4439_v51 = vpop.permute.xlu1 %4438  ;;  %v2014_v47 = vsel %vm1957_vm9, %v1949_v45, %v4390_v52  ;;  %v2015_v60 = vsel %vm1957_vm9, %v1950_v39, %v4391_v29  ;;  %v7094_v52 = vld [vmem:[#allocation28_spill] sm:$0xff] }
 0x18e   : > { %v2016_v46 = vsel %vm1957_vm9, %v1951_v20, %v4425_v22  ;;  %v2017_v49 = vsel %vm1957_vm9, %v1952_v34, %v4426_v30  ;;  %v2079_v57 = vsel %vm2022_vm10, %v2014_v47, %v4395_v56  ;;  %v2080_v44 = vsel %vm2022_vm10, %v2015_v60, %v4396_v61 }
 0x18f   : > { %v4434_v15 = vpop.permute.xlu0 %4433  ;;  %v2081_v11 = vsel %vm2022_vm10, %v2016_v46, %v4430_v43  ;;  %v2082_v9 = vsel %vm2022_vm10, %v2017_v49, %v4431_v21  ;;  %v1660_v29 = vsel %vm1627_vm3, %v7094_v52, %v3885_v42  ;;  %v4441_v55 = vunpack.i.h.bf16 %v4439_v51 }
 0x190   : > { %v4436_v18 = vunpack.i.h.bf16 %v4434_v15  ;;  %v4435_v6 = vunpack.i.l.bf16 %v4434_v15  ;;  %v4440_v16 = vunpack.i.l.bf16 %v4439_v51  ;;  %v2115_v48 = vpack.c.bf16 %v2080_v44, %v2079_v57 }
 0x191   : > { %v2116_v56 = vpack.c.bf16 %v2082_v9, %v2081_v11  ;;  %v4449_v17 = vpop.permute.xlu1 %4448  ;;  %v1759_v5 = vsel %vm1697_vm5, %v6452_v33, %v4441_v55 }
 0x192   : > { %v1695_v61 = vsel %vm1662_vm4, %v1660_v29, %v4435_v6  ;;  %v1696_v19 = vsel %vm1662_vm4, %v1661_v25, %v4436_v18  ;;  %3747 = vmatprep.mubr.msk.bf16.mxu1 %vm2162_vm11, %v2115_v48  ;;  %v4451_v41 = vunpack.i.h.bf16 %v4449_v17  ;;  %v4450_v1 = vunpack.i.l.bf16 %v4449_v17 }
 0x193   : > { %v4444_v63 = vpop.permute.xlu0 %4443  ;;  %3748 = vmatmul.mubr.msk.bf16.gmra.mrb[24].mxu1 %vm2162_vm11, %v2116_v56  ;;  %v1758_v38 = vsel %vm1697_vm5, %v6455_v4, %v4440_v16  ;;  %v1760_v8 = vsel %vm1697_vm5, %v1695_v61, %v4440_v16  ;;  %v1761_v31 = vsel %vm1697_vm5, %v1696_v19, %v4441_v55 }
 0x194   : > { %v4446_v24 = vunpack.i.h.bf16 %v4444_v63  ;;  %v4445_v53 = vunpack.i.l.bf16 %v4444_v63 }
 0x195   : > { %v4459_v40 = vpop.permute.xlu1 %4458 }
 0x196   : > { %v1824_v3 = vsel %vm1762_vm6, %v1759_v5, %v4446_v24  ;;  %v1823_v54 = vsel %vm1762_vm6, %v1758_v38, %v4445_v53  ;;  %v1825_v32 = vsel %vm1762_vm6, %v1760_v8, %v4445_v53  ;;  %v1826_v7 = vsel %vm1762_vm6, %v1761_v31, %v4446_v24 }
 0x197   : > { %v1888_v13 = vsel %vm1827_vm7, %v1823_v54, %v4450_v1  ;;  %v1889_v4 = vsel %vm1827_vm7, %v1824_v3, %v4451_v41  ;;  %v1890_v36 = vsel %vm1827_vm7, %v1825_v32, %v4450_v1  ;;  %v1891_v33 = vsel %vm1827_vm7, %v1826_v7, %v4451_v41  ;;  %v4454_v23 = vpop.permute.xlu0 %4453 }
 0x198   : > { %v1953_v2 = vsel %vm1892_vm8, %v1888_v13, %v4420_v59  ;;  %v1954_v27 = vsel %vm1892_vm8, %v1889_v4, %v4421_v26  ;;  %v4456_v10 = vunpack.i.h.bf16 %v4454_v23  ;;  %v4455_v58 = vunpack.i.l.bf16 %v4454_v23 }
 0x199   : > { %v4461_v37 = vunpack.i.h.bf16 %v4459_v40  ;;  %v4460_v14 = vunpack.i.l.bf16 %v4459_v40  ;;  %v2018_v12 = vsel %vm1957_vm9, %v1953_v2, %v4425_v22  ;;  %v2019_v45 = vsel %vm1957_vm9, %v1954_v27, %v4426_v30 }
 0x19a   : > { %v1955_v39 = vsel %vm1892_vm8, %v1890_v36, %v4455_v58  ;;  %v1956_v35 = vsel %vm1892_vm8, %v1891_v33, %v4456_v10  ;;  %v2083_v50 = vsel %vm2022_vm10, %v2018_v12, %v4430_v43  ;;  %v2084_v0 = vsel %vm2022_vm10, %v2019_v45, %v4431_v21 }
 0x19b   : > { %v4464_v26 = vpop.permute.xlu0 %4463  ;;  %v2117_v59 = vpack.c.bf16 %v2084_v0, %v2083_v50  ;;  %v2020_v20 = vsel %vm1957_vm9, %v1955_v39, %v4460_v14  ;;  %v2021_v22 = vsel %vm1957_vm9, %v1956_v35, %v4461_v37 }
 0x19c   : > { %v4466_v62 = vunpack.i.h.bf16 %v4464_v26  ;;  %v4465_v42 = vunpack.i.l.bf16 %v4464_v26 }
 0x19d   : > { %3751 = vmatprep.mubr.msk.bf16.mxu1 %vm2162_vm11, %v2117_v59 }
 0x19e   : > { %v2085_v30 = vsel %vm2022_vm10, %v2020_v20, %v4465_v42  ;;  %v2086_v34 = vsel %vm2022_vm10, %v2021_v22, %v4466_v62 }
 0x19f   : > { %v2118_v51 = vpack.c.bf16 %v2086_v34, %v2085_v30 }
 0x1a1   : > { %3752 = vmatmul.mubr.msk.bf16.gmra.mrb[28].mxu1 %vm2162_vm11, %v2118_v51 }
 0x1b1   : > { %v3693_v21 = vpop.f32.mrb[0].mxu0 }
 0x1b2   : > { %v2306_v43 = vadd.f32 %v3693_v21, %v6551_v28  ;;  %v2297_v47 = vpop.f32.mrb[1].mxu0 }
 0x1b3   : > { %v2298_v60 = vadd.f32 %v6551_v28, %v2297_v47  ;;  %v3694_v46 = vpop.f32.mrb[2].mxu0 }
 0x1b4   : > { %v3535_v49 = vpack.c.bf16 %v2306_v43, %v2306_v43  ;;  %v2309_v15 = vadd.f32 %v3694_v46, %v6551_v28  ;;  %v2300_v57 = vpop.f32.mrb[3].mxu0  ;;  %v3010_v25 = vmul.f32 %v2306_v43, %v2306_v43  ;;  %v2876_v48 = vsel %vm1762_vm6, %v2306_v43, 0.0 }
 0x1b5   : > { %v3533_v44 = vpack.c.bf16 %v2298_v60, %v2298_v60  ;;  %v3008_v11 = vmul.f32 %v2298_v60, %v2298_v60  ;;  %v2301_v9 = vadd.f32 %v6551_v28, %v2300_v57  ;;  %v2873_v29 = vsel %vm1762_vm6, %v2298_v60, 0.0 }
 0x1b6   : > { %2811 = vst.msk [vmem:[%s6558_s21 + $0x8] sm:$0xf] %vm2808_vm12, %v3535_v49  ;;  %v3536_v52 = vpack.c.bf16 %v2309_v15, %v2309_v15  ;;  %v3011_v17 = vmul.f32 %v2309_v15, %v2309_v15  ;;  %v3075_v41 = vsel %vm1762_vm6, %v3010_v25, 0.0  ;;  %v2878_v1 = vsel %vm1762_vm6, %v2309_v15, 0.0 }
 0x1b7   : > { %2809 = vst.msk [vmem:[%s6558_s21] sm:$0xf] %vm2808_vm12, %v3533_v44  ;;  %v3534_v18 = vpack.c.bf16 %v2301_v9, %v2301_v9  ;;  %v2874_v6 = vsel %vm1762_vm6, %v2301_v9, 0.0  ;;  %v3009_v55 = vmul.f32 %v2301_v9, %v2301_v9  ;;  %v3072_v56 = vsel %vm1762_vm6, %v3008_v11, 0.0 }
 0x1b8   : > { %2812 = vst.msk [vmem:[%s6558_s21 + $0xc] sm:$0xf] %vm2808_vm12, %v3536_v52  ;;  %v2875_v16 = vadd.f32 %v2874_v6, %v2873_v29  ;;  %v3077_v38 = vsel %vm1762_vm6, %v3011_v17, 0.0 }
 0x1b9   : > { %2810 = vst.msk [vmem:[%s6558_s21 + $0x4] sm:$0xf] %vm2808_vm12, %v3534_v18  ;;  %v3073_v61 = vsel %vm1762_vm6, %v3009_v55, 0.0 }
 0x1ba   : > { %v2877_v19 = vadd.f32 %v2876_v48, %v2875_v16  ;;  %v3074_v63 = vadd.f32 %v3073_v61, %v3072_v56 }
 0x1bc   : > { %v3076_v24 = vadd.f32 %v3075_v41, %v3074_v63  ;;  %v2879_v53 = vadd.f32 %v2878_v1, %v2877_v19 }
 0x1be   : > { %v3078_v8 = vadd.f32 %v3077_v38, %v3076_v24 }
 0x1bf   : > { %v3697_v5 = vpop.f32.mrb[4].mxu0 }
 0x1c0   : > { %v2322_v31 = vadd.f32 %v3697_v5, %v6551_v28  ;;  %v2313_v3 = vpop.f32.mrb[5].mxu0 }
 0x1c1   : > { %v2314_v54 = vadd.f32 %v6551_v28, %v2313_v3  ;;  %v3698_v32 = vpop.f32.mrb[6].mxu0 }
 0x1c2   : > { %v3539_v7 = vpack.c.bf16 %v2322_v31, %v2322_v31  ;;  %v2325_v40 = vadd.f32 %v3698_v32, %v6551_v28  ;;  %v2316_v13 = vpop.f32.mrb[7].mxu0  ;;  %v3014_v14 = vmul.f32 %v2322_v31, %v2322_v31  ;;  %v2884_v35 = vsel %vm1762_vm6, %v2322_v31, 0.0 }
 0x1c3   : > { %v3537_v4 = vpack.c.bf16 %v2314_v54, %v2314_v54  ;;  %v2880_v36 = vsel %vm1762_vm6, %v2314_v54, 0.0  ;;  %v3012_v33 = vmul.f32 %v2314_v54, %v2314_v54  ;;  %v2317_v23 = vadd.f32 %v6551_v28, %v2316_v13 }
 0x1c4   : > { %2815 = vst.msk [vmem:[%s6558_s21 + $0x18] sm:$0xf] %vm2808_vm12, %v3539_v7  ;;  %v2881_v2 = vadd.f32 %v2880_v36, %v2879_v53  ;;  %v3540_v27 = vpack.c.bf16 %v2325_v40, %v2325_v40  ;;  %v3015_v50 = vmul.f32 %v2325_v40, %v2325_v40  ;;  %v2886_v59 = vsel %vm1762_vm6, %v2325_v40, 0.0 }
 0x1c5   : > { %2813 = vst.msk [vmem:[%s6558_s21 + $0x10] sm:$0xf] %vm2808_vm12, %v3537_v4  ;;  %v3079_v10 = vsel %vm1762_vm6, %v3012_v33, 0.0  ;;  %v3538_v58 = vpack.c.bf16 %v2317_v23, %v2317_v23  ;;  %v2882_v37 = vsel %vm1762_vm6, %v2317_v23, 0.0  ;;  %v3013_v39 = vmul.f32 %v2317_v23, %v2317_v23 }
 0x1c6   : > { %v3080_v12 = vadd.f32 %v3079_v10, %v3078_v8  ;;  %2816 = vst.msk [vmem:[%s6558_s21 + $0x1c] sm:$0xf] %vm2808_vm12, %v3540_v27  ;;  %v2883_v45 = vadd.f32 %v2882_v37, %v2881_v2  ;;  %v3083_v42 = vsel %vm1762_vm6, %v3014_v14, 0.0  ;;  %v3085_v34 = vsel %vm1762_vm6, %v3015_v50, 0.0 }
 0x1c7   : > { %2814 = vst.msk [vmem:[%s6558_s21 + $0x14] sm:$0xf] %vm2808_vm12, %v3538_v58  ;;  %v3081_v26 = vsel %vm1762_vm6, %v3013_v39, 0.0 }
 0x1c8   : > { %v2885_v0 = vadd.f32 %v2884_v35, %v2883_v45  ;;  %v3082_v62 = vadd.f32 %v3081_v26, %v3080_v12 }
 0x1c9   : > { %v3701_v30 = vpop.f32.mrb[8].mxu0 }
 0x1ca   : > { %v2887_v20 = vadd.f32 %v2886_v59, %v2885_v0  ;;  %v3084_v22 = vadd.f32 %v3083_v42, %v3082_v62  ;;  %v2338_v51 = vadd.f32 %v3701_v30, %v6551_v28  ;;  %v2329_v21 = vpop.f32.mrb[9].mxu0 }
 0x1cb   : > { %v2330_v43 = vadd.f32 %v6551_v28, %v2329_v21  ;;  %v3702_v60 = vpop.f32.mrb[10].mxu0 }
 0x1cc   : > { %v3086_v47 = vadd.f32 %v3085_v34, %v3084_v22  ;;  %v3543_v46 = vpack.c.bf16 %v2338_v51, %v2338_v51  ;;  %v2341_v49 = vadd.f32 %v3702_v60, %v6551_v28  ;;  %v2332_v15 = vpop.f32.mrb[11].mxu0  ;;  %v3018_v55 = vmul.f32 %v2338_v51, %v2338_v51 }
 0x1cd   : > { %v3541_v57 = vpack.c.bf16 %v2330_v43, %v2330_v43  ;;  %v2888_v44 = vsel %vm1762_vm6, %v2330_v43, 0.0  ;;  %v3016_v11 = vmul.f32 %v2330_v43, %v2330_v43  ;;  %v2333_v9 = vadd.f32 %v6551_v28, %v2332_v15 }
 0x1ce   : > { %2819 = vst.msk [vmem:[%s6558_s21 + $0x28] sm:$0xf] %vm2808_vm12, %v3543_v46  ;;  %v2889_v25 = vadd.f32 %v2888_v44, %v2887_v20  ;;  %v3544_v52 = vpack.c.bf16 %v2341_v49, %v2341_v49  ;;  %v2892_v17 = vsel %vm1762_vm6, %v2338_v51, 0.0  ;;  %v3019_v61 = vmul.f32 %v2341_v49, %v2341_v49 }
 0x1cf   : > { %2817 = vst.msk [vmem:[%s6558_s21 + $0x20] sm:$0xf] %vm2808_vm12, %v3541_v57  ;;  %v3087_v29 = vsel %vm1762_vm6, %v3016_v11, 0.0  ;;  %v3542_v18 = vpack.c.bf16 %v2333_v9, %v2333_v9  ;;  %v2890_v6 = vsel %vm1762_vm6, %v2333_v9, 0.0  ;;  %v3017_v56 = vmul.f32 %v2333_v9, %v2333_v9 }
 0x1d0   : > { %v3088_v16 = vadd.f32 %v3087_v29, %v3086_v47  ;;  %2820 = vst.msk [vmem:[%s6558_s21 + $0x2c] sm:$0xf] %vm2808_vm12, %v3544_v52  ;;  %v2891_v48 = vadd.f32 %v2890_v6, %v2889_v25  ;;  %v2894_v41 = vsel %vm1762_vm6, %v2341_v49, 0.0  ;;  %v3091_v24 = vsel %vm1762_vm6, %v3018_v55, 0.0 }
 0x1d1   : > { %2818 = vst.msk [vmem:[%s6558_s21 + $0x24] sm:$0xf] %vm2808_vm12, %v3542_v18  ;;  %v3089_v63 = vsel %vm1762_vm6, %v3017_v56, 0.0  ;;  %v3093_v8 = vsel %vm1762_vm6, %v3019_v61, 0.0 }
 0x1d2   : > { %v2893_v19 = vadd.f32 %v2892_v17, %v2891_v48  ;;  %v3090_v1 = vadd.f32 %v3089_v63, %v3088_v16 }
 0x1d4   : > { %v2895_v53 = vadd.f32 %v2894_v41, %v2893_v19  ;;  %v3092_v38 = vadd.f32 %v3091_v24, %v3090_v1 }
 0x1d5   : > { %v3705_v5 = vpop.f32.mrb[12].mxu0 }
 0x1d6   : > { %v2354_v31 = vadd.f32 %v3705_v5, %v6551_v28  ;;  %v2345_v3 = vpop.f32.mrb[13].mxu0  ;;  %v3094_v32 = vadd.f32 %v3093_v8, %v3092_v38 }
 0x1d7   : > { %v2346_v54 = vadd.f32 %v6551_v28, %v2345_v3  ;;  %v3706_v7 = vpop.f32.mrb[14].mxu0 }
 0x1d8   : > { %v3547_v40 = vpack.c.bf16 %v2354_v31, %v2354_v31  ;;  %v2357_v13 = vadd.f32 %v3706_v7, %v6551_v28  ;;  %v2348_v4 = vpop.f32.mrb[15].mxu0  ;;  %v3022_v12 = vmul.f32 %v2354_v31, %v2354_v31  ;;  %v2900_v50 = vsel %vm1762_vm6, %v2354_v31, 0.0 }
 0x1d9   : > { %v3545_v36 = vpack.c.bf16 %v2346_v54, %v2346_v54  ;;  %v2896_v33 = vsel %vm1762_vm6, %v2346_v54, 0.0  ;;  %v3020_v23 = vmul.f32 %v2346_v54, %v2346_v54  ;;  %v2349_v2 = vadd.f32 %v6551_v28, %v2348_v4 }
 0x1da   : > { %2823 = vst.msk [vmem:[%s6558_s21 + $0x38] sm:$0xf] %vm2808_vm12, %v3547_v40  ;;  %v2897_v27 = vadd.f32 %v2896_v33, %v2895_v53  ;;  %v3548_v10 = vpack.c.bf16 %v2357_v13, %v2357_v13  ;;  %v3023_v0 = vmul.f32 %v2357_v13, %v2357_v13  ;;  %v2902_v62 = vsel %vm1762_vm6, %v2357_v13, 0.0 }
 0x1db   : > { %2821 = vst.msk [vmem:[%s6558_s21 + $0x30] sm:$0xf] %vm2808_vm12, %v3545_v36  ;;  %v3095_v58 = vsel %vm1762_vm6, %v3020_v23, 0.0  ;;  %v3546_v37 = vpack.c.bf16 %v2349_v2, %v2349_v2  ;;  %v2898_v14 = vsel %vm1762_vm6, %v2349_v2, 0.0  ;;  %v3021_v35 = vmul.f32 %v2349_v2, %v2349_v2 }
 0x1dc   : > { %v3096_v45 = vadd.f32 %v3095_v58, %v3094_v32  ;;  %2824 = vst.msk [vmem:[%s6558_s21 + $0x3c] sm:$0xf] %vm2808_vm12, %v3548_v10  ;;  %v2899_v39 = vadd.f32 %v2898_v14, %v2897_v27  ;;  %v3099_v20 = vsel %vm1762_vm6, %v3022_v12, 0.0  ;;  %v3101_v51 = vsel %vm1762_vm6, %v3023_v0, 0.0 }
 0x1dd   : > { %2822 = vst.msk [vmem:[%s6558_s21 + $0x34] sm:$0xf] %vm2808_vm12, %v3546_v37  ;;  %v3097_v59 = vsel %vm1762_vm6, %v3021_v35, 0.0 }
 0x1de   : > { %v2901_v26 = vadd.f32 %v2900_v50, %v2899_v39  ;;  %v3098_v42 = vadd.f32 %v3097_v59, %v3096_v45 }
 0x1e0   : > { %v2903_v22 = vadd.f32 %v2902_v62, %v2901_v26  ;;  %v3100_v30 = vadd.f32 %v3099_v20, %v3098_v42 }
 0x1e1   : > { %v3709_v34 = vpop.f32.mrb[16].mxu0 }
 0x1e2   : > { %v2370_v21 = vadd.f32 %v3709_v34, %v6551_v28  ;;  %v2361_v43 = vpop.f32.mrb[17].mxu0  ;;  %v3102_v60 = vadd.f32 %v3101_v51, %v3100_v30 }
 0x1e3   : > { %v2362_v47 = vadd.f32 %v6551_v28, %v2361_v43  ;;  %v3710_v46 = vpop.f32.mrb[18].mxu0 }
 0x1e4   : > { %v3551_v49 = vpack.c.bf16 %v2370_v21, %v2370_v21  ;;  %v2373_v15 = vadd.f32 %v3710_v46, %v6551_v28  ;;  %v2364_v57 = vpop.f32.mrb[19].mxu0  ;;  %v3026_v16 = vmul.f32 %v2370_v21, %v2370_v21  ;;  %v2908_v61 = vsel %vm1762_vm6, %v2370_v21, 0.0 }
 0x1e5   : > { %v3549_v44 = vpack.c.bf16 %v2362_v47, %v2362_v47  ;;  %v2904_v11 = vsel %vm1762_vm6, %v2362_v47, 0.0  ;;  %v3024_v9 = vmul.f32 %v2362_v47, %v2362_v47  ;;  %v2365_v25 = vadd.f32 %v6551_v28, %v2364_v57 }
 0x1e6   : > { %2827 = vst.msk [vmem:[%s6558_s21 + $0x48] sm:$0xf] %vm2808_vm12, %v3551_v49  ;;  %v2905_v52 = vadd.f32 %v2904_v11, %v2903_v22  ;;  %v3552_v29 = vpack.c.bf16 %v2373_v15, %v2373_v15  ;;  %v3027_v19 = vmul.f32 %v2373_v15, %v2373_v15  ;;  %v2910_v1 = vsel %vm1762_vm6, %v2373_v15, 0.0 }
 0x1e7   : > { %2825 = vst.msk [vmem:[%s6558_s21 + $0x40] sm:$0xf] %vm2808_vm12, %v3549_v44  ;;  %v3103_v18 = vsel %vm1762_vm6, %v3024_v9, 0.0  ;;  %v3550_v6 = vpack.c.bf16 %v2365_v25, %v2365_v25  ;;  %v2906_v55 = vsel %vm1762_vm6, %v2365_v25, 0.0  ;;  %v3025_v17 = vmul.f32 %v2365_v25, %v2365_v25 }
 0x1e8   : > { %v3104_v48 = vadd.f32 %v3103_v18, %v3102_v60  ;;  %2828 = vst.msk [vmem:[%s6558_s21 + $0x4c] sm:$0xf] %vm2808_vm12, %v3552_v29  ;;  %v2907_v56 = vadd.f32 %v2906_v55, %v2905_v52  ;;  %v3107_v53 = vsel %vm1762_vm6, %v3026_v16, 0.0  ;;  %v3109_v31 = vsel %vm1762_vm6, %v3027_v19, 0.0 }
 0x1e9   : > { %2826 = vst.msk [vmem:[%s6558_s21 + $0x44] sm:$0xf] %vm2808_vm12, %v3550_v6  ;;  %v3105_v41 = vsel %vm1762_vm6, %v3025_v17, 0.0 }
 0x1ea   : > { %v2909_v63 = vadd.f32 %v2908_v61, %v2907_v56  ;;  %v3106_v24 = vadd.f32 %v3105_v41, %v3104_v48 }
 0x1ec   : > { %v2911_v38 = vadd.f32 %v2910_v1, %v2909_v63  ;;  %v3108_v5 = vadd.f32 %v3107_v53, %v3106_v24 }
 0x1ed   : > { %v3713_v8 = vpop.f32.mrb[20].mxu0 }
 0x1ee   : > { %v2386_v3 = vadd.f32 %v3713_v8, %v6551_v28  ;;  %v2377_v54 = vpop.f32.mrb[21].mxu0  ;;  %v3110_v7 = vadd.f32 %v3109_v31, %v3108_v5 }
 0x1ef   : > { %v2378_v32 = vadd.f32 %v6551_v28, %v2377_v54  ;;  %v3714_v40 = vpop.f32.mrb[22].mxu0 }
 0x1f0   : > { %v3555_v13 = vpack.c.bf16 %v2386_v3, %v2386_v3  ;;  %v2389_v4 = vadd.f32 %v3714_v40, %v6551_v28  ;;  %v2380_v36 = vpop.f32.mrb[23].mxu0  ;;  %v3030_v45 = vmul.f32 %v2386_v3, %v2386_v3  ;;  %v2916_v0 = vsel %vm1762_vm6, %v2386_v3, 0.0 }
 0x1f1   : > { %v3553_v33 = vpack.c.bf16 %v2378_v32, %v2378_v32  ;;  %v2912_v23 = vsel %vm1762_vm6, %v2378_v32, 0.0  ;;  %v3028_v2 = vmul.f32 %v2378_v32, %v2378_v32  ;;  %v2381_v27 = vadd.f32 %v6551_v28, %v2380_v36 }
 0x1f2   : > { %2831 = vst.msk [vmem:[%s6558_s21 + $0x58] sm:$0xf] %vm2808_vm12, %v3555_v13  ;;  %v2913_v10 = vadd.f32 %v2912_v23, %v2911_v38  ;;  %v3556_v58 = vpack.c.bf16 %v2389_v4, %v2389_v4  ;;  %v3031_v26 = vmul.f32 %v2389_v4, %v2389_v4  ;;  %v2918_v42 = vsel %vm1762_vm6, %v2389_v4, 0.0 }
 0x1f3   : > { %2829 = vst.msk [vmem:[%s6558_s21 + $0x50] sm:$0xf] %vm2808_vm12, %v3553_v33  ;;  %v3111_v37 = vsel %vm1762_vm6, %v3028_v2, 0.0  ;;  %v3554_v14 = vpack.c.bf16 %v2381_v27, %v2381_v27  ;;  %v2914_v12 = vsel %vm1762_vm6, %v2381_v27, 0.0  ;;  %v3029_v50 = vmul.f32 %v2381_v27, %v2381_v27 }
 0x1f4   : > { %v3112_v39 = vadd.f32 %v3111_v37, %v3110_v7  ;;  %2832 = vst.msk [vmem:[%s6558_s21 + $0x5c] sm:$0xf] %vm2808_vm12, %v3556_v58  ;;  %v2915_v35 = vadd.f32 %v2914_v12, %v2913_v10  ;;  %v3115_v22 = vsel %vm1762_vm6, %v3030_v45, 0.0  ;;  %v3117_v21 = vsel %vm1762_vm6, %v3031_v26, 0.0 }
 0x1f5   : > { %2830 = vst.msk [vmem:[%s6558_s21 + $0x54] sm:$0xf] %vm2808_vm12, %v3554_v14  ;;  %v3113_v62 = vsel %vm1762_vm6, %v3029_v50, 0.0 }
 0x1f6   : > { %v2917_v59 = vadd.f32 %v2916_v0, %v2915_v35  ;;  %v3114_v20 = vadd.f32 %v3113_v62, %v3112_v39 }
 0x1f8   : > { %v2919_v30 = vadd.f32 %v2918_v42, %v2917_v59  ;;  %v3116_v34 = vadd.f32 %v3115_v22, %v3114_v20 }
 0x1f9   : > { %v3717_v51 = vpop.f32.mrb[24].mxu0 }
 0x1fa   : > { %v2402_v43 = vadd.f32 %v3717_v51, %v6551_v28  ;;  %v2393_v47 = vpop.f32.mrb[25].mxu0  ;;  %v3118_v46 = vadd.f32 %v3117_v21, %v3116_v34 }
 0x1fb   : > { %v2394_v60 = vadd.f32 %v6551_v28, %v2393_v47  ;;  %v3718_v49 = vpop.f32.mrb[26].mxu0 }
 0x1fc   : > { %v3559_v15 = vpack.c.bf16 %v2402_v43, %v2402_v43  ;;  %v2405_v57 = vadd.f32 %v3718_v49, %v6551_v28  ;;  %v2396_v44 = vpop.f32.mrb[27].mxu0  ;;  %v3034_v48 = vmul.f32 %v2402_v43, %v2402_v43  ;;  %v2924_v19 = vsel %vm1762_vm6, %v2402_v43, 0.0 }
 0x1fd   : > { %v3557_v11 = vpack.c.bf16 %v2394_v60, %v2394_v60  ;;  %v2920_v9 = vsel %vm1762_vm6, %v2394_v60, 0.0  ;;  %v3032_v25 = vmul.f32 %v2394_v60, %v2394_v60  ;;  %v2397_v52 = vadd.f32 %v6551_v28, %v2396_v44 }
 0x1fe   : > { %2835 = vst.msk [vmem:[%s6558_s21 + $0x68] sm:$0xf] %vm2808_vm12, %v3559_v15  ;;  %v2921_v29 = vadd.f32 %v2920_v9, %v2919_v30  ;;  %v3560_v18 = vpack.c.bf16 %v2405_v57, %v2405_v57  ;;  %v3035_v63 = vmul.f32 %v2405_v57, %v2405_v57  ;;  %v2926_v24 = vsel %vm1762_vm6, %v2405_v57, 0.0 }
 0x1ff   : > { %2833 = vst.msk [vmem:[%s6558_s21 + $0x60] sm:$0xf] %vm2808_vm12, %v3557_v11  ;;  %v3119_v6 = vsel %vm1762_vm6, %v3032_v25, 0.0  ;;  %v3558_v55 = vpack.c.bf16 %v2397_v52, %v2397_v52  ;;  %v2922_v16 = vsel %vm1762_vm6, %v2397_v52, 0.0  ;;  %v3033_v61 = vmul.f32 %v2397_v52, %v2397_v52 }
 0x200   : > { %v3120_v56 = vadd.f32 %v3119_v6, %v3118_v46  ;;  %2836 = vst.msk [vmem:[%s6558_s21 + $0x6c] sm:$0xf] %vm2808_vm12, %v3560_v18  ;;  %v2923_v17 = vadd.f32 %v2922_v16, %v2921_v29  ;;  %v3123_v38 = vsel %vm1762_vm6, %v3034_v48, 0.0  ;;  %v3125_v3 = vsel %vm1762_vm6, %v3035_v63, 0.0 }
 0x201   : > { %2834 = vst.msk [vmem:[%s6558_s21 + $0x64] sm:$0xf] %vm2808_vm12, %v3558_v55  ;;  %v3121_v1 = vsel %vm1762_vm6, %v3033_v61, 0.0 }
 0x202   : > { %v2925_v41 = vadd.f32 %v2924_v19, %v2923_v17  ;;  %v3122_v53 = vadd.f32 %v3121_v1, %v3120_v56 }
 0x204   : > { %v2927_v5 = vadd.f32 %v2926_v24, %v2925_v41  ;;  %v3124_v8 = vadd.f32 %v3123_v38, %v3122_v53 }
 0x205   : > { %v3721_v31 = vpop.f32.mrb[28].mxu0 }
 0x206   : > { %v2418_v54 = vadd.f32 %v3721_v31, %v6551_v28  ;;  %v2409_v32 = vpop.f32.mrb[29].mxu0  ;;  %v3126_v40 = vadd.f32 %v3125_v3, %v3124_v8 }
 0x207   : > { %v2410_v7 = vadd.f32 %v6551_v28, %v2409_v32  ;;  %v3722_v13 = vpop.f32.mrb[30].mxu0 }
 0x208   : > { %v3563_v4 = vpack.c.bf16 %v2418_v54, %v2418_v54  ;;  %v2421_v36 = vadd.f32 %v3722_v13, %v6551_v28  ;;  %v2412_v33 = vpop.f32.mrb[31].mxu0  ;;  %v3038_v39 = vmul.f32 %v2418_v54, %v2418_v54  ;;  %v2932_v26 = vsel %vm1762_vm6, %v2418_v54, 0.0 }
 0x209   : > { %v3561_v23 = vpack.c.bf16 %v2410_v7, %v2410_v7  ;;  %v2928_v2 = vsel %vm1762_vm6, %v2410_v7, 0.0  ;;  %v3036_v27 = vmul.f32 %v2410_v7, %v2410_v7  ;;  %v2413_v10 = vadd.f32 %v6551_v28, %v2412_v33 }
 0x20a   : > { %2839 = vst.msk [vmem:[%s6558_s21 + $0x78] sm:$0xf] %vm2808_vm12, %v3563_v4  ;;  %v2929_v58 = vadd.f32 %v2928_v2, %v2927_v5  ;;  %v3564_v37 = vpack.c.bf16 %v2421_v36, %v2421_v36  ;;  %v3039_v59 = vmul.f32 %v2421_v36, %v2421_v36  ;;  %v2934_v20 = vsel %vm1762_vm6, %v2421_v36, 0.0 }
 0x20b   : > { %2837 = vst.msk [vmem:[%s6558_s21 + $0x70] sm:$0xf] %vm2808_vm12, %v3561_v23  ;;  %v3127_v14 = vsel %vm1762_vm6, %v3036_v27, 0.0  ;;  %v3562_v12 = vpack.c.bf16 %v2413_v10, %v2413_v10  ;;  %v2930_v45 = vsel %vm1762_vm6, %v2413_v10, 0.0  ;;  %v3037_v0 = vmul.f32 %v2413_v10, %v2413_v10 }
 0x20c   : > { %v3128_v35 = vadd.f32 %v3127_v14, %v3126_v40  ;;  %2840 = vst.msk [vmem:[%s6558_s21 + $0x7c] sm:$0xf] %vm2808_vm12, %v3564_v37  ;;  %v2931_v50 = vadd.f32 %v2930_v45, %v2929_v58  ;;  %v3131_v30 = vsel %vm1762_vm6, %v3038_v39, 0.0  ;;  %v3133_v21 = vsel %vm1762_vm6, %v3039_v59, 0.0 }
 0x20d   : > { %2838 = vst.msk [vmem:[%s6558_s21 + $0x74] sm:$0xf] %vm2808_vm12, %v3562_v12  ;;  %v3129_v42 = vsel %vm1762_vm6, %v3037_v0, 0.0 }
 0x20e   : > { %v2933_v62 = vadd.f32 %v2932_v26, %v2931_v50  ;;  %v3130_v22 = vadd.f32 %v3129_v42, %v3128_v35 }
 0x210   : > { %v2935_v34 = vadd.f32 %v2934_v20, %v2933_v62  ;;  %v3132_v51 = vadd.f32 %v3131_v30, %v3130_v22 }
 0x212   : > { %v3725_v43 = vpop.f32.mrb[0].mxu1  ;;  %v3134_v46 = vadd.f32 %v3133_v21, %v3132_v51 }
 0x213   : > { %v2434_v47 = vadd.f32 %v3725_v43, %v6551_v28  ;;  %v2425_v60 = vpop.f32.mrb[1].mxu1 }
 0x214   : > { %v2426_v49 = vadd.f32 %v6551_v28, %v2425_v60  ;;  %v3726_v15 = vpop.f32.mrb[2].mxu1 }
 0x215   : > { %v3567_v57 = vpack.c.bf16 %v2434_v47, %v2434_v47  ;;  %v2437_v44 = vadd.f32 %v3726_v15, %v6551_v28  ;;  %v2428_v11 = vpop.f32.mrb[3].mxu1  ;;  %v3042_v56 = vmul.f32 %v2434_v47, %v2434_v47  ;;  %v2940_v63 = vsel %vm1762_vm6, %v2434_v47, 0.0 }
 0x216   : > { %v3565_v9 = vpack.c.bf16 %v2426_v49, %v2426_v49  ;;  %v2936_v25 = vsel %vm1762_vm6, %v2426_v49, 0.0  ;;  %v3040_v52 = vmul.f32 %v2426_v49, %v2426_v49  ;;  %v2429_v29 = vadd.f32 %v6551_v28, %v2428_v11 }
 0x217   : > { %2843 = vst.msk [vmem:[%s6558_s21 + $0x88] sm:$0xf] %vm2808_vm12, %v3567_v57  ;;  %v2937_v18 = vadd.f32 %v2936_v25, %v2935_v34  ;;  %v3568_v6 = vpack.c.bf16 %v2437_v44, %v2437_v44  ;;  %v3043_v41 = vmul.f32 %v2437_v44, %v2437_v44  ;;  %v2942_v53 = vsel %vm1762_vm6, %v2437_v44, 0.0 }
 0x218   : > { %2841 = vst.msk [vmem:[%s6558_s21 + $0x80] sm:$0xf] %vm2808_vm12, %v3565_v9  ;;  %v3135_v55 = vsel %vm1762_vm6, %v3040_v52, 0.0  ;;  %v3566_v16 = vpack.c.bf16 %v2429_v29, %v2429_v29  ;;  %v2938_v48 = vsel %vm1762_vm6, %v2429_v29, 0.0  ;;  %v3041_v19 = vmul.f32 %v2429_v29, %v2429_v29 }
 0x219   : > { %v3136_v17 = vadd.f32 %v3135_v55, %v3134_v46  ;;  %2844 = vst.msk [vmem:[%s6558_s21 + $0x8c] sm:$0xf] %vm2808_vm12, %v3568_v6  ;;  %v2939_v61 = vadd.f32 %v2938_v48, %v2937_v18  ;;  %v3139_v5 = vsel %vm1762_vm6, %v3042_v56, 0.0  ;;  %v3141_v3 = vsel %vm1762_vm6, %v3043_v41, 0.0 }
 0x21a   : > { %2842 = vst.msk [vmem:[%s6558_s21 + $0x84] sm:$0xf] %vm2808_vm12, %v3566_v16  ;;  %v3137_v24 = vsel %vm1762_vm6, %v3041_v19, 0.0 }
 0x21b   : > { %v2941_v1 = vadd.f32 %v2940_v63, %v2939_v61  ;;  %v3138_v38 = vadd.f32 %v3137_v24, %v3136_v17 }
 0x21d   : > { %v2943_v8 = vadd.f32 %v2942_v53, %v2941_v1  ;;  %v3140_v31 = vadd.f32 %v3139_v5, %v3138_v38 }
 0x21f   : > { %v3142_v40 = vadd.f32 %v3141_v3, %v3140_v31 }
 0x220   : > { %v3729_v54 = vpop.f32.mrb[4].mxu1 }
 0x221   : > { %v2450_v32 = vadd.f32 %v3729_v54, %v6551_v28  ;;  %v2441_v7 = vpop.f32.mrb[5].mxu1 }
 0x222   : > { %v2442_v13 = vadd.f32 %v6551_v28, %v2441_v7  ;;  %v3730_v4 = vpop.f32.mrb[6].mxu1 }
 0x223   : > { %v3571_v36 = vpack.c.bf16 %v2450_v32, %v2450_v32  ;;  %v2453_v33 = vadd.f32 %v3730_v4, %v6551_v28  ;;  %v2444_v23 = vpop.f32.mrb[7].mxu1  ;;  %v3046_v35 = vmul.f32 %v2450_v32, %v2450_v32  ;;  %v2948_v59 = vsel %vm1762_vm6, %v2450_v32, 0.0 }
 0x224   : > { %v3569_v2 = vpack.c.bf16 %v2442_v13, %v2442_v13  ;;  %v2944_v27 = vsel %vm1762_vm6, %v2442_v13, 0.0  ;;  %v3044_v10 = vmul.f32 %v2442_v13, %v2442_v13  ;;  %v2445_v58 = vadd.f32 %v6551_v28, %v2444_v23 }
 0x225   : > { %2847 = vst.msk [vmem:[%s6558_s21 + $0x98] sm:$0xf] %vm2808_vm12, %v3571_v36  ;;  %v2945_v37 = vadd.f32 %v2944_v27, %v2943_v8  ;;  %v3572_v14 = vpack.c.bf16 %v2453_v33, %v2453_v33  ;;  %v3047_v62 = vmul.f32 %v2453_v33, %v2453_v33  ;;  %v2950_v22 = vsel %vm1762_vm6, %v2453_v33, 0.0 }
 0x226   : > { %2845 = vst.msk [vmem:[%s6558_s21 + $0x90] sm:$0xf] %vm2808_vm12, %v3569_v2  ;;  %v3143_v12 = vsel %vm1762_vm6, %v3044_v10, 0.0  ;;  %v3570_v45 = vpack.c.bf16 %v2445_v58, %v2445_v58  ;;  %v2946_v39 = vsel %vm1762_vm6, %v2445_v58, 0.0  ;;  %v3045_v26 = vmul.f32 %v2445_v58, %v2445_v58 }
 0x227   : > { %v3144_v50 = vadd.f32 %v3143_v12, %v3142_v40  ;;  %2848 = vst.msk [vmem:[%s6558_s21 + $0x9c] sm:$0xf] %vm2808_vm12, %v3572_v14  ;;  %v2947_v0 = vadd.f32 %v2946_v39, %v2945_v37  ;;  %v3147_v34 = vsel %vm1762_vm6, %v3046_v35, 0.0  ;;  %v3149_v43 = vsel %vm1762_vm6, %v3047_v62, 0.0 }
 0x228   : > { %2846 = vst.msk [vmem:[%s6558_s21 + $0x94] sm:$0xf] %vm2808_vm12, %v3570_v45  ;;  %v3145_v20 = vsel %vm1762_vm6, %v3045_v26, 0.0 }
 0x229   : > { %v2949_v42 = vadd.f32 %v2948_v59, %v2947_v0  ;;  %v3146_v30 = vadd.f32 %v3145_v20, %v3144_v50 }
 0x22b   : > { %v2951_v51 = vadd.f32 %v2950_v22, %v2949_v42  ;;  %v3148_v21 = vadd.f32 %v3147_v34, %v3146_v30 }
 0x22d   : > { %v3150_v47 = vadd.f32 %v3149_v43, %v3148_v21 }
 0x22e   : > { %v3733_v60 = vpop.f32.mrb[8].mxu1 }
 0x22f   : > { %v2466_v46 = vadd.f32 %v3733_v60, %v6551_v28  ;;  %v2457_v49 = vpop.f32.mrb[9].mxu1 }
 0x230   : > { %v2458_v15 = vadd.f32 %v6551_v28, %v2457_v49  ;;  %v3734_v57 = vpop.f32.mrb[10].mxu1 }
 0x231   : > { %v3575_v44 = vpack.c.bf16 %v2466_v46, %v2466_v46  ;;  %v2469_v11 = vadd.f32 %v3734_v57, %v6551_v28  ;;  %v2460_v9 = vpop.f32.mrb[11].mxu1  ;;  %v3050_v17 = vmul.f32 %v2466_v46, %v2466_v46  ;;  %v2956_v41 = vsel %vm1762_vm6, %v2466_v46, 0.0 }
 0x232   : > { %v3573_v25 = vpack.c.bf16 %v2458_v15, %v2458_v15  ;;  %v2952_v52 = vsel %vm1762_vm6, %v2458_v15, 0.0  ;;  %v3048_v29 = vmul.f32 %v2458_v15, %v2458_v15  ;;  %v2461_v18 = vadd.f32 %v6551_v28, %v2460_v9 }
 0x233   : > { %2851 = vst.msk [vmem:[%s6558_s21 + $0xa8] sm:$0xf] %vm2808_vm12, %v3575_v44  ;;  %v2953_v6 = vadd.f32 %v2952_v52, %v2951_v51  ;;  %v3576_v55 = vpack.c.bf16 %v2469_v11, %v2469_v11  ;;  %v3051_v1 = vmul.f32 %v2469_v11, %v2469_v11  ;;  %v2958_v38 = vsel %vm1762_vm6, %v2469_v11, 0.0 }
 0x234   : > { %2849 = vst.msk [vmem:[%s6558_s21 + $0xa0] sm:$0xf] %vm2808_vm12, %v3573_v25  ;;  %v3151_v16 = vsel %vm1762_vm6, %v3048_v29, 0.0  ;;  %v3574_v48 = vpack.c.bf16 %v2461_v18, %v2461_v18  ;;  %v2954_v56 = vsel %vm1762_vm6, %v2461_v18, 0.0  ;;  %v3049_v63 = vmul.f32 %v2461_v18, %v2461_v18 }
 0x235   : > { %v3152_v61 = vadd.f32 %v3151_v16, %v3150_v47  ;;  %2852 = vst.msk [vmem:[%s6558_s21 + $0xac] sm:$0xf] %vm2808_vm12, %v3576_v55  ;;  %v2955_v19 = vadd.f32 %v2954_v56, %v2953_v6  ;;  %v3155_v8 = vsel %vm1762_vm6, %v3050_v17, 0.0  ;;  %v3157_v54 = vsel %vm1762_vm6, %v3051_v1, 0.0 }
 0x236   : > { %2850 = vst.msk [vmem:[%s6558_s21 + $0xa4] sm:$0xf] %vm2808_vm12, %v3574_v48  ;;  %v3153_v53 = vsel %vm1762_vm6, %v3049_v63, 0.0 }
 0x237   : > { %v2957_v24 = vadd.f32 %v2956_v41, %v2955_v19  ;;  %v3154_v5 = vadd.f32 %v3153_v53, %v3152_v61 }
 0x239   : > { %v2959_v31 = vadd.f32 %v2958_v38, %v2957_v24  ;;  %v3156_v3 = vadd.f32 %v3155_v8, %v3154_v5 }
 0x23b   : > { %v3158_v13 = vadd.f32 %v3157_v54, %v3156_v3 }
 0x23c   : > { %v3737_v32 = vpop.f32.mrb[12].mxu1 }
 0x23d   : > { %v2482_v7 = vadd.f32 %v3737_v32, %v6551_v28  ;;  %v2473_v40 = vpop.f32.mrb[13].mxu1 }
 0x23e   : > { %v2474_v4 = vadd.f32 %v6551_v28, %v2473_v40  ;;  %v3738_v36 = vpop.f32.mrb[14].mxu1 }
 0x23f   : > { %v3579_v33 = vpack.c.bf16 %v2482_v7, %v2482_v7  ;;  %v2485_v23 = vadd.f32 %v3738_v36, %v6551_v28  ;;  %v2476_v2 = vpop.f32.mrb[15].mxu1  ;;  %v3054_v50 = vmul.f32 %v2482_v7, %v2482_v7  ;;  %v2964_v62 = vsel %vm1762_vm6, %v2482_v7, 0.0 }
 0x240   : > { %v3577_v27 = vpack.c.bf16 %v2474_v4, %v2474_v4  ;;  %v2960_v10 = vsel %vm1762_vm6, %v2474_v4, 0.0  ;;  %v3052_v58 = vmul.f32 %v2474_v4, %v2474_v4  ;;  %v2477_v37 = vadd.f32 %v6551_v28, %v2476_v2 }
 0x241   : > { %2855 = vst.msk [vmem:[%s6558_s21 + $0xb8] sm:$0xf] %vm2808_vm12, %v3579_v33  ;;  %v2961_v14 = vadd.f32 %v2960_v10, %v2959_v31  ;;  %v3580_v12 = vpack.c.bf16 %v2485_v23, %v2485_v23  ;;  %v3055_v42 = vmul.f32 %v2485_v23, %v2485_v23  ;;  %v2966_v30 = vsel %vm1762_vm6, %v2485_v23, 0.0 }
 0x242   : > { %2853 = vst.msk [vmem:[%s6558_s21 + $0xb0] sm:$0xf] %vm2808_vm12, %v3577_v27  ;;  %v3159_v45 = vsel %vm1762_vm6, %v3052_v58, 0.0  ;;  %v3578_v39 = vpack.c.bf16 %v2477_v37, %v2477_v37  ;;  %v2962_v35 = vsel %vm1762_vm6, %v2477_v37, 0.0  ;;  %v3053_v59 = vmul.f32 %v2477_v37, %v2477_v37 }
 0x243   : > { %v3160_v0 = vadd.f32 %v3159_v45, %v3158_v13  ;;  %2856 = vst.msk [vmem:[%s6558_s21 + $0xbc] sm:$0xf] %vm2808_vm12, %v3580_v12  ;;  %v2963_v26 = vadd.f32 %v2962_v35, %v2961_v14  ;;  %v3163_v51 = vsel %vm1762_vm6, %v3054_v50, 0.0  ;;  %v3165_v47 = vsel %vm1762_vm6, %v3055_v42, 0.0 }
 0x244   : > { %2854 = vst.msk [vmem:[%s6558_s21 + $0xb4] sm:$0xf] %vm2808_vm12, %v3578_v39  ;;  %v3161_v22 = vsel %vm1762_vm6, %v3053_v59, 0.0 }
 0x245   : > { %v2965_v20 = vadd.f32 %v2964_v62, %v2963_v26  ;;  %v3162_v34 = vadd.f32 %v3161_v22, %v3160_v0 }
 0x247   : > { %v2967_v21 = vadd.f32 %v2966_v30, %v2965_v20  ;;  %v3164_v43 = vadd.f32 %v3163_v51, %v3162_v34 }
 0x249   : > { %v3166_v60 = vadd.f32 %v3165_v47, %v3164_v43 }
 0x24a   : > { %v3741_v46 = vpop.f32.mrb[16].mxu1 }
 0x24b   : > { %v2498_v49 = vadd.f32 %v3741_v46, %v6551_v28  ;;  %v2489_v15 = vpop.f32.mrb[17].mxu1 }
 0x24c   : > { %v2490_v57 = vadd.f32 %v6551_v28, %v2489_v15  ;;  %v3742_v44 = vpop.f32.mrb[18].mxu1 }
 0x24d   : > { %v3583_v11 = vpack.c.bf16 %v2498_v49, %v2498_v49  ;;  %v2501_v9 = vadd.f32 %v3742_v44, %v6551_v28  ;;  %v2492_v25 = vpop.f32.mrb[19].mxu1  ;;  %v3058_v61 = vmul.f32 %v2498_v49, %v2498_v49  ;;  %v2972_v1 = vsel %vm1762_vm6, %v2498_v49, 0.0 }
 0x24e   : > { %v3581_v52 = vpack.c.bf16 %v2490_v57, %v2490_v57  ;;  %v2968_v29 = vsel %vm1762_vm6, %v2490_v57, 0.0  ;;  %v3056_v18 = vmul.f32 %v2490_v57, %v2490_v57  ;;  %v2493_v6 = vadd.f32 %v6551_v28, %v2492_v25  ;;  %v4472_v25 = vld [vmem:[%s6897_s4] ss:$0 sm:$0xff] }
 0x24f   : > { %2859 = vst.msk [vmem:[%s6558_s21 + $0xc8] sm:$0xf] %vm2808_vm12, %v3583_v11  ;;  %v2969_v55 = vadd.f32 %v2968_v29, %v2967_v21  ;;  %v3584_v16 = vpack.c.bf16 %v2501_v9, %v2501_v9  ;;  %v3059_v24 = vmul.f32 %v2501_v9, %v2501_v9  ;;  %v2974_v5 = vsel %vm1762_vm6, %v2501_v9, 0.0 }
 0x250   : > { %2857 = vst.msk [vmem:[%s6558_s21 + $0xc0] sm:$0xf] %vm2808_vm12, %v3581_v52  ;;  %v3167_v48 = vsel %vm1762_vm6, %v3056_v18, 0.0  ;;  %v3582_v56 = vpack.c.bf16 %v2493_v6, %v2493_v6  ;;  %v2970_v17 = vsel %vm1762_vm6, %v2493_v6, 0.0  ;;  %v3057_v41 = vmul.f32 %v2493_v6, %v2493_v6 }
 0x251   : > { %v3168_v19 = vadd.f32 %v3167_v48, %v3166_v60  ;;  %2860 = vst.msk [vmem:[%s6558_s21 + $0xcc] sm:$0xf] %vm2808_vm12, %v3584_v16  ;;  %v2971_v63 = vadd.f32 %v2970_v17, %v2969_v55  ;;  %v3171_v31 = vsel %vm1762_vm6, %v3058_v61, 0.0  ;;  %v3173_v32 = vsel %vm1762_vm6, %v3059_v24, 0.0 }
 0x252   : > { %2858 = vst.msk [vmem:[%s6558_s21 + $0xc4] sm:$0xf] %vm2808_vm12, %v3582_v56  ;;  %v3169_v38 = vsel %vm1762_vm6, %v3057_v41, 0.0 }
 0x253   : > { %v2973_v53 = vadd.f32 %v2972_v1, %v2971_v63  ;;  %v3170_v8 = vadd.f32 %v3169_v38, %v3168_v19 }
 0x255   : > { %v2975_v3 = vadd.f32 %v2974_v5, %v2973_v53  ;;  %v3172_v54 = vadd.f32 %v3171_v31, %v3170_v8 }
 0x257   : > { %v3174_v4 = vadd.f32 %v3173_v32, %v3172_v54 }
 0x258   : > { %v3745_v7 = vpop.f32.mrb[20].mxu1 }
 0x259   : > { %v2514_v40 = vadd.f32 %v3745_v7, %v6551_v28  ;;  %v2505_v13 = vpop.f32.mrb[21].mxu1 }
 0x25a   : > { %v2506_v36 = vadd.f32 %v6551_v28, %v2505_v13  ;;  %v3746_v33 = vpop.f32.mrb[22].mxu1 }
 0x25b   : > { %v3587_v23 = vpack.c.bf16 %v2514_v40, %v2514_v40  ;;  %v2517_v2 = vadd.f32 %v3746_v33, %v6551_v28  ;;  %v2508_v27 = vpop.f32.mrb[23].mxu1  ;;  %v3062_v0 = vmul.f32 %v2514_v40, %v2514_v40  ;;  %v2980_v42 = vsel %vm1762_vm6, %v2514_v40, 0.0 }
 0x25c   : > { %v3585_v10 = vpack.c.bf16 %v2506_v36, %v2506_v36  ;;  %v2976_v58 = vsel %vm1762_vm6, %v2506_v36, 0.0  ;;  %v3060_v37 = vmul.f32 %v2506_v36, %v2506_v36  ;;  %v2509_v14 = vadd.f32 %v6551_v28, %v2508_v27 }
 0x25d   : > { %2863 = vst.msk [vmem:[%s6558_s21 + $0xd8] sm:$0xf] %vm2808_vm12, %v3587_v23  ;;  %v2977_v12 = vadd.f32 %v2976_v58, %v2975_v3  ;;  %v3588_v45 = vpack.c.bf16 %v2517_v2, %v2517_v2  ;;  %v3063_v20 = vmul.f32 %v2517_v2, %v2517_v2  ;;  %v2982_v34 = vsel %vm1762_vm6, %v2517_v2, 0.0 }
 0x25e   : > { %2861 = vst.msk [vmem:[%s6558_s21 + $0xd0] sm:$0xf] %vm2808_vm12, %v3585_v10  ;;  %v3175_v39 = vsel %vm1762_vm6, %v3060_v37, 0.0  ;;  %v3586_v35 = vpack.c.bf16 %v2509_v14, %v2509_v14  ;;  %v2978_v50 = vsel %vm1762_vm6, %v2509_v14, 0.0  ;;  %v3061_v62 = vmul.f32 %v2509_v14, %v2509_v14 }
 0x25f   : > { %v3176_v26 = vadd.f32 %v3175_v39, %v3174_v4  ;;  %2864 = vst.msk [vmem:[%s6558_s21 + $0xdc] sm:$0xf] %vm2808_vm12, %v3588_v45  ;;  %v2979_v59 = vadd.f32 %v2978_v50, %v2977_v12  ;;  %v3179_v21 = vsel %vm1762_vm6, %v3062_v0, 0.0  ;;  %v3181_v60 = vsel %vm1762_vm6, %v3063_v20, 0.0 }
 0x260   : > { %2862 = vst.msk [vmem:[%s6558_s21 + $0xd4] sm:$0xf] %vm2808_vm12, %v3586_v35  ;;  %v3177_v30 = vsel %vm1762_vm6, %v3061_v62, 0.0 }
 0x261   : > { %v2981_v22 = vadd.f32 %v2980_v42, %v2979_v59  ;;  %v3178_v51 = vadd.f32 %v3177_v30, %v3176_v26 }
 0x263   : > { %v2983_v43 = vadd.f32 %v2982_v34, %v2981_v22  ;;  %v3180_v47 = vadd.f32 %v3179_v21, %v3178_v51 }
 0x265   : > { %v3182_v46 = vadd.f32 %v3181_v60, %v3180_v47 }
 0x266   : > { %v3749_v49 = vpop.f32.mrb[24].mxu1 }
 0x267   : > { %v2530_v15 = vadd.f32 %v3749_v49, %v6551_v28  ;;  %v2521_v57 = vpop.f32.mrb[25].mxu1 }
 0x268   : > { %v2522_v44 = vadd.f32 %v6551_v28, %v2521_v57  ;;  %v3750_v11 = vpop.f32.mrb[26].mxu1 }
 0x269   : > { %v3591_v9 = vpack.c.bf16 %v2530_v15, %v2530_v15  ;;  %v2533_v52 = vadd.f32 %v4472_v25, %v3750_v11  ;;  %v2524_v29 = vpop.f32.mrb[27].mxu1  ;;  %v3066_v19 = vmul.f32 %v2530_v15, %v2530_v15  ;;  %v2988_v24 = vsel %vm1762_vm6, %v2530_v15, 0.0 }
 0x26a   : > { %v3589_v18 = vpack.c.bf16 %v2522_v44, %v2522_v44  ;;  %v2984_v6 = vsel %vm1762_vm6, %v2522_v44, 0.0  ;;  %v3064_v55 = vmul.f32 %v2522_v44, %v2522_v44  ;;  %v2525_v16 = vadd.f32 %v4472_v25, %v2524_v29 }
 0x26b   : > { %2867 = vst.msk [vmem:[%s6558_s21 + $0xe8] sm:$0xf] %vm2808_vm12, %v3591_v9  ;;  %v2985_v48 = vadd.f32 %v2984_v6, %v2983_v43  ;;  %v3592_v56 = vpack.c.bf16 %v2533_v52, %v2533_v52  ;;  %v3067_v53 = vmul.f32 %v2533_v52, %v2533_v52  ;;  %v2990_v8 = vsel %vm1762_vm6, %v2533_v52, 0.0 }
 0x26c   : > { %2865 = vst.msk [vmem:[%s6558_s21 + $0xe0] sm:$0xf] %vm2808_vm12, %v3589_v18  ;;  %v3183_v28 = vsel %vm1762_vm6, %v3064_v55, 0.0  ;;  %v3590_v17 = vpack.c.bf16 %v2525_v16, %v2525_v16  ;;  %v2986_v61 = vsel %vm1762_vm6, %v2525_v16, 0.0  ;;  %v3065_v1 = vmul.f32 %v2525_v16, %v2525_v16 }
 0x26d   : > { %v3184_v63 = vadd.f32 %v3183_v28, %v3182_v46  ;;  %2868 = vst.msk [vmem:[%s6558_s21 + $0xec] sm:$0xf] %vm2808_vm12, %v3592_v56  ;;  %v2987_v41 = vadd.f32 %v2986_v61, %v2985_v48  ;;  %v3187_v3 = vsel %vm1762_vm6, %v3066_v19, 0.0  ;;  %v3189_v7 = vsel %vm1762_vm6, %v3067_v53, 0.0 }
 0x26e   : > { %2866 = vst.msk [vmem:[%s6558_s21 + $0xe4] sm:$0xf] %vm2808_vm12, %v3590_v17  ;;  %v3185_v5 = vsel %vm1762_vm6, %v3065_v1, 0.0 }
 0x26f   : > { %v2989_v38 = vadd.f32 %v2988_v24, %v2987_v41  ;;  %v3186_v31 = vadd.f32 %v3185_v5, %v3184_v63 }
 0x271   : > { %v2991_v54 = vadd.f32 %v2990_v8, %v2989_v38  ;;  %v3188_v32 = vadd.f32 %v3187_v3, %v3186_v31 }
 0x273   : > { %v3190_v36 = vadd.f32 %v3189_v7, %v3188_v32 }
 0x274   : > { %v3753_v40 = vpop.f32.mrb[28].mxu1 }
 0x275   : > { %v2546_v13 = vadd.f32 %v4472_v25, %v3753_v40  ;;  %v2537_v4 = vpop.f32.mrb[29].mxu1 }
 0x276   : > { %v2538_v33 = vadd.f32 %v4472_v25, %v2537_v4  ;;  %v3754_v23 = vpop.f32.mrb[30].mxu1 }
 0x277   : > { %v3595_v2 = vpack.c.bf16 %v2546_v13, %v2546_v13  ;;  %v2549_v27 = vadd.f32 %v4472_v25, %v3754_v23  ;;  %v2540_v10 = vpop.f32.mrb[31].mxu1  ;;  %v3070_v26 = vmul.f32 %v2546_v13, %v2546_v13  ;;  %v2996_v20 = vsel %vm1762_vm6, %v2546_v13, 0.0 }
 0x278   : > { %v3593_v58 = vpack.c.bf16 %v2538_v33, %v2538_v33  ;;  %v2992_v37 = vsel %vm1762_vm6, %v2538_v33, 0.0  ;;  %v3068_v14 = vmul.f32 %v2538_v33, %v2538_v33  ;;  %v2541_v12 = vadd.f32 %v4472_v25, %v2540_v10 }
 0x279   : > { %2871 = vst.msk [vmem:[%s6558_s21 + $0xf8] sm:$0xf] %vm2808_vm12, %v3595_v2  ;;  %v2993_v45 = vadd.f32 %v2992_v37, %v2991_v54  ;;  %v3596_v39 = vpack.c.bf16 %v2549_v27, %v2549_v27  ;;  %v3071_v22 = vmul.f32 %v2549_v27, %v2549_v27  ;;  %v2998_v51 = vsel %vm1762_vm6, %v2549_v27, 0.0 }
 0x27a   : > { %2869 = vst.msk [vmem:[%s6558_s21 + $0xf0] sm:$0xf] %vm2808_vm12, %v3593_v58  ;;  %v3191_v35 = vsel %vm1762_vm6, %v3068_v14, 0.0  ;;  %v3594_v50 = vpack.c.bf16 %v2541_v12, %v2541_v12  ;;  %v2994_v0 = vsel %vm1762_vm6, %v2541_v12, 0.0  ;;  %v3069_v42 = vmul.f32 %v2541_v12, %v2541_v12 }
 0x27b   : > { %v3192_v59 = vadd.f32 %v3191_v35, %v3190_v36  ;;  %2872 = vst.msk [vmem:[%s6558_s21 + $0xfc] sm:$0xf] %vm2808_vm12, %v3596_v39  ;;  %v2995_v62 = vadd.f32 %v2994_v0, %v2993_v45  ;;  %v3195_v43 = vsel %vm1762_vm6, %v3070_v26, 0.0  ;;  %v3197_v46 = vsel %vm1762_vm6, %v3071_v22, 0.0 }
 0x27c   : > { %2870 = vst.msk [vmem:[%s6558_s21 + $0xf4] sm:$0xf] %vm2808_vm12, %v3594_v50  ;;  %v3193_v34 = vsel %vm1762_vm6, %v3069_v42, 0.0 }
 0x27d   : > { %v2997_v30 = vadd.f32 %v2996_v20, %v2995_v62  ;;  %v3194_v21 = vadd.f32 %v3193_v34, %v3192_v59 }
 0x27f   : > { %v2999_v47 = vadd.f32 %v2998_v51, %v2997_v30  ;;  %v3196_v60 = vadd.f32 %v3195_v43, %v3194_v21 }
 0x281   : > { %v3000_v49 = vrot.slane %v2999_v47, 4  ;;  %v3198_v15 = vadd.f32 %v3197_v46, %v3196_v60 }
 0x283   : > { %v3001_v57 = vadd.f32 %v3000_v49, %v2999_v47  ;;  %v3199_v44 = vrot.slane %v3198_v15, 4 }
 0x285   : > { %v3002_v11 = vrot.slane %v3001_v57, 2  ;;  %v3200_v9 = vadd.f32 %v3199_v44, %v3198_v15 }
 0x287   : > { %v3003_v25 = vadd.f32 %v3002_v11, %v3001_v57  ;;  %v3201_v52 = vrot.slane %v3200_v9, 2 }
 0x289   : > { %v3004_v29 = vrot.slane %v3003_v25, 1  ;;  %v3202_v18 = vadd.f32 %v3201_v52, %v3200_v9 }
 0x28b   : > { %v3005_v6 = vadd.f32 %v3004_v29, %v3003_v25  ;;  %v3203_v55 = vrot.slane %v3202_v18, 1 }
 0x28d   : > { %3007 = vst.msk [vmem:[%s477_s8] sm:$0x1] %vm3006_vm13, %v3005_v6  ;;  %v3204_v16 = vadd.f32 %v3203_v55, %v3202_v18 }
 0x28f   : > { %3205 = vst.msk [vmem:[%s483_s11] sm:$0x1] %vm3006_vm13, %v3204_v16 }
 0x290 PF: > { %s18_s26 = sadd.s32 1, %s4495_s26   ;;  %s7095_s24 = smov %s4491_s25 }
 0x291   : > { %p15_p5 = scmp.ge.s32.totalorder %s18_s26, 4   ;;  %s7096_s25 = smov %s7098_s27 }
 0x293   :  { %17 = sbr.rel (!%p15_p5) target bundleno = 2 (0x2), region = 100 }

</bundles_post_ra>
